<compile_context>
chip_gen: v7x
topology: tpu7x:2x2x1
jax: 0.10.0
libtpu: 0.0.40
codegen_flags: <defaults>
</compile_context>

<pallas_src>
import jax
import jax.numpy as jnp
from jax import lax
from jax.experimental import pallas as pl
from jax.experimental.pallas import tpu as pltpu

BN_EPS = 0.8
LRELU_SLOPE = 0.2


def _generator_kernel(z_ref,
                      w1, b1,
                      w2, b2, g2, be2,
                      w3, b3, g3, be3,
                      w4_hbm, b4, g4, be4,
                      w5_hbm, b5,
                      out_ref,
                      w4_vmem, w5_vmem, dma_sems):
    """Whole MLP forward in one kernel invocation.

    w4 / w5 (the two largest weights, ~2.6 MiB bf16 combined) arrive as raw HBM
    refs; their DMA into VMEM scratch is started immediately and overlapped
    with layers 1-3, then waited on just before use.
    """
    w4_cp = pltpu.make_async_copy(w4_hbm, w4_vmem, dma_sems.at[0])
    w5_cp = pltpu.make_async_copy(w5_hbm, w5_vmem, dma_sems.at[1])
    w4_cp.start()
    w5_cp.start()

    def linear(x_f32, w_bf16, b_ref):
        # bf16 x bf16 MXU matmul with f32 accumulation, f32 bias add.
        return jnp.dot(x_f32.astype(jnp.bfloat16), w_bf16,
                       preferred_element_type=jnp.float32) + b_ref[...]

    def leaky_relu(x):
        # single vmax instead of compare+select+mul
        return jnp.maximum(x, LRELU_SLOPE * x)

    def batch_norm(x, gamma_ref, beta_ref):
        # training-mode BatchNorm1d (batch mean, biased variance, eps=0.8)
        # folded into one scale/shift: per-element cost is one mul-add.
        mean = jnp.mean(x, axis=0, keepdims=True)
        var = jnp.mean((x - mean) * (x - mean), axis=0, keepdims=True)
        scale = gamma_ref[...] * lax.rsqrt(var + BN_EPS)   # rsqrt -> EUP slot
        shift = beta_ref[...] - scale * mean
        return x * scale + shift

    h = leaky_relu(linear(z_ref[...], w1[...], b1))                    # (B, 128)
    h = leaky_relu(batch_norm(linear(h, w2[...], b2), g2, be2))        # (B, 256)
    h = leaky_relu(batch_norm(linear(h, w3[...], b3), g3, be3))        # (B, 512)
    w4_cp.wait()
    h = leaky_relu(batch_norm(linear(h, w4_vmem[...], b4), g4, be4))   # (B, 1024)
    w5_cp.wait()
    out_ref[...] = jnp.tanh(linear(h, w5_vmem[...], b5))               # (B, 784)


def init_params(key):
    """Deterministic synthetic parameters with the module's shapes (f32 master)."""
    dims = [(100, 128), (128, 256), (256, 512), (512, 1024), (1024, 28 * 28)]
    params = {}
    keys = jax.random.split(key, 2 * len(dims) + 6)
    ki = 0
    for li, (fin, fout) in enumerate(dims, start=1):
        bound = 1.0 / jnp.sqrt(float(fin))
        params[f"w{li}"] = jax.random.uniform(
            keys[ki], (fin, fout), jnp.float32, -bound, bound); ki += 1
        params[f"b{li}"] = jax.random.uniform(
            keys[ki], (1, fout), jnp.float32, -bound, bound); ki += 1
    # BatchNorm affine params for layers 2, 3, 4 (non-default so BN is exercised)
    for li, fout in zip((2, 3, 4), (256, 512, 1024)):
        params[f"g{li}"] = 1.0 + 0.1 * jax.random.normal(keys[ki], (1, fout), jnp.float32); ki += 1
        params[f"be{li}"] = 0.1 * jax.random.normal(keys[ki], (1, fout), jnp.float32); ki += 1
    return params


def generator_forward(z, params):
    """z: (B, 100) f32 -> img: (B, 1, 28, 28) f32."""
    B = z.shape[0]
    bf16 = jnp.bfloat16
    w = {k: params[k].astype(bf16) for k in ("w1", "w2", "w3", "w4", "w5")}

    args = (
        z,
        w["w1"], params["b1"],
        w["w2"], params["b2"], params["g2"], params["be2"],
        w["w3"], params["b3"], params["g3"], params["be3"],
        w["w4"], params["b4"], params["g4"], params["be4"],
        w["w5"], params["b5"],
    )

    vmem = pl.BlockSpec(memory_space=pltpu.MemorySpace.VMEM)
    hbm = pl.BlockSpec(memory_space=pl.ANY)   # raw HBM ref; DMA'd manually in-kernel
    in_specs = [
        vmem,                      # z
        vmem, vmem,                # w1, b1
        vmem, vmem, vmem, vmem,    # w2, b2, g2, be2
        vmem, vmem, vmem, vmem,    # w3, b3, g3, be3
        hbm,  vmem, vmem, vmem,    # w4 (manual DMA), b4, g4, be4
        hbm,  vmem,                # w5 (manual DMA), b5
    ]

    flat = pl.pallas_call(
        _generator_kernel,
        out_shape=jax.ShapeDtypeStruct((B, 28 * 28), jnp.float32),
        in_specs=in_specs,
        out_specs=vmem,
        scratch_shapes=[
            pltpu.VMEM((512, 1024), bf16),       # w4 landing buffer
            pltpu.VMEM((1024, 28 * 28), bf16),   # w5 landing buffer
            pltpu.SemaphoreType.DMA((2,)),
        ],
        compiler_params=pltpu.CompilerParams(vmem_limit_bytes=16 << 20),
    )(*args)
    return flat.reshape(B, 1, 28, 28)


def generator_reference(z, params):
    """Plain-JAX reference mirroring the kernel's bf16-weight / f32-accum path."""
    bf16 = jnp.bfloat16

    def lin(x, w, b):
        return jnp.dot(x.astype(bf16), w.astype(bf16),
                       preferred_element_type=jnp.float32) + b

    def lrelu(x):
        return jnp.maximum(x, LRELU_SLOPE * x)

    def bn(x, g, b):
        m = jnp.mean(x, axis=0, keepdims=True)
        v = jnp.mean((x - m) ** 2, axis=0, keepdims=True)
        return g * (x - m) * lax.rsqrt(v + BN_EPS) + b

    h = lrelu(lin(z, params["w1"], params["b1"]))
    h = lrelu(bn(lin(h, params["w2"], params["b2"]), params["g2"], params["be2"]))
    h = lrelu(bn(lin(h, params["w3"], params["b3"]), params["g3"], params["be3"]))
    h = lrelu(bn(lin(h, params["w4"], params["b4"]), params["g4"], params["be4"]))
    out = jnp.tanh(lin(h, params["w5"], params["b5"]))
    return out.reshape(z.shape[0], 1, 28, 28)


if __name__ == "__main__":
    key = jax.random.PRNGKey(0)
    pkey, zkey = jax.random.split(key)
    params = init_params(pkey)

    B = 8
    z = jax.random.normal(zkey, (B, 100), jnp.float32)

    img = generator_forward(z, params)
    jax.block_until_ready(img)

    ref = generator_reference(z, params)
    assert img.shape == (B, 1, 28, 28), img.shape
    assert jnp.allclose(img, ref, atol=5e-3, rtol=5e-3), "mismatch vs reference"

    print("KERNEL_OK")
</pallas_src>

<mosaic_0001>
module attributes {stable_mosaic.version = 11 : i64} {
  func.func @_generator_kernel(%arg0: memref<8x100xf32, #tpu.memory_space<vmem>>, %arg1: memref<100x128xbf16, #tpu.memory_space<vmem>>, %arg2: memref<1x128xf32, #tpu.memory_space<vmem>>, %arg3: memref<128x256xbf16, #tpu.memory_space<vmem>>, %arg4: memref<1x256xf32, #tpu.memory_space<vmem>>, %arg5: memref<1x256xf32, #tpu.memory_space<vmem>>, %arg6: memref<1x256xf32, #tpu.memory_space<vmem>>, %arg7: memref<256x512xbf16, #tpu.memory_space<vmem>>, %arg8: memref<1x512xf32, #tpu.memory_space<vmem>>, %arg9: memref<1x512xf32, #tpu.memory_space<vmem>>, %arg10: memref<1x512xf32, #tpu.memory_space<vmem>>, %arg11: memref<512x1024xbf16, #tpu.memory_space<any>>, %arg12: memref<1x1024xf32, #tpu.memory_space<vmem>>, %arg13: memref<1x1024xf32, #tpu.memory_space<vmem>>, %arg14: memref<1x1024xf32, #tpu.memory_space<vmem>>, %arg15: memref<1024x784xbf16, #tpu.memory_space<any>>, %arg16: memref<1x784xf32, #tpu.memory_space<vmem>>, %arg17: memref<8x784xf32, #tpu.memory_space<vmem>>, %arg18: memref<512x1024xbf16, #tpu.memory_space<vmem>>, %arg19: memref<1024x784xbf16, #tpu.memory_space<vmem>>, %arg20: memref<2x!tpu.dma_semaphore, #tpu.memory_space<semaphore_mem>>) attributes {dimension_semantics = [], scalar_prefetch = 0 : i64, scratch_operands = 3 : i64, tpu.core_type = #tpu.core_type<tc>} {
    %c0_i32 = arith.constant 0 : i32
    %0 = tpu.memref_slice %arg20[%c0_i32] : memref<2x!tpu.dma_semaphore, #tpu.memory_space<semaphore_mem>> -> memref<1x!tpu.dma_semaphore, #tpu.memory_space<semaphore_mem>>
    %1 = tpu.memref_squeeze %0 : memref<1x!tpu.dma_semaphore, #tpu.memory_space<semaphore_mem>> -> memref<!tpu.dma_semaphore, #tpu.memory_space<semaphore_mem>>
    tpu.enqueue_dma source(%arg11 : memref<512x1024xbf16, #tpu.memory_space<any>>) target(%arg18 : memref<512x1024xbf16, #tpu.memory_space<vmem>>) target_semaphore(%1 : memref<!tpu.dma_semaphore, #tpu.memory_space<semaphore_mem>>)
    %c1_i32 = arith.constant 1 : i32
    %2 = tpu.memref_slice %arg20[%c1_i32] : memref<2x!tpu.dma_semaphore, #tpu.memory_space<semaphore_mem>> -> memref<1x!tpu.dma_semaphore, #tpu.memory_space<semaphore_mem>>
    %3 = tpu.memref_squeeze %2 : memref<1x!tpu.dma_semaphore, #tpu.memory_space<semaphore_mem>> -> memref<!tpu.dma_semaphore, #tpu.memory_space<semaphore_mem>>
    tpu.enqueue_dma source(%arg15 : memref<1024x784xbf16, #tpu.memory_space<any>>) target(%arg19 : memref<1024x784xbf16, #tpu.memory_space<vmem>>) target_semaphore(%3 : memref<!tpu.dma_semaphore, #tpu.memory_space<semaphore_mem>>)
    %c0 = arith.constant 0 : index
    %c0_0 = arith.constant 0 : index
    %4 = vector.load %arg0[%c0, %c0_0] : memref<8x100xf32, #tpu.memory_space<vmem>>, vector<8x100xf32>
    %c0_1 = arith.constant 0 : index
    %c0_2 = arith.constant 0 : index
    %5 = vector.load %arg1[%c0_1, %c0_2] : memref<100x128xbf16, #tpu.memory_space<vmem>>, vector<100x128xbf16>
    %6 = arith.truncf %4 : vector<8x100xf32> to vector<8x100xbf16>
    %cst = arith.constant dense<0.000000e+00> : vector<8x128xf32>
    %7 = tpu.matmul %6, %5, %cst {dimension_numbers = #tpu.dot_dimension_numbers<[1], [0], [0], [1], [0, 0, 1, 1], [], []>} : vector<8x100xbf16>, vector<100x128xbf16>, vector<8x128xf32> -> vector<8x128xf32>
    %c0_3 = arith.constant 0 : index
    %c0_4 = arith.constant 0 : index
    %8 = vector.load %arg2[%c0_3, %c0_4] : memref<1x128xf32, #tpu.memory_space<vmem>>, vector<1x128xf32>
    %9 = vector.broadcast %8 : vector<1x128xf32> to vector<8x128xf32>
    %10 = arith.addf %7, %9 : vector<8x128xf32>
    %cst_5 = arith.constant 2.000000e-01 : f32
    %11 = vector.broadcast %cst_5 : f32 to vector<8x128xf32>
    %12 = arith.mulf %11, %10 : vector<8x128xf32>
    %13 = arith.maximumf %10, %12 : vector<8x128xf32>
    %c0_6 = arith.constant 0 : index
    %c0_7 = arith.constant 0 : index
    %14 = vector.load %arg3[%c0_6, %c0_7] : memref<128x256xbf16, #tpu.memory_space<vmem>>, vector<128x256xbf16>
    %15 = arith.truncf %13 : vector<8x128xf32> to vector<8x128xbf16>
    %cst_8 = arith.constant dense<0.000000e+00> : vector<8x256xf32>
    %16 = tpu.matmul %15, %14, %cst_8 {dimension_numbers = #tpu.dot_dimension_numbers<[1], [0], [0], [1], [0, 0, 1, 1], [], []>} : vector<8x128xbf16>, vector<128x256xbf16>, vector<8x256xf32> -> vector<8x256xf32>
    %c0_9 = arith.constant 0 : index
    %c0_10 = arith.constant 0 : index
    %17 = vector.load %arg4[%c0_9, %c0_10] : memref<1x256xf32, #tpu.memory_space<vmem>>, vector<1x256xf32>
    %18 = vector.broadcast %17 : vector<1x256xf32> to vector<8x256xf32>
    %19 = arith.addf %16, %18 : vector<8x256xf32>
    %cst_11 = arith.constant dense<0.000000e+00> : vector<256xf32>
    %20 = vector.multi_reduction <add>, %19, %cst_11 [0] : vector<8x256xf32> to vector<256xf32>
    %21 = vector.shape_cast %20 : vector<256xf32> to vector<1x256xf32>
    %cst_12 = arith.constant 8.000000e+00 : f32
    %22 = vector.broadcast %cst_12 : f32 to vector<1x256xf32>
    %23 = arith.divf %21, %22 : vector<1x256xf32>
    %24 = vector.broadcast %23 : vector<1x256xf32> to vector<8x256xf32>
    %25 = arith.subf %19, %24 : vector<8x256xf32>
    %26 = vector.broadcast %23 : vector<1x256xf32> to vector<8x256xf32>
    %27 = arith.subf %19, %26 : vector<8x256xf32>
    %28 = arith.mulf %25, %27 : vector<8x256xf32>
    %cst_13 = arith.constant dense<0.000000e+00> : vector<256xf32>
    %29 = vector.multi_reduction <add>, %28, %cst_13 [0] : vector<8x256xf32> to vector<256xf32>
    %30 = vector.shape_cast %29 : vector<256xf32> to vector<1x256xf32>
    %cst_14 = arith.constant 8.000000e+00 : f32
    %31 = vector.broadcast %cst_14 : f32 to vector<1x256xf32>
    %32 = arith.divf %30, %31 : vector<1x256xf32>
    %c0_15 = arith.constant 0 : index
    %c0_16 = arith.constant 0 : index
    %33 = vector.load %arg5[%c0_15, %c0_16] : memref<1x256xf32, #tpu.memory_space<vmem>>, vector<1x256xf32>
    %cst_17 = arith.constant 8.000000e-01 : f32
    %34 = vector.broadcast %cst_17 : f32 to vector<1x256xf32>
    %35 = arith.addf %32, %34 : vector<1x256xf32>
    %36 = math.rsqrt %35 : vector<1x256xf32>
    %37 = arith.mulf %33, %36 : vector<1x256xf32>
    %c0_18 = arith.constant 0 : index
    %c0_19 = arith.constant 0 : index
    %38 = vector.load %arg6[%c0_18, %c0_19] : memref<1x256xf32, #tpu.memory_space<vmem>>, vector<1x256xf32>
    %39 = arith.mulf %37, %23 : vector<1x256xf32>
    %40 = arith.subf %38, %39 : vector<1x256xf32>
    %41 = vector.broadcast %37 : vector<1x256xf32> to vector<8x256xf32>
    %42 = arith.mulf %19, %41 : vector<8x256xf32>
    %43 = vector.broadcast %40 : vector<1x256xf32> to vector<8x256xf32>
    %44 = arith.addf %42, %43 : vector<8x256xf32>
    %cst_20 = arith.constant 2.000000e-01 : f32
    %45 = vector.broadcast %cst_20 : f32 to vector<8x256xf32>
    %46 = arith.mulf %45, %44 : vector<8x256xf32>
    %47 = arith.maximumf %44, %46 : vector<8x256xf32>
    %c0_21 = arith.constant 0 : index
    %c0_22 = arith.constant 0 : index
    %48 = vector.load %arg7[%c0_21, %c0_22] : memref<256x512xbf16, #tpu.memory_space<vmem>>, vector<256x512xbf16>
    %49 = arith.truncf %47 : vector<8x256xf32> to vector<8x256xbf16>
    %cst_23 = arith.constant dense<0.000000e+00> : vector<8x512xf32>
    %50 = tpu.matmul %49, %48, %cst_23 {dimension_numbers = #tpu.dot_dimension_numbers<[1], [0], [0], [1], [0, 0, 1, 1], [], []>} : vector<8x256xbf16>, vector<256x512xbf16>, vector<8x512xf32> -> vector<8x512xf32>
    %c0_24 = arith.constant 0 : index
    %c0_25 = arith.constant 0 : index
    %51 = vector.load %arg8[%c0_24, %c0_25] : memref<1x512xf32, #tpu.memory_space<vmem>>, vector<1x512xf32>
    %52 = vector.broadcast %51 : vector<1x512xf32> to vector<8x512xf32>
    %53 = arith.addf %50, %52 : vector<8x512xf32>
    %cst_26 = arith.constant dense<0.000000e+00> : vector<512xf32>
    %54 = vector.multi_reduction <add>, %53, %cst_26 [0] : vector<8x512xf32> to vector<512xf32>
    %55 = vector.shape_cast %54 : vector<512xf32> to vector<1x512xf32>
    %cst_27 = arith.constant 8.000000e+00 : f32
    %56 = vector.broadcast %cst_27 : f32 to vector<1x512xf32>
    %57 = arith.divf %55, %56 : vector<1x512xf32>
    %58 = vector.broadcast %57 : vector<1x512xf32> to vector<8x512xf32>
    %59 = arith.subf %53, %58 : vector<8x512xf32>
    %60 = vector.broadcast %57 : vector<1x512xf32> to vector<8x512xf32>
    %61 = arith.subf %53, %60 : vector<8x512xf32>
    %62 = arith.mulf %59, %61 : vector<8x512xf32>
    %cst_28 = arith.constant dense<0.000000e+00> : vector<512xf32>
    %63 = vector.multi_reduction <add>, %62, %cst_28 [0] : vector<8x512xf32> to vector<512xf32>
    %64 = vector.shape_cast %63 : vector<512xf32> to vector<1x512xf32>
    %cst_29 = arith.constant 8.000000e+00 : f32
    %65 = vector.broadcast %cst_29 : f32 to vector<1x512xf32>
    %66 = arith.divf %64, %65 : vector<1x512xf32>
    %c0_30 = arith.constant 0 : index
    %c0_31 = arith.constant 0 : index
    %67 = vector.load %arg9[%c0_30, %c0_31] : memref<1x512xf32, #tpu.memory_space<vmem>>, vector<1x512xf32>
    %cst_32 = arith.constant 8.000000e-01 : f32
    %68 = vector.broadcast %cst_32 : f32 to vector<1x512xf32>
    %69 = arith.addf %66, %68 : vector<1x512xf32>
    %70 = math.rsqrt %69 : vector<1x512xf32>
    %71 = arith.mulf %67, %70 : vector<1x512xf32>
    %c0_33 = arith.constant 0 : index
    %c0_34 = arith.constant 0 : index
    %72 = vector.load %arg10[%c0_33, %c0_34] : memref<1x512xf32, #tpu.memory_space<vmem>>, vector<1x512xf32>
    %73 = arith.mulf %71, %57 : vector<1x512xf32>
    %74 = arith.subf %72, %73 : vector<1x512xf32>
    %75 = vector.broadcast %71 : vector<1x512xf32> to vector<8x512xf32>
    %76 = arith.mulf %53, %75 : vector<8x512xf32>
    %77 = vector.broadcast %74 : vector<1x512xf32> to vector<8x512xf32>
    %78 = arith.addf %76, %77 : vector<8x512xf32>
    %cst_35 = arith.constant 2.000000e-01 : f32
    %79 = vector.broadcast %cst_35 : f32 to vector<8x512xf32>
    %80 = arith.mulf %79, %78 : vector<8x512xf32>
    %81 = arith.maximumf %78, %80 : vector<8x512xf32>
    %c0_i32_36 = arith.constant 0 : i32
    %82 = tpu.memref_slice %arg20[%c0_i32_36] : memref<2x!tpu.dma_semaphore, #tpu.memory_space<semaphore_mem>> -> memref<1x!tpu.dma_semaphore, #tpu.memory_space<semaphore_mem>>
    %83 = tpu.memref_squeeze %82 : memref<1x!tpu.dma_semaphore, #tpu.memory_space<semaphore_mem>> -> memref<!tpu.dma_semaphore, #tpu.memory_space<semaphore_mem>>
    tpu.wait_dma2 semaphore(%83 : memref<!tpu.dma_semaphore, #tpu.memory_space<semaphore_mem>>) src(%arg11 : memref<512x1024xbf16, #tpu.memory_space<any>>) dst(%arg18 : memref<512x1024xbf16, #tpu.memory_space<vmem>>)
    %c0_37 = arith.constant 0 : index
    %c0_38 = arith.constant 0 : index
    %84 = vector.load %arg18[%c0_37, %c0_38] : memref<512x1024xbf16, #tpu.memory_space<vmem>>, vector<512x1024xbf16>
    %85 = arith.truncf %81 : vector<8x512xf32> to vector<8x512xbf16>
    %cst_39 = arith.constant dense<0.000000e+00> : vector<8x1024xf32>
    %86 = tpu.matmul %85, %84, %cst_39 {dimension_numbers = #tpu.dot_dimension_numbers<[1], [0], [0], [1], [0, 0, 1, 1], [], []>} : vector<8x512xbf16>, vector<512x1024xbf16>, vector<8x1024xf32> -> vector<8x1024xf32>
    %c0_40 = arith.constant 0 : index
    %c0_41 = arith.constant 0 : index
    %87 = vector.load %arg12[%c0_40, %c0_41] : memref<1x1024xf32, #tpu.memory_space<vmem>>, vector<1x1024xf32>
    %88 = vector.broadcast %87 : vector<1x1024xf32> to vector<8x1024xf32>
    %89 = arith.addf %86, %88 : vector<8x1024xf32>
    %cst_42 = arith.constant dense<0.000000e+00> : vector<1024xf32>
    %90 = vector.multi_reduction <add>, %89, %cst_42 [0] : vector<8x1024xf32> to vector<1024xf32>
    %91 = vector.shape_cast %90 : vector<1024xf32> to vector<1x1024xf32>
    %cst_43 = arith.constant 8.000000e+00 : f32
    %92 = vector.broadcast %cst_43 : f32 to vector<1x1024xf32>
    %93 = arith.divf %91, %92 : vector<1x1024xf32>
    %94 = vector.broadcast %93 : vector<1x1024xf32> to vector<8x1024xf32>
    %95 = arith.subf %89, %94 : vector<8x1024xf32>
    %96 = vector.broadcast %93 : vector<1x1024xf32> to vector<8x1024xf32>
    %97 = arith.subf %89, %96 : vector<8x1024xf32>
    %98 = arith.mulf %95, %97 : vector<8x1024xf32>
    %cst_44 = arith.constant dense<0.000000e+00> : vector<1024xf32>
    %99 = vector.multi_reduction <add>, %98, %cst_44 [0] : vector<8x1024xf32> to vector<1024xf32>
    %100 = vector.shape_cast %99 : vector<1024xf32> to vector<1x1024xf32>
    %cst_45 = arith.constant 8.000000e+00 : f32
    %101 = vector.broadcast %cst_45 : f32 to vector<1x1024xf32>
    %102 = arith.divf %100, %101 : vector<1x1024xf32>
    %c0_46 = arith.constant 0 : index
    %c0_47 = arith.constant 0 : index
    %103 = vector.load %arg13[%c0_46, %c0_47] : memref<1x1024xf32, #tpu.memory_space<vmem>>, vector<1x1024xf32>
    %cst_48 = arith.constant 8.000000e-01 : f32
    %104 = vector.broadcast %cst_48 : f32 to vector<1x1024xf32>
    %105 = arith.addf %102, %104 : vector<1x1024xf32>
    %106 = math.rsqrt %105 : vector<1x1024xf32>
    %107 = arith.mulf %103, %106 : vector<1x1024xf32>
    %c0_49 = arith.constant 0 : index
    %c0_50 = arith.constant 0 : index
    %108 = vector.load %arg14[%c0_49, %c0_50] : memref<1x1024xf32, #tpu.memory_space<vmem>>, vector<1x1024xf32>
    %109 = arith.mulf %107, %93 : vector<1x1024xf32>
    %110 = arith.subf %108, %109 : vector<1x1024xf32>
    %111 = vector.broadcast %107 : vector<1x1024xf32> to vector<8x1024xf32>
    %112 = arith.mulf %89, %111 : vector<8x1024xf32>
    %113 = vector.broadcast %110 : vector<1x1024xf32> to vector<8x1024xf32>
    %114 = arith.addf %112, %113 : vector<8x1024xf32>
    %cst_51 = arith.constant 2.000000e-01 : f32
    %115 = vector.broadcast %cst_51 : f32 to vector<8x1024xf32>
    %116 = arith.mulf %115, %114 : vector<8x1024xf32>
    %117 = arith.maximumf %114, %116 : vector<8x1024xf32>
    %c1_i32_52 = arith.constant 1 : i32
    %118 = tpu.memref_slice %arg20[%c1_i32_52] : memref<2x!tpu.dma_semaphore, #tpu.memory_space<semaphore_mem>> -> memref<1x!tpu.dma_semaphore, #tpu.memory_space<semaphore_mem>>
    %119 = tpu.memref_squeeze %118 : memref<1x!tpu.dma_semaphore, #tpu.memory_space<semaphore_mem>> -> memref<!tpu.dma_semaphore, #tpu.memory_space<semaphore_mem>>
    tpu.wait_dma2 semaphore(%119 : memref<!tpu.dma_semaphore, #tpu.memory_space<semaphore_mem>>) src(%arg15 : memref<1024x784xbf16, #tpu.memory_space<any>>) dst(%arg19 : memref<1024x784xbf16, #tpu.memory_space<vmem>>)
    %c0_53 = arith.constant 0 : index
    %c0_54 = arith.constant 0 : index
    %120 = vector.load %arg19[%c0_53, %c0_54] : memref<1024x784xbf16, #tpu.memory_space<vmem>>, vector<1024x784xbf16>
    %121 = arith.truncf %117 : vector<8x1024xf32> to vector<8x1024xbf16>
    %cst_55 = arith.constant dense<0.000000e+00> : vector<8x784xf32>
    %122 = tpu.matmul %121, %120, %cst_55 {dimension_numbers = #tpu.dot_dimension_numbers<[1], [0], [0], [1], [0, 0, 1, 1], [], []>} : vector<8x1024xbf16>, vector<1024x784xbf16>, vector<8x784xf32> -> vector<8x784xf32>
    %c0_56 = arith.constant 0 : index
    %c0_57 = arith.constant 0 : index
    %123 = vector.load %arg16[%c0_56, %c0_57] : memref<1x784xf32, #tpu.memory_space<vmem>>, vector<1x784xf32>
    %124 = vector.broadcast %123 : vector<1x784xf32> to vector<8x784xf32>
    %125 = arith.addf %122, %124 : vector<8x784xf32>
    %126 = math.tanh %125 : vector<8x784xf32>
    %c0_58 = arith.constant 0 : index
    %c0_59 = arith.constant 0 : index
    %127 = vector.load %arg17[%c0_58, %c0_59] : memref<8x784xf32, #tpu.memory_space<vmem>>, vector<8x784xf32>
    tpu.vector_store %arg17[%c0_58, %c0_59], %126 {strides = array<i32>} : memref<8x784xf32, #tpu.memory_space<vmem>>, vector<8x784xf32>,
    return
  }
}

</mosaic_0001>

<bundles_post_ra>
// kernel: tpu_custom_call.1
= control target key start
LH: loop header
LB: loop body
LE: loop exit
PB: predicated region body
PF: predicated region fallthrough
CT: control target
= control target key end

     0   :  { %s19981_s0 = inlined_call_operand.vmem [shape: f32[8,100], index: 0, kind: input, shape index: {}]   ;;  %s19982_s1 = inlined_call_operand.vmem [shape: bf16[100,128], index: 1, kind: input, shape index: {}]   ;;  %s19983_s2 = inlined_call_operand.vmem [shape: f32[1,128], index: 2, kind: input, shape index: {}]   ;;  %s19984_s3 = inlined_call_operand.vmem [shape: bf16[128,256], index: 3, kind: input, shape index: {}]   ;;  %s19985_s4 = inlined_call_operand.vmem [shape: f32[1,256], index: 4, kind: input, shape index: {}]   ;;  %s19986_s5 = inlined_call_operand.vmem [shape: f32[1,256], index: 5, kind: input, shape index: {}]   ;;  %s19987_s6 = inlined_call_operand.vmem [shape: f32[1,256], index: 6, kind: input, shape index: {}]   ;;  %s19988_s7 = inlined_call_operand.vmem [shape: bf16[256,512], index: 7, kind: input, shape index: {}]   ;;  %s19989_s8 = inlined_call_operand.vmem [shape: f32[1,512], index: 8, kind: input, shape index: {}]   ;;  %s19990_s9 = inlined_call_operand.vmem [shape: f32[1,512], index: 9, kind: input, shape index: {}]   ;;  %s19991_s10 = inlined_call_operand.vmem [shape: f32[1,512], index: 10, kind: input, shape index: {}]   ;;  %s19992_s11 = inlined_call_operand.vmem [shape: bf16[512,1024], index: 11, kind: input, shape index: {}]   ;;  %s19993_s12 = inlined_call_operand.vmem [shape: f32[1,1024], index: 12, kind: input, shape index: {}]   ;;  %s19994_s13 = inlined_call_operand.vmem [shape: f32[1,1024], index: 13, kind: input, shape index: {}]   ;;  %s19995_s14 = inlined_call_operand.vmem [shape: f32[1,1024], index: 14, kind: input, shape index: {}]   ;;  %s19996_s15 = inlined_call_operand.vmem [shape: bf16[1024,784], index: 15, kind: input, shape index: {}]   ;;  %s19997_s16 = inlined_call_operand.vmem [shape: f32[1,784], index: 16, kind: input, shape index: {}]   ;;  %s19998_s17 = inlined_call_operand.hbm [shape: f32[8,784], index: 17, kind: output, shape index: {}]  }
   0x1   :  { %20000 = sst [smem:[#allocation12_spill]] %s19981_s0 }
   0x2   :  { %20001 = sst [smem:[#allocation13_spill]] %s19982_s1 }
   0x3   :  { %22 = vsyncpa [#allocation6], 0  ;;  %v71_v0 = vld [vmem:[%s19992_s11] sm:$0xf]  ;;  %v75_v2 = vld [vmem:[%s19992_s11 + $0x4] sm:$0xf] }
   0x4   :  { %v73_v1 = vld [vmem:[%s19992_s11 + $0x20] sm:$0xf]  ;;  %72 = vst [vmem:[#allocation2] sm:$0xf] %v71_v0  ;;  %v77_v3 = vld [vmem:[%s19992_s11 + $0x24] sm:$0xf] }
   0x5   :  { %74 = vst [vmem:[#allocation2 + $0x4] sm:$0xf] %v73_v1  ;;  %v79_v4 = vld [vmem:[%s19992_s11 + $0x8] sm:$0xf]  ;;  %76 = vst [vmem:[#allocation2 + $0x8] sm:$0xf] %v75_v2 }
   0x6   :  { %78 = vst [vmem:[#allocation2 + $0xc] sm:$0xf] %v77_v3  ;;  %80 = vst [vmem:[#allocation2 + $0x10] sm:$0xf] %v79_v4  ;;  %v81_v5 = vld [vmem:[%s19992_s11 + $0x28] sm:$0xf] }
   0x7   :  { %v83_v6 = vld [vmem:[%s19992_s11 + $0xc] sm:$0xf]  ;;  %82 = vst [vmem:[#allocation2 + $0x14] sm:$0xf] %v81_v5  ;;  %v87_v8 = vld [vmem:[%s19992_s11 + $0x10] sm:$0xf] }
   0x8   :  { %v85_v7 = vld [vmem:[%s19992_s11 + $0x2c] sm:$0xf]  ;;  %84 = vst [vmem:[#allocation2 + $0x18] sm:$0xf] %v83_v6  ;;  %v89_v9 = vld [vmem:[%s19992_s11 + $0x30] sm:$0xf] }
   0x9   :  { %86 = vst [vmem:[#allocation2 + $0x1c] sm:$0xf] %v85_v7  ;;  %v91_v10 = vld [vmem:[%s19992_s11 + $0x14] sm:$0xf]  ;;  %88 = vst [vmem:[#allocation2 + $0x20] sm:$0xf] %v87_v8 }
   0xa   :  { %90 = vst [vmem:[#allocation2 + $0x24] sm:$0xf] %v89_v9  ;;  %92 = vst [vmem:[#allocation2 + $0x28] sm:$0xf] %v91_v10  ;;  %v93_v11 = vld [vmem:[%s19992_s11 + $0x34] sm:$0xf] }
   0xb   :  { %v95_v12 = vld [vmem:[%s19992_s11 + $0x18] sm:$0xf]  ;;  %94 = vst [vmem:[#allocation2 + $0x2c] sm:$0xf] %v93_v11  ;;  %v99_v14 = vld [vmem:[%s19992_s11 + $0x1c] sm:$0xf] }
   0xc   :  { %v97_v13 = vld [vmem:[%s19992_s11 + $0x38] sm:$0xf]  ;;  %96 = vst [vmem:[#allocation2 + $0x30] sm:$0xf] %v95_v12  ;;  %v101_v15 = vld [vmem:[%s19992_s11 + $0x3c] sm:$0xff]  }
   0xd   :  { %98 = vst [vmem:[#allocation2 + $0x34] sm:$0xf] %v97_v13  ;;  %v105_v16 = vld [vmem:[%s19992_s11 + $0x60] sm:$0xf]  ;;  %100 = vst [vmem:[#allocation2 + $0x38] sm:$0xf] %v99_v14 }
   0xe   :  { %102 = vst [vmem:[#allocation2 + $0x3c] sm:$0xff] %v101_v15   ;;  %106 = vst [vmem:[#allocation2 + $0x44] sm:$0xf] %v105_v16  ;;  %v107_v17 = vld [vmem:[%s19992_s11 + $0x44] sm:$0xf]  ;;  %v133_v30 = vld [vmem:[%s19992_s11 + $0x7c] sm:$0xff]  }
   0xf   :  { %v109_v18 = vld [vmem:[%s19992_s11 + $0x64] sm:$0xf]  ;;  %v111_v19 = vld [vmem:[%s19992_s11 + $0x48] sm:$0xf]  ;;  %108 = vst [vmem:[#allocation2 + $0x48] sm:$0xf] %v107_v17 }
  0x10   :  { %110 = vst [vmem:[#allocation2 + $0x4c] sm:$0xf] %v109_v18  ;;  %112 = vst [vmem:[#allocation2 + $0x50] sm:$0xf] %v111_v19  ;;  %v113_v20 = vld [vmem:[%s19992_s11 + $0x68] sm:$0xf] }
  0x11   :  { %v115_v21 = vld [vmem:[%s19992_s11 + $0x4c] sm:$0xf]  ;;  %114 = vst [vmem:[#allocation2 + $0x54] sm:$0xf] %v113_v20  ;;  %v119_v23 = vld [vmem:[%s19992_s11 + $0x50] sm:$0xf] }
  0x12   :  { %v117_v22 = vld [vmem:[%s19992_s11 + $0x6c] sm:$0xf]  ;;  %116 = vst [vmem:[#allocation2 + $0x58] sm:$0xf] %v115_v21  ;;  %v121_v24 = vld [vmem:[%s19992_s11 + $0x70] sm:$0xf] }
  0x13   :  { %118 = vst [vmem:[#allocation2 + $0x5c] sm:$0xf] %v117_v22  ;;  %v123_v25 = vld [vmem:[%s19992_s11 + $0x54] sm:$0xf]  ;;  %120 = vst [vmem:[#allocation2 + $0x60] sm:$0xf] %v119_v23 }
  0x14   :  { %122 = vst [vmem:[#allocation2 + $0x64] sm:$0xf] %v121_v24  ;;  %124 = vst [vmem:[#allocation2 + $0x68] sm:$0xf] %v123_v25  ;;  %v125_v26 = vld [vmem:[%s19992_s11 + $0x74] sm:$0xf] }
  0x15   :  { %v127_v27 = vld [vmem:[%s19992_s11 + $0x58] sm:$0xf]  ;;  %126 = vst [vmem:[#allocation2 + $0x6c] sm:$0xf] %v125_v26  ;;  %v131_v29 = vld [vmem:[%s19992_s11 + $0x5c] sm:$0xf] }
  0x16   :  { %v129_v28 = vld [vmem:[%s19992_s11 + $0x78] sm:$0xf]  ;;  %128 = vst [vmem:[#allocation2 + $0x70] sm:$0xf] %v127_v27  ;;  %v137_v31 = vld [vmem:[%s19992_s11 + $0xa0] sm:$0xf] }
  0x17   :  { %130 = vst [vmem:[#allocation2 + $0x74] sm:$0xf] %v129_v28  ;;  %132 = vst [vmem:[#allocation2 + $0x78] sm:$0xf] %v131_v29  ;;  %v139_v32 = vld [vmem:[%s19992_s11 + $0x84] sm:$0xf] }
  0x18   :  { %134 = vst [vmem:[#allocation2 + $0x7c] sm:$0xff] %v133_v30   ;;  %138 = vst [vmem:[#allocation2 + $0x84] sm:$0xf] %v137_v31  ;;  %v141_v33 = vld [vmem:[%s19992_s11 + $0xa4] sm:$0xf]  ;;  %v165_v45 = vld [vmem:[%s19992_s11 + $0xbc] sm:$0xff]  }
  0x19   :  { %v143_v34 = vld [vmem:[%s19992_s11 + $0x88] sm:$0xf]  ;;  %140 = vst [vmem:[#allocation2 + $0x88] sm:$0xf] %v139_v32  ;;  %142 = vst [vmem:[#allocation2 + $0x8c] sm:$0xf] %v141_v33 }
  0x1a   :  { %144 = vst [vmem:[#allocation2 + $0x90] sm:$0xf] %v143_v34  ;;  %v145_v35 = vld [vmem:[%s19992_s11 + $0xa8] sm:$0xf]  ;;  %v147_v36 = vld [vmem:[%s19992_s11 + $0x8c] sm:$0xf] }
  0x1b   :  { %v149_v37 = vld [vmem:[%s19992_s11 + $0xac] sm:$0xf]  ;;  %146 = vst [vmem:[#allocation2 + $0x94] sm:$0xf] %v145_v35  ;;  %148 = vst [vmem:[#allocation2 + $0x98] sm:$0xf] %v147_v36 }
  0x1c   :  { %150 = vst [vmem:[#allocation2 + $0x9c] sm:$0xf] %v149_v37  ;;  %v151_v38 = vld [vmem:[%s19992_s11 + $0x90] sm:$0xf]  ;;  %v155_v40 = vld [vmem:[%s19992_s11 + $0x94] sm:$0xf] }
  0x1d   :  { %v153_v39 = vld [vmem:[%s19992_s11 + $0xb0] sm:$0xf]  ;;  %152 = vst [vmem:[#allocation2 + $0xa0] sm:$0xf] %v151_v38  ;;  %156 = vst [vmem:[#allocation2 + $0xa8] sm:$0xf] %v155_v40 }
  0x1e   :  { %154 = vst [vmem:[#allocation2 + $0xa4] sm:$0xf] %v153_v39  ;;  %v157_v41 = vld [vmem:[%s19992_s11 + $0xb4] sm:$0xf]  ;;  %v159_v42 = vld [vmem:[%s19992_s11 + $0x98] sm:$0xf] }
  0x1f   :  { %v161_v43 = vld [vmem:[%s19992_s11 + $0xb8] sm:$0xf]  ;;  %158 = vst [vmem:[#allocation2 + $0xac] sm:$0xf] %v157_v41  ;;  %160 = vst [vmem:[#allocation2 + $0xb0] sm:$0xf] %v159_v42 }
  0x20   :  { %162 = vst [vmem:[#allocation2 + $0xb4] sm:$0xf] %v161_v43  ;;  %v163_v44 = vld [vmem:[%s19992_s11 + $0x9c] sm:$0xf]  ;;  %v169_v46 = vld [vmem:[%s19992_s11 + $0xe0] sm:$0xf] }
  0x21   :  { %164 = vst [vmem:[#allocation2 + $0xb8] sm:$0xf] %v163_v44  ;;  %166 = vst [vmem:[#allocation2 + $0xbc] sm:$0xff] %v165_v45   ;;  %v171_v47 = vld [vmem:[%s19992_s11 + $0xc4] sm:$0xf]  ;;  %v197_v60 = vld [vmem:[%s19992_s11 + $0xfc] sm:$0xff]  }
  0x22   :  { %170 = vst [vmem:[#allocation2 + $0xc4] sm:$0xf] %v169_v46  ;;  %v173_v48 = vld [vmem:[%s19992_s11 + $0xe4] sm:$0xf]  ;;  %v175_v49 = vld [vmem:[%s19992_s11 + $0xc8] sm:$0xf] }
  0x23   :  { %172 = vst [vmem:[#allocation2 + $0xc8] sm:$0xf] %v171_v47  ;;  %174 = vst [vmem:[#allocation2 + $0xcc] sm:$0xf] %v173_v48  ;;  %v177_v50 = vld [vmem:[%s19992_s11 + $0xe8] sm:$0xf] }
  0x24   :  { %176 = vst [vmem:[#allocation2 + $0xd0] sm:$0xf] %v175_v49  ;;  %v179_v51 = vld [vmem:[%s19992_s11 + $0xcc] sm:$0xf]  ;;  %178 = vst [vmem:[#allocation2 + $0xd4] sm:$0xf] %v177_v50 }
  0x25   :  { %v181_v52 = vld [vmem:[%s19992_s11 + $0xec] sm:$0xf]  ;;  %180 = vst [vmem:[#allocation2 + $0xd8] sm:$0xf] %v179_v51  ;;  %v183_v53 = vld [vmem:[%s19992_s11 + $0xd0] sm:$0xf] }
  0x26   :  { %182 = vst [vmem:[#allocation2 + $0xdc] sm:$0xf] %v181_v52  ;;  %v185_v54 = vld [vmem:[%s19992_s11 + $0xf0] sm:$0xf]  ;;  %v187_v55 = vld [vmem:[%s19992_s11 + $0xd4] sm:$0xf] }
  0x27   :  { %184 = vst [vmem:[#allocation2 + $0xe0] sm:$0xf] %v183_v53  ;;  %186 = vst [vmem:[#allocation2 + $0xe4] sm:$0xf] %v185_v54  ;;  %v189_v56 = vld [vmem:[%s19992_s11 + $0xf4] sm:$0xf] }
  0x28   :  { %188 = vst [vmem:[#allocation2 + $0xe8] sm:$0xf] %v187_v55  ;;  %v191_v57 = vld [vmem:[%s19992_s11 + $0xd8] sm:$0xf]  ;;  %190 = vst [vmem:[#allocation2 + $0xec] sm:$0xf] %v189_v56 }
  0x29   :  { %v193_v58 = vld [vmem:[%s19992_s11 + $0xf8] sm:$0xf]  ;;  %192 = vst [vmem:[#allocation2 + $0xf0] sm:$0xf] %v191_v57  ;;  %v195_v59 = vld [vmem:[%s19992_s11 + $0xdc] sm:$0xf] }
  0x2a   :  { %194 = vst [vmem:[#allocation2 + $0xf4] sm:$0xf] %v193_v58  ;;  %v201_v61 = vld [vmem:[%s19992_s11 + $0x120] sm:$0xf]  ;;  %196 = vst [vmem:[#allocation2 + $0xf8] sm:$0xf] %v195_v59 }
  0x2b   :  { %198 = vst [vmem:[#allocation2 + $0xfc] sm:$0xff] %v197_v60   ;;  %202 = vst [vmem:[#allocation2 + $0x104] sm:$0xf] %v201_v61  ;;  %v203_v62 = vld [vmem:[%s19992_s11 + $0x104] sm:$0xf]  ;;  %v229_v11 = vld [vmem:[%s19992_s11 + $0x13c] sm:$0xff]  }
  0x2c   :  { %v205_v63 = vld [vmem:[%s19992_s11 + $0x124] sm:$0xf]  ;;  %v207_v0 = vld [vmem:[%s19992_s11 + $0x108] sm:$0xf]  ;;  %204 = vst [vmem:[#allocation2 + $0x108] sm:$0xf] %v203_v62 }
  0x2d   :  { %206 = vst [vmem:[#allocation2 + $0x10c] sm:$0xf] %v205_v63  ;;  %208 = vst [vmem:[#allocation2 + $0x110] sm:$0xf] %v207_v0  ;;  %v209_v1 = vld [vmem:[%s19992_s11 + $0x128] sm:$0xf] }
  0x2e   :  { %v211_v2 = vld [vmem:[%s19992_s11 + $0x10c] sm:$0xf]  ;;  %210 = vst [vmem:[#allocation2 + $0x114] sm:$0xf] %v209_v1  ;;  %v215_v4 = vld [vmem:[%s19992_s11 + $0x110] sm:$0xf] }
  0x2f   :  { %v213_v3 = vld [vmem:[%s19992_s11 + $0x12c] sm:$0xf]  ;;  %212 = vst [vmem:[#allocation2 + $0x118] sm:$0xf] %v211_v2  ;;  %v217_v5 = vld [vmem:[%s19992_s11 + $0x130] sm:$0xf] }
  0x30   :  { %214 = vst [vmem:[#allocation2 + $0x11c] sm:$0xf] %v213_v3  ;;  %v219_v6 = vld [vmem:[%s19992_s11 + $0x114] sm:$0xf]  ;;  %216 = vst [vmem:[#allocation2 + $0x120] sm:$0xf] %v215_v4 }
  0x31   :  { %218 = vst [vmem:[#allocation2 + $0x124] sm:$0xf] %v217_v5  ;;  %220 = vst [vmem:[#allocation2 + $0x128] sm:$0xf] %v219_v6  ;;  %v221_v7 = vld [vmem:[%s19992_s11 + $0x134] sm:$0xf] }
  0x32   :  { %v223_v8 = vld [vmem:[%s19992_s11 + $0x118] sm:$0xf]  ;;  %222 = vst [vmem:[#allocation2 + $0x12c] sm:$0xf] %v221_v7  ;;  %v227_v10 = vld [vmem:[%s19992_s11 + $0x11c] sm:$0xf] }
  0x33   :  { %v225_v9 = vld [vmem:[%s19992_s11 + $0x138] sm:$0xf]  ;;  %224 = vst [vmem:[#allocation2 + $0x130] sm:$0xf] %v223_v8  ;;  %v233_v12 = vld [vmem:[%s19992_s11 + $0x160] sm:$0xf] }
  0x34   :  { %226 = vst [vmem:[#allocation2 + $0x134] sm:$0xf] %v225_v9  ;;  %228 = vst [vmem:[#allocation2 + $0x138] sm:$0xf] %v227_v10  ;;  %v235_v13 = vld [vmem:[%s19992_s11 + $0x144] sm:$0xf] }
  0x35   :  { %230 = vst [vmem:[#allocation2 + $0x13c] sm:$0xff] %v229_v11   ;;  %234 = vst [vmem:[#allocation2 + $0x144] sm:$0xf] %v233_v12  ;;  %v237_v14 = vld [vmem:[%s19992_s11 + $0x164] sm:$0xf]  ;;  %v261_v26 = vld [vmem:[%s19992_s11 + $0x17c] sm:$0xff]  }
  0x36   :  { %v239_v15 = vld [vmem:[%s19992_s11 + $0x148] sm:$0xf]  ;;  %236 = vst [vmem:[#allocation2 + $0x148] sm:$0xf] %v235_v13  ;;  %238 = vst [vmem:[#allocation2 + $0x14c] sm:$0xf] %v237_v14 }
  0x37   :  { %240 = vst [vmem:[#allocation2 + $0x150] sm:$0xf] %v239_v15  ;;  %v241_v16 = vld [vmem:[%s19992_s11 + $0x168] sm:$0xf]  ;;  %v243_v17 = vld [vmem:[%s19992_s11 + $0x14c] sm:$0xf] }
  0x38   :  { %v245_v18 = vld [vmem:[%s19992_s11 + $0x16c] sm:$0xf]  ;;  %242 = vst [vmem:[#allocation2 + $0x154] sm:$0xf] %v241_v16  ;;  %244 = vst [vmem:[#allocation2 + $0x158] sm:$0xf] %v243_v17 }
  0x39   :  { %246 = vst [vmem:[#allocation2 + $0x15c] sm:$0xf] %v245_v18  ;;  %v247_v19 = vld [vmem:[%s19992_s11 + $0x150] sm:$0xf]  ;;  %v251_v21 = vld [vmem:[%s19992_s11 + $0x154] sm:$0xf] }
  0x3a   :  { %v249_v20 = vld [vmem:[%s19992_s11 + $0x170] sm:$0xf]  ;;  %248 = vst [vmem:[#allocation2 + $0x160] sm:$0xf] %v247_v19  ;;  %252 = vst [vmem:[#allocation2 + $0x168] sm:$0xf] %v251_v21 }
  0x3b   :  { %250 = vst [vmem:[#allocation2 + $0x164] sm:$0xf] %v249_v20  ;;  %v253_v22 = vld [vmem:[%s19992_s11 + $0x174] sm:$0xf]  ;;  %v255_v23 = vld [vmem:[%s19992_s11 + $0x158] sm:$0xf] }
  0x3c   :  { %v257_v24 = vld [vmem:[%s19992_s11 + $0x178] sm:$0xf]  ;;  %254 = vst [vmem:[#allocation2 + $0x16c] sm:$0xf] %v253_v22  ;;  %256 = vst [vmem:[#allocation2 + $0x170] sm:$0xf] %v255_v23 }
  0x3d   :  { %258 = vst [vmem:[#allocation2 + $0x174] sm:$0xf] %v257_v24  ;;  %v259_v25 = vld [vmem:[%s19992_s11 + $0x15c] sm:$0xf]  ;;  %v265_v27 = vld [vmem:[%s19992_s11 + $0x1a0] sm:$0xf] }
  0x3e   :  { %260 = vst [vmem:[#allocation2 + $0x178] sm:$0xf] %v259_v25  ;;  %262 = vst [vmem:[#allocation2 + $0x17c] sm:$0xff] %v261_v26   ;;  %v267_v28 = vld [vmem:[%s19992_s11 + $0x184] sm:$0xf]  ;;  %v293_v41 = vld [vmem:[%s19992_s11 + $0x1bc] sm:$0xff]  }
  0x3f   :  { %266 = vst [vmem:[#allocation2 + $0x184] sm:$0xf] %v265_v27  ;;  %v269_v29 = vld [vmem:[%s19992_s11 + $0x1a4] sm:$0xf]  ;;  %v271_v30 = vld [vmem:[%s19992_s11 + $0x188] sm:$0xf] }
  0x40   :  { %268 = vst [vmem:[#allocation2 + $0x188] sm:$0xf] %v267_v28  ;;  %270 = vst [vmem:[#allocation2 + $0x18c] sm:$0xf] %v269_v29  ;;  %v273_v31 = vld [vmem:[%s19992_s11 + $0x1a8] sm:$0xf] }
  0x41   :  { %272 = vst [vmem:[#allocation2 + $0x190] sm:$0xf] %v271_v30  ;;  %v275_v32 = vld [vmem:[%s19992_s11 + $0x18c] sm:$0xf]  ;;  %274 = vst [vmem:[#allocation2 + $0x194] sm:$0xf] %v273_v31 }
  0x42   :  { %v277_v33 = vld [vmem:[%s19992_s11 + $0x1ac] sm:$0xf]  ;;  %276 = vst [vmem:[#allocation2 + $0x198] sm:$0xf] %v275_v32  ;;  %v279_v34 = vld [vmem:[%s19992_s11 + $0x190] sm:$0xf] }
  0x43   :  { %278 = vst [vmem:[#allocation2 + $0x19c] sm:$0xf] %v277_v33  ;;  %v281_v35 = vld [vmem:[%s19992_s11 + $0x1b0] sm:$0xf]  ;;  %v283_v36 = vld [vmem:[%s19992_s11 + $0x194] sm:$0xf] }
  0x44   :  { %280 = vst [vmem:[#allocation2 + $0x1a0] sm:$0xf] %v279_v34  ;;  %282 = vst [vmem:[#allocation2 + $0x1a4] sm:$0xf] %v281_v35  ;;  %v285_v37 = vld [vmem:[%s19992_s11 + $0x1b4] sm:$0xf] }
  0x45   :  { %284 = vst [vmem:[#allocation2 + $0x1a8] sm:$0xf] %v283_v36  ;;  %v287_v38 = vld [vmem:[%s19992_s11 + $0x198] sm:$0xf]  ;;  %286 = vst [vmem:[#allocation2 + $0x1ac] sm:$0xf] %v285_v37 }
  0x46   :  { %v289_v39 = vld [vmem:[%s19992_s11 + $0x1b8] sm:$0xf]  ;;  %288 = vst [vmem:[#allocation2 + $0x1b0] sm:$0xf] %v287_v38  ;;  %v291_v40 = vld [vmem:[%s19992_s11 + $0x19c] sm:$0xf] }
  0x47   :  { %290 = vst [vmem:[#allocation2 + $0x1b4] sm:$0xf] %v289_v39  ;;  %v297_v42 = vld [vmem:[%s19992_s11 + $0x1e0] sm:$0xf]  ;;  %292 = vst [vmem:[#allocation2 + $0x1b8] sm:$0xf] %v291_v40 }
  0x48   :  { %294 = vst [vmem:[#allocation2 + $0x1bc] sm:$0xff] %v293_v41   ;;  %298 = vst [vmem:[#allocation2 + $0x1c4] sm:$0xf] %v297_v42  ;;  %v299_v43 = vld [vmem:[%s19992_s11 + $0x1c4] sm:$0xf]  ;;  %v325_v56 = vld [vmem:[%s19992_s11 + $0x1fc] sm:$0xff]  }
  0x49   :  { %v301_v44 = vld [vmem:[%s19992_s11 + $0x1e4] sm:$0xf]  ;;  %v303_v45 = vld [vmem:[%s19992_s11 + $0x1c8] sm:$0xf]  ;;  %300 = vst [vmem:[#allocation2 + $0x1c8] sm:$0xf] %v299_v43 }
  0x4a   :  { %302 = vst [vmem:[#allocation2 + $0x1cc] sm:$0xf] %v301_v44  ;;  %304 = vst [vmem:[#allocation2 + $0x1d0] sm:$0xf] %v303_v45  ;;  %v305_v46 = vld [vmem:[%s19992_s11 + $0x1e8] sm:$0xf] }
  0x4b   :  { %v307_v47 = vld [vmem:[%s19992_s11 + $0x1cc] sm:$0xf]  ;;  %306 = vst [vmem:[#allocation2 + $0x1d4] sm:$0xf] %v305_v46  ;;  %v311_v49 = vld [vmem:[%s19992_s11 + $0x1d0] sm:$0xf] }
  0x4c   :  { %v309_v48 = vld [vmem:[%s19992_s11 + $0x1ec] sm:$0xf]  ;;  %308 = vst [vmem:[#allocation2 + $0x1d8] sm:$0xf] %v307_v47  ;;  %v313_v50 = vld [vmem:[%s19992_s11 + $0x1f0] sm:$0xf] }
  0x4d   :  { %310 = vst [vmem:[#allocation2 + $0x1dc] sm:$0xf] %v309_v48  ;;  %v315_v51 = vld [vmem:[%s19992_s11 + $0x1d4] sm:$0xf]  ;;  %312 = vst [vmem:[#allocation2 + $0x1e0] sm:$0xf] %v311_v49 }
  0x4e   :  { %314 = vst [vmem:[#allocation2 + $0x1e4] sm:$0xf] %v313_v50  ;;  %316 = vst [vmem:[#allocation2 + $0x1e8] sm:$0xf] %v315_v51  ;;  %v317_v52 = vld [vmem:[%s19992_s11 + $0x1f4] sm:$0xf] }
  0x4f   :  { %v319_v53 = vld [vmem:[%s19992_s11 + $0x1d8] sm:$0xf]  ;;  %318 = vst [vmem:[#allocation2 + $0x1ec] sm:$0xf] %v317_v52  ;;  %v323_v55 = vld [vmem:[%s19992_s11 + $0x1dc] sm:$0xf] }
  0x50   :  { %v321_v54 = vld [vmem:[%s19992_s11 + $0x1f8] sm:$0xf]  ;;  %320 = vst [vmem:[#allocation2 + $0x1f0] sm:$0xf] %v319_v53  ;;  %v329_v57 = vld [vmem:[%s19992_s11 + $0x220] sm:$0xf] }
  0x51   :  { %322 = vst [vmem:[#allocation2 + $0x1f4] sm:$0xf] %v321_v54  ;;  %324 = vst [vmem:[#allocation2 + $0x1f8] sm:$0xf] %v323_v55  ;;  %v331_v58 = vld [vmem:[%s19992_s11 + $0x204] sm:$0xf] }
  0x52   :  { %326 = vst [vmem:[#allocation2 + $0x1fc] sm:$0xff] %v325_v56   ;;  %330 = vst [vmem:[#allocation2 + $0x204] sm:$0xf] %v329_v57  ;;  %v333_v59 = vld [vmem:[%s19992_s11 + $0x224] sm:$0xf]  ;;  %v357_v7 = vld [vmem:[%s19992_s11 + $0x23c] sm:$0xff]  }
  0x53   :  { %v335_v60 = vld [vmem:[%s19992_s11 + $0x208] sm:$0xf]  ;;  %332 = vst [vmem:[#allocation2 + $0x208] sm:$0xf] %v331_v58  ;;  %334 = vst [vmem:[#allocation2 + $0x20c] sm:$0xf] %v333_v59 }
  0x54   :  { %336 = vst [vmem:[#allocation2 + $0x210] sm:$0xf] %v335_v60  ;;  %v337_v61 = vld [vmem:[%s19992_s11 + $0x228] sm:$0xf]  ;;  %v339_v62 = vld [vmem:[%s19992_s11 + $0x20c] sm:$0xf] }
  0x55   :  { %v341_v63 = vld [vmem:[%s19992_s11 + $0x22c] sm:$0xf]  ;;  %338 = vst [vmem:[#allocation2 + $0x214] sm:$0xf] %v337_v61  ;;  %340 = vst [vmem:[#allocation2 + $0x218] sm:$0xf] %v339_v62 }
  0x56   :  { %342 = vst [vmem:[#allocation2 + $0x21c] sm:$0xf] %v341_v63  ;;  %v343_v0 = vld [vmem:[%s19992_s11 + $0x210] sm:$0xf]  ;;  %v347_v2 = vld [vmem:[%s19992_s11 + $0x214] sm:$0xf] }
  0x57   :  { %v345_v1 = vld [vmem:[%s19992_s11 + $0x230] sm:$0xf]  ;;  %344 = vst [vmem:[#allocation2 + $0x220] sm:$0xf] %v343_v0  ;;  %348 = vst [vmem:[#allocation2 + $0x228] sm:$0xf] %v347_v2 }
  0x58   :  { %346 = vst [vmem:[#allocation2 + $0x224] sm:$0xf] %v345_v1  ;;  %v349_v3 = vld [vmem:[%s19992_s11 + $0x234] sm:$0xf]  ;;  %v351_v4 = vld [vmem:[%s19992_s11 + $0x218] sm:$0xf] }
  0x59   :  { %v353_v5 = vld [vmem:[%s19992_s11 + $0x238] sm:$0xf]  ;;  %350 = vst [vmem:[#allocation2 + $0x22c] sm:$0xf] %v349_v3  ;;  %352 = vst [vmem:[#allocation2 + $0x230] sm:$0xf] %v351_v4 }
  0x5a   :  { %354 = vst [vmem:[#allocation2 + $0x234] sm:$0xf] %v353_v5  ;;  %v355_v6 = vld [vmem:[%s19992_s11 + $0x21c] sm:$0xf]  ;;  %v361_v8 = vld [vmem:[%s19992_s11 + $0x260] sm:$0xf] }
  0x5b   :  { %356 = vst [vmem:[#allocation2 + $0x238] sm:$0xf] %v355_v6  ;;  %358 = vst [vmem:[#allocation2 + $0x23c] sm:$0xff] %v357_v7   ;;  %v363_v9 = vld [vmem:[%s19992_s11 + $0x244] sm:$0xf]  ;;  %v389_v22 = vld [vmem:[%s19992_s11 + $0x27c] sm:$0xff]  }
  0x5c   :  { %362 = vst [vmem:[#allocation2 + $0x244] sm:$0xf] %v361_v8  ;;  %v365_v10 = vld [vmem:[%s19992_s11 + $0x264] sm:$0xf]  ;;  %v367_v11 = vld [vmem:[%s19992_s11 + $0x248] sm:$0xf] }
  0x5d   :  { %364 = vst [vmem:[#allocation2 + $0x248] sm:$0xf] %v363_v9  ;;  %366 = vst [vmem:[#allocation2 + $0x24c] sm:$0xf] %v365_v10  ;;  %v369_v12 = vld [vmem:[%s19992_s11 + $0x268] sm:$0xf] }
  0x5e   :  { %368 = vst [vmem:[#allocation2 + $0x250] sm:$0xf] %v367_v11  ;;  %v371_v13 = vld [vmem:[%s19992_s11 + $0x24c] sm:$0xf]  ;;  %370 = vst [vmem:[#allocation2 + $0x254] sm:$0xf] %v369_v12 }
  0x5f   :  { %v373_v14 = vld [vmem:[%s19992_s11 + $0x26c] sm:$0xf]  ;;  %372 = vst [vmem:[#allocation2 + $0x258] sm:$0xf] %v371_v13  ;;  %v375_v15 = vld [vmem:[%s19992_s11 + $0x250] sm:$0xf] }
  0x60   :  { %374 = vst [vmem:[#allocation2 + $0x25c] sm:$0xf] %v373_v14  ;;  %v377_v16 = vld [vmem:[%s19992_s11 + $0x270] sm:$0xf]  ;;  %v379_v17 = vld [vmem:[%s19992_s11 + $0x254] sm:$0xf] }
  0x61   :  { %376 = vst [vmem:[#allocation2 + $0x260] sm:$0xf] %v375_v15  ;;  %378 = vst [vmem:[#allocation2 + $0x264] sm:$0xf] %v377_v16  ;;  %v381_v18 = vld [vmem:[%s19992_s11 + $0x274] sm:$0xf] }
  0x62   :  { %380 = vst [vmem:[#allocation2 + $0x268] sm:$0xf] %v379_v17  ;;  %v383_v19 = vld [vmem:[%s19992_s11 + $0x258] sm:$0xf]  ;;  %382 = vst [vmem:[#allocation2 + $0x26c] sm:$0xf] %v381_v18 }
  0x63   :  { %v385_v20 = vld [vmem:[%s19992_s11 + $0x278] sm:$0xf]  ;;  %384 = vst [vmem:[#allocation2 + $0x270] sm:$0xf] %v383_v19  ;;  %v387_v21 = vld [vmem:[%s19992_s11 + $0x25c] sm:$0xf] }
  0x64   :  { %386 = vst [vmem:[#allocation2 + $0x274] sm:$0xf] %v385_v20  ;;  %v393_v23 = vld [vmem:[%s19992_s11 + $0x2a0] sm:$0xf]  ;;  %388 = vst [vmem:[#allocation2 + $0x278] sm:$0xf] %v387_v21 }
  0x65   :  { %390 = vst [vmem:[#allocation2 + $0x27c] sm:$0xff] %v389_v22   ;;  %394 = vst [vmem:[#allocation2 + $0x284] sm:$0xf] %v393_v23  ;;  %v395_v24 = vld [vmem:[%s19992_s11 + $0x284] sm:$0xf]  ;;  %v421_v37 = vld [vmem:[%s19992_s11 + $0x2bc] sm:$0xff]  }
  0x66   :  { %v397_v25 = vld [vmem:[%s19992_s11 + $0x2a4] sm:$0xf]  ;;  %v399_v26 = vld [vmem:[%s19992_s11 + $0x288] sm:$0xf]  ;;  %396 = vst [vmem:[#allocation2 + $0x288] sm:$0xf] %v395_v24 }
  0x67   :  { %398 = vst [vmem:[#allocation2 + $0x28c] sm:$0xf] %v397_v25  ;;  %400 = vst [vmem:[#allocation2 + $0x290] sm:$0xf] %v399_v26  ;;  %v401_v27 = vld [vmem:[%s19992_s11 + $0x2a8] sm:$0xf] }
  0x68   :  { %v403_v28 = vld [vmem:[%s19992_s11 + $0x28c] sm:$0xf]  ;;  %402 = vst [vmem:[#allocation2 + $0x294] sm:$0xf] %v401_v27  ;;  %v407_v30 = vld [vmem:[%s19992_s11 + $0x290] sm:$0xf] }
  0x69   :  { %v405_v29 = vld [vmem:[%s19992_s11 + $0x2ac] sm:$0xf]  ;;  %404 = vst [vmem:[#allocation2 + $0x298] sm:$0xf] %v403_v28  ;;  %v409_v31 = vld [vmem:[%s19992_s11 + $0x2b0] sm:$0xf] }
  0x6a   :  { %406 = vst [vmem:[#allocation2 + $0x29c] sm:$0xf] %v405_v29  ;;  %v411_v32 = vld [vmem:[%s19992_s11 + $0x294] sm:$0xf]  ;;  %408 = vst [vmem:[#allocation2 + $0x2a0] sm:$0xf] %v407_v30 }
  0x6b   :  { %410 = vst [vmem:[#allocation2 + $0x2a4] sm:$0xf] %v409_v31  ;;  %412 = vst [vmem:[#allocation2 + $0x2a8] sm:$0xf] %v411_v32  ;;  %v413_v33 = vld [vmem:[%s19992_s11 + $0x2b4] sm:$0xf] }
  0x6c   :  { %v415_v34 = vld [vmem:[%s19992_s11 + $0x298] sm:$0xf]  ;;  %414 = vst [vmem:[#allocation2 + $0x2ac] sm:$0xf] %v413_v33  ;;  %v419_v36 = vld [vmem:[%s19992_s11 + $0x29c] sm:$0xf] }
  0x6d   :  { %v417_v35 = vld [vmem:[%s19992_s11 + $0x2b8] sm:$0xf]  ;;  %416 = vst [vmem:[#allocation2 + $0x2b0] sm:$0xf] %v415_v34  ;;  %v425_v38 = vld [vmem:[%s19992_s11 + $0x2e0] sm:$0xf] }
  0x6e   :  { %418 = vst [vmem:[#allocation2 + $0x2b4] sm:$0xf] %v417_v35  ;;  %420 = vst [vmem:[#allocation2 + $0x2b8] sm:$0xf] %v419_v36  ;;  %v427_v39 = vld [vmem:[%s19992_s11 + $0x2c4] sm:$0xf] }
  0x6f   :  { %422 = vst [vmem:[#allocation2 + $0x2bc] sm:$0xff] %v421_v37   ;;  %426 = vst [vmem:[#allocation2 + $0x2c4] sm:$0xf] %v425_v38  ;;  %v429_v40 = vld [vmem:[%s19992_s11 + $0x2e4] sm:$0xf]  ;;  %v453_v52 = vld [vmem:[%s19992_s11 + $0x2fc] sm:$0xff]  }
  0x70   :  { %v431_v41 = vld [vmem:[%s19992_s11 + $0x2c8] sm:$0xf]  ;;  %428 = vst [vmem:[#allocation2 + $0x2c8] sm:$0xf] %v427_v39  ;;  %430 = vst [vmem:[#allocation2 + $0x2cc] sm:$0xf] %v429_v40 }
  0x71   :  { %432 = vst [vmem:[#allocation2 + $0x2d0] sm:$0xf] %v431_v41  ;;  %v433_v42 = vld [vmem:[%s19992_s11 + $0x2e8] sm:$0xf]  ;;  %v435_v43 = vld [vmem:[%s19992_s11 + $0x2cc] sm:$0xf] }
  0x72   :  { %v437_v44 = vld [vmem:[%s19992_s11 + $0x2ec] sm:$0xf]  ;;  %434 = vst [vmem:[#allocation2 + $0x2d4] sm:$0xf] %v433_v42  ;;  %436 = vst [vmem:[#allocation2 + $0x2d8] sm:$0xf] %v435_v43 }
  0x73   :  { %438 = vst [vmem:[#allocation2 + $0x2dc] sm:$0xf] %v437_v44  ;;  %v439_v45 = vld [vmem:[%s19992_s11 + $0x2d0] sm:$0xf]  ;;  %v443_v47 = vld [vmem:[%s19992_s11 + $0x2d4] sm:$0xf] }
  0x74   :  { %v441_v46 = vld [vmem:[%s19992_s11 + $0x2f0] sm:$0xf]  ;;  %440 = vst [vmem:[#allocation2 + $0x2e0] sm:$0xf] %v439_v45  ;;  %444 = vst [vmem:[#allocation2 + $0x2e8] sm:$0xf] %v443_v47 }
  0x75   :  { %442 = vst [vmem:[#allocation2 + $0x2e4] sm:$0xf] %v441_v46  ;;  %v445_v48 = vld [vmem:[%s19992_s11 + $0x2f4] sm:$0xf]  ;;  %v447_v49 = vld [vmem:[%s19992_s11 + $0x2d8] sm:$0xf] }
  0x76   :  { %v449_v50 = vld [vmem:[%s19992_s11 + $0x2f8] sm:$0xf]  ;;  %446 = vst [vmem:[#allocation2 + $0x2ec] sm:$0xf] %v445_v48  ;;  %448 = vst [vmem:[#allocation2 + $0x2f0] sm:$0xf] %v447_v49 }
  0x77   :  { %450 = vst [vmem:[#allocation2 + $0x2f4] sm:$0xf] %v449_v50  ;;  %v451_v51 = vld [vmem:[%s19992_s11 + $0x2dc] sm:$0xf]  ;;  %v457_v53 = vld [vmem:[%s19992_s11 + $0x320] sm:$0xf] }
  0x78   :  { %452 = vst [vmem:[#allocation2 + $0x2f8] sm:$0xf] %v451_v51  ;;  %454 = vst [vmem:[#allocation2 + $0x2fc] sm:$0xff] %v453_v52   ;;  %v459_v54 = vld [vmem:[%s19992_s11 + $0x304] sm:$0xf]  ;;  %v485_v3 = vld [vmem:[%s19992_s11 + $0x33c] sm:$0xff]  }
  0x79   :  { %458 = vst [vmem:[#allocation2 + $0x304] sm:$0xf] %v457_v53  ;;  %v461_v55 = vld [vmem:[%s19992_s11 + $0x324] sm:$0xf]  ;;  %v463_v56 = vld [vmem:[%s19992_s11 + $0x308] sm:$0xf] }
  0x7a   :  { %460 = vst [vmem:[#allocation2 + $0x308] sm:$0xf] %v459_v54  ;;  %462 = vst [vmem:[#allocation2 + $0x30c] sm:$0xf] %v461_v55  ;;  %v465_v57 = vld [vmem:[%s19992_s11 + $0x328] sm:$0xf] }
  0x7b   :  { %464 = vst [vmem:[#allocation2 + $0x310] sm:$0xf] %v463_v56  ;;  %v467_v58 = vld [vmem:[%s19992_s11 + $0x30c] sm:$0xf]  ;;  %466 = vst [vmem:[#allocation2 + $0x314] sm:$0xf] %v465_v57 }
  0x7c   :  { %v469_v59 = vld [vmem:[%s19992_s11 + $0x32c] sm:$0xf]  ;;  %468 = vst [vmem:[#allocation2 + $0x318] sm:$0xf] %v467_v58  ;;  %v471_v60 = vld [vmem:[%s19992_s11 + $0x310] sm:$0xf] }
  0x7d   :  { %470 = vst [vmem:[#allocation2 + $0x31c] sm:$0xf] %v469_v59  ;;  %v473_v61 = vld [vmem:[%s19992_s11 + $0x330] sm:$0xf]  ;;  %v475_v62 = vld [vmem:[%s19992_s11 + $0x314] sm:$0xf] }
  0x7e   :  { %472 = vst [vmem:[#allocation2 + $0x320] sm:$0xf] %v471_v60  ;;  %474 = vst [vmem:[#allocation2 + $0x324] sm:$0xf] %v473_v61  ;;  %v477_v63 = vld [vmem:[%s19992_s11 + $0x334] sm:$0xf] }
  0x7f   :  { %476 = vst [vmem:[#allocation2 + $0x328] sm:$0xf] %v475_v62  ;;  %v479_v0 = vld [vmem:[%s19992_s11 + $0x318] sm:$0xf]  ;;  %478 = vst [vmem:[#allocation2 + $0x32c] sm:$0xf] %v477_v63 }
  0x80   :  { %v481_v1 = vld [vmem:[%s19992_s11 + $0x338] sm:$0xf]  ;;  %480 = vst [vmem:[#allocation2 + $0x330] sm:$0xf] %v479_v0  ;;  %v483_v2 = vld [vmem:[%s19992_s11 + $0x31c] sm:$0xf] }
  0x81   :  { %482 = vst [vmem:[#allocation2 + $0x334] sm:$0xf] %v481_v1  ;;  %v489_v4 = vld [vmem:[%s19992_s11 + $0x360] sm:$0xf]  ;;  %484 = vst [vmem:[#allocation2 + $0x338] sm:$0xf] %v483_v2 }
  0x82   :  { %486 = vst [vmem:[#allocation2 + $0x33c] sm:$0xff] %v485_v3   ;;  %490 = vst [vmem:[#allocation2 + $0x344] sm:$0xf] %v489_v4  ;;  %v491_v5 = vld [vmem:[%s19992_s11 + $0x344] sm:$0xf]  ;;  %v517_v18 = vld [vmem:[%s19992_s11 + $0x37c] sm:$0xff]  }
  0x83   :  { %v493_v6 = vld [vmem:[%s19992_s11 + $0x364] sm:$0xf]  ;;  %v495_v7 = vld [vmem:[%s19992_s11 + $0x348] sm:$0xf]  ;;  %492 = vst [vmem:[#allocation2 + $0x348] sm:$0xf] %v491_v5 }
  0x84   :  { %494 = vst [vmem:[#allocation2 + $0x34c] sm:$0xf] %v493_v6  ;;  %496 = vst [vmem:[#allocation2 + $0x350] sm:$0xf] %v495_v7  ;;  %v497_v8 = vld [vmem:[%s19992_s11 + $0x368] sm:$0xf] }
  0x85   :  { %v499_v9 = vld [vmem:[%s19992_s11 + $0x34c] sm:$0xf]  ;;  %498 = vst [vmem:[#allocation2 + $0x354] sm:$0xf] %v497_v8  ;;  %v503_v11 = vld [vmem:[%s19992_s11 + $0x350] sm:$0xf] }
  0x86   :  { %v501_v10 = vld [vmem:[%s19992_s11 + $0x36c] sm:$0xf]  ;;  %500 = vst [vmem:[#allocation2 + $0x358] sm:$0xf] %v499_v9  ;;  %v505_v12 = vld [vmem:[%s19992_s11 + $0x370] sm:$0xf] }
  0x87   :  { %502 = vst [vmem:[#allocation2 + $0x35c] sm:$0xf] %v501_v10  ;;  %v507_v13 = vld [vmem:[%s19992_s11 + $0x354] sm:$0xf]  ;;  %504 = vst [vmem:[#allocation2 + $0x360] sm:$0xf] %v503_v11 }
  0x88   :  { %506 = vst [vmem:[#allocation2 + $0x364] sm:$0xf] %v505_v12  ;;  %508 = vst [vmem:[#allocation2 + $0x368] sm:$0xf] %v507_v13  ;;  %v509_v14 = vld [vmem:[%s19992_s11 + $0x374] sm:$0xf] }
  0x89   :  { %v511_v15 = vld [vmem:[%s19992_s11 + $0x358] sm:$0xf]  ;;  %510 = vst [vmem:[#allocation2 + $0x36c] sm:$0xf] %v509_v14  ;;  %v515_v17 = vld [vmem:[%s19992_s11 + $0x35c] sm:$0xf] }
  0x8a   :  { %v513_v16 = vld [vmem:[%s19992_s11 + $0x378] sm:$0xf]  ;;  %512 = vst [vmem:[#allocation2 + $0x370] sm:$0xf] %v511_v15  ;;  %v521_v19 = vld [vmem:[%s19992_s11 + $0x3a0] sm:$0xf] }
  0x8b   :  { %514 = vst [vmem:[#allocation2 + $0x374] sm:$0xf] %v513_v16  ;;  %516 = vst [vmem:[#allocation2 + $0x378] sm:$0xf] %v515_v17  ;;  %v523_v20 = vld [vmem:[%s19992_s11 + $0x384] sm:$0xf] }
  0x8c   :  { %518 = vst [vmem:[#allocation2 + $0x37c] sm:$0xff] %v517_v18   ;;  %522 = vst [vmem:[#allocation2 + $0x384] sm:$0xf] %v521_v19  ;;  %v525_v21 = vld [vmem:[%s19992_s11 + $0x3a4] sm:$0xf]  ;;  %v549_v33 = vld [vmem:[%s19992_s11 + $0x3bc] sm:$0xff]  }
  0x8d   :  { %v527_v22 = vld [vmem:[%s19992_s11 + $0x388] sm:$0xf]  ;;  %524 = vst [vmem:[#allocation2 + $0x388] sm:$0xf] %v523_v20  ;;  %526 = vst [vmem:[#allocation2 + $0x38c] sm:$0xf] %v525_v21 }
  0x8e   :  { %528 = vst [vmem:[#allocation2 + $0x390] sm:$0xf] %v527_v22  ;;  %v529_v23 = vld [vmem:[%s19992_s11 + $0x3a8] sm:$0xf]  ;;  %v531_v24 = vld [vmem:[%s19992_s11 + $0x38c] sm:$0xf] }
  0x8f   :  { %v533_v25 = vld [vmem:[%s19992_s11 + $0x3ac] sm:$0xf]  ;;  %530 = vst [vmem:[#allocation2 + $0x394] sm:$0xf] %v529_v23  ;;  %532 = vst [vmem:[#allocation2 + $0x398] sm:$0xf] %v531_v24 }
  0x90   :  { %534 = vst [vmem:[#allocation2 + $0x39c] sm:$0xf] %v533_v25  ;;  %v535_v26 = vld [vmem:[%s19992_s11 + $0x390] sm:$0xf]  ;;  %v539_v28 = vld [vmem:[%s19992_s11 + $0x394] sm:$0xf] }
  0x91   :  { %v537_v27 = vld [vmem:[%s19992_s11 + $0x3b0] sm:$0xf]  ;;  %536 = vst [vmem:[#allocation2 + $0x3a0] sm:$0xf] %v535_v26  ;;  %540 = vst [vmem:[#allocation2 + $0x3a8] sm:$0xf] %v539_v28 }
  0x92   :  { %538 = vst [vmem:[#allocation2 + $0x3a4] sm:$0xf] %v537_v27  ;;  %v541_v29 = vld [vmem:[%s19992_s11 + $0x3b4] sm:$0xf]  ;;  %v543_v30 = vld [vmem:[%s19992_s11 + $0x398] sm:$0xf] }
  0x93   :  { %v545_v31 = vld [vmem:[%s19992_s11 + $0x3b8] sm:$0xf]  ;;  %542 = vst [vmem:[#allocation2 + $0x3ac] sm:$0xf] %v541_v29  ;;  %544 = vst [vmem:[#allocation2 + $0x3b0] sm:$0xf] %v543_v30 }
  0x94   :  { %546 = vst [vmem:[#allocation2 + $0x3b4] sm:$0xf] %v545_v31  ;;  %v547_v32 = vld [vmem:[%s19992_s11 + $0x39c] sm:$0xf]  ;;  %v553_v34 = vld [vmem:[%s19992_s11 + $0x3e0] sm:$0xf] }
  0x95   :  { %548 = vst [vmem:[#allocation2 + $0x3b8] sm:$0xf] %v547_v32  ;;  %550 = vst [vmem:[#allocation2 + $0x3bc] sm:$0xff] %v549_v33   ;;  %v555_v35 = vld [vmem:[%s19992_s11 + $0x3c4] sm:$0xf]  ;;  %v581_v48 = vld [vmem:[%s19992_s11 + $0x3fc] sm:$0xff]  }
  0x96   :  { %554 = vst [vmem:[#allocation2 + $0x3c4] sm:$0xf] %v553_v34  ;;  %v557_v36 = vld [vmem:[%s19992_s11 + $0x3e4] sm:$0xf]  ;;  %v559_v37 = vld [vmem:[%s19992_s11 + $0x3c8] sm:$0xf] }
  0x97   :  { %556 = vst [vmem:[#allocation2 + $0x3c8] sm:$0xf] %v555_v35  ;;  %558 = vst [vmem:[#allocation2 + $0x3cc] sm:$0xf] %v557_v36  ;;  %v561_v38 = vld [vmem:[%s19992_s11 + $0x3e8] sm:$0xf] }
  0x98   :  { %560 = vst [vmem:[#allocation2 + $0x3d0] sm:$0xf] %v559_v37  ;;  %v563_v39 = vld [vmem:[%s19992_s11 + $0x3cc] sm:$0xf]  ;;  %562 = vst [vmem:[#allocation2 + $0x3d4] sm:$0xf] %v561_v38 }
  0x99   :  { %v565_v40 = vld [vmem:[%s19992_s11 + $0x3ec] sm:$0xf]  ;;  %564 = vst [vmem:[#allocation2 + $0x3d8] sm:$0xf] %v563_v39  ;;  %v567_v41 = vld [vmem:[%s19992_s11 + $0x3d0] sm:$0xf] }
  0x9a   :  { %566 = vst [vmem:[#allocation2 + $0x3dc] sm:$0xf] %v565_v40  ;;  %v569_v42 = vld [vmem:[%s19992_s11 + $0x3f0] sm:$0xf]  ;;  %v571_v43 = vld [vmem:[%s19992_s11 + $0x3d4] sm:$0xf] }
  0x9b   :  { %568 = vst [vmem:[#allocation2 + $0x3e0] sm:$0xf] %v567_v41  ;;  %570 = vst [vmem:[#allocation2 + $0x3e4] sm:$0xf] %v569_v42  ;;  %v573_v44 = vld [vmem:[%s19992_s11 + $0x3f4] sm:$0xf] }
  0x9c   :  { %572 = vst [vmem:[#allocation2 + $0x3e8] sm:$0xf] %v571_v43  ;;  %v575_v45 = vld [vmem:[%s19992_s11 + $0x3d8] sm:$0xf]  ;;  %574 = vst [vmem:[#allocation2 + $0x3ec] sm:$0xf] %v573_v44 }
  0x9d   :  { %v577_v46 = vld [vmem:[%s19992_s11 + $0x3f8] sm:$0xf]  ;;  %576 = vst [vmem:[#allocation2 + $0x3f0] sm:$0xf] %v575_v45  ;;  %v579_v47 = vld [vmem:[%s19992_s11 + $0x3dc] sm:$0xf] }
  0x9e   :  { %578 = vst [vmem:[#allocation2 + $0x3f4] sm:$0xf] %v577_v46  ;;  %v585_v49 = vld [vmem:[%s19992_s11 + $0x420] sm:$0xf]  ;;  %580 = vst [vmem:[#allocation2 + $0x3f8] sm:$0xf] %v579_v47 }
  0x9f   :  { %582 = vst [vmem:[#allocation2 + $0x3fc] sm:$0xff] %v581_v48   ;;  %586 = vst [vmem:[#allocation2 + $0x404] sm:$0xf] %v585_v49  ;;  %v587_v50 = vld [vmem:[%s19992_s11 + $0x404] sm:$0xf]  ;;  %v613_v63 = vld [vmem:[%s19992_s11 + $0x43c] sm:$0xff]  }
  0xa0   :  { %v589_v51 = vld [vmem:[%s19992_s11 + $0x424] sm:$0xf]  ;;  %v591_v52 = vld [vmem:[%s19992_s11 + $0x408] sm:$0xf]  ;;  %588 = vst [vmem:[#allocation2 + $0x408] sm:$0xf] %v587_v50 }
  0xa1   :  { %590 = vst [vmem:[#allocation2 + $0x40c] sm:$0xf] %v589_v51  ;;  %592 = vst [vmem:[#allocation2 + $0x410] sm:$0xf] %v591_v52  ;;  %v593_v53 = vld [vmem:[%s19992_s11 + $0x428] sm:$0xf] }
  0xa2   :  { %v595_v54 = vld [vmem:[%s19992_s11 + $0x40c] sm:$0xf]  ;;  %594 = vst [vmem:[#allocation2 + $0x414] sm:$0xf] %v593_v53  ;;  %v599_v56 = vld [vmem:[%s19992_s11 + $0x410] sm:$0xf] }
  0xa3   :  { %v597_v55 = vld [vmem:[%s19992_s11 + $0x42c] sm:$0xf]  ;;  %596 = vst [vmem:[#allocation2 + $0x418] sm:$0xf] %v595_v54  ;;  %v601_v57 = vld [vmem:[%s19992_s11 + $0x430] sm:$0xf] }
  0xa4   :  { %598 = vst [vmem:[#allocation2 + $0x41c] sm:$0xf] %v597_v55  ;;  %v603_v58 = vld [vmem:[%s19992_s11 + $0x414] sm:$0xf]  ;;  %600 = vst [vmem:[#allocation2 + $0x420] sm:$0xf] %v599_v56 }
  0xa5   :  { %602 = vst [vmem:[#allocation2 + $0x424] sm:$0xf] %v601_v57  ;;  %604 = vst [vmem:[#allocation2 + $0x428] sm:$0xf] %v603_v58  ;;  %v605_v59 = vld [vmem:[%s19992_s11 + $0x434] sm:$0xf] }
  0xa6   :  { %v607_v60 = vld [vmem:[%s19992_s11 + $0x418] sm:$0xf]  ;;  %606 = vst [vmem:[#allocation2 + $0x42c] sm:$0xf] %v605_v59  ;;  %v611_v62 = vld [vmem:[%s19992_s11 + $0x41c] sm:$0xf] }
  0xa7   :  { %v609_v61 = vld [vmem:[%s19992_s11 + $0x438] sm:$0xf]  ;;  %608 = vst [vmem:[#allocation2 + $0x430] sm:$0xf] %v607_v60  ;;  %v617_v0 = vld [vmem:[%s19992_s11 + $0x460] sm:$0xf] }
  0xa8   :  { %610 = vst [vmem:[#allocation2 + $0x434] sm:$0xf] %v609_v61  ;;  %612 = vst [vmem:[#allocation2 + $0x438] sm:$0xf] %v611_v62  ;;  %v619_v1 = vld [vmem:[%s19992_s11 + $0x444] sm:$0xf] }
  0xa9   :  { %614 = vst [vmem:[#allocation2 + $0x43c] sm:$0xff] %v613_v63   ;;  %618 = vst [vmem:[#allocation2 + $0x444] sm:$0xf] %v617_v0  ;;  %v621_v2 = vld [vmem:[%s19992_s11 + $0x464] sm:$0xf]  ;;  %v645_v14 = vld [vmem:[%s19992_s11 + $0x47c] sm:$0xff]  }
  0xaa   :  { %v623_v3 = vld [vmem:[%s19992_s11 + $0x448] sm:$0xf]  ;;  %620 = vst [vmem:[#allocation2 + $0x448] sm:$0xf] %v619_v1  ;;  %622 = vst [vmem:[#allocation2 + $0x44c] sm:$0xf] %v621_v2 }
  0xab   :  { %624 = vst [vmem:[#allocation2 + $0x450] sm:$0xf] %v623_v3  ;;  %v625_v4 = vld [vmem:[%s19992_s11 + $0x468] sm:$0xf]  ;;  %v627_v5 = vld [vmem:[%s19992_s11 + $0x44c] sm:$0xf] }
  0xac   :  { %v629_v6 = vld [vmem:[%s19992_s11 + $0x46c] sm:$0xf]  ;;  %626 = vst [vmem:[#allocation2 + $0x454] sm:$0xf] %v625_v4  ;;  %628 = vst [vmem:[#allocation2 + $0x458] sm:$0xf] %v627_v5 }
  0xad   :  { %630 = vst [vmem:[#allocation2 + $0x45c] sm:$0xf] %v629_v6  ;;  %v631_v7 = vld [vmem:[%s19992_s11 + $0x450] sm:$0xf]  ;;  %v635_v9 = vld [vmem:[%s19992_s11 + $0x454] sm:$0xf] }
  0xae   :  { %v633_v8 = vld [vmem:[%s19992_s11 + $0x470] sm:$0xf]  ;;  %632 = vst [vmem:[#allocation2 + $0x460] sm:$0xf] %v631_v7  ;;  %636 = vst [vmem:[#allocation2 + $0x468] sm:$0xf] %v635_v9 }
  0xaf   :  { %634 = vst [vmem:[#allocation2 + $0x464] sm:$0xf] %v633_v8  ;;  %v637_v10 = vld [vmem:[%s19992_s11 + $0x474] sm:$0xf]  ;;  %v639_v11 = vld [vmem:[%s19992_s11 + $0x458] sm:$0xf] }
  0xb0   :  { %v641_v12 = vld [vmem:[%s19992_s11 + $0x478] sm:$0xf]  ;;  %638 = vst [vmem:[#allocation2 + $0x46c] sm:$0xf] %v637_v10  ;;  %640 = vst [vmem:[#allocation2 + $0x470] sm:$0xf] %v639_v11 }
  0xb1   :  { %642 = vst [vmem:[#allocation2 + $0x474] sm:$0xf] %v641_v12  ;;  %v643_v13 = vld [vmem:[%s19992_s11 + $0x45c] sm:$0xf]  ;;  %v649_v15 = vld [vmem:[%s19992_s11 + $0x4a0] sm:$0xf] }
  0xb2   :  { %644 = vst [vmem:[#allocation2 + $0x478] sm:$0xf] %v643_v13  ;;  %646 = vst [vmem:[#allocation2 + $0x47c] sm:$0xff] %v645_v14   ;;  %v651_v16 = vld [vmem:[%s19992_s11 + $0x484] sm:$0xf]  ;;  %v677_v29 = vld [vmem:[%s19992_s11 + $0x4bc] sm:$0xff]  }
  0xb3   :  { %650 = vst [vmem:[#allocation2 + $0x484] sm:$0xf] %v649_v15  ;;  %v653_v17 = vld [vmem:[%s19992_s11 + $0x4a4] sm:$0xf]  ;;  %v655_v18 = vld [vmem:[%s19992_s11 + $0x488] sm:$0xf] }
  0xb4   :  { %652 = vst [vmem:[#allocation2 + $0x488] sm:$0xf] %v651_v16  ;;  %654 = vst [vmem:[#allocation2 + $0x48c] sm:$0xf] %v653_v17  ;;  %v657_v19 = vld [vmem:[%s19992_s11 + $0x4a8] sm:$0xf] }
  0xb5   :  { %656 = vst [vmem:[#allocation2 + $0x490] sm:$0xf] %v655_v18  ;;  %v659_v20 = vld [vmem:[%s19992_s11 + $0x48c] sm:$0xf]  ;;  %658 = vst [vmem:[#allocation2 + $0x494] sm:$0xf] %v657_v19 }
  0xb6   :  { %v661_v21 = vld [vmem:[%s19992_s11 + $0x4ac] sm:$0xf]  ;;  %660 = vst [vmem:[#allocation2 + $0x498] sm:$0xf] %v659_v20  ;;  %v663_v22 = vld [vmem:[%s19992_s11 + $0x490] sm:$0xf] }
  0xb7   :  { %662 = vst [vmem:[#allocation2 + $0x49c] sm:$0xf] %v661_v21  ;;  %v665_v23 = vld [vmem:[%s19992_s11 + $0x4b0] sm:$0xf]  ;;  %v667_v24 = vld [vmem:[%s19992_s11 + $0x494] sm:$0xf] }
  0xb8   :  { %664 = vst [vmem:[#allocation2 + $0x4a0] sm:$0xf] %v663_v22  ;;  %666 = vst [vmem:[#allocation2 + $0x4a4] sm:$0xf] %v665_v23  ;;  %v669_v25 = vld [vmem:[%s19992_s11 + $0x4b4] sm:$0xf] }
  0xb9   :  { %668 = vst [vmem:[#allocation2 + $0x4a8] sm:$0xf] %v667_v24  ;;  %v671_v26 = vld [vmem:[%s19992_s11 + $0x498] sm:$0xf]  ;;  %670 = vst [vmem:[#allocation2 + $0x4ac] sm:$0xf] %v669_v25 }
  0xba   :  { %v673_v27 = vld [vmem:[%s19992_s11 + $0x4b8] sm:$0xf]  ;;  %672 = vst [vmem:[#allocation2 + $0x4b0] sm:$0xf] %v671_v26  ;;  %v675_v28 = vld [vmem:[%s19992_s11 + $0x49c] sm:$0xf] }
  0xbb   :  { %674 = vst [vmem:[#allocation2 + $0x4b4] sm:$0xf] %v673_v27  ;;  %v681_v30 = vld [vmem:[%s19992_s11 + $0x4e0] sm:$0xf]  ;;  %676 = vst [vmem:[#allocation2 + $0x4b8] sm:$0xf] %v675_v28 }
  0xbc   :  { %678 = vst [vmem:[#allocation2 + $0x4bc] sm:$0xff] %v677_v29   ;;  %682 = vst [vmem:[#allocation2 + $0x4c4] sm:$0xf] %v681_v30  ;;  %v683_v31 = vld [vmem:[%s19992_s11 + $0x4c4] sm:$0xf]  ;;  %v709_v44 = vld [vmem:[%s19992_s11 + $0x4fc] sm:$0xff]  }
  0xbd   :  { %v685_v32 = vld [vmem:[%s19992_s11 + $0x4e4] sm:$0xf]  ;;  %v687_v33 = vld [vmem:[%s19992_s11 + $0x4c8] sm:$0xf]  ;;  %684 = vst [vmem:[#allocation2 + $0x4c8] sm:$0xf] %v683_v31 }
  0xbe   :  { %686 = vst [vmem:[#allocation2 + $0x4cc] sm:$0xf] %v685_v32  ;;  %688 = vst [vmem:[#allocation2 + $0x4d0] sm:$0xf] %v687_v33  ;;  %v689_v34 = vld [vmem:[%s19992_s11 + $0x4e8] sm:$0xf] }
  0xbf   :  { %v691_v35 = vld [vmem:[%s19992_s11 + $0x4cc] sm:$0xf]  ;;  %690 = vst [vmem:[#allocation2 + $0x4d4] sm:$0xf] %v689_v34  ;;  %v695_v37 = vld [vmem:[%s19992_s11 + $0x4d0] sm:$0xf] }
  0xc0   :  { %v693_v36 = vld [vmem:[%s19992_s11 + $0x4ec] sm:$0xf]  ;;  %692 = vst [vmem:[#allocation2 + $0x4d8] sm:$0xf] %v691_v35  ;;  %v697_v38 = vld [vmem:[%s19992_s11 + $0x4f0] sm:$0xf] }
  0xc1   :  { %694 = vst [vmem:[#allocation2 + $0x4dc] sm:$0xf] %v693_v36  ;;  %v699_v39 = vld [vmem:[%s19992_s11 + $0x4d4] sm:$0xf]  ;;  %696 = vst [vmem:[#allocation2 + $0x4e0] sm:$0xf] %v695_v37 }
  0xc2   :  { %698 = vst [vmem:[#allocation2 + $0x4e4] sm:$0xf] %v697_v38  ;;  %700 = vst [vmem:[#allocation2 + $0x4e8] sm:$0xf] %v699_v39  ;;  %v701_v40 = vld [vmem:[%s19992_s11 + $0x4f4] sm:$0xf] }
  0xc3   :  { %v703_v41 = vld [vmem:[%s19992_s11 + $0x4d8] sm:$0xf]  ;;  %702 = vst [vmem:[#allocation2 + $0x4ec] sm:$0xf] %v701_v40  ;;  %v707_v43 = vld [vmem:[%s19992_s11 + $0x4dc] sm:$0xf] }
  0xc4   :  { %v705_v42 = vld [vmem:[%s19992_s11 + $0x4f8] sm:$0xf]  ;;  %704 = vst [vmem:[#allocation2 + $0x4f0] sm:$0xf] %v703_v41  ;;  %v713_v45 = vld [vmem:[%s19992_s11 + $0x520] sm:$0xf] }
  0xc5   :  { %706 = vst [vmem:[#allocation2 + $0x4f4] sm:$0xf] %v705_v42  ;;  %708 = vst [vmem:[#allocation2 + $0x4f8] sm:$0xf] %v707_v43  ;;  %v715_v46 = vld [vmem:[%s19992_s11 + $0x504] sm:$0xf] }
  0xc6   :  { %710 = vst [vmem:[#allocation2 + $0x4fc] sm:$0xff] %v709_v44   ;;  %714 = vst [vmem:[#allocation2 + $0x504] sm:$0xf] %v713_v45  ;;  %v717_v47 = vld [vmem:[%s19992_s11 + $0x524] sm:$0xf]  ;;  %v741_v59 = vld [vmem:[%s19992_s11 + $0x53c] sm:$0xff]  }
  0xc7   :  { %v719_v48 = vld [vmem:[%s19992_s11 + $0x508] sm:$0xf]  ;;  %716 = vst [vmem:[#allocation2 + $0x508] sm:$0xf] %v715_v46  ;;  %718 = vst [vmem:[#allocation2 + $0x50c] sm:$0xf] %v717_v47 }
  0xc8   :  { %720 = vst [vmem:[#allocation2 + $0x510] sm:$0xf] %v719_v48  ;;  %v721_v49 = vld [vmem:[%s19992_s11 + $0x528] sm:$0xf]  ;;  %v723_v50 = vld [vmem:[%s19992_s11 + $0x50c] sm:$0xf] }
  0xc9   :  { %v725_v51 = vld [vmem:[%s19992_s11 + $0x52c] sm:$0xf]  ;;  %722 = vst [vmem:[#allocation2 + $0x514] sm:$0xf] %v721_v49  ;;  %724 = vst [vmem:[#allocation2 + $0x518] sm:$0xf] %v723_v50 }
  0xca   :  { %726 = vst [vmem:[#allocation2 + $0x51c] sm:$0xf] %v725_v51  ;;  %v727_v52 = vld [vmem:[%s19992_s11 + $0x510] sm:$0xf]  ;;  %v731_v54 = vld [vmem:[%s19992_s11 + $0x514] sm:$0xf] }
  0xcb   :  { %v729_v53 = vld [vmem:[%s19992_s11 + $0x530] sm:$0xf]  ;;  %728 = vst [vmem:[#allocation2 + $0x520] sm:$0xf] %v727_v52  ;;  %732 = vst [vmem:[#allocation2 + $0x528] sm:$0xf] %v731_v54 }
  0xcc   :  { %730 = vst [vmem:[#allocation2 + $0x524] sm:$0xf] %v729_v53  ;;  %v733_v55 = vld [vmem:[%s19992_s11 + $0x534] sm:$0xf]  ;;  %v735_v56 = vld [vmem:[%s19992_s11 + $0x518] sm:$0xf] }
  0xcd   :  { %v737_v57 = vld [vmem:[%s19992_s11 + $0x538] sm:$0xf]  ;;  %734 = vst [vmem:[#allocation2 + $0x52c] sm:$0xf] %v733_v55  ;;  %736 = vst [vmem:[#allocation2 + $0x530] sm:$0xf] %v735_v56 }
  0xce   :  { %738 = vst [vmem:[#allocation2 + $0x534] sm:$0xf] %v737_v57  ;;  %v739_v58 = vld [vmem:[%s19992_s11 + $0x51c] sm:$0xf]  ;;  %v745_v60 = vld [vmem:[%s19992_s11 + $0x560] sm:$0xf] }
  0xcf   :  { %740 = vst [vmem:[#allocation2 + $0x538] sm:$0xf] %v739_v58  ;;  %742 = vst [vmem:[#allocation2 + $0x53c] sm:$0xff] %v741_v59   ;;  %v747_v61 = vld [vmem:[%s19992_s11 + $0x544] sm:$0xf]  ;;  %v773_v10 = vld [vmem:[%s19992_s11 + $0x57c] sm:$0xff]  }
  0xd0   :  { %746 = vst [vmem:[#allocation2 + $0x544] sm:$0xf] %v745_v60  ;;  %v749_v62 = vld [vmem:[%s19992_s11 + $0x564] sm:$0xf]  ;;  %v751_v63 = vld [vmem:[%s19992_s11 + $0x548] sm:$0xf] }
  0xd1   :  { %748 = vst [vmem:[#allocation2 + $0x548] sm:$0xf] %v747_v61  ;;  %750 = vst [vmem:[#allocation2 + $0x54c] sm:$0xf] %v749_v62  ;;  %v753_v0 = vld [vmem:[%s19992_s11 + $0x568] sm:$0xf] }
  0xd2   :  { %752 = vst [vmem:[#allocation2 + $0x550] sm:$0xf] %v751_v63  ;;  %v755_v1 = vld [vmem:[%s19992_s11 + $0x54c] sm:$0xf]  ;;  %754 = vst [vmem:[#allocation2 + $0x554] sm:$0xf] %v753_v0 }
  0xd3   :  { %v757_v2 = vld [vmem:[%s19992_s11 + $0x56c] sm:$0xf]  ;;  %756 = vst [vmem:[#allocation2 + $0x558] sm:$0xf] %v755_v1  ;;  %v759_v3 = vld [vmem:[%s19992_s11 + $0x550] sm:$0xf] }
  0xd4   :  { %758 = vst [vmem:[#allocation2 + $0x55c] sm:$0xf] %v757_v2  ;;  %v761_v4 = vld [vmem:[%s19992_s11 + $0x570] sm:$0xf]  ;;  %v763_v5 = vld [vmem:[%s19992_s11 + $0x554] sm:$0xf] }
  0xd5   :  { %760 = vst [vmem:[#allocation2 + $0x560] sm:$0xf] %v759_v3  ;;  %762 = vst [vmem:[#allocation2 + $0x564] sm:$0xf] %v761_v4  ;;  %v765_v6 = vld [vmem:[%s19992_s11 + $0x574] sm:$0xf] }
  0xd6   :  { %764 = vst [vmem:[#allocation2 + $0x568] sm:$0xf] %v763_v5  ;;  %v767_v7 = vld [vmem:[%s19992_s11 + $0x558] sm:$0xf]  ;;  %766 = vst [vmem:[#allocation2 + $0x56c] sm:$0xf] %v765_v6 }
  0xd7   :  { %v769_v8 = vld [vmem:[%s19992_s11 + $0x578] sm:$0xf]  ;;  %768 = vst [vmem:[#allocation2 + $0x570] sm:$0xf] %v767_v7  ;;  %v771_v9 = vld [vmem:[%s19992_s11 + $0x55c] sm:$0xf] }
  0xd8   :  { %770 = vst [vmem:[#allocation2 + $0x574] sm:$0xf] %v769_v8  ;;  %v777_v11 = vld [vmem:[%s19992_s11 + $0x5a0] sm:$0xf]  ;;  %772 = vst [vmem:[#allocation2 + $0x578] sm:$0xf] %v771_v9 }
  0xd9   :  { %774 = vst [vmem:[#allocation2 + $0x57c] sm:$0xff] %v773_v10   ;;  %778 = vst [vmem:[#allocation2 + $0x584] sm:$0xf] %v777_v11  ;;  %v779_v12 = vld [vmem:[%s19992_s11 + $0x584] sm:$0xf]  ;;  %v805_v25 = vld [vmem:[%s19992_s11 + $0x5bc] sm:$0xff]  }
  0xda   :  { %v781_v13 = vld [vmem:[%s19992_s11 + $0x5a4] sm:$0xf]  ;;  %v783_v14 = vld [vmem:[%s19992_s11 + $0x588] sm:$0xf]  ;;  %780 = vst [vmem:[#allocation2 + $0x588] sm:$0xf] %v779_v12 }
  0xdb   :  { %782 = vst [vmem:[#allocation2 + $0x58c] sm:$0xf] %v781_v13  ;;  %784 = vst [vmem:[#allocation2 + $0x590] sm:$0xf] %v783_v14  ;;  %v785_v15 = vld [vmem:[%s19992_s11 + $0x5a8] sm:$0xf] }
  0xdc   :  { %v787_v16 = vld [vmem:[%s19992_s11 + $0x58c] sm:$0xf]  ;;  %786 = vst [vmem:[#allocation2 + $0x594] sm:$0xf] %v785_v15  ;;  %v791_v18 = vld [vmem:[%s19992_s11 + $0x590] sm:$0xf] }
  0xdd   :  { %v789_v17 = vld [vmem:[%s19992_s11 + $0x5ac] sm:$0xf]  ;;  %788 = vst [vmem:[#allocation2 + $0x598] sm:$0xf] %v787_v16  ;;  %v793_v19 = vld [vmem:[%s19992_s11 + $0x5b0] sm:$0xf] }
  0xde   :  { %790 = vst [vmem:[#allocation2 + $0x59c] sm:$0xf] %v789_v17  ;;  %v795_v20 = vld [vmem:[%s19992_s11 + $0x594] sm:$0xf]  ;;  %792 = vst [vmem:[#allocation2 + $0x5a0] sm:$0xf] %v791_v18 }
  0xdf   :  { %794 = vst [vmem:[#allocation2 + $0x5a4] sm:$0xf] %v793_v19  ;;  %796 = vst [vmem:[#allocation2 + $0x5a8] sm:$0xf] %v795_v20  ;;  %v797_v21 = vld [vmem:[%s19992_s11 + $0x5b4] sm:$0xf] }
  0xe0   :  { %v799_v22 = vld [vmem:[%s19992_s11 + $0x598] sm:$0xf]  ;;  %798 = vst [vmem:[#allocation2 + $0x5ac] sm:$0xf] %v797_v21  ;;  %v803_v24 = vld [vmem:[%s19992_s11 + $0x59c] sm:$0xf] }
  0xe1   :  { %v801_v23 = vld [vmem:[%s19992_s11 + $0x5b8] sm:$0xf]  ;;  %800 = vst [vmem:[#allocation2 + $0x5b0] sm:$0xf] %v799_v22  ;;  %v809_v26 = vld [vmem:[%s19992_s11 + $0x5e0] sm:$0xf] }
  0xe2   :  { %802 = vst [vmem:[#allocation2 + $0x5b4] sm:$0xf] %v801_v23  ;;  %804 = vst [vmem:[#allocation2 + $0x5b8] sm:$0xf] %v803_v24  ;;  %v811_v27 = vld [vmem:[%s19992_s11 + $0x5c4] sm:$0xf] }
  0xe3   :  { %806 = vst [vmem:[#allocation2 + $0x5bc] sm:$0xff] %v805_v25   ;;  %810 = vst [vmem:[#allocation2 + $0x5c4] sm:$0xf] %v809_v26  ;;  %v813_v28 = vld [vmem:[%s19992_s11 + $0x5e4] sm:$0xf]  ;;  %v837_v40 = vld [vmem:[%s19992_s11 + $0x5fc] sm:$0xff]  }
  0xe4   :  { %v815_v29 = vld [vmem:[%s19992_s11 + $0x5c8] sm:$0xf]  ;;  %812 = vst [vmem:[#allocation2 + $0x5c8] sm:$0xf] %v811_v27  ;;  %814 = vst [vmem:[#allocation2 + $0x5cc] sm:$0xf] %v813_v28 }
  0xe5   :  { %816 = vst [vmem:[#allocation2 + $0x5d0] sm:$0xf] %v815_v29  ;;  %v817_v30 = vld [vmem:[%s19992_s11 + $0x5e8] sm:$0xf]  ;;  %v819_v31 = vld [vmem:[%s19992_s11 + $0x5cc] sm:$0xf] }
  0xe6   :  { %v821_v32 = vld [vmem:[%s19992_s11 + $0x5ec] sm:$0xf]  ;;  %818 = vst [vmem:[#allocation2 + $0x5d4] sm:$0xf] %v817_v30  ;;  %820 = vst [vmem:[#allocation2 + $0x5d8] sm:$0xf] %v819_v31 }
  0xe7   :  { %822 = vst [vmem:[#allocation2 + $0x5dc] sm:$0xf] %v821_v32  ;;  %v823_v33 = vld [vmem:[%s19992_s11 + $0x5d0] sm:$0xf]  ;;  %v827_v35 = vld [vmem:[%s19992_s11 + $0x5d4] sm:$0xf] }
  0xe8   :  { %v825_v34 = vld [vmem:[%s19992_s11 + $0x5f0] sm:$0xf]  ;;  %824 = vst [vmem:[#allocation2 + $0x5e0] sm:$0xf] %v823_v33  ;;  %828 = vst [vmem:[#allocation2 + $0x5e8] sm:$0xf] %v827_v35 }
  0xe9   :  { %826 = vst [vmem:[#allocation2 + $0x5e4] sm:$0xf] %v825_v34  ;;  %v829_v36 = vld [vmem:[%s19992_s11 + $0x5f4] sm:$0xf]  ;;  %v831_v37 = vld [vmem:[%s19992_s11 + $0x5d8] sm:$0xf] }
  0xea   :  { %v833_v38 = vld [vmem:[%s19992_s11 + $0x5f8] sm:$0xf]  ;;  %830 = vst [vmem:[#allocation2 + $0x5ec] sm:$0xf] %v829_v36  ;;  %832 = vst [vmem:[#allocation2 + $0x5f0] sm:$0xf] %v831_v37 }
  0xeb   :  { %834 = vst [vmem:[#allocation2 + $0x5f4] sm:$0xf] %v833_v38  ;;  %v835_v39 = vld [vmem:[%s19992_s11 + $0x5dc] sm:$0xf]  ;;  %v841_v41 = vld [vmem:[%s19992_s11 + $0x620] sm:$0xf] }
  0xec   :  { %836 = vst [vmem:[#allocation2 + $0x5f8] sm:$0xf] %v835_v39  ;;  %838 = vst [vmem:[#allocation2 + $0x5fc] sm:$0xff] %v837_v40   ;;  %v843_v42 = vld [vmem:[%s19992_s11 + $0x604] sm:$0xf]  ;;  %v869_v55 = vld [vmem:[%s19992_s11 + $0x63c] sm:$0xff]  }
  0xed   :  { %842 = vst [vmem:[#allocation2 + $0x604] sm:$0xf] %v841_v41  ;;  %v845_v43 = vld [vmem:[%s19992_s11 + $0x624] sm:$0xf]  ;;  %v847_v44 = vld [vmem:[%s19992_s11 + $0x608] sm:$0xf] }
  0xee   :  { %844 = vst [vmem:[#allocation2 + $0x608] sm:$0xf] %v843_v42  ;;  %846 = vst [vmem:[#allocation2 + $0x60c] sm:$0xf] %v845_v43  ;;  %v849_v45 = vld [vmem:[%s19992_s11 + $0x628] sm:$0xf] }
  0xef   :  { %848 = vst [vmem:[#allocation2 + $0x610] sm:$0xf] %v847_v44  ;;  %v851_v46 = vld [vmem:[%s19992_s11 + $0x60c] sm:$0xf]  ;;  %850 = vst [vmem:[#allocation2 + $0x614] sm:$0xf] %v849_v45 }
  0xf0   :  { %v853_v47 = vld [vmem:[%s19992_s11 + $0x62c] sm:$0xf]  ;;  %852 = vst [vmem:[#allocation2 + $0x618] sm:$0xf] %v851_v46  ;;  %v855_v48 = vld [vmem:[%s19992_s11 + $0x610] sm:$0xf] }
  0xf1   :  { %854 = vst [vmem:[#allocation2 + $0x61c] sm:$0xf] %v853_v47  ;;  %v857_v49 = vld [vmem:[%s19992_s11 + $0x630] sm:$0xf]  ;;  %v859_v50 = vld [vmem:[%s19992_s11 + $0x614] sm:$0xf] }
  0xf2   :  { %856 = vst [vmem:[#allocation2 + $0x620] sm:$0xf] %v855_v48  ;;  %858 = vst [vmem:[#allocation2 + $0x624] sm:$0xf] %v857_v49  ;;  %v861_v51 = vld [vmem:[%s19992_s11 + $0x634] sm:$0xf] }
  0xf3   :  { %860 = vst [vmem:[#allocation2 + $0x628] sm:$0xf] %v859_v50  ;;  %v863_v52 = vld [vmem:[%s19992_s11 + $0x618] sm:$0xf]  ;;  %862 = vst [vmem:[#allocation2 + $0x62c] sm:$0xf] %v861_v51 }
  0xf4   :  { %v865_v53 = vld [vmem:[%s19992_s11 + $0x638] sm:$0xf]  ;;  %864 = vst [vmem:[#allocation2 + $0x630] sm:$0xf] %v863_v52  ;;  %v867_v54 = vld [vmem:[%s19992_s11 + $0x61c] sm:$0xf] }
  0xf5   :  { %866 = vst [vmem:[#allocation2 + $0x634] sm:$0xf] %v865_v53  ;;  %v873_v56 = vld [vmem:[%s19992_s11 + $0x660] sm:$0xf]  ;;  %868 = vst [vmem:[#allocation2 + $0x638] sm:$0xf] %v867_v54 }
  0xf6   :  { %870 = vst [vmem:[#allocation2 + $0x63c] sm:$0xff] %v869_v55   ;;  %874 = vst [vmem:[#allocation2 + $0x644] sm:$0xf] %v873_v56  ;;  %v875_v57 = vld [vmem:[%s19992_s11 + $0x644] sm:$0xf]  ;;  %v901_v6 = vld [vmem:[%s19992_s11 + $0x67c] sm:$0xff]  }
  0xf7   :  { %v877_v58 = vld [vmem:[%s19992_s11 + $0x664] sm:$0xf]  ;;  %v879_v59 = vld [vmem:[%s19992_s11 + $0x648] sm:$0xf]  ;;  %876 = vst [vmem:[#allocation2 + $0x648] sm:$0xf] %v875_v57 }
  0xf8   :  { %878 = vst [vmem:[#allocation2 + $0x64c] sm:$0xf] %v877_v58  ;;  %880 = vst [vmem:[#allocation2 + $0x650] sm:$0xf] %v879_v59  ;;  %v881_v60 = vld [vmem:[%s19992_s11 + $0x668] sm:$0xf] }
  0xf9   :  { %v883_v61 = vld [vmem:[%s19992_s11 + $0x64c] sm:$0xf]  ;;  %882 = vst [vmem:[#allocation2 + $0x654] sm:$0xf] %v881_v60  ;;  %v887_v63 = vld [vmem:[%s19992_s11 + $0x650] sm:$0xf] }
  0xfa   :  { %v885_v62 = vld [vmem:[%s19992_s11 + $0x66c] sm:$0xf]  ;;  %884 = vst [vmem:[#allocation2 + $0x658] sm:$0xf] %v883_v61  ;;  %v889_v0 = vld [vmem:[%s19992_s11 + $0x670] sm:$0xf] }
  0xfb   :  { %886 = vst [vmem:[#allocation2 + $0x65c] sm:$0xf] %v885_v62  ;;  %v891_v1 = vld [vmem:[%s19992_s11 + $0x654] sm:$0xf]  ;;  %888 = vst [vmem:[#allocation2 + $0x660] sm:$0xf] %v887_v63 }
  0xfc   :  { %890 = vst [vmem:[#allocation2 + $0x664] sm:$0xf] %v889_v0  ;;  %892 = vst [vmem:[#allocation2 + $0x668] sm:$0xf] %v891_v1  ;;  %v893_v2 = vld [vmem:[%s19992_s11 + $0x674] sm:$0xf] }
  0xfd   :  { %v895_v3 = vld [vmem:[%s19992_s11 + $0x658] sm:$0xf]  ;;  %894 = vst [vmem:[#allocation2 + $0x66c] sm:$0xf] %v893_v2  ;;  %v899_v5 = vld [vmem:[%s19992_s11 + $0x65c] sm:$0xf] }
  0xfe   :  { %v897_v4 = vld [vmem:[%s19992_s11 + $0x678] sm:$0xf]  ;;  %896 = vst [vmem:[#allocation2 + $0x670] sm:$0xf] %v895_v3  ;;  %v905_v7 = vld [vmem:[%s19992_s11 + $0x6a0] sm:$0xf] }
  0xff   :  { %898 = vst [vmem:[#allocation2 + $0x674] sm:$0xf] %v897_v4  ;;  %900 = vst [vmem:[#allocation2 + $0x678] sm:$0xf] %v899_v5  ;;  %v907_v8 = vld [vmem:[%s19992_s11 + $0x684] sm:$0xf] }
 0x100   :  { %902 = vst [vmem:[#allocation2 + $0x67c] sm:$0xff] %v901_v6   ;;  %906 = vst [vmem:[#allocation2 + $0x684] sm:$0xf] %v905_v7  ;;  %v909_v9 = vld [vmem:[%s19992_s11 + $0x6a4] sm:$0xf]  ;;  %v933_v21 = vld [vmem:[%s19992_s11 + $0x6bc] sm:$0xff]  }
 0x101   :  { %v911_v10 = vld [vmem:[%s19992_s11 + $0x688] sm:$0xf]  ;;  %908 = vst [vmem:[#allocation2 + $0x688] sm:$0xf] %v907_v8  ;;  %910 = vst [vmem:[#allocation2 + $0x68c] sm:$0xf] %v909_v9 }
 0x102   :  { %912 = vst [vmem:[#allocation2 + $0x690] sm:$0xf] %v911_v10  ;;  %v913_v11 = vld [vmem:[%s19992_s11 + $0x6a8] sm:$0xf]  ;;  %v915_v12 = vld [vmem:[%s19992_s11 + $0x68c] sm:$0xf] }
 0x103   :  { %v917_v13 = vld [vmem:[%s19992_s11 + $0x6ac] sm:$0xf]  ;;  %914 = vst [vmem:[#allocation2 + $0x694] sm:$0xf] %v913_v11  ;;  %916 = vst [vmem:[#allocation2 + $0x698] sm:$0xf] %v915_v12 }
 0x104   :  { %918 = vst [vmem:[#allocation2 + $0x69c] sm:$0xf] %v917_v13  ;;  %v919_v14 = vld [vmem:[%s19992_s11 + $0x690] sm:$0xf]  ;;  %v923_v16 = vld [vmem:[%s19992_s11 + $0x694] sm:$0xf] }
 0x105   :  { %v921_v15 = vld [vmem:[%s19992_s11 + $0x6b0] sm:$0xf]  ;;  %920 = vst [vmem:[#allocation2 + $0x6a0] sm:$0xf] %v919_v14  ;;  %924 = vst [vmem:[#allocation2 + $0x6a8] sm:$0xf] %v923_v16 }
 0x106   :  { %922 = vst [vmem:[#allocation2 + $0x6a4] sm:$0xf] %v921_v15  ;;  %v925_v17 = vld [vmem:[%s19992_s11 + $0x6b4] sm:$0xf]  ;;  %v927_v18 = vld [vmem:[%s19992_s11 + $0x698] sm:$0xf] }
 0x107   :  { %v929_v19 = vld [vmem:[%s19992_s11 + $0x6b8] sm:$0xf]  ;;  %926 = vst [vmem:[#allocation2 + $0x6ac] sm:$0xf] %v925_v17  ;;  %928 = vst [vmem:[#allocation2 + $0x6b0] sm:$0xf] %v927_v18 }
 0x108   :  { %930 = vst [vmem:[#allocation2 + $0x6b4] sm:$0xf] %v929_v19  ;;  %v931_v20 = vld [vmem:[%s19992_s11 + $0x69c] sm:$0xf]  ;;  %v937_v22 = vld [vmem:[%s19992_s11 + $0x6e0] sm:$0xf] }
 0x109   :  { %932 = vst [vmem:[#allocation2 + $0x6b8] sm:$0xf] %v931_v20  ;;  %934 = vst [vmem:[#allocation2 + $0x6bc] sm:$0xff] %v933_v21   ;;  %v939_v23 = vld [vmem:[%s19992_s11 + $0x6c4] sm:$0xf]  ;;  %v965_v36 = vld [vmem:[%s19992_s11 + $0x6fc] sm:$0xff]  }
 0x10a   :  { %938 = vst [vmem:[#allocation2 + $0x6c4] sm:$0xf] %v937_v22  ;;  %v941_v24 = vld [vmem:[%s19992_s11 + $0x6e4] sm:$0xf]  ;;  %v943_v25 = vld [vmem:[%s19992_s11 + $0x6c8] sm:$0xf] }
 0x10b   :  { %940 = vst [vmem:[#allocation2 + $0x6c8] sm:$0xf] %v939_v23  ;;  %942 = vst [vmem:[#allocation2 + $0x6cc] sm:$0xf] %v941_v24  ;;  %v945_v26 = vld [vmem:[%s19992_s11 + $0x6e8] sm:$0xf] }
 0x10c   :  { %944 = vst [vmem:[#allocation2 + $0x6d0] sm:$0xf] %v943_v25  ;;  %v947_v27 = vld [vmem:[%s19992_s11 + $0x6cc] sm:$0xf]  ;;  %946 = vst [vmem:[#allocation2 + $0x6d4] sm:$0xf] %v945_v26 }
 0x10d   :  { %v949_v28 = vld [vmem:[%s19992_s11 + $0x6ec] sm:$0xf]  ;;  %948 = vst [vmem:[#allocation2 + $0x6d8] sm:$0xf] %v947_v27  ;;  %v951_v29 = vld [vmem:[%s19992_s11 + $0x6d0] sm:$0xf] }
 0x10e   :  { %950 = vst [vmem:[#allocation2 + $0x6dc] sm:$0xf] %v949_v28  ;;  %v953_v30 = vld [vmem:[%s19992_s11 + $0x6f0] sm:$0xf]  ;;  %v955_v31 = vld [vmem:[%s19992_s11 + $0x6d4] sm:$0xf] }
 0x10f   :  { %952 = vst [vmem:[#allocation2 + $0x6e0] sm:$0xf] %v951_v29  ;;  %954 = vst [vmem:[#allocation2 + $0x6e4] sm:$0xf] %v953_v30  ;;  %v957_v32 = vld [vmem:[%s19992_s11 + $0x6f4] sm:$0xf] }
 0x110   :  { %956 = vst [vmem:[#allocation2 + $0x6e8] sm:$0xf] %v955_v31  ;;  %v959_v33 = vld [vmem:[%s19992_s11 + $0x6d8] sm:$0xf]  ;;  %958 = vst [vmem:[#allocation2 + $0x6ec] sm:$0xf] %v957_v32 }
 0x111   :  { %v961_v34 = vld [vmem:[%s19992_s11 + $0x6f8] sm:$0xf]  ;;  %960 = vst [vmem:[#allocation2 + $0x6f0] sm:$0xf] %v959_v33  ;;  %v963_v35 = vld [vmem:[%s19992_s11 + $0x6dc] sm:$0xf] }
 0x112   :  { %962 = vst [vmem:[#allocation2 + $0x6f4] sm:$0xf] %v961_v34  ;;  %v969_v37 = vld [vmem:[%s19992_s11 + $0x720] sm:$0xf]  ;;  %964 = vst [vmem:[#allocation2 + $0x6f8] sm:$0xf] %v963_v35 }
 0x113   :  { %966 = vst [vmem:[#allocation2 + $0x6fc] sm:$0xff] %v965_v36   ;;  %970 = vst [vmem:[#allocation2 + $0x704] sm:$0xf] %v969_v37  ;;  %v971_v38 = vld [vmem:[%s19992_s11 + $0x704] sm:$0xf]  ;;  %v997_v51 = vld [vmem:[%s19992_s11 + $0x73c] sm:$0xff]  }
 0x114   :  { %v973_v39 = vld [vmem:[%s19992_s11 + $0x724] sm:$0xf]  ;;  %v975_v40 = vld [vmem:[%s19992_s11 + $0x708] sm:$0xf]  ;;  %972 = vst [vmem:[#allocation2 + $0x708] sm:$0xf] %v971_v38 }
 0x115   :  { %974 = vst [vmem:[#allocation2 + $0x70c] sm:$0xf] %v973_v39  ;;  %976 = vst [vmem:[#allocation2 + $0x710] sm:$0xf] %v975_v40  ;;  %v977_v41 = vld [vmem:[%s19992_s11 + $0x728] sm:$0xf] }
 0x116   :  { %v979_v42 = vld [vmem:[%s19992_s11 + $0x70c] sm:$0xf]  ;;  %978 = vst [vmem:[#allocation2 + $0x714] sm:$0xf] %v977_v41  ;;  %v983_v44 = vld [vmem:[%s19992_s11 + $0x710] sm:$0xf] }
 0x117   :  { %v981_v43 = vld [vmem:[%s19992_s11 + $0x72c] sm:$0xf]  ;;  %980 = vst [vmem:[#allocation2 + $0x718] sm:$0xf] %v979_v42  ;;  %v985_v45 = vld [vmem:[%s19992_s11 + $0x730] sm:$0xf] }
 0x118   :  { %982 = vst [vmem:[#allocation2 + $0x71c] sm:$0xf] %v981_v43  ;;  %v987_v46 = vld [vmem:[%s19992_s11 + $0x714] sm:$0xf]  ;;  %984 = vst [vmem:[#allocation2 + $0x720] sm:$0xf] %v983_v44 }
 0x119   :  { %986 = vst [vmem:[#allocation2 + $0x724] sm:$0xf] %v985_v45  ;;  %988 = vst [vmem:[#allocation2 + $0x728] sm:$0xf] %v987_v46  ;;  %v989_v47 = vld [vmem:[%s19992_s11 + $0x734] sm:$0xf] }
 0x11a   :  { %v991_v48 = vld [vmem:[%s19992_s11 + $0x718] sm:$0xf]  ;;  %990 = vst [vmem:[#allocation2 + $0x72c] sm:$0xf] %v989_v47  ;;  %v995_v50 = vld [vmem:[%s19992_s11 + $0x71c] sm:$0xf] }
 0x11b   :  { %v993_v49 = vld [vmem:[%s19992_s11 + $0x738] sm:$0xf]  ;;  %992 = vst [vmem:[#allocation2 + $0x730] sm:$0xf] %v991_v48  ;;  %v1001_v52 = vld [vmem:[%s19992_s11 + $0x760] sm:$0xf] }
 0x11c   :  { %994 = vst [vmem:[#allocation2 + $0x734] sm:$0xf] %v993_v49  ;;  %996 = vst [vmem:[#allocation2 + $0x738] sm:$0xf] %v995_v50  ;;  %v1003_v53 = vld [vmem:[%s19992_s11 + $0x744] sm:$0xf] }
 0x11d   :  { %998 = vst [vmem:[#allocation2 + $0x73c] sm:$0xff] %v997_v51   ;;  %1002 = vst [vmem:[#allocation2 + $0x744] sm:$0xf] %v1001_v52  ;;  %v1005_v54 = vld [vmem:[%s19992_s11 + $0x764] sm:$0xf]  ;;  %v1029_v2 = vld [vmem:[%s19992_s11 + $0x77c] sm:$0xff]  }
 0x11e   :  { %v1007_v55 = vld [vmem:[%s19992_s11 + $0x748] sm:$0xf]  ;;  %1004 = vst [vmem:[#allocation2 + $0x748] sm:$0xf] %v1003_v53  ;;  %1006 = vst [vmem:[#allocation2 + $0x74c] sm:$0xf] %v1005_v54 }
 0x11f   :  { %1008 = vst [vmem:[#allocation2 + $0x750] sm:$0xf] %v1007_v55  ;;  %v1009_v56 = vld [vmem:[%s19992_s11 + $0x768] sm:$0xf]  ;;  %v1011_v57 = vld [vmem:[%s19992_s11 + $0x74c] sm:$0xf] }
 0x120   :  { %v1013_v58 = vld [vmem:[%s19992_s11 + $0x76c] sm:$0xf]  ;;  %1010 = vst [vmem:[#allocation2 + $0x754] sm:$0xf] %v1009_v56  ;;  %1012 = vst [vmem:[#allocation2 + $0x758] sm:$0xf] %v1011_v57 }
 0x121   :  { %1014 = vst [vmem:[#allocation2 + $0x75c] sm:$0xf] %v1013_v58  ;;  %v1015_v59 = vld [vmem:[%s19992_s11 + $0x750] sm:$0xf]  ;;  %v1019_v61 = vld [vmem:[%s19992_s11 + $0x754] sm:$0xf] }
 0x122   :  { %v1017_v60 = vld [vmem:[%s19992_s11 + $0x770] sm:$0xf]  ;;  %1016 = vst [vmem:[#allocation2 + $0x760] sm:$0xf] %v1015_v59  ;;  %1020 = vst [vmem:[#allocation2 + $0x768] sm:$0xf] %v1019_v61 }
 0x123   :  { %1018 = vst [vmem:[#allocation2 + $0x764] sm:$0xf] %v1017_v60  ;;  %v1021_v62 = vld [vmem:[%s19992_s11 + $0x774] sm:$0xf]  ;;  %v1023_v63 = vld [vmem:[%s19992_s11 + $0x758] sm:$0xf] }
 0x124   :  { %v1025_v0 = vld [vmem:[%s19992_s11 + $0x778] sm:$0xf]  ;;  %1022 = vst [vmem:[#allocation2 + $0x76c] sm:$0xf] %v1021_v62  ;;  %1024 = vst [vmem:[#allocation2 + $0x770] sm:$0xf] %v1023_v63 }
 0x125   :  { %1026 = vst [vmem:[#allocation2 + $0x774] sm:$0xf] %v1025_v0  ;;  %v1027_v1 = vld [vmem:[%s19992_s11 + $0x75c] sm:$0xf]  ;;  %v1033_v3 = vld [vmem:[%s19992_s11 + $0x7a0] sm:$0xf] }
 0x126   :  { %1028 = vst [vmem:[#allocation2 + $0x778] sm:$0xf] %v1027_v1  ;;  %1030 = vst [vmem:[#allocation2 + $0x77c] sm:$0xff] %v1029_v2   ;;  %v1035_v4 = vld [vmem:[%s19992_s11 + $0x784] sm:$0xf]  ;;  %v1061_v17 = vld [vmem:[%s19992_s11 + $0x7bc] sm:$0xff]  }
 0x127   :  { %1034 = vst [vmem:[#allocation2 + $0x784] sm:$0xf] %v1033_v3  ;;  %v1037_v5 = vld [vmem:[%s19992_s11 + $0x7a4] sm:$0xf]  ;;  %v1039_v6 = vld [vmem:[%s19992_s11 + $0x788] sm:$0xf] }
 0x128   :  { %1036 = vst [vmem:[#allocation2 + $0x788] sm:$0xf] %v1035_v4  ;;  %1038 = vst [vmem:[#allocation2 + $0x78c] sm:$0xf] %v1037_v5  ;;  %v1041_v7 = vld [vmem:[%s19992_s11 + $0x7a8] sm:$0xf] }
 0x129   :  { %1040 = vst [vmem:[#allocation2 + $0x790] sm:$0xf] %v1039_v6  ;;  %v1043_v8 = vld [vmem:[%s19992_s11 + $0x78c] sm:$0xf]  ;;  %1042 = vst [vmem:[#allocation2 + $0x794] sm:$0xf] %v1041_v7 }
 0x12a   :  { %v1045_v9 = vld [vmem:[%s19992_s11 + $0x7ac] sm:$0xf]  ;;  %1044 = vst [vmem:[#allocation2 + $0x798] sm:$0xf] %v1043_v8  ;;  %v1047_v10 = vld [vmem:[%s19992_s11 + $0x790] sm:$0xf] }
 0x12b   :  { %1046 = vst [vmem:[#allocation2 + $0x79c] sm:$0xf] %v1045_v9  ;;  %v1049_v11 = vld [vmem:[%s19992_s11 + $0x7b0] sm:$0xf]  ;;  %v1051_v12 = vld [vmem:[%s19992_s11 + $0x794] sm:$0xf] }
 0x12c   :  { %1048 = vst [vmem:[#allocation2 + $0x7a0] sm:$0xf] %v1047_v10  ;;  %1050 = vst [vmem:[#allocation2 + $0x7a4] sm:$0xf] %v1049_v11  ;;  %v1053_v13 = vld [vmem:[%s19992_s11 + $0x7b4] sm:$0xf] }
 0x12d   :  { %1052 = vst [vmem:[#allocation2 + $0x7a8] sm:$0xf] %v1051_v12  ;;  %v1055_v14 = vld [vmem:[%s19992_s11 + $0x798] sm:$0xf]  ;;  %1054 = vst [vmem:[#allocation2 + $0x7ac] sm:$0xf] %v1053_v13 }
 0x12e   :  { %v1057_v15 = vld [vmem:[%s19992_s11 + $0x7b8] sm:$0xf]  ;;  %1056 = vst [vmem:[#allocation2 + $0x7b0] sm:$0xf] %v1055_v14  ;;  %v1059_v16 = vld [vmem:[%s19992_s11 + $0x79c] sm:$0xf] }
 0x12f   :  { %1058 = vst [vmem:[#allocation2 + $0x7b4] sm:$0xf] %v1057_v15  ;;  %v1065_v18 = vld [vmem:[%s19992_s11 + $0x7e0] sm:$0xf]  ;;  %1060 = vst [vmem:[#allocation2 + $0x7b8] sm:$0xf] %v1059_v16 }
 0x130   :  { %1062 = vst [vmem:[#allocation2 + $0x7bc] sm:$0xff] %v1061_v17   ;;  %1066 = vst [vmem:[#allocation2 + $0x7c4] sm:$0xf] %v1065_v18  ;;  %v1067_v19 = vld [vmem:[%s19992_s11 + $0x7c4] sm:$0xf] }
 0x131   :  { %v1069_v20 = vld [vmem:[%s19992_s11 + $0x7e4] sm:$0xf]  ;;  %v1071_v21 = vld [vmem:[%s19992_s11 + $0x7c8] sm:$0xf]  ;;  %1068 = vst [vmem:[#allocation2 + $0x7c8] sm:$0xf] %v1067_v19 }
 0x132   :  { %1070 = vst [vmem:[#allocation2 + $0x7cc] sm:$0xf] %v1069_v20  ;;  %1072 = vst [vmem:[#allocation2 + $0x7d0] sm:$0xf] %v1071_v21  ;;  %v1073_v22 = vld [vmem:[%s19992_s11 + $0x7e8] sm:$0xf] }
 0x133   :  { %v1075_v23 = vld [vmem:[%s19992_s11 + $0x7cc] sm:$0xf]  ;;  %1074 = vst [vmem:[#allocation2 + $0x7d4] sm:$0xf] %v1073_v22  ;;  %v1079_v25 = vld [vmem:[%s19992_s11 + $0x7d0] sm:$0xf] }
 0x134   :  { %v1077_v24 = vld [vmem:[%s19992_s11 + $0x7ec] sm:$0xf]  ;;  %1076 = vst [vmem:[#allocation2 + $0x7d8] sm:$0xf] %v1075_v23  ;;  %v1081_v26 = vld [vmem:[%s19992_s11 + $0x7f0] sm:$0xf] }
 0x135   :  { %1078 = vst [vmem:[#allocation2 + $0x7dc] sm:$0xf] %v1077_v24  ;;  %v1083_v27 = vld [vmem:[%s19992_s11 + $0x7d4] sm:$0xf]  ;;  %1080 = vst [vmem:[#allocation2 + $0x7e0] sm:$0xf] %v1079_v25 }
 0x136   :  { %1082 = vst [vmem:[#allocation2 + $0x7e4] sm:$0xf] %v1081_v26  ;;  %1084 = vst [vmem:[#allocation2 + $0x7e8] sm:$0xf] %v1083_v27  ;;  %v1085_v28 = vld [vmem:[%s19992_s11 + $0x7f4] sm:$0xf] }
 0x137   :  { %v1087_v29 = vld [vmem:[%s19992_s11 + $0x7d8] sm:$0xf]  ;;  %1086 = vst [vmem:[#allocation2 + $0x7ec] sm:$0xf] %v1085_v28  ;;  %v1091_v31 = vld [vmem:[%s19992_s11 + $0x7dc] sm:$0xf] }
 0x138   :  { %v1089_v30 = vld [vmem:[%s19992_s11 + $0x7f8] sm:$0xf]  ;;  %1088 = vst [vmem:[#allocation2 + $0x7f0] sm:$0xf] %v1087_v29  ;;  %v1093_v32 = vld [vmem:[%s19992_s11 + $0x7fc] sm:$0xf] }
 0x139   :  { %1090 = vst [vmem:[#allocation2 + $0x7f4] sm:$0xf] %v1089_v30  ;;  %1092 = vst [vmem:[#allocation2 + $0x7f8] sm:$0xf] %v1091_v31 }
 0x13a   :  { %1094 = vst [vmem:[#allocation2 + $0x7fc] sm:$0xf] %v1093_v32 }
 0x13b   :  { %4230 = vsyncadd [#allocation4], 32768  ;;  %v4249_v33 = vld [vmem:[%s19996_s15] sm:$0xf]  ;;  %v4251_v34 = vld [vmem:[%s19996_s15 + $0x1c] sm:$0xf] }
 0x13c   :  { %4250 = vst [vmem:[#allocation3] sm:$0xf] %v4249_v33  ;;  %4252 = vst [vmem:[#allocation3 + $0x4] sm:$0xf] %v4251_v34  ;;  %v4253_v35 = vld [vmem:[%s19996_s15 + $0x4] sm:$0xf] }
 0x13d   :  { %v4255_v36 = vld [vmem:[%s19996_s15 + $0x20] sm:$0xf]  ;;  %v4257_v37 = vld [vmem:[%s19996_s15 + $0x8] sm:$0xf]  ;;  %4254 = vst [vmem:[#allocation3 + $0x8] sm:$0xf] %v4253_v35 }
 0x13e   :  { %4256 = vst [vmem:[#allocation3 + $0xc] sm:$0xf] %v4255_v36  ;;  %4258 = vst [vmem:[#allocation3 + $0x10] sm:$0xf] %v4257_v37  ;;  %v4259_v38 = vld [vmem:[%s19996_s15 + $0x24] sm:$0xf] }
 0x13f   :  { %v4261_v39 = vld [vmem:[%s19996_s15 + $0xc] sm:$0xf]  ;;  %v4263_v40 = vld [vmem:[%s19996_s15 + $0x28] sm:$0xf]  ;;  %4260 = vst [vmem:[#allocation3 + $0x14] sm:$0xf] %v4259_v38 }
 0x140   :  { %4262 = vst [vmem:[#allocation3 + $0x18] sm:$0xf] %v4261_v39  ;;  %4264 = vst [vmem:[#allocation3 + $0x1c] sm:$0xf] %v4263_v40  ;;  %v4265_v41 = vld [vmem:[%s19996_s15 + $0x10] sm:$0xf] }
 0x141   :  { %v4267_v42 = vld [vmem:[%s19996_s15 + $0x2c] sm:$0xf]  ;;  %v4269_v43 = vld [vmem:[%s19996_s15 + $0x14] sm:$0xf]  ;;  %4266 = vst [vmem:[#allocation3 + $0x20] sm:$0xf] %v4265_v41 }
 0x142   :  { %4268 = vst [vmem:[#allocation3 + $0x24] sm:$0xf] %v4267_v42  ;;  %4270 = vst [vmem:[#allocation3 + $0x28] sm:$0xf] %v4269_v43  ;;  %v4271_v44 = vld [vmem:[%s19996_s15 + $0x30] sm:$0xf] }
 0x143   :  { %v4273_v45 = vld [vmem:[%s19996_s15 + $0x18] sm:$0xf]  ;;  %4272 = vst [vmem:[#allocation3 + $0x2c] sm:$0xf] %v4271_v44  ;;  %v4279_v47 = vld [vmem:[%s19996_s15 + $0x54] sm:$0xf] }
 0x144   :  { %v4275_v46 = vld [vmem:[%s19996_s15 + $0x34] sm:$0xff]   ;;  %4274 = vst [vmem:[#allocation3 + $0x30] sm:$0xf] %v4273_v45  ;;  %v4281_v48 = vld [vmem:[%s19996_s15 + $0x3c] sm:$0xf]  ;;  %v4303_v59 = vld [vmem:[%s19996_s15 + $0x6c] sm:$0xff]  }
 0x145   :  { %4276 = vst [vmem:[#allocation3 + $0x34] sm:$0xff] %v4275_v46   ;;  %v4283_v49 = vld [vmem:[%s19996_s15 + $0x58] sm:$0xf]  ;;  %4280 = vst [vmem:[#allocation3 + $0x3c] sm:$0xf] %v4279_v47  ;;  %v4331_v8 = vld [vmem:[%s19996_s15 + $0xa4] sm:$0xff]  }
 0x146   :  { %4282 = vst [vmem:[#allocation3 + $0x40] sm:$0xf] %v4281_v48  ;;  %4284 = vst [vmem:[#allocation3 + $0x44] sm:$0xf] %v4283_v49  ;;  %v4285_v50 = vld [vmem:[%s19996_s15 + $0x40] sm:$0xf] }
 0x147   :  { %v4287_v51 = vld [vmem:[%s19996_s15 + $0x5c] sm:$0xf]  ;;  %v4289_v52 = vld [vmem:[%s19996_s15 + $0x44] sm:$0xf]  ;;  %4286 = vst [vmem:[#allocation3 + $0x48] sm:$0xf] %v4285_v50 }
 0x148   :  { %4288 = vst [vmem:[#allocation3 + $0x4c] sm:$0xf] %v4287_v51  ;;  %4290 = vst [vmem:[#allocation3 + $0x50] sm:$0xf] %v4289_v52  ;;  %v4291_v53 = vld [vmem:[%s19996_s15 + $0x60] sm:$0xf] }
 0x149   :  { %v4293_v54 = vld [vmem:[%s19996_s15 + $0x48] sm:$0xf]  ;;  %v4295_v55 = vld [vmem:[%s19996_s15 + $0x64] sm:$0xf]  ;;  %4292 = vst [vmem:[#allocation3 + $0x54] sm:$0xf] %v4291_v53 }
 0x14a   :  { %4294 = vst [vmem:[#allocation3 + $0x58] sm:$0xf] %v4293_v54  ;;  %4296 = vst [vmem:[#allocation3 + $0x5c] sm:$0xf] %v4295_v55  ;;  %v4297_v56 = vld [vmem:[%s19996_s15 + $0x4c] sm:$0xf] }
 0x14b   :  { %v4299_v57 = vld [vmem:[%s19996_s15 + $0x68] sm:$0xf]  ;;  %v4301_v58 = vld [vmem:[%s19996_s15 + $0x50] sm:$0xf]  ;;  %4298 = vst [vmem:[#allocation3 + $0x60] sm:$0xf] %v4297_v56 }
 0x14c   :  { %4300 = vst [vmem:[#allocation3 + $0x64] sm:$0xf] %v4299_v57  ;;  %4302 = vst [vmem:[#allocation3 + $0x68] sm:$0xf] %v4301_v58  ;;  %v4307_v60 = vld [vmem:[%s19996_s15 + $0x8c] sm:$0xf] }
 0x14d   :  { %v4309_v61 = vld [vmem:[%s19996_s15 + $0x74] sm:$0xf]  ;;  %4304 = vst [vmem:[#allocation3 + $0x6c] sm:$0xff] %v4303_v59   ;;  %4308 = vst [vmem:[#allocation3 + $0x74] sm:$0xf] %v4307_v60  ;;  %v4359_v21 = vld [vmem:[%s19996_s15 + $0xdc] sm:$0xff]  }
 0x14e   :  { %4310 = vst [vmem:[#allocation3 + $0x78] sm:$0xf] %v4309_v61  ;;  %v4311_v62 = vld [vmem:[%s19996_s15 + $0x90] sm:$0xf]  ;;  %v4313_v63 = vld [vmem:[%s19996_s15 + $0x78] sm:$0xf] }
 0x14f   :  { %v4315_v0 = vld [vmem:[%s19996_s15 + $0x94] sm:$0xf]  ;;  %4312 = vst [vmem:[#allocation3 + $0x7c] sm:$0xf] %v4311_v62  ;;  %4314 = vst [vmem:[#allocation3 + $0x80] sm:$0xf] %v4313_v63 }
 0x150   :  { %4316 = vst [vmem:[#allocation3 + $0x84] sm:$0xf] %v4315_v0  ;;  %v4317_v1 = vld [vmem:[%s19996_s15 + $0x7c] sm:$0xf]  ;;  %v4319_v2 = vld [vmem:[%s19996_s15 + $0x98] sm:$0xf] }
 0x151   :  { %v4321_v3 = vld [vmem:[%s19996_s15 + $0x80] sm:$0xf]  ;;  %4318 = vst [vmem:[#allocation3 + $0x88] sm:$0xf] %v4317_v1  ;;  %4320 = vst [vmem:[#allocation3 + $0x8c] sm:$0xf] %v4319_v2 }
 0x152   :  { %4322 = vst [vmem:[#allocation3 + $0x90] sm:$0xf] %v4321_v3  ;;  %v4323_v4 = vld [vmem:[%s19996_s15 + $0x9c] sm:$0xf]  ;;  %v4325_v5 = vld [vmem:[%s19996_s15 + $0x84] sm:$0xf] }
 0x153   :  { %v4327_v6 = vld [vmem:[%s19996_s15 + $0xa0] sm:$0xf]  ;;  %4324 = vst [vmem:[#allocation3 + $0x94] sm:$0xf] %v4323_v4  ;;  %4326 = vst [vmem:[#allocation3 + $0x98] sm:$0xf] %v4325_v5 }
 0x154   :  { %4328 = vst [vmem:[#allocation3 + $0x9c] sm:$0xf] %v4327_v6  ;;  %v4329_v7 = vld [vmem:[%s19996_s15 + $0x88] sm:$0xf]  ;;  %v4335_v9 = vld [vmem:[%s19996_s15 + $0xc4] sm:$0xf] }
 0x155   :  { %4330 = vst [vmem:[#allocation3 + $0xa0] sm:$0xf] %v4329_v7  ;;  %4332 = vst [vmem:[#allocation3 + $0xa4] sm:$0xff] %v4331_v8   ;;  %v4337_v10 = vld [vmem:[%s19996_s15 + $0xac] sm:$0xf]  ;;  %v4387_v34 = vld [vmem:[%s19996_s15 + $0x114] sm:$0xff]  }
 0x156   :  { %4336 = vst [vmem:[#allocation3 + $0xac] sm:$0xf] %v4335_v9  ;;  %v4339_v11 = vld [vmem:[%s19996_s15 + $0xc8] sm:$0xf]  ;;  %v4341_v12 = vld [vmem:[%s19996_s15 + $0xb0] sm:$0xf] }
 0x157   :  { %4338 = vst [vmem:[#allocation3 + $0xb0] sm:$0xf] %v4337_v10  ;;  %4340 = vst [vmem:[#allocation3 + $0xb4] sm:$0xf] %v4339_v11  ;;  %v4343_v13 = vld [vmem:[%s19996_s15 + $0xcc] sm:$0xf] }
 0x158   :  { %4342 = vst [vmem:[#allocation3 + $0xb8] sm:$0xf] %v4341_v12  ;;  %v4345_v14 = vld [vmem:[%s19996_s15 + $0xb4] sm:$0xf]  ;;  %v4347_v15 = vld [vmem:[%s19996_s15 + $0xd0] sm:$0xf] }
 0x159   :  { %4344 = vst [vmem:[#allocation3 + $0xbc] sm:$0xf] %v4343_v13  ;;  %4346 = vst [vmem:[#allocation3 + $0xc0] sm:$0xf] %v4345_v14  ;;  %v4349_v16 = vld [vmem:[%s19996_s15 + $0xb8] sm:$0xf] }
 0x15a   :  { %4348 = vst [vmem:[#allocation3 + $0xc4] sm:$0xf] %v4347_v15  ;;  %v4351_v17 = vld [vmem:[%s19996_s15 + $0xd4] sm:$0xf]  ;;  %v4353_v18 = vld [vmem:[%s19996_s15 + $0xbc] sm:$0xf] }
 0x15b   :  { %4350 = vst [vmem:[#allocation3 + $0xc8] sm:$0xf] %v4349_v16  ;;  %4352 = vst [vmem:[#allocation3 + $0xcc] sm:$0xf] %v4351_v17  ;;  %v4355_v19 = vld [vmem:[%s19996_s15 + $0xd8] sm:$0xf] }
 0x15c   :  { %4354 = vst [vmem:[#allocation3 + $0xd0] sm:$0xf] %v4353_v18  ;;  %v4357_v20 = vld [vmem:[%s19996_s15 + $0xc0] sm:$0xf]  ;;  %4356 = vst [vmem:[#allocation3 + $0xd4] sm:$0xf] %v4355_v19 }
 0x15d   :  { %4358 = vst [vmem:[#allocation3 + $0xd8] sm:$0xf] %v4357_v20  ;;  %4360 = vst [vmem:[#allocation3 + $0xdc] sm:$0xff] %v4359_v21   ;;  %v4363_v22 = vld [vmem:[%s19996_s15 + $0xfc] sm:$0xf]  ;;  %v4415_v47 = vld [vmem:[%s19996_s15 + $0x14c] sm:$0xff]  }
 0x15e   :  { %v4365_v23 = vld [vmem:[%s19996_s15 + $0xe4] sm:$0xf]  ;;  %v4367_v24 = vld [vmem:[%s19996_s15 + $0x100] sm:$0xf]  ;;  %4364 = vst [vmem:[#allocation3 + $0xe4] sm:$0xf] %v4363_v22 }
 0x15f   :  { %4366 = vst [vmem:[#allocation3 + $0xe8] sm:$0xf] %v4365_v23  ;;  %4368 = vst [vmem:[#allocation3 + $0xec] sm:$0xf] %v4367_v24  ;;  %v4369_v25 = vld [vmem:[%s19996_s15 + $0xe8] sm:$0xf] }
 0x160   :  { %v4371_v26 = vld [vmem:[%s19996_s15 + $0x104] sm:$0xf]  ;;  %v4373_v27 = vld [vmem:[%s19996_s15 + $0xec] sm:$0xf]  ;;  %4370 = vst [vmem:[#allocation3 + $0xf0] sm:$0xf] %v4369_v25 }
 0x161   :  { %4372 = vst [vmem:[#allocation3 + $0xf4] sm:$0xf] %v4371_v26  ;;  %4374 = vst [vmem:[#allocation3 + $0xf8] sm:$0xf] %v4373_v27  ;;  %v4375_v28 = vld [vmem:[%s19996_s15 + $0x108] sm:$0xf] }
 0x162   :  { %v4377_v29 = vld [vmem:[%s19996_s15 + $0xf0] sm:$0xf]  ;;  %v4379_v30 = vld [vmem:[%s19996_s15 + $0x10c] sm:$0xf]  ;;  %4376 = vst [vmem:[#allocation3 + $0xfc] sm:$0xf] %v4375_v28 }
 0x163   :  { %4378 = vst [vmem:[#allocation3 + $0x100] sm:$0xf] %v4377_v29  ;;  %4380 = vst [vmem:[#allocation3 + $0x104] sm:$0xf] %v4379_v30  ;;  %v4381_v31 = vld [vmem:[%s19996_s15 + $0xf4] sm:$0xf] }
 0x164   :  { %v4383_v32 = vld [vmem:[%s19996_s15 + $0x110] sm:$0xf]  ;;  %v4385_v33 = vld [vmem:[%s19996_s15 + $0xf8] sm:$0xf]  ;;  %4382 = vst [vmem:[#allocation3 + $0x108] sm:$0xf] %v4381_v31 }
 0x165   :  { %4384 = vst [vmem:[#allocation3 + $0x10c] sm:$0xf] %v4383_v32  ;;  %4386 = vst [vmem:[#allocation3 + $0x110] sm:$0xf] %v4385_v33  ;;  %v4391_v35 = vld [vmem:[%s19996_s15 + $0x134] sm:$0xf] }
 0x166   :  { %v4393_v36 = vld [vmem:[%s19996_s15 + $0x11c] sm:$0xf]  ;;  %4388 = vst [vmem:[#allocation3 + $0x114] sm:$0xff] %v4387_v34   ;;  %4392 = vst [vmem:[#allocation3 + $0x11c] sm:$0xf] %v4391_v35  ;;  %v4443_v60 = vld [vmem:[%s19996_s15 + $0x184] sm:$0xff]  }
 0x167   :  { %4394 = vst [vmem:[#allocation3 + $0x120] sm:$0xf] %v4393_v36  ;;  %v4395_v37 = vld [vmem:[%s19996_s15 + $0x138] sm:$0xf]  ;;  %v4397_v38 = vld [vmem:[%s19996_s15 + $0x120] sm:$0xf] }
 0x168   :  { %v4399_v39 = vld [vmem:[%s19996_s15 + $0x13c] sm:$0xf]  ;;  %4396 = vst [vmem:[#allocation3 + $0x124] sm:$0xf] %v4395_v37  ;;  %4398 = vst [vmem:[#allocation3 + $0x128] sm:$0xf] %v4397_v38 }
 0x169   :  { %4400 = vst [vmem:[#allocation3 + $0x12c] sm:$0xf] %v4399_v39  ;;  %v4401_v40 = vld [vmem:[%s19996_s15 + $0x124] sm:$0xf]  ;;  %v4403_v41 = vld [vmem:[%s19996_s15 + $0x140] sm:$0xf] }
 0x16a   :  { %v4405_v42 = vld [vmem:[%s19996_s15 + $0x128] sm:$0xf]  ;;  %4402 = vst [vmem:[#allocation3 + $0x130] sm:$0xf] %v4401_v40  ;;  %4404 = vst [vmem:[#allocation3 + $0x134] sm:$0xf] %v4403_v41 }
 0x16b   :  { %4406 = vst [vmem:[#allocation3 + $0x138] sm:$0xf] %v4405_v42  ;;  %v4407_v43 = vld [vmem:[%s19996_s15 + $0x144] sm:$0xf]  ;;  %v4409_v44 = vld [vmem:[%s19996_s15 + $0x12c] sm:$0xf] }
 0x16c   :  { %v4411_v45 = vld [vmem:[%s19996_s15 + $0x148] sm:$0xf]  ;;  %4408 = vst [vmem:[#allocation3 + $0x13c] sm:$0xf] %v4407_v43  ;;  %4410 = vst [vmem:[#allocation3 + $0x140] sm:$0xf] %v4409_v44 }
 0x16d   :  { %4412 = vst [vmem:[#allocation3 + $0x144] sm:$0xf] %v4411_v45  ;;  %v4413_v46 = vld [vmem:[%s19996_s15 + $0x130] sm:$0xf]  ;;  %v4419_v48 = vld [vmem:[%s19996_s15 + $0x16c] sm:$0xf] }
 0x16e   :  { %4414 = vst [vmem:[#allocation3 + $0x148] sm:$0xf] %v4413_v46  ;;  %4416 = vst [vmem:[#allocation3 + $0x14c] sm:$0xff] %v4415_v47   ;;  %v4421_v49 = vld [vmem:[%s19996_s15 + $0x154] sm:$0xf]  ;;  %v4471_v9 = vld [vmem:[%s19996_s15 + $0x1bc] sm:$0xff]  }
 0x16f   :  { %4420 = vst [vmem:[#allocation3 + $0x154] sm:$0xf] %v4419_v48  ;;  %v4423_v50 = vld [vmem:[%s19996_s15 + $0x170] sm:$0xf]  ;;  %v4425_v51 = vld [vmem:[%s19996_s15 + $0x158] sm:$0xf] }
 0x170   :  { %4422 = vst [vmem:[#allocation3 + $0x158] sm:$0xf] %v4421_v49  ;;  %4424 = vst [vmem:[#allocation3 + $0x15c] sm:$0xf] %v4423_v50  ;;  %v4427_v52 = vld [vmem:[%s19996_s15 + $0x174] sm:$0xf] }
 0x171   :  { %4426 = vst [vmem:[#allocation3 + $0x160] sm:$0xf] %v4425_v51  ;;  %v4429_v53 = vld [vmem:[%s19996_s15 + $0x15c] sm:$0xf]  ;;  %v4431_v54 = vld [vmem:[%s19996_s15 + $0x178] sm:$0xf] }
 0x172   :  { %4428 = vst [vmem:[#allocation3 + $0x164] sm:$0xf] %v4427_v52  ;;  %4430 = vst [vmem:[#allocation3 + $0x168] sm:$0xf] %v4429_v53  ;;  %v4433_v55 = vld [vmem:[%s19996_s15 + $0x160] sm:$0xf] }
 0x173   :  { %4432 = vst [vmem:[#allocation3 + $0x16c] sm:$0xf] %v4431_v54  ;;  %v4435_v56 = vld [vmem:[%s19996_s15 + $0x17c] sm:$0xf]  ;;  %v4437_v57 = vld [vmem:[%s19996_s15 + $0x164] sm:$0xf] }
 0x174   :  { %4434 = vst [vmem:[#allocation3 + $0x170] sm:$0xf] %v4433_v55  ;;  %4436 = vst [vmem:[#allocation3 + $0x174] sm:$0xf] %v4435_v56  ;;  %v4439_v58 = vld [vmem:[%s19996_s15 + $0x180] sm:$0xf] }
 0x175   :  { %4438 = vst [vmem:[#allocation3 + $0x178] sm:$0xf] %v4437_v57  ;;  %v4441_v59 = vld [vmem:[%s19996_s15 + $0x168] sm:$0xf]  ;;  %4440 = vst [vmem:[#allocation3 + $0x17c] sm:$0xf] %v4439_v58 }
 0x176   :  { %4442 = vst [vmem:[#allocation3 + $0x180] sm:$0xf] %v4441_v59  ;;  %4444 = vst [vmem:[#allocation3 + $0x184] sm:$0xff] %v4443_v60   ;;  %v4447_v61 = vld [vmem:[%s19996_s15 + $0x1a4] sm:$0xf]  ;;  %v4499_v22 = vld [vmem:[%s19996_s15 + $0x1f4] sm:$0xff]  }
 0x177   :  { %v4449_v62 = vld [vmem:[%s19996_s15 + $0x18c] sm:$0xf]  ;;  %v4451_v63 = vld [vmem:[%s19996_s15 + $0x1a8] sm:$0xf]  ;;  %4448 = vst [vmem:[#allocation3 + $0x18c] sm:$0xf] %v4447_v61 }
 0x178   :  { %4450 = vst [vmem:[#allocation3 + $0x190] sm:$0xf] %v4449_v62  ;;  %4452 = vst [vmem:[#allocation3 + $0x194] sm:$0xf] %v4451_v63  ;;  %v4453_v0 = vld [vmem:[%s19996_s15 + $0x190] sm:$0xf] }
 0x179   :  { %v4455_v1 = vld [vmem:[%s19996_s15 + $0x1ac] sm:$0xf]  ;;  %v4457_v2 = vld [vmem:[%s19996_s15 + $0x194] sm:$0xf]  ;;  %4454 = vst [vmem:[#allocation3 + $0x198] sm:$0xf] %v4453_v0 }
 0x17a   :  { %4456 = vst [vmem:[#allocation3 + $0x19c] sm:$0xf] %v4455_v1  ;;  %4458 = vst [vmem:[#allocation3 + $0x1a0] sm:$0xf] %v4457_v2  ;;  %v4459_v3 = vld [vmem:[%s19996_s15 + $0x1b0] sm:$0xf] }
 0x17b   :  { %v4461_v4 = vld [vmem:[%s19996_s15 + $0x198] sm:$0xf]  ;;  %v4463_v5 = vld [vmem:[%s19996_s15 + $0x1b4] sm:$0xf]  ;;  %4460 = vst [vmem:[#allocation3 + $0x1a4] sm:$0xf] %v4459_v3 }
 0x17c   :  { %4462 = vst [vmem:[#allocation3 + $0x1a8] sm:$0xf] %v4461_v4  ;;  %4464 = vst [vmem:[#allocation3 + $0x1ac] sm:$0xf] %v4463_v5  ;;  %v4465_v6 = vld [vmem:[%s19996_s15 + $0x19c] sm:$0xf] }
 0x17d   :  { %v4467_v7 = vld [vmem:[%s19996_s15 + $0x1b8] sm:$0xf]  ;;  %v4469_v8 = vld [vmem:[%s19996_s15 + $0x1a0] sm:$0xf]  ;;  %4466 = vst [vmem:[#allocation3 + $0x1b0] sm:$0xf] %v4465_v6 }
 0x17e   :  { %4468 = vst [vmem:[#allocation3 + $0x1b4] sm:$0xf] %v4467_v7  ;;  %4470 = vst [vmem:[#allocation3 + $0x1b8] sm:$0xf] %v4469_v8  ;;  %v4475_v10 = vld [vmem:[%s19996_s15 + $0x1dc] sm:$0xf] }
 0x17f   :  { %v4477_v11 = vld [vmem:[%s19996_s15 + $0x1c4] sm:$0xf]  ;;  %4472 = vst [vmem:[#allocation3 + $0x1bc] sm:$0xff] %v4471_v9   ;;  %4476 = vst [vmem:[#allocation3 + $0x1c4] sm:$0xf] %v4475_v10  ;;  %v4527_v35 = vld [vmem:[%s19996_s15 + $0x22c] sm:$0xff]  }
 0x180   :  { %4478 = vst [vmem:[#allocation3 + $0x1c8] sm:$0xf] %v4477_v11  ;;  %v4479_v12 = vld [vmem:[%s19996_s15 + $0x1e0] sm:$0xf]  ;;  %v4481_v13 = vld [vmem:[%s19996_s15 + $0x1c8] sm:$0xf] }
 0x181   :  { %v4483_v14 = vld [vmem:[%s19996_s15 + $0x1e4] sm:$0xf]  ;;  %4480 = vst [vmem:[#allocation3 + $0x1cc] sm:$0xf] %v4479_v12  ;;  %4482 = vst [vmem:[#allocation3 + $0x1d0] sm:$0xf] %v4481_v13 }
 0x182   :  { %4484 = vst [vmem:[#allocation3 + $0x1d4] sm:$0xf] %v4483_v14  ;;  %v4485_v15 = vld [vmem:[%s19996_s15 + $0x1cc] sm:$0xf]  ;;  %v4487_v16 = vld [vmem:[%s19996_s15 + $0x1e8] sm:$0xf] }
 0x183   :  { %v4489_v17 = vld [vmem:[%s19996_s15 + $0x1d0] sm:$0xf]  ;;  %4486 = vst [vmem:[#allocation3 + $0x1d8] sm:$0xf] %v4485_v15  ;;  %4488 = vst [vmem:[#allocation3 + $0x1dc] sm:$0xf] %v4487_v16 }
 0x184   :  { %4490 = vst [vmem:[#allocation3 + $0x1e0] sm:$0xf] %v4489_v17  ;;  %v4491_v18 = vld [vmem:[%s19996_s15 + $0x1ec] sm:$0xf]  ;;  %v4493_v19 = vld [vmem:[%s19996_s15 + $0x1d4] sm:$0xf] }
 0x185   :  { %v4495_v20 = vld [vmem:[%s19996_s15 + $0x1f0] sm:$0xf]  ;;  %4492 = vst [vmem:[#allocation3 + $0x1e4] sm:$0xf] %v4491_v18  ;;  %4494 = vst [vmem:[#allocation3 + $0x1e8] sm:$0xf] %v4493_v19 }
 0x186   :  { %4496 = vst [vmem:[#allocation3 + $0x1ec] sm:$0xf] %v4495_v20  ;;  %v4497_v21 = vld [vmem:[%s19996_s15 + $0x1d8] sm:$0xf]  ;;  %v4503_v23 = vld [vmem:[%s19996_s15 + $0x214] sm:$0xf] }
 0x187   :  { %4498 = vst [vmem:[#allocation3 + $0x1f0] sm:$0xf] %v4497_v21  ;;  %4500 = vst [vmem:[#allocation3 + $0x1f4] sm:$0xff] %v4499_v22   ;;  %v4505_v24 = vld [vmem:[%s19996_s15 + $0x1fc] sm:$0xf]  ;;  %v4555_v48 = vld [vmem:[%s19996_s15 + $0x264] sm:$0xff]  }
 0x188   :  { %4504 = vst [vmem:[#allocation3 + $0x1fc] sm:$0xf] %v4503_v23  ;;  %v4507_v25 = vld [vmem:[%s19996_s15 + $0x218] sm:$0xf]  ;;  %v4509_v26 = vld [vmem:[%s19996_s15 + $0x200] sm:$0xf] }
 0x189   :  { %4506 = vst [vmem:[#allocation3 + $0x200] sm:$0xf] %v4505_v24  ;;  %4508 = vst [vmem:[#allocation3 + $0x204] sm:$0xf] %v4507_v25  ;;  %v4511_v27 = vld [vmem:[%s19996_s15 + $0x21c] sm:$0xf] }
 0x18a   :  { %4510 = vst [vmem:[#allocation3 + $0x208] sm:$0xf] %v4509_v26  ;;  %v4513_v28 = vld [vmem:[%s19996_s15 + $0x204] sm:$0xf]  ;;  %v4515_v29 = vld [vmem:[%s19996_s15 + $0x220] sm:$0xf] }
 0x18b   :  { %4512 = vst [vmem:[#allocation3 + $0x20c] sm:$0xf] %v4511_v27  ;;  %4514 = vst [vmem:[#allocation3 + $0x210] sm:$0xf] %v4513_v28  ;;  %v4517_v30 = vld [vmem:[%s19996_s15 + $0x208] sm:$0xf] }
 0x18c   :  { %4516 = vst [vmem:[#allocation3 + $0x214] sm:$0xf] %v4515_v29  ;;  %v4519_v31 = vld [vmem:[%s19996_s15 + $0x224] sm:$0xf]  ;;  %v4521_v32 = vld [vmem:[%s19996_s15 + $0x20c] sm:$0xf] }
 0x18d   :  { %4518 = vst [vmem:[#allocation3 + $0x218] sm:$0xf] %v4517_v30  ;;  %4520 = vst [vmem:[#allocation3 + $0x21c] sm:$0xf] %v4519_v31  ;;  %v4523_v33 = vld [vmem:[%s19996_s15 + $0x228] sm:$0xf] }
 0x18e   :  { %4522 = vst [vmem:[#allocation3 + $0x220] sm:$0xf] %v4521_v32  ;;  %v4525_v34 = vld [vmem:[%s19996_s15 + $0x210] sm:$0xf]  ;;  %4524 = vst [vmem:[#allocation3 + $0x224] sm:$0xf] %v4523_v33 }
 0x18f   :  { %4526 = vst [vmem:[#allocation3 + $0x228] sm:$0xf] %v4525_v34  ;;  %4528 = vst [vmem:[#allocation3 + $0x22c] sm:$0xff] %v4527_v35   ;;  %v4531_v36 = vld [vmem:[%s19996_s15 + $0x24c] sm:$0xf]  ;;  %v4583_v61 = vld [vmem:[%s19996_s15 + $0x29c] sm:$0xff]  }
 0x190   :  { %v4533_v37 = vld [vmem:[%s19996_s15 + $0x234] sm:$0xf]  ;;  %v4535_v38 = vld [vmem:[%s19996_s15 + $0x250] sm:$0xf]  ;;  %4532 = vst [vmem:[#allocation3 + $0x234] sm:$0xf] %v4531_v36 }
 0x191   :  { %4534 = vst [vmem:[#allocation3 + $0x238] sm:$0xf] %v4533_v37  ;;  %4536 = vst [vmem:[#allocation3 + $0x23c] sm:$0xf] %v4535_v38  ;;  %v4537_v39 = vld [vmem:[%s19996_s15 + $0x238] sm:$0xf] }
 0x192   :  { %v4539_v40 = vld [vmem:[%s19996_s15 + $0x254] sm:$0xf]  ;;  %v4541_v41 = vld [vmem:[%s19996_s15 + $0x23c] sm:$0xf]  ;;  %4538 = vst [vmem:[#allocation3 + $0x240] sm:$0xf] %v4537_v39 }
 0x193   :  { %4540 = vst [vmem:[#allocation3 + $0x244] sm:$0xf] %v4539_v40  ;;  %4542 = vst [vmem:[#allocation3 + $0x248] sm:$0xf] %v4541_v41  ;;  %v4543_v42 = vld [vmem:[%s19996_s15 + $0x258] sm:$0xf] }
 0x194   :  { %v4545_v43 = vld [vmem:[%s19996_s15 + $0x240] sm:$0xf]  ;;  %v4547_v44 = vld [vmem:[%s19996_s15 + $0x25c] sm:$0xf]  ;;  %4544 = vst [vmem:[#allocation3 + $0x24c] sm:$0xf] %v4543_v42 }
 0x195   :  { %4546 = vst [vmem:[#allocation3 + $0x250] sm:$0xf] %v4545_v43  ;;  %4548 = vst [vmem:[#allocation3 + $0x254] sm:$0xf] %v4547_v44  ;;  %v4549_v45 = vld [vmem:[%s19996_s15 + $0x244] sm:$0xf] }
 0x196   :  { %v4551_v46 = vld [vmem:[%s19996_s15 + $0x260] sm:$0xf]  ;;  %v4553_v47 = vld [vmem:[%s19996_s15 + $0x248] sm:$0xf]  ;;  %4550 = vst [vmem:[#allocation3 + $0x258] sm:$0xf] %v4549_v45 }
 0x197   :  { %4552 = vst [vmem:[#allocation3 + $0x25c] sm:$0xf] %v4551_v46  ;;  %4554 = vst [vmem:[#allocation3 + $0x260] sm:$0xf] %v4553_v47  ;;  %v4559_v49 = vld [vmem:[%s19996_s15 + $0x284] sm:$0xf] }
 0x198   :  { %v4561_v50 = vld [vmem:[%s19996_s15 + $0x26c] sm:$0xf]  ;;  %4556 = vst [vmem:[#allocation3 + $0x264] sm:$0xff] %v4555_v48   ;;  %4560 = vst [vmem:[#allocation3 + $0x26c] sm:$0xf] %v4559_v49  ;;  %v4611_v10 = vld [vmem:[%s19996_s15 + $0x2d4] sm:$0xff]  }
 0x199   :  { %4562 = vst [vmem:[#allocation3 + $0x270] sm:$0xf] %v4561_v50  ;;  %v4563_v51 = vld [vmem:[%s19996_s15 + $0x288] sm:$0xf]  ;;  %v4565_v52 = vld [vmem:[%s19996_s15 + $0x270] sm:$0xf] }
 0x19a   :  { %v4567_v53 = vld [vmem:[%s19996_s15 + $0x28c] sm:$0xf]  ;;  %4564 = vst [vmem:[#allocation3 + $0x274] sm:$0xf] %v4563_v51  ;;  %4566 = vst [vmem:[#allocation3 + $0x278] sm:$0xf] %v4565_v52 }
 0x19b   :  { %4568 = vst [vmem:[#allocation3 + $0x27c] sm:$0xf] %v4567_v53  ;;  %v4569_v54 = vld [vmem:[%s19996_s15 + $0x274] sm:$0xf]  ;;  %v4571_v55 = vld [vmem:[%s19996_s15 + $0x290] sm:$0xf] }
 0x19c   :  { %v4573_v56 = vld [vmem:[%s19996_s15 + $0x278] sm:$0xf]  ;;  %4570 = vst [vmem:[#allocation3 + $0x280] sm:$0xf] %v4569_v54  ;;  %4572 = vst [vmem:[#allocation3 + $0x284] sm:$0xf] %v4571_v55 }
 0x19d   :  { %4574 = vst [vmem:[#allocation3 + $0x288] sm:$0xf] %v4573_v56  ;;  %v4575_v57 = vld [vmem:[%s19996_s15 + $0x294] sm:$0xf]  ;;  %v4577_v58 = vld [vmem:[%s19996_s15 + $0x27c] sm:$0xf] }
 0x19e   :  { %v4579_v59 = vld [vmem:[%s19996_s15 + $0x298] sm:$0xf]  ;;  %4576 = vst [vmem:[#allocation3 + $0x28c] sm:$0xf] %v4575_v57  ;;  %4578 = vst [vmem:[#allocation3 + $0x290] sm:$0xf] %v4577_v58 }
 0x19f   :  { %4580 = vst [vmem:[#allocation3 + $0x294] sm:$0xf] %v4579_v59  ;;  %v4581_v60 = vld [vmem:[%s19996_s15 + $0x280] sm:$0xf]  ;;  %v4587_v62 = vld [vmem:[%s19996_s15 + $0x2bc] sm:$0xf] }
 0x1a0   :  { %4582 = vst [vmem:[#allocation3 + $0x298] sm:$0xf] %v4581_v60  ;;  %4584 = vst [vmem:[#allocation3 + $0x29c] sm:$0xff] %v4583_v61   ;;  %v4589_v63 = vld [vmem:[%s19996_s15 + $0x2a4] sm:$0xf]  ;;  %v4639_v23 = vld [vmem:[%s19996_s15 + $0x30c] sm:$0xff]  }
 0x1a1   :  { %4588 = vst [vmem:[#allocation3 + $0x2a4] sm:$0xf] %v4587_v62  ;;  %v4591_v0 = vld [vmem:[%s19996_s15 + $0x2c0] sm:$0xf]  ;;  %v4593_v1 = vld [vmem:[%s19996_s15 + $0x2a8] sm:$0xf] }
 0x1a2   :  { %4590 = vst [vmem:[#allocation3 + $0x2a8] sm:$0xf] %v4589_v63  ;;  %4592 = vst [vmem:[#allocation3 + $0x2ac] sm:$0xf] %v4591_v0  ;;  %v4595_v2 = vld [vmem:[%s19996_s15 + $0x2c4] sm:$0xf] }
 0x1a3   :  { %4594 = vst [vmem:[#allocation3 + $0x2b0] sm:$0xf] %v4593_v1  ;;  %v4597_v3 = vld [vmem:[%s19996_s15 + $0x2ac] sm:$0xf]  ;;  %v4599_v4 = vld [vmem:[%s19996_s15 + $0x2c8] sm:$0xf] }
 0x1a4   :  { %4596 = vst [vmem:[#allocation3 + $0x2b4] sm:$0xf] %v4595_v2  ;;  %4598 = vst [vmem:[#allocation3 + $0x2b8] sm:$0xf] %v4597_v3  ;;  %v4601_v5 = vld [vmem:[%s19996_s15 + $0x2b0] sm:$0xf] }
 0x1a5   :  { %4600 = vst [vmem:[#allocation3 + $0x2bc] sm:$0xf] %v4599_v4  ;;  %v4603_v6 = vld [vmem:[%s19996_s15 + $0x2cc] sm:$0xf]  ;;  %v4605_v7 = vld [vmem:[%s19996_s15 + $0x2b4] sm:$0xf] }
 0x1a6   :  { %4602 = vst [vmem:[#allocation3 + $0x2c0] sm:$0xf] %v4601_v5  ;;  %4604 = vst [vmem:[#allocation3 + $0x2c4] sm:$0xf] %v4603_v6  ;;  %v4607_v8 = vld [vmem:[%s19996_s15 + $0x2d0] sm:$0xf] }
 0x1a7   :  { %4606 = vst [vmem:[#allocation3 + $0x2c8] sm:$0xf] %v4605_v7  ;;  %v4609_v9 = vld [vmem:[%s19996_s15 + $0x2b8] sm:$0xf]  ;;  %4608 = vst [vmem:[#allocation3 + $0x2cc] sm:$0xf] %v4607_v8 }
 0x1a8   :  { %4610 = vst [vmem:[#allocation3 + $0x2d0] sm:$0xf] %v4609_v9  ;;  %4612 = vst [vmem:[#allocation3 + $0x2d4] sm:$0xff] %v4611_v10   ;;  %v4615_v11 = vld [vmem:[%s19996_s15 + $0x2f4] sm:$0xf]  ;;  %v4667_v36 = vld [vmem:[%s19996_s15 + $0x344] sm:$0xff]  }
 0x1a9   :  { %v4617_v12 = vld [vmem:[%s19996_s15 + $0x2dc] sm:$0xf]  ;;  %v4619_v13 = vld [vmem:[%s19996_s15 + $0x2f8] sm:$0xf]  ;;  %4616 = vst [vmem:[#allocation3 + $0x2dc] sm:$0xf] %v4615_v11 }
 0x1aa   :  { %4618 = vst [vmem:[#allocation3 + $0x2e0] sm:$0xf] %v4617_v12  ;;  %4620 = vst [vmem:[#allocation3 + $0x2e4] sm:$0xf] %v4619_v13  ;;  %v4621_v14 = vld [vmem:[%s19996_s15 + $0x2e0] sm:$0xf] }
 0x1ab   :  { %v4623_v15 = vld [vmem:[%s19996_s15 + $0x2fc] sm:$0xf]  ;;  %v4625_v16 = vld [vmem:[%s19996_s15 + $0x2e4] sm:$0xf]  ;;  %4622 = vst [vmem:[#allocation3 + $0x2e8] sm:$0xf] %v4621_v14 }
 0x1ac   :  { %4624 = vst [vmem:[#allocation3 + $0x2ec] sm:$0xf] %v4623_v15  ;;  %4626 = vst [vmem:[#allocation3 + $0x2f0] sm:$0xf] %v4625_v16  ;;  %v4627_v17 = vld [vmem:[%s19996_s15 + $0x300] sm:$0xf] }
 0x1ad   :  { %v4629_v18 = vld [vmem:[%s19996_s15 + $0x2e8] sm:$0xf]  ;;  %v4631_v19 = vld [vmem:[%s19996_s15 + $0x304] sm:$0xf]  ;;  %4628 = vst [vmem:[#allocation3 + $0x2f4] sm:$0xf] %v4627_v17 }
 0x1ae   :  { %4630 = vst [vmem:[#allocation3 + $0x2f8] sm:$0xf] %v4629_v18  ;;  %4632 = vst [vmem:[#allocation3 + $0x2fc] sm:$0xf] %v4631_v19  ;;  %v4633_v20 = vld [vmem:[%s19996_s15 + $0x2ec] sm:$0xf] }
 0x1af   :  { %v4635_v21 = vld [vmem:[%s19996_s15 + $0x308] sm:$0xf]  ;;  %v4637_v22 = vld [vmem:[%s19996_s15 + $0x2f0] sm:$0xf]  ;;  %4634 = vst [vmem:[#allocation3 + $0x300] sm:$0xf] %v4633_v20 }
 0x1b0   :  { %4636 = vst [vmem:[#allocation3 + $0x304] sm:$0xf] %v4635_v21  ;;  %4638 = vst [vmem:[#allocation3 + $0x308] sm:$0xf] %v4637_v22  ;;  %v4643_v24 = vld [vmem:[%s19996_s15 + $0x32c] sm:$0xf] }
 0x1b1   :  { %v4645_v25 = vld [vmem:[%s19996_s15 + $0x314] sm:$0xf]  ;;  %4640 = vst [vmem:[#allocation3 + $0x30c] sm:$0xff] %v4639_v23   ;;  %4644 = vst [vmem:[#allocation3 + $0x314] sm:$0xf] %v4643_v24  ;;  %v4695_v49 = vld [vmem:[%s19996_s15 + $0x37c] sm:$0xff]  }
 0x1b2   :  { %4646 = vst [vmem:[#allocation3 + $0x318] sm:$0xf] %v4645_v25  ;;  %v4647_v26 = vld [vmem:[%s19996_s15 + $0x330] sm:$0xf]  ;;  %v4649_v27 = vld [vmem:[%s19996_s15 + $0x318] sm:$0xf] }
 0x1b3   :  { %v4651_v28 = vld [vmem:[%s19996_s15 + $0x334] sm:$0xf]  ;;  %4648 = vst [vmem:[#allocation3 + $0x31c] sm:$0xf] %v4647_v26  ;;  %4650 = vst [vmem:[#allocation3 + $0x320] sm:$0xf] %v4649_v27 }
 0x1b4   :  { %4652 = vst [vmem:[#allocation3 + $0x324] sm:$0xf] %v4651_v28  ;;  %v4653_v29 = vld [vmem:[%s19996_s15 + $0x31c] sm:$0xf]  ;;  %v4655_v30 = vld [vmem:[%s19996_s15 + $0x338] sm:$0xf] }
 0x1b5   :  { %v4657_v31 = vld [vmem:[%s19996_s15 + $0x320] sm:$0xf]  ;;  %4654 = vst [vmem:[#allocation3 + $0x328] sm:$0xf] %v4653_v29  ;;  %4656 = vst [vmem:[#allocation3 + $0x32c] sm:$0xf] %v4655_v30 }
 0x1b6   :  { %4658 = vst [vmem:[#allocation3 + $0x330] sm:$0xf] %v4657_v31  ;;  %v4659_v32 = vld [vmem:[%s19996_s15 + $0x33c] sm:$0xf]  ;;  %v4661_v33 = vld [vmem:[%s19996_s15 + $0x324] sm:$0xf] }
 0x1b7   :  { %v4663_v34 = vld [vmem:[%s19996_s15 + $0x340] sm:$0xf]  ;;  %4660 = vst [vmem:[#allocation3 + $0x334] sm:$0xf] %v4659_v32  ;;  %4662 = vst [vmem:[#allocation3 + $0x338] sm:$0xf] %v4661_v33 }
 0x1b8   :  { %4664 = vst [vmem:[#allocation3 + $0x33c] sm:$0xf] %v4663_v34  ;;  %v4665_v35 = vld [vmem:[%s19996_s15 + $0x328] sm:$0xf]  ;;  %v4671_v37 = vld [vmem:[%s19996_s15 + $0x364] sm:$0xf] }
 0x1b9   :  { %4666 = vst [vmem:[#allocation3 + $0x340] sm:$0xf] %v4665_v35  ;;  %4668 = vst [vmem:[#allocation3 + $0x344] sm:$0xff] %v4667_v36   ;;  %v4673_v38 = vld [vmem:[%s19996_s15 + $0x34c] sm:$0xf]  ;;  %v4723_v62 = vld [vmem:[%s19996_s15 + $0x3b4] sm:$0xff]  }
 0x1ba   :  { %4672 = vst [vmem:[#allocation3 + $0x34c] sm:$0xf] %v4671_v37  ;;  %v4675_v39 = vld [vmem:[%s19996_s15 + $0x368] sm:$0xf]  ;;  %v4677_v40 = vld [vmem:[%s19996_s15 + $0x350] sm:$0xf] }
 0x1bb   :  { %4674 = vst [vmem:[#allocation3 + $0x350] sm:$0xf] %v4673_v38  ;;  %4676 = vst [vmem:[#allocation3 + $0x354] sm:$0xf] %v4675_v39  ;;  %v4679_v41 = vld [vmem:[%s19996_s15 + $0x36c] sm:$0xf] }
 0x1bc   :  { %4678 = vst [vmem:[#allocation3 + $0x358] sm:$0xf] %v4677_v40  ;;  %v4681_v42 = vld [vmem:[%s19996_s15 + $0x354] sm:$0xf]  ;;  %v4683_v43 = vld [vmem:[%s19996_s15 + $0x370] sm:$0xf] }
 0x1bd   :  { %4680 = vst [vmem:[#allocation3 + $0x35c] sm:$0xf] %v4679_v41  ;;  %4682 = vst [vmem:[#allocation3 + $0x360] sm:$0xf] %v4681_v42  ;;  %v4685_v44 = vld [vmem:[%s19996_s15 + $0x358] sm:$0xf] }
 0x1be   :  { %4684 = vst [vmem:[#allocation3 + $0x364] sm:$0xf] %v4683_v43  ;;  %v4687_v45 = vld [vmem:[%s19996_s15 + $0x374] sm:$0xf]  ;;  %v4689_v46 = vld [vmem:[%s19996_s15 + $0x35c] sm:$0xf] }
 0x1bf   :  { %4686 = vst [vmem:[#allocation3 + $0x368] sm:$0xf] %v4685_v44  ;;  %4688 = vst [vmem:[#allocation3 + $0x36c] sm:$0xf] %v4687_v45  ;;  %v4691_v47 = vld [vmem:[%s19996_s15 + $0x378] sm:$0xf] }
 0x1c0   :  { %4690 = vst [vmem:[#allocation3 + $0x370] sm:$0xf] %v4689_v46  ;;  %v4693_v48 = vld [vmem:[%s19996_s15 + $0x360] sm:$0xf]  ;;  %4692 = vst [vmem:[#allocation3 + $0x374] sm:$0xf] %v4691_v47 }
 0x1c1   :  { %4694 = vst [vmem:[#allocation3 + $0x378] sm:$0xf] %v4693_v48  ;;  %4696 = vst [vmem:[#allocation3 + $0x37c] sm:$0xff] %v4695_v49   ;;  %v4699_v50 = vld [vmem:[%s19996_s15 + $0x39c] sm:$0xf]  ;;  %v4751_v11 = vld [vmem:[%s19996_s15 + $0x3ec] sm:$0xff]  }
 0x1c2   :  { %v4701_v51 = vld [vmem:[%s19996_s15 + $0x384] sm:$0xf]  ;;  %v4703_v52 = vld [vmem:[%s19996_s15 + $0x3a0] sm:$0xf]  ;;  %4700 = vst [vmem:[#allocation3 + $0x384] sm:$0xf] %v4699_v50 }
 0x1c3   :  { %4702 = vst [vmem:[#allocation3 + $0x388] sm:$0xf] %v4701_v51  ;;  %4704 = vst [vmem:[#allocation3 + $0x38c] sm:$0xf] %v4703_v52  ;;  %v4705_v53 = vld [vmem:[%s19996_s15 + $0x388] sm:$0xf] }
 0x1c4   :  { %v4707_v54 = vld [vmem:[%s19996_s15 + $0x3a4] sm:$0xf]  ;;  %v4709_v55 = vld [vmem:[%s19996_s15 + $0x38c] sm:$0xf]  ;;  %4706 = vst [vmem:[#allocation3 + $0x390] sm:$0xf] %v4705_v53 }
 0x1c5   :  { %4708 = vst [vmem:[#allocation3 + $0x394] sm:$0xf] %v4707_v54  ;;  %4710 = vst [vmem:[#allocation3 + $0x398] sm:$0xf] %v4709_v55  ;;  %v4711_v56 = vld [vmem:[%s19996_s15 + $0x3a8] sm:$0xf] }
 0x1c6   :  { %v4713_v57 = vld [vmem:[%s19996_s15 + $0x390] sm:$0xf]  ;;  %v4715_v58 = vld [vmem:[%s19996_s15 + $0x3ac] sm:$0xf]  ;;  %4712 = vst [vmem:[#allocation3 + $0x39c] sm:$0xf] %v4711_v56 }
 0x1c7   :  { %4714 = vst [vmem:[#allocation3 + $0x3a0] sm:$0xf] %v4713_v57  ;;  %4716 = vst [vmem:[#allocation3 + $0x3a4] sm:$0xf] %v4715_v58  ;;  %v4717_v59 = vld [vmem:[%s19996_s15 + $0x394] sm:$0xf] }
 0x1c8   :  { %v4719_v60 = vld [vmem:[%s19996_s15 + $0x3b0] sm:$0xf]  ;;  %v4721_v61 = vld [vmem:[%s19996_s15 + $0x398] sm:$0xf]  ;;  %4718 = vst [vmem:[#allocation3 + $0x3a8] sm:$0xf] %v4717_v59 }
 0x1c9   :  { %4720 = vst [vmem:[#allocation3 + $0x3ac] sm:$0xf] %v4719_v60  ;;  %4722 = vst [vmem:[#allocation3 + $0x3b0] sm:$0xf] %v4721_v61  ;;  %v4727_v63 = vld [vmem:[%s19996_s15 + $0x3d4] sm:$0xf] }
 0x1ca   :  { %v4729_v0 = vld [vmem:[%s19996_s15 + $0x3bc] sm:$0xf]  ;;  %4724 = vst [vmem:[#allocation3 + $0x3b4] sm:$0xff] %v4723_v62   ;;  %4728 = vst [vmem:[#allocation3 + $0x3bc] sm:$0xf] %v4727_v63  ;;  %v4779_v24 = vld [vmem:[%s19996_s15 + $0x424] sm:$0xff]  }
 0x1cb   :  { %4730 = vst [vmem:[#allocation3 + $0x3c0] sm:$0xf] %v4729_v0  ;;  %v4731_v1 = vld [vmem:[%s19996_s15 + $0x3d8] sm:$0xf]  ;;  %v4733_v2 = vld [vmem:[%s19996_s15 + $0x3c0] sm:$0xf] }
 0x1cc   :  { %v4735_v3 = vld [vmem:[%s19996_s15 + $0x3dc] sm:$0xf]  ;;  %4732 = vst [vmem:[#allocation3 + $0x3c4] sm:$0xf] %v4731_v1  ;;  %4734 = vst [vmem:[#allocation3 + $0x3c8] sm:$0xf] %v4733_v2 }
 0x1cd   :  { %4736 = vst [vmem:[#allocation3 + $0x3cc] sm:$0xf] %v4735_v3  ;;  %v4737_v4 = vld [vmem:[%s19996_s15 + $0x3c4] sm:$0xf]  ;;  %v4739_v5 = vld [vmem:[%s19996_s15 + $0x3e0] sm:$0xf] }
 0x1ce   :  { %v4741_v6 = vld [vmem:[%s19996_s15 + $0x3c8] sm:$0xf]  ;;  %4738 = vst [vmem:[#allocation3 + $0x3d0] sm:$0xf] %v4737_v4  ;;  %4740 = vst [vmem:[#allocation3 + $0x3d4] sm:$0xf] %v4739_v5 }
 0x1cf   :  { %4742 = vst [vmem:[#allocation3 + $0x3d8] sm:$0xf] %v4741_v6  ;;  %v4743_v7 = vld [vmem:[%s19996_s15 + $0x3e4] sm:$0xf]  ;;  %v4745_v8 = vld [vmem:[%s19996_s15 + $0x3cc] sm:$0xf] }
 0x1d0   :  { %v4747_v9 = vld [vmem:[%s19996_s15 + $0x3e8] sm:$0xf]  ;;  %4744 = vst [vmem:[#allocation3 + $0x3dc] sm:$0xf] %v4743_v7  ;;  %4746 = vst [vmem:[#allocation3 + $0x3e0] sm:$0xf] %v4745_v8 }
 0x1d1   :  { %4748 = vst [vmem:[#allocation3 + $0x3e4] sm:$0xf] %v4747_v9  ;;  %v4749_v10 = vld [vmem:[%s19996_s15 + $0x3d0] sm:$0xf]  ;;  %v4755_v12 = vld [vmem:[%s19996_s15 + $0x40c] sm:$0xf] }
 0x1d2   :  { %4750 = vst [vmem:[#allocation3 + $0x3e8] sm:$0xf] %v4749_v10  ;;  %4752 = vst [vmem:[#allocation3 + $0x3ec] sm:$0xff] %v4751_v11   ;;  %v4757_v13 = vld [vmem:[%s19996_s15 + $0x3f4] sm:$0xf]  ;;  %v4807_v37 = vld [vmem:[%s19996_s15 + $0x45c] sm:$0xff]  }
 0x1d3   :  { %4756 = vst [vmem:[#allocation3 + $0x3f4] sm:$0xf] %v4755_v12  ;;  %v4759_v14 = vld [vmem:[%s19996_s15 + $0x410] sm:$0xf]  ;;  %v4761_v15 = vld [vmem:[%s19996_s15 + $0x3f8] sm:$0xf] }
 0x1d4   :  { %4758 = vst [vmem:[#allocation3 + $0x3f8] sm:$0xf] %v4757_v13  ;;  %4760 = vst [vmem:[#allocation3 + $0x3fc] sm:$0xf] %v4759_v14  ;;  %v4763_v16 = vld [vmem:[%s19996_s15 + $0x414] sm:$0xf] }
 0x1d5   :  { %4762 = vst [vmem:[#allocation3 + $0x400] sm:$0xf] %v4761_v15  ;;  %v4765_v17 = vld [vmem:[%s19996_s15 + $0x3fc] sm:$0xf]  ;;  %v4767_v18 = vld [vmem:[%s19996_s15 + $0x418] sm:$0xf] }
 0x1d6   :  { %4764 = vst [vmem:[#allocation3 + $0x404] sm:$0xf] %v4763_v16  ;;  %4766 = vst [vmem:[#allocation3 + $0x408] sm:$0xf] %v4765_v17  ;;  %v4769_v19 = vld [vmem:[%s19996_s15 + $0x400] sm:$0xf] }
 0x1d7   :  { %4768 = vst [vmem:[#allocation3 + $0x40c] sm:$0xf] %v4767_v18  ;;  %v4771_v20 = vld [vmem:[%s19996_s15 + $0x41c] sm:$0xf]  ;;  %v4773_v21 = vld [vmem:[%s19996_s15 + $0x404] sm:$0xf] }
 0x1d8   :  { %4770 = vst [vmem:[#allocation3 + $0x410] sm:$0xf] %v4769_v19  ;;  %4772 = vst [vmem:[#allocation3 + $0x414] sm:$0xf] %v4771_v20  ;;  %v4775_v22 = vld [vmem:[%s19996_s15 + $0x420] sm:$0xf] }
 0x1d9   :  { %4774 = vst [vmem:[#allocation3 + $0x418] sm:$0xf] %v4773_v21  ;;  %v4777_v23 = vld [vmem:[%s19996_s15 + $0x408] sm:$0xf]  ;;  %4776 = vst [vmem:[#allocation3 + $0x41c] sm:$0xf] %v4775_v22 }
 0x1da   :  { %4778 = vst [vmem:[#allocation3 + $0x420] sm:$0xf] %v4777_v23  ;;  %4780 = vst [vmem:[#allocation3 + $0x424] sm:$0xff] %v4779_v24   ;;  %v4783_v25 = vld [vmem:[%s19996_s15 + $0x444] sm:$0xf]  ;;  %v4835_v50 = vld [vmem:[%s19996_s15 + $0x494] sm:$0xff]  }
 0x1db   :  { %v4785_v26 = vld [vmem:[%s19996_s15 + $0x42c] sm:$0xf]  ;;  %v4787_v27 = vld [vmem:[%s19996_s15 + $0x448] sm:$0xf]  ;;  %4784 = vst [vmem:[#allocation3 + $0x42c] sm:$0xf] %v4783_v25 }
 0x1dc   :  { %4786 = vst [vmem:[#allocation3 + $0x430] sm:$0xf] %v4785_v26  ;;  %4788 = vst [vmem:[#allocation3 + $0x434] sm:$0xf] %v4787_v27  ;;  %v4789_v28 = vld [vmem:[%s19996_s15 + $0x430] sm:$0xf] }
 0x1dd   :  { %v4791_v29 = vld [vmem:[%s19996_s15 + $0x44c] sm:$0xf]  ;;  %v4793_v30 = vld [vmem:[%s19996_s15 + $0x434] sm:$0xf]  ;;  %4790 = vst [vmem:[#allocation3 + $0x438] sm:$0xf] %v4789_v28 }
 0x1de   :  { %4792 = vst [vmem:[#allocation3 + $0x43c] sm:$0xf] %v4791_v29  ;;  %4794 = vst [vmem:[#allocation3 + $0x440] sm:$0xf] %v4793_v30  ;;  %v4795_v31 = vld [vmem:[%s19996_s15 + $0x450] sm:$0xf] }
 0x1df   :  { %v4797_v32 = vld [vmem:[%s19996_s15 + $0x438] sm:$0xf]  ;;  %v4799_v33 = vld [vmem:[%s19996_s15 + $0x454] sm:$0xf]  ;;  %4796 = vst [vmem:[#allocation3 + $0x444] sm:$0xf] %v4795_v31 }
 0x1e0   :  { %4798 = vst [vmem:[#allocation3 + $0x448] sm:$0xf] %v4797_v32  ;;  %4800 = vst [vmem:[#allocation3 + $0x44c] sm:$0xf] %v4799_v33  ;;  %v4801_v34 = vld [vmem:[%s19996_s15 + $0x43c] sm:$0xf] }
 0x1e1   :  { %v4803_v35 = vld [vmem:[%s19996_s15 + $0x458] sm:$0xf]  ;;  %v4805_v36 = vld [vmem:[%s19996_s15 + $0x440] sm:$0xf]  ;;  %4802 = vst [vmem:[#allocation3 + $0x450] sm:$0xf] %v4801_v34 }
 0x1e2   :  { %4804 = vst [vmem:[#allocation3 + $0x454] sm:$0xf] %v4803_v35  ;;  %4806 = vst [vmem:[#allocation3 + $0x458] sm:$0xf] %v4805_v36  ;;  %v4811_v38 = vld [vmem:[%s19996_s15 + $0x47c] sm:$0xf] }
 0x1e3   :  { %v4813_v39 = vld [vmem:[%s19996_s15 + $0x464] sm:$0xf]  ;;  %4808 = vst [vmem:[#allocation3 + $0x45c] sm:$0xff] %v4807_v37   ;;  %4812 = vst [vmem:[#allocation3 + $0x464] sm:$0xf] %v4811_v38  ;;  %v4863_v63 = vld [vmem:[%s19996_s15 + $0x4cc] sm:$0xff]  }
 0x1e4   :  { %4814 = vst [vmem:[#allocation3 + $0x468] sm:$0xf] %v4813_v39  ;;  %v4815_v40 = vld [vmem:[%s19996_s15 + $0x480] sm:$0xf]  ;;  %v4817_v41 = vld [vmem:[%s19996_s15 + $0x468] sm:$0xf] }
 0x1e5   :  { %v4819_v42 = vld [vmem:[%s19996_s15 + $0x484] sm:$0xf]  ;;  %4816 = vst [vmem:[#allocation3 + $0x46c] sm:$0xf] %v4815_v40  ;;  %4818 = vst [vmem:[#allocation3 + $0x470] sm:$0xf] %v4817_v41 }
 0x1e6   :  { %4820 = vst [vmem:[#allocation3 + $0x474] sm:$0xf] %v4819_v42  ;;  %v4821_v43 = vld [vmem:[%s19996_s15 + $0x46c] sm:$0xf]  ;;  %v4823_v44 = vld [vmem:[%s19996_s15 + $0x488] sm:$0xf] }
 0x1e7   :  { %v4825_v45 = vld [vmem:[%s19996_s15 + $0x470] sm:$0xf]  ;;  %4822 = vst [vmem:[#allocation3 + $0x478] sm:$0xf] %v4821_v43  ;;  %4824 = vst [vmem:[#allocation3 + $0x47c] sm:$0xf] %v4823_v44 }
 0x1e8   :  { %4826 = vst [vmem:[#allocation3 + $0x480] sm:$0xf] %v4825_v45  ;;  %v4827_v46 = vld [vmem:[%s19996_s15 + $0x48c] sm:$0xf]  ;;  %v4829_v47 = vld [vmem:[%s19996_s15 + $0x474] sm:$0xf] }
 0x1e9   :  { %v4831_v48 = vld [vmem:[%s19996_s15 + $0x490] sm:$0xf]  ;;  %4828 = vst [vmem:[#allocation3 + $0x484] sm:$0xf] %v4827_v46  ;;  %4830 = vst [vmem:[#allocation3 + $0x488] sm:$0xf] %v4829_v47 }
 0x1ea   :  { %4832 = vst [vmem:[#allocation3 + $0x48c] sm:$0xf] %v4831_v48  ;;  %v4833_v49 = vld [vmem:[%s19996_s15 + $0x478] sm:$0xf]  ;;  %v4839_v51 = vld [vmem:[%s19996_s15 + $0x4b4] sm:$0xf] }
 0x1eb   :  { %4834 = vst [vmem:[#allocation3 + $0x490] sm:$0xf] %v4833_v49  ;;  %4836 = vst [vmem:[#allocation3 + $0x494] sm:$0xff] %v4835_v50   ;;  %v4841_v52 = vld [vmem:[%s19996_s15 + $0x49c] sm:$0xf]  ;;  %v4891_v12 = vld [vmem:[%s19996_s15 + $0x504] sm:$0xff]  }
 0x1ec   :  { %4840 = vst [vmem:[#allocation3 + $0x49c] sm:$0xf] %v4839_v51  ;;  %v4843_v53 = vld [vmem:[%s19996_s15 + $0x4b8] sm:$0xf]  ;;  %v4845_v54 = vld [vmem:[%s19996_s15 + $0x4a0] sm:$0xf] }
 0x1ed   :  { %4842 = vst [vmem:[#allocation3 + $0x4a0] sm:$0xf] %v4841_v52  ;;  %4844 = vst [vmem:[#allocation3 + $0x4a4] sm:$0xf] %v4843_v53  ;;  %v4847_v55 = vld [vmem:[%s19996_s15 + $0x4bc] sm:$0xf] }
 0x1ee   :  { %4846 = vst [vmem:[#allocation3 + $0x4a8] sm:$0xf] %v4845_v54  ;;  %v4849_v56 = vld [vmem:[%s19996_s15 + $0x4a4] sm:$0xf]  ;;  %v4851_v57 = vld [vmem:[%s19996_s15 + $0x4c0] sm:$0xf] }
 0x1ef   :  { %4848 = vst [vmem:[#allocation3 + $0x4ac] sm:$0xf] %v4847_v55  ;;  %4850 = vst [vmem:[#allocation3 + $0x4b0] sm:$0xf] %v4849_v56  ;;  %v4853_v58 = vld [vmem:[%s19996_s15 + $0x4a8] sm:$0xf] }
 0x1f0   :  { %4852 = vst [vmem:[#allocation3 + $0x4b4] sm:$0xf] %v4851_v57  ;;  %v4855_v59 = vld [vmem:[%s19996_s15 + $0x4c4] sm:$0xf]  ;;  %v4857_v60 = vld [vmem:[%s19996_s15 + $0x4ac] sm:$0xf] }
 0x1f1   :  { %4854 = vst [vmem:[#allocation3 + $0x4b8] sm:$0xf] %v4853_v58  ;;  %4856 = vst [vmem:[#allocation3 + $0x4bc] sm:$0xf] %v4855_v59  ;;  %v4859_v61 = vld [vmem:[%s19996_s15 + $0x4c8] sm:$0xf] }
 0x1f2   :  { %4858 = vst [vmem:[#allocation3 + $0x4c0] sm:$0xf] %v4857_v60  ;;  %v4861_v62 = vld [vmem:[%s19996_s15 + $0x4b0] sm:$0xf]  ;;  %4860 = vst [vmem:[#allocation3 + $0x4c4] sm:$0xf] %v4859_v61 }
 0x1f3   :  { %4862 = vst [vmem:[#allocation3 + $0x4c8] sm:$0xf] %v4861_v62  ;;  %4864 = vst [vmem:[#allocation3 + $0x4cc] sm:$0xff] %v4863_v63   ;;  %v4867_v0 = vld [vmem:[%s19996_s15 + $0x4ec] sm:$0xf]  ;;  %v4919_v25 = vld [vmem:[%s19996_s15 + $0x53c] sm:$0xff]  }
 0x1f4   :  { %v4869_v1 = vld [vmem:[%s19996_s15 + $0x4d4] sm:$0xf]  ;;  %v4871_v2 = vld [vmem:[%s19996_s15 + $0x4f0] sm:$0xf]  ;;  %4868 = vst [vmem:[#allocation3 + $0x4d4] sm:$0xf] %v4867_v0 }
 0x1f5   :  { %4870 = vst [vmem:[#allocation3 + $0x4d8] sm:$0xf] %v4869_v1  ;;  %4872 = vst [vmem:[#allocation3 + $0x4dc] sm:$0xf] %v4871_v2  ;;  %v4873_v3 = vld [vmem:[%s19996_s15 + $0x4d8] sm:$0xf] }
 0x1f6   :  { %v4875_v4 = vld [vmem:[%s19996_s15 + $0x4f4] sm:$0xf]  ;;  %v4877_v5 = vld [vmem:[%s19996_s15 + $0x4dc] sm:$0xf]  ;;  %4874 = vst [vmem:[#allocation3 + $0x4e0] sm:$0xf] %v4873_v3 }
 0x1f7   :  { %4876 = vst [vmem:[#allocation3 + $0x4e4] sm:$0xf] %v4875_v4  ;;  %4878 = vst [vmem:[#allocation3 + $0x4e8] sm:$0xf] %v4877_v5  ;;  %v4879_v6 = vld [vmem:[%s19996_s15 + $0x4f8] sm:$0xf] }
 0x1f8   :  { %v4881_v7 = vld [vmem:[%s19996_s15 + $0x4e0] sm:$0xf]  ;;  %v4883_v8 = vld [vmem:[%s19996_s15 + $0x4fc] sm:$0xf]  ;;  %4880 = vst [vmem:[#allocation3 + $0x4ec] sm:$0xf] %v4879_v6 }
 0x1f9   :  { %4882 = vst [vmem:[#allocation3 + $0x4f0] sm:$0xf] %v4881_v7  ;;  %4884 = vst [vmem:[#allocation3 + $0x4f4] sm:$0xf] %v4883_v8  ;;  %v4885_v9 = vld [vmem:[%s19996_s15 + $0x4e4] sm:$0xf] }
 0x1fa   :  { %v4887_v10 = vld [vmem:[%s19996_s15 + $0x500] sm:$0xf]  ;;  %v4889_v11 = vld [vmem:[%s19996_s15 + $0x4e8] sm:$0xf]  ;;  %4886 = vst [vmem:[#allocation3 + $0x4f8] sm:$0xf] %v4885_v9 }
 0x1fb   :  { %4888 = vst [vmem:[#allocation3 + $0x4fc] sm:$0xf] %v4887_v10  ;;  %4890 = vst [vmem:[#allocation3 + $0x500] sm:$0xf] %v4889_v11  ;;  %v4895_v13 = vld [vmem:[%s19996_s15 + $0x524] sm:$0xf] }
 0x1fc   :  { %v4897_v14 = vld [vmem:[%s19996_s15 + $0x50c] sm:$0xf]  ;;  %4892 = vst [vmem:[#allocation3 + $0x504] sm:$0xff] %v4891_v12   ;;  %4896 = vst [vmem:[#allocation3 + $0x50c] sm:$0xf] %v4895_v13  ;;  %v4947_v38 = vld [vmem:[%s19996_s15 + $0x574] sm:$0xff]  }
 0x1fd   :  { %4898 = vst [vmem:[#allocation3 + $0x510] sm:$0xf] %v4897_v14  ;;  %v4899_v15 = vld [vmem:[%s19996_s15 + $0x528] sm:$0xf]  ;;  %v4901_v16 = vld [vmem:[%s19996_s15 + $0x510] sm:$0xf] }
 0x1fe   :  { %v4903_v17 = vld [vmem:[%s19996_s15 + $0x52c] sm:$0xf]  ;;  %4900 = vst [vmem:[#allocation3 + $0x514] sm:$0xf] %v4899_v15  ;;  %4902 = vst [vmem:[#allocation3 + $0x518] sm:$0xf] %v4901_v16 }
 0x1ff   :  { %4904 = vst [vmem:[#allocation3 + $0x51c] sm:$0xf] %v4903_v17  ;;  %v4905_v18 = vld [vmem:[%s19996_s15 + $0x514] sm:$0xf]  ;;  %v4907_v19 = vld [vmem:[%s19996_s15 + $0x530] sm:$0xf] }
 0x200   :  { %v4909_v20 = vld [vmem:[%s19996_s15 + $0x518] sm:$0xf]  ;;  %4906 = vst [vmem:[#allocation3 + $0x520] sm:$0xf] %v4905_v18  ;;  %4908 = vst [vmem:[#allocation3 + $0x524] sm:$0xf] %v4907_v19 }
 0x201   :  { %4910 = vst [vmem:[#allocation3 + $0x528] sm:$0xf] %v4909_v20  ;;  %v4911_v21 = vld [vmem:[%s19996_s15 + $0x534] sm:$0xf]  ;;  %v4913_v22 = vld [vmem:[%s19996_s15 + $0x51c] sm:$0xf] }
 0x202   :  { %v4915_v23 = vld [vmem:[%s19996_s15 + $0x538] sm:$0xf]  ;;  %4912 = vst [vmem:[#allocation3 + $0x52c] sm:$0xf] %v4911_v21  ;;  %4914 = vst [vmem:[#allocation3 + $0x530] sm:$0xf] %v4913_v22 }
 0x203   :  { %4916 = vst [vmem:[#allocation3 + $0x534] sm:$0xf] %v4915_v23  ;;  %v4917_v24 = vld [vmem:[%s19996_s15 + $0x520] sm:$0xf]  ;;  %v4923_v26 = vld [vmem:[%s19996_s15 + $0x55c] sm:$0xf] }
 0x204   :  { %4918 = vst [vmem:[#allocation3 + $0x538] sm:$0xf] %v4917_v24  ;;  %4920 = vst [vmem:[#allocation3 + $0x53c] sm:$0xff] %v4919_v25   ;;  %v4925_v27 = vld [vmem:[%s19996_s15 + $0x544] sm:$0xf]  ;;  %v4975_v51 = vld [vmem:[%s19996_s15 + $0x5ac] sm:$0xff]  }
 0x205   :  { %4924 = vst [vmem:[#allocation3 + $0x544] sm:$0xf] %v4923_v26  ;;  %v4927_v28 = vld [vmem:[%s19996_s15 + $0x560] sm:$0xf]  ;;  %v4929_v29 = vld [vmem:[%s19996_s15 + $0x548] sm:$0xf] }
 0x206   :  { %4926 = vst [vmem:[#allocation3 + $0x548] sm:$0xf] %v4925_v27  ;;  %4928 = vst [vmem:[#allocation3 + $0x54c] sm:$0xf] %v4927_v28  ;;  %v4931_v30 = vld [vmem:[%s19996_s15 + $0x564] sm:$0xf] }
 0x207   :  { %4930 = vst [vmem:[#allocation3 + $0x550] sm:$0xf] %v4929_v29  ;;  %v4933_v31 = vld [vmem:[%s19996_s15 + $0x54c] sm:$0xf]  ;;  %v4935_v32 = vld [vmem:[%s19996_s15 + $0x568] sm:$0xf] }
 0x208   :  { %4932 = vst [vmem:[#allocation3 + $0x554] sm:$0xf] %v4931_v30  ;;  %4934 = vst [vmem:[#allocation3 + $0x558] sm:$0xf] %v4933_v31  ;;  %v4937_v33 = vld [vmem:[%s19996_s15 + $0x550] sm:$0xf] }
 0x209   :  { %4936 = vst [vmem:[#allocation3 + $0x55c] sm:$0xf] %v4935_v32  ;;  %v4939_v34 = vld [vmem:[%s19996_s15 + $0x56c] sm:$0xf]  ;;  %v4941_v35 = vld [vmem:[%s19996_s15 + $0x554] sm:$0xf] }
 0x20a   :  { %4938 = vst [vmem:[#allocation3 + $0x560] sm:$0xf] %v4937_v33  ;;  %4940 = vst [vmem:[#allocation3 + $0x564] sm:$0xf] %v4939_v34  ;;  %v4943_v36 = vld [vmem:[%s19996_s15 + $0x570] sm:$0xf] }
 0x20b   :  { %4942 = vst [vmem:[#allocation3 + $0x568] sm:$0xf] %v4941_v35  ;;  %v4945_v37 = vld [vmem:[%s19996_s15 + $0x558] sm:$0xf]  ;;  %4944 = vst [vmem:[#allocation3 + $0x56c] sm:$0xf] %v4943_v36 }
 0x20c   :  { %4946 = vst [vmem:[#allocation3 + $0x570] sm:$0xf] %v4945_v37  ;;  %4948 = vst [vmem:[#allocation3 + $0x574] sm:$0xff] %v4947_v38   ;;  %v4951_v39 = vld [vmem:[%s19996_s15 + $0x594] sm:$0xf]  ;;  %v5003_v0 = vld [vmem:[%s19996_s15 + $0x5e4] sm:$0xff]  }
 0x20d   :  { %v4953_v40 = vld [vmem:[%s19996_s15 + $0x57c] sm:$0xf]  ;;  %v4955_v41 = vld [vmem:[%s19996_s15 + $0x598] sm:$0xf]  ;;  %4952 = vst [vmem:[#allocation3 + $0x57c] sm:$0xf] %v4951_v39 }
 0x20e   :  { %4954 = vst [vmem:[#allocation3 + $0x580] sm:$0xf] %v4953_v40  ;;  %4956 = vst [vmem:[#allocation3 + $0x584] sm:$0xf] %v4955_v41  ;;  %v4957_v42 = vld [vmem:[%s19996_s15 + $0x580] sm:$0xf] }
 0x20f   :  { %v4959_v43 = vld [vmem:[%s19996_s15 + $0x59c] sm:$0xf]  ;;  %v4961_v44 = vld [vmem:[%s19996_s15 + $0x584] sm:$0xf]  ;;  %4958 = vst [vmem:[#allocation3 + $0x588] sm:$0xf] %v4957_v42 }
 0x210   :  { %4960 = vst [vmem:[#allocation3 + $0x58c] sm:$0xf] %v4959_v43  ;;  %4962 = vst [vmem:[#allocation3 + $0x590] sm:$0xf] %v4961_v44  ;;  %v4963_v45 = vld [vmem:[%s19996_s15 + $0x5a0] sm:$0xf] }
 0x211   :  { %v4965_v46 = vld [vmem:[%s19996_s15 + $0x588] sm:$0xf]  ;;  %v4967_v47 = vld [vmem:[%s19996_s15 + $0x5a4] sm:$0xf]  ;;  %4964 = vst [vmem:[#allocation3 + $0x594] sm:$0xf] %v4963_v45 }
 0x212   :  { %4966 = vst [vmem:[#allocation3 + $0x598] sm:$0xf] %v4965_v46  ;;  %4968 = vst [vmem:[#allocation3 + $0x59c] sm:$0xf] %v4967_v47  ;;  %v4969_v48 = vld [vmem:[%s19996_s15 + $0x58c] sm:$0xf] }
 0x213   :  { %v4971_v49 = vld [vmem:[%s19996_s15 + $0x5a8] sm:$0xf]  ;;  %v4973_v50 = vld [vmem:[%s19996_s15 + $0x590] sm:$0xf]  ;;  %4970 = vst [vmem:[#allocation3 + $0x5a0] sm:$0xf] %v4969_v48 }
 0x214   :  { %4972 = vst [vmem:[#allocation3 + $0x5a4] sm:$0xf] %v4971_v49  ;;  %4974 = vst [vmem:[#allocation3 + $0x5a8] sm:$0xf] %v4973_v50  ;;  %v4979_v52 = vld [vmem:[%s19996_s15 + $0x5cc] sm:$0xf] }
 0x215   :  { %v4981_v53 = vld [vmem:[%s19996_s15 + $0x5b4] sm:$0xf]  ;;  %4976 = vst [vmem:[#allocation3 + $0x5ac] sm:$0xff] %v4975_v51   ;;  %4980 = vst [vmem:[#allocation3 + $0x5b4] sm:$0xf] %v4979_v52  ;;  %v5031_v13 = vld [vmem:[%s19996_s15 + $0x61c] sm:$0xff]  }
 0x216   :  { %4982 = vst [vmem:[#allocation3 + $0x5b8] sm:$0xf] %v4981_v53  ;;  %v4983_v54 = vld [vmem:[%s19996_s15 + $0x5d0] sm:$0xf]  ;;  %v4985_v55 = vld [vmem:[%s19996_s15 + $0x5b8] sm:$0xf] }
 0x217   :  { %v4987_v56 = vld [vmem:[%s19996_s15 + $0x5d4] sm:$0xf]  ;;  %4984 = vst [vmem:[#allocation3 + $0x5bc] sm:$0xf] %v4983_v54  ;;  %4986 = vst [vmem:[#allocation3 + $0x5c0] sm:$0xf] %v4985_v55 }
 0x218   :  { %4988 = vst [vmem:[#allocation3 + $0x5c4] sm:$0xf] %v4987_v56  ;;  %v4989_v57 = vld [vmem:[%s19996_s15 + $0x5bc] sm:$0xf]  ;;  %v4991_v58 = vld [vmem:[%s19996_s15 + $0x5d8] sm:$0xf] }
 0x219   :  { %v4993_v59 = vld [vmem:[%s19996_s15 + $0x5c0] sm:$0xf]  ;;  %4990 = vst [vmem:[#allocation3 + $0x5c8] sm:$0xf] %v4989_v57  ;;  %4992 = vst [vmem:[#allocation3 + $0x5cc] sm:$0xf] %v4991_v58 }
 0x21a   :  { %4994 = vst [vmem:[#allocation3 + $0x5d0] sm:$0xf] %v4993_v59  ;;  %v4995_v60 = vld [vmem:[%s19996_s15 + $0x5dc] sm:$0xf]  ;;  %v4997_v61 = vld [vmem:[%s19996_s15 + $0x5c4] sm:$0xf] }
 0x21b   :  { %v4999_v62 = vld [vmem:[%s19996_s15 + $0x5e0] sm:$0xf]  ;;  %4996 = vst [vmem:[#allocation3 + $0x5d4] sm:$0xf] %v4995_v60  ;;  %4998 = vst [vmem:[#allocation3 + $0x5d8] sm:$0xf] %v4997_v61 }
 0x21c   :  { %5000 = vst [vmem:[#allocation3 + $0x5dc] sm:$0xf] %v4999_v62  ;;  %v5001_v63 = vld [vmem:[%s19996_s15 + $0x5c8] sm:$0xf]  ;;  %v5007_v1 = vld [vmem:[%s19996_s15 + $0x604] sm:$0xf] }
 0x21d   :  { %5002 = vst [vmem:[#allocation3 + $0x5e0] sm:$0xf] %v5001_v63  ;;  %5004 = vst [vmem:[#allocation3 + $0x5e4] sm:$0xff] %v5003_v0   ;;  %v5009_v2 = vld [vmem:[%s19996_s15 + $0x5ec] sm:$0xf]  ;;  %v5059_v26 = vld [vmem:[%s19996_s15 + $0x654] sm:$0xff]  }
 0x21e   :  { %5008 = vst [vmem:[#allocation3 + $0x5ec] sm:$0xf] %v5007_v1  ;;  %v5011_v3 = vld [vmem:[%s19996_s15 + $0x608] sm:$0xf]  ;;  %v5013_v4 = vld [vmem:[%s19996_s15 + $0x5f0] sm:$0xf] }
 0x21f   :  { %5010 = vst [vmem:[#allocation3 + $0x5f0] sm:$0xf] %v5009_v2  ;;  %5012 = vst [vmem:[#allocation3 + $0x5f4] sm:$0xf] %v5011_v3  ;;  %v5015_v5 = vld [vmem:[%s19996_s15 + $0x60c] sm:$0xf] }
 0x220   :  { %5014 = vst [vmem:[#allocation3 + $0x5f8] sm:$0xf] %v5013_v4  ;;  %v5017_v6 = vld [vmem:[%s19996_s15 + $0x5f4] sm:$0xf]  ;;  %v5019_v7 = vld [vmem:[%s19996_s15 + $0x610] sm:$0xf] }
 0x221   :  { %5016 = vst [vmem:[#allocation3 + $0x5fc] sm:$0xf] %v5015_v5  ;;  %5018 = vst [vmem:[#allocation3 + $0x600] sm:$0xf] %v5017_v6  ;;  %v5021_v8 = vld [vmem:[%s19996_s15 + $0x5f8] sm:$0xf] }
 0x222   :  { %5020 = vst [vmem:[#allocation3 + $0x604] sm:$0xf] %v5019_v7  ;;  %v5023_v9 = vld [vmem:[%s19996_s15 + $0x614] sm:$0xf]  ;;  %v5025_v10 = vld [vmem:[%s19996_s15 + $0x5fc] sm:$0xf] }
 0x223   :  { %5022 = vst [vmem:[#allocation3 + $0x608] sm:$0xf] %v5021_v8  ;;  %5024 = vst [vmem:[#allocation3 + $0x60c] sm:$0xf] %v5023_v9  ;;  %v5027_v11 = vld [vmem:[%s19996_s15 + $0x618] sm:$0xf] }
 0x224   :  { %5026 = vst [vmem:[#allocation3 + $0x610] sm:$0xf] %v5025_v10  ;;  %v5029_v12 = vld [vmem:[%s19996_s15 + $0x600] sm:$0xf]  ;;  %5028 = vst [vmem:[#allocation3 + $0x614] sm:$0xf] %v5027_v11 }
 0x225   :  { %5030 = vst [vmem:[#allocation3 + $0x618] sm:$0xf] %v5029_v12  ;;  %5032 = vst [vmem:[#allocation3 + $0x61c] sm:$0xff] %v5031_v13   ;;  %v5035_v14 = vld [vmem:[%s19996_s15 + $0x63c] sm:$0xf]  ;;  %v5087_v39 = vld [vmem:[%s19996_s15 + $0x68c] sm:$0xff]  }
 0x226   :  { %v5037_v15 = vld [vmem:[%s19996_s15 + $0x624] sm:$0xf]  ;;  %v5039_v16 = vld [vmem:[%s19996_s15 + $0x640] sm:$0xf]  ;;  %5036 = vst [vmem:[#allocation3 + $0x624] sm:$0xf] %v5035_v14 }
 0x227   :  { %5038 = vst [vmem:[#allocation3 + $0x628] sm:$0xf] %v5037_v15  ;;  %5040 = vst [vmem:[#allocation3 + $0x62c] sm:$0xf] %v5039_v16  ;;  %v5041_v17 = vld [vmem:[%s19996_s15 + $0x628] sm:$0xf] }
 0x228   :  { %v5043_v18 = vld [vmem:[%s19996_s15 + $0x644] sm:$0xf]  ;;  %v5045_v19 = vld [vmem:[%s19996_s15 + $0x62c] sm:$0xf]  ;;  %5042 = vst [vmem:[#allocation3 + $0x630] sm:$0xf] %v5041_v17 }
 0x229   :  { %5044 = vst [vmem:[#allocation3 + $0x634] sm:$0xf] %v5043_v18  ;;  %5046 = vst [vmem:[#allocation3 + $0x638] sm:$0xf] %v5045_v19  ;;  %v5047_v20 = vld [vmem:[%s19996_s15 + $0x648] sm:$0xf] }
 0x22a   :  { %v5049_v21 = vld [vmem:[%s19996_s15 + $0x630] sm:$0xf]  ;;  %v5051_v22 = vld [vmem:[%s19996_s15 + $0x64c] sm:$0xf]  ;;  %5048 = vst [vmem:[#allocation3 + $0x63c] sm:$0xf] %v5047_v20 }
 0x22b   :  { %5050 = vst [vmem:[#allocation3 + $0x640] sm:$0xf] %v5049_v21  ;;  %5052 = vst [vmem:[#allocation3 + $0x644] sm:$0xf] %v5051_v22  ;;  %v5053_v23 = vld [vmem:[%s19996_s15 + $0x634] sm:$0xf] }
 0x22c   :  { %v5055_v24 = vld [vmem:[%s19996_s15 + $0x650] sm:$0xf]  ;;  %v5057_v25 = vld [vmem:[%s19996_s15 + $0x638] sm:$0xf]  ;;  %5054 = vst [vmem:[#allocation3 + $0x648] sm:$0xf] %v5053_v23 }
 0x22d   :  { %5056 = vst [vmem:[#allocation3 + $0x64c] sm:$0xf] %v5055_v24  ;;  %5058 = vst [vmem:[#allocation3 + $0x650] sm:$0xf] %v5057_v25  ;;  %v5063_v27 = vld [vmem:[%s19996_s15 + $0x674] sm:$0xf] }
 0x22e   :  { %v5065_v28 = vld [vmem:[%s19996_s15 + $0x65c] sm:$0xf]  ;;  %5060 = vst [vmem:[#allocation3 + $0x654] sm:$0xff] %v5059_v26   ;;  %5064 = vst [vmem:[#allocation3 + $0x65c] sm:$0xf] %v5063_v27  ;;  %v5115_v52 = vld [vmem:[%s19996_s15 + $0x6c4] sm:$0xff]  }
 0x22f   :  { %5066 = vst [vmem:[#allocation3 + $0x660] sm:$0xf] %v5065_v28  ;;  %v5067_v29 = vld [vmem:[%s19996_s15 + $0x678] sm:$0xf]  ;;  %v5069_v30 = vld [vmem:[%s19996_s15 + $0x660] sm:$0xf] }
 0x230   :  { %v5071_v31 = vld [vmem:[%s19996_s15 + $0x67c] sm:$0xf]  ;;  %5068 = vst [vmem:[#allocation3 + $0x664] sm:$0xf] %v5067_v29  ;;  %5070 = vst [vmem:[#allocation3 + $0x668] sm:$0xf] %v5069_v30 }
 0x231   :  { %5072 = vst [vmem:[#allocation3 + $0x66c] sm:$0xf] %v5071_v31  ;;  %v5073_v32 = vld [vmem:[%s19996_s15 + $0x664] sm:$0xf]  ;;  %v5075_v33 = vld [vmem:[%s19996_s15 + $0x680] sm:$0xf] }
 0x232   :  { %v5077_v34 = vld [vmem:[%s19996_s15 + $0x668] sm:$0xf]  ;;  %5074 = vst [vmem:[#allocation3 + $0x670] sm:$0xf] %v5073_v32  ;;  %5076 = vst [vmem:[#allocation3 + $0x674] sm:$0xf] %v5075_v33 }
 0x233   :  { %5078 = vst [vmem:[#allocation3 + $0x678] sm:$0xf] %v5077_v34  ;;  %v5079_v35 = vld [vmem:[%s19996_s15 + $0x684] sm:$0xf]  ;;  %v5081_v36 = vld [vmem:[%s19996_s15 + $0x66c] sm:$0xf] }
 0x234   :  { %v5083_v37 = vld [vmem:[%s19996_s15 + $0x688] sm:$0xf]  ;;  %5080 = vst [vmem:[#allocation3 + $0x67c] sm:$0xf] %v5079_v35  ;;  %5082 = vst [vmem:[#allocation3 + $0x680] sm:$0xf] %v5081_v36 }
 0x235   :  { %5084 = vst [vmem:[#allocation3 + $0x684] sm:$0xf] %v5083_v37  ;;  %v5085_v38 = vld [vmem:[%s19996_s15 + $0x670] sm:$0xf]  ;;  %v5091_v40 = vld [vmem:[%s19996_s15 + $0x6ac] sm:$0xf] }
 0x236   :  { %5086 = vst [vmem:[#allocation3 + $0x688] sm:$0xf] %v5085_v38  ;;  %5088 = vst [vmem:[#allocation3 + $0x68c] sm:$0xff] %v5087_v39   ;;  %v5093_v41 = vld [vmem:[%s19996_s15 + $0x694] sm:$0xf]  ;;  %v5143_v1 = vld [vmem:[%s19996_s15 + $0x6fc] sm:$0xff]  }
 0x237   :  { %5092 = vst [vmem:[#allocation3 + $0x694] sm:$0xf] %v5091_v40  ;;  %v5095_v42 = vld [vmem:[%s19996_s15 + $0x6b0] sm:$0xf]  ;;  %v5097_v43 = vld [vmem:[%s19996_s15 + $0x698] sm:$0xf] }
 0x238   :  { %5094 = vst [vmem:[#allocation3 + $0x698] sm:$0xf] %v5093_v41  ;;  %5096 = vst [vmem:[#allocation3 + $0x69c] sm:$0xf] %v5095_v42  ;;  %v5099_v44 = vld [vmem:[%s19996_s15 + $0x6b4] sm:$0xf] }
 0x239   :  { %5098 = vst [vmem:[#allocation3 + $0x6a0] sm:$0xf] %v5097_v43  ;;  %v5101_v45 = vld [vmem:[%s19996_s15 + $0x69c] sm:$0xf]  ;;  %v5103_v46 = vld [vmem:[%s19996_s15 + $0x6b8] sm:$0xf] }
 0x23a   :  { %5100 = vst [vmem:[#allocation3 + $0x6a4] sm:$0xf] %v5099_v44  ;;  %5102 = vst [vmem:[#allocation3 + $0x6a8] sm:$0xf] %v5101_v45  ;;  %v5105_v47 = vld [vmem:[%s19996_s15 + $0x6a0] sm:$0xf] }
 0x23b   :  { %5104 = vst [vmem:[#allocation3 + $0x6ac] sm:$0xf] %v5103_v46  ;;  %v5107_v48 = vld [vmem:[%s19996_s15 + $0x6bc] sm:$0xf]  ;;  %v5109_v49 = vld [vmem:[%s19996_s15 + $0x6a4] sm:$0xf] }
 0x23c   :  { %5106 = vst [vmem:[#allocation3 + $0x6b0] sm:$0xf] %v5105_v47  ;;  %5108 = vst [vmem:[#allocation3 + $0x6b4] sm:$0xf] %v5107_v48  ;;  %v5111_v50 = vld [vmem:[%s19996_s15 + $0x6c0] sm:$0xf] }
 0x23d   :  { %5110 = vst [vmem:[#allocation3 + $0x6b8] sm:$0xf] %v5109_v49  ;;  %v5113_v51 = vld [vmem:[%s19996_s15 + $0x6a8] sm:$0xf]  ;;  %5112 = vst [vmem:[#allocation3 + $0x6bc] sm:$0xf] %v5111_v50 }
 0x23e   :  { %5114 = vst [vmem:[#allocation3 + $0x6c0] sm:$0xf] %v5113_v51  ;;  %5116 = vst [vmem:[#allocation3 + $0x6c4] sm:$0xff] %v5115_v52   ;;  %v5119_v53 = vld [vmem:[%s19996_s15 + $0x6e4] sm:$0xf]  ;;  %v5171_v14 = vld [vmem:[%s19996_s15 + $0x734] sm:$0xff]  }
 0x23f   :  { %v5121_v54 = vld [vmem:[%s19996_s15 + $0x6cc] sm:$0xf]  ;;  %v5123_v55 = vld [vmem:[%s19996_s15 + $0x6e8] sm:$0xf]  ;;  %5120 = vst [vmem:[#allocation3 + $0x6cc] sm:$0xf] %v5119_v53 }
 0x240   :  { %5122 = vst [vmem:[#allocation3 + $0x6d0] sm:$0xf] %v5121_v54  ;;  %5124 = vst [vmem:[#allocation3 + $0x6d4] sm:$0xf] %v5123_v55  ;;  %v5125_v56 = vld [vmem:[%s19996_s15 + $0x6d0] sm:$0xf] }
 0x241   :  { %v5127_v57 = vld [vmem:[%s19996_s15 + $0x6ec] sm:$0xf]  ;;  %v5129_v58 = vld [vmem:[%s19996_s15 + $0x6d4] sm:$0xf]  ;;  %5126 = vst [vmem:[#allocation3 + $0x6d8] sm:$0xf] %v5125_v56 }
 0x242   :  { %5128 = vst [vmem:[#allocation3 + $0x6dc] sm:$0xf] %v5127_v57  ;;  %5130 = vst [vmem:[#allocation3 + $0x6e0] sm:$0xf] %v5129_v58  ;;  %v5131_v59 = vld [vmem:[%s19996_s15 + $0x6f0] sm:$0xf] }
 0x243   :  { %v5133_v60 = vld [vmem:[%s19996_s15 + $0x6d8] sm:$0xf]  ;;  %v5135_v61 = vld [vmem:[%s19996_s15 + $0x6f4] sm:$0xf]  ;;  %5132 = vst [vmem:[#allocation3 + $0x6e4] sm:$0xf] %v5131_v59 }
 0x244   :  { %5134 = vst [vmem:[#allocation3 + $0x6e8] sm:$0xf] %v5133_v60  ;;  %5136 = vst [vmem:[#allocation3 + $0x6ec] sm:$0xf] %v5135_v61  ;;  %v5137_v62 = vld [vmem:[%s19996_s15 + $0x6dc] sm:$0xf] }
 0x245   :  { %v5139_v63 = vld [vmem:[%s19996_s15 + $0x6f8] sm:$0xf]  ;;  %v5141_v0 = vld [vmem:[%s19996_s15 + $0x6e0] sm:$0xf]  ;;  %5138 = vst [vmem:[#allocation3 + $0x6f0] sm:$0xf] %v5137_v62 }
 0x246   :  { %5140 = vst [vmem:[#allocation3 + $0x6f4] sm:$0xf] %v5139_v63  ;;  %5142 = vst [vmem:[#allocation3 + $0x6f8] sm:$0xf] %v5141_v0  ;;  %v5147_v2 = vld [vmem:[%s19996_s15 + $0x71c] sm:$0xf] }
 0x247   :  { %v5149_v3 = vld [vmem:[%s19996_s15 + $0x704] sm:$0xf]  ;;  %5144 = vst [vmem:[#allocation3 + $0x6fc] sm:$0xff] %v5143_v1   ;;  %5148 = vst [vmem:[#allocation3 + $0x704] sm:$0xf] %v5147_v2  ;;  %v5199_v27 = vld [vmem:[%s19996_s15 + $0x76c] sm:$0xff]  }
 0x248   :  { %5150 = vst [vmem:[#allocation3 + $0x708] sm:$0xf] %v5149_v3  ;;  %v5151_v4 = vld [vmem:[%s19996_s15 + $0x720] sm:$0xf]  ;;  %v5153_v5 = vld [vmem:[%s19996_s15 + $0x708] sm:$0xf] }
 0x249   :  { %v5155_v6 = vld [vmem:[%s19996_s15 + $0x724] sm:$0xf]  ;;  %5152 = vst [vmem:[#allocation3 + $0x70c] sm:$0xf] %v5151_v4  ;;  %5154 = vst [vmem:[#allocation3 + $0x710] sm:$0xf] %v5153_v5 }
 0x24a   :  { %5156 = vst [vmem:[#allocation3 + $0x714] sm:$0xf] %v5155_v6  ;;  %v5157_v7 = vld [vmem:[%s19996_s15 + $0x70c] sm:$0xf]  ;;  %v5159_v8 = vld [vmem:[%s19996_s15 + $0x728] sm:$0xf] }
 0x24b   :  { %v5161_v9 = vld [vmem:[%s19996_s15 + $0x710] sm:$0xf]  ;;  %5158 = vst [vmem:[#allocation3 + $0x718] sm:$0xf] %v5157_v7  ;;  %5160 = vst [vmem:[#allocation3 + $0x71c] sm:$0xf] %v5159_v8 }
 0x24c   :  { %5162 = vst [vmem:[#allocation3 + $0x720] sm:$0xf] %v5161_v9  ;;  %v5163_v10 = vld [vmem:[%s19996_s15 + $0x72c] sm:$0xf]  ;;  %v5165_v11 = vld [vmem:[%s19996_s15 + $0x714] sm:$0xf] }
 0x24d   :  { %v5167_v12 = vld [vmem:[%s19996_s15 + $0x730] sm:$0xf]  ;;  %5164 = vst [vmem:[#allocation3 + $0x724] sm:$0xf] %v5163_v10  ;;  %5166 = vst [vmem:[#allocation3 + $0x728] sm:$0xf] %v5165_v11 }
 0x24e   :  { %5168 = vst [vmem:[#allocation3 + $0x72c] sm:$0xf] %v5167_v12  ;;  %v5169_v13 = vld [vmem:[%s19996_s15 + $0x718] sm:$0xf]  ;;  %v5175_v15 = vld [vmem:[%s19996_s15 + $0x754] sm:$0xf] }
 0x24f   :  { %5170 = vst [vmem:[#allocation3 + $0x730] sm:$0xf] %v5169_v13  ;;  %5172 = vst [vmem:[#allocation3 + $0x734] sm:$0xff] %v5171_v14   ;;  %v5177_v16 = vld [vmem:[%s19996_s15 + $0x73c] sm:$0xf]  ;;  %v5227_v40 = vld [vmem:[%s19996_s15 + $0x7a4] sm:$0xff]  }
 0x250   :  { %5176 = vst [vmem:[#allocation3 + $0x73c] sm:$0xf] %v5175_v15  ;;  %v5179_v17 = vld [vmem:[%s19996_s15 + $0x758] sm:$0xf]  ;;  %v5181_v18 = vld [vmem:[%s19996_s15 + $0x740] sm:$0xf] }
 0x251   :  { %5178 = vst [vmem:[#allocation3 + $0x740] sm:$0xf] %v5177_v16  ;;  %5180 = vst [vmem:[#allocation3 + $0x744] sm:$0xf] %v5179_v17  ;;  %v5183_v19 = vld [vmem:[%s19996_s15 + $0x75c] sm:$0xf] }
 0x252   :  { %5182 = vst [vmem:[#allocation3 + $0x748] sm:$0xf] %v5181_v18  ;;  %v5185_v20 = vld [vmem:[%s19996_s15 + $0x744] sm:$0xf]  ;;  %v5187_v21 = vld [vmem:[%s19996_s15 + $0x760] sm:$0xf] }
 0x253   :  { %5184 = vst [vmem:[#allocation3 + $0x74c] sm:$0xf] %v5183_v19  ;;  %5186 = vst [vmem:[#allocation3 + $0x750] sm:$0xf] %v5185_v20  ;;  %v5189_v22 = vld [vmem:[%s19996_s15 + $0x748] sm:$0xf] }
 0x254   :  { %5188 = vst [vmem:[#allocation3 + $0x754] sm:$0xf] %v5187_v21  ;;  %v5191_v23 = vld [vmem:[%s19996_s15 + $0x764] sm:$0xf]  ;;  %v5193_v24 = vld [vmem:[%s19996_s15 + $0x74c] sm:$0xf] }
 0x255   :  { %5190 = vst [vmem:[#allocation3 + $0x758] sm:$0xf] %v5189_v22  ;;  %5192 = vst [vmem:[#allocation3 + $0x75c] sm:$0xf] %v5191_v23  ;;  %v5195_v25 = vld [vmem:[%s19996_s15 + $0x768] sm:$0xf] }
 0x256   :  { %5194 = vst [vmem:[#allocation3 + $0x760] sm:$0xf] %v5193_v24  ;;  %v5197_v26 = vld [vmem:[%s19996_s15 + $0x750] sm:$0xf]  ;;  %5196 = vst [vmem:[#allocation3 + $0x764] sm:$0xf] %v5195_v25 }
 0x257   :  { %5198 = vst [vmem:[#allocation3 + $0x768] sm:$0xf] %v5197_v26  ;;  %5200 = vst [vmem:[#allocation3 + $0x76c] sm:$0xff] %v5199_v27   ;;  %v5203_v28 = vld [vmem:[%s19996_s15 + $0x78c] sm:$0xf]  ;;  %v5255_v53 = vld [vmem:[%s19996_s15 + $0x7dc] sm:$0xff]  }
 0x258   :  { %v5205_v29 = vld [vmem:[%s19996_s15 + $0x774] sm:$0xf]  ;;  %v5207_v30 = vld [vmem:[%s19996_s15 + $0x790] sm:$0xf]  ;;  %5204 = vst [vmem:[#allocation3 + $0x774] sm:$0xf] %v5203_v28 }
 0x259   :  { %5206 = vst [vmem:[#allocation3 + $0x778] sm:$0xf] %v5205_v29  ;;  %5208 = vst [vmem:[#allocation3 + $0x77c] sm:$0xf] %v5207_v30  ;;  %v5209_v31 = vld [vmem:[%s19996_s15 + $0x778] sm:$0xf] }
 0x25a   :  { %v5211_v32 = vld [vmem:[%s19996_s15 + $0x794] sm:$0xf]  ;;  %v5213_v33 = vld [vmem:[%s19996_s15 + $0x77c] sm:$0xf]  ;;  %5210 = vst [vmem:[#allocation3 + $0x780] sm:$0xf] %v5209_v31 }
 0x25b   :  { %5212 = vst [vmem:[#allocation3 + $0x784] sm:$0xf] %v5211_v32  ;;  %5214 = vst [vmem:[#allocation3 + $0x788] sm:$0xf] %v5213_v33  ;;  %v5215_v34 = vld [vmem:[%s19996_s15 + $0x798] sm:$0xf] }
 0x25c   :  { %v5217_v35 = vld [vmem:[%s19996_s15 + $0x780] sm:$0xf]  ;;  %v5219_v36 = vld [vmem:[%s19996_s15 + $0x79c] sm:$0xf]  ;;  %5216 = vst [vmem:[#allocation3 + $0x78c] sm:$0xf] %v5215_v34 }
 0x25d   :  { %5218 = vst [vmem:[#allocation3 + $0x790] sm:$0xf] %v5217_v35  ;;  %5220 = vst [vmem:[#allocation3 + $0x794] sm:$0xf] %v5219_v36  ;;  %v5221_v37 = vld [vmem:[%s19996_s15 + $0x784] sm:$0xf] }
 0x25e   :  { %v5223_v38 = vld [vmem:[%s19996_s15 + $0x7a0] sm:$0xf]  ;;  %v5225_v39 = vld [vmem:[%s19996_s15 + $0x788] sm:$0xf]  ;;  %5222 = vst [vmem:[#allocation3 + $0x798] sm:$0xf] %v5221_v37 }
 0x25f   :  { %5224 = vst [vmem:[#allocation3 + $0x79c] sm:$0xf] %v5223_v38  ;;  %5226 = vst [vmem:[#allocation3 + $0x7a0] sm:$0xf] %v5225_v39  ;;  %v5231_v41 = vld [vmem:[%s19996_s15 + $0x7c4] sm:$0xf] }
 0x260   :  { %v5233_v42 = vld [vmem:[%s19996_s15 + $0x7ac] sm:$0xf]  ;;  %5228 = vst [vmem:[#allocation3 + $0x7a4] sm:$0xff] %v5227_v40   ;;  %5232 = vst [vmem:[#allocation3 + $0x7ac] sm:$0xf] %v5231_v41  ;;  %v5283_v2 = vld [vmem:[%s19996_s15 + $0x814] sm:$0xff]  }
 0x261   :  { %5234 = vst [vmem:[#allocation3 + $0x7b0] sm:$0xf] %v5233_v42  ;;  %v5235_v43 = vld [vmem:[%s19996_s15 + $0x7c8] sm:$0xf]  ;;  %v5237_v44 = vld [vmem:[%s19996_s15 + $0x7b0] sm:$0xf] }
 0x262   :  { %v5239_v45 = vld [vmem:[%s19996_s15 + $0x7cc] sm:$0xf]  ;;  %5236 = vst [vmem:[#allocation3 + $0x7b4] sm:$0xf] %v5235_v43  ;;  %5238 = vst [vmem:[#allocation3 + $0x7b8] sm:$0xf] %v5237_v44 }
 0x263   :  { %5240 = vst [vmem:[#allocation3 + $0x7bc] sm:$0xf] %v5239_v45  ;;  %v5241_v46 = vld [vmem:[%s19996_s15 + $0x7b4] sm:$0xf]  ;;  %v5243_v47 = vld [vmem:[%s19996_s15 + $0x7d0] sm:$0xf] }
 0x264   :  { %v5245_v48 = vld [vmem:[%s19996_s15 + $0x7b8] sm:$0xf]  ;;  %5242 = vst [vmem:[#allocation3 + $0x7c0] sm:$0xf] %v5241_v46  ;;  %5244 = vst [vmem:[#allocation3 + $0x7c4] sm:$0xf] %v5243_v47 }
 0x265   :  { %5246 = vst [vmem:[#allocation3 + $0x7c8] sm:$0xf] %v5245_v48  ;;  %v5247_v49 = vld [vmem:[%s19996_s15 + $0x7d4] sm:$0xf]  ;;  %v5249_v50 = vld [vmem:[%s19996_s15 + $0x7bc] sm:$0xf] }
 0x266   :  { %v5251_v51 = vld [vmem:[%s19996_s15 + $0x7d8] sm:$0xf]  ;;  %5248 = vst [vmem:[#allocation3 + $0x7cc] sm:$0xf] %v5247_v49  ;;  %5250 = vst [vmem:[#allocation3 + $0x7d0] sm:$0xf] %v5249_v50 }
 0x267   :  { %5252 = vst [vmem:[#allocation3 + $0x7d4] sm:$0xf] %v5251_v51  ;;  %v5253_v52 = vld [vmem:[%s19996_s15 + $0x7c0] sm:$0xf]  ;;  %v5259_v54 = vld [vmem:[%s19996_s15 + $0x7fc] sm:$0xf] }
 0x268   :  { %5254 = vst [vmem:[#allocation3 + $0x7d8] sm:$0xf] %v5253_v52  ;;  %5256 = vst [vmem:[#allocation3 + $0x7dc] sm:$0xff] %v5255_v53   ;;  %v5261_v55 = vld [vmem:[%s19996_s15 + $0x7e4] sm:$0xf]  ;;  %v5311_v15 = vld [vmem:[%s19996_s15 + $0x84c] sm:$0xff]  }
 0x269   :  { %5260 = vst [vmem:[#allocation3 + $0x7e4] sm:$0xf] %v5259_v54  ;;  %v5263_v56 = vld [vmem:[%s19996_s15 + $0x800] sm:$0xf]  ;;  %v5265_v57 = vld [vmem:[%s19996_s15 + $0x7e8] sm:$0xf] }
 0x26a   :  { %5262 = vst [vmem:[#allocation3 + $0x7e8] sm:$0xf] %v5261_v55  ;;  %5264 = vst [vmem:[#allocation3 + $0x7ec] sm:$0xf] %v5263_v56  ;;  %v5267_v58 = vld [vmem:[%s19996_s15 + $0x804] sm:$0xf] }
 0x26b   :  { %5266 = vst [vmem:[#allocation3 + $0x7f0] sm:$0xf] %v5265_v57  ;;  %v5269_v59 = vld [vmem:[%s19996_s15 + $0x7ec] sm:$0xf]  ;;  %v5271_v60 = vld [vmem:[%s19996_s15 + $0x808] sm:$0xf] }
 0x26c   :  { %5268 = vst [vmem:[#allocation3 + $0x7f4] sm:$0xf] %v5267_v58  ;;  %5270 = vst [vmem:[#allocation3 + $0x7f8] sm:$0xf] %v5269_v59  ;;  %v5273_v61 = vld [vmem:[%s19996_s15 + $0x7f0] sm:$0xf] }
 0x26d   :  { %5272 = vst [vmem:[#allocation3 + $0x7fc] sm:$0xf] %v5271_v60  ;;  %v5275_v62 = vld [vmem:[%s19996_s15 + $0x80c] sm:$0xf]  ;;  %v5277_v63 = vld [vmem:[%s19996_s15 + $0x7f4] sm:$0xf] }
 0x26e   :  { %5274 = vst [vmem:[#allocation3 + $0x800] sm:$0xf] %v5273_v61  ;;  %5276 = vst [vmem:[#allocation3 + $0x804] sm:$0xf] %v5275_v62  ;;  %v5279_v0 = vld [vmem:[%s19996_s15 + $0x810] sm:$0xf] }
 0x26f   :  { %5278 = vst [vmem:[#allocation3 + $0x808] sm:$0xf] %v5277_v63  ;;  %v5281_v1 = vld [vmem:[%s19996_s15 + $0x7f8] sm:$0xf]  ;;  %5280 = vst [vmem:[#allocation3 + $0x80c] sm:$0xf] %v5279_v0 }
 0x270   :  { %5282 = vst [vmem:[#allocation3 + $0x810] sm:$0xf] %v5281_v1  ;;  %5284 = vst [vmem:[#allocation3 + $0x814] sm:$0xff] %v5283_v2   ;;  %v5287_v3 = vld [vmem:[%s19996_s15 + $0x834] sm:$0xf]  ;;  %v5339_v28 = vld [vmem:[%s19996_s15 + $0x884] sm:$0xff]  }
 0x271   :  { %v5289_v4 = vld [vmem:[%s19996_s15 + $0x81c] sm:$0xf]  ;;  %v5291_v5 = vld [vmem:[%s19996_s15 + $0x838] sm:$0xf]  ;;  %5288 = vst [vmem:[#allocation3 + $0x81c] sm:$0xf] %v5287_v3 }
 0x272   :  { %5290 = vst [vmem:[#allocation3 + $0x820] sm:$0xf] %v5289_v4  ;;  %5292 = vst [vmem:[#allocation3 + $0x824] sm:$0xf] %v5291_v5  ;;  %v5293_v6 = vld [vmem:[%s19996_s15 + $0x820] sm:$0xf] }
 0x273   :  { %v5295_v7 = vld [vmem:[%s19996_s15 + $0x83c] sm:$0xf]  ;;  %v5297_v8 = vld [vmem:[%s19996_s15 + $0x824] sm:$0xf]  ;;  %5294 = vst [vmem:[#allocation3 + $0x828] sm:$0xf] %v5293_v6 }
 0x274   :  { %5296 = vst [vmem:[#allocation3 + $0x82c] sm:$0xf] %v5295_v7  ;;  %5298 = vst [vmem:[#allocation3 + $0x830] sm:$0xf] %v5297_v8  ;;  %v5299_v9 = vld [vmem:[%s19996_s15 + $0x840] sm:$0xf] }
 0x275   :  { %v5301_v10 = vld [vmem:[%s19996_s15 + $0x828] sm:$0xf]  ;;  %v5303_v11 = vld [vmem:[%s19996_s15 + $0x844] sm:$0xf]  ;;  %5300 = vst [vmem:[#allocation3 + $0x834] sm:$0xf] %v5299_v9 }
 0x276   :  { %5302 = vst [vmem:[#allocation3 + $0x838] sm:$0xf] %v5301_v10  ;;  %5304 = vst [vmem:[#allocation3 + $0x83c] sm:$0xf] %v5303_v11  ;;  %v5305_v12 = vld [vmem:[%s19996_s15 + $0x82c] sm:$0xf] }
 0x277   :  { %v5307_v13 = vld [vmem:[%s19996_s15 + $0x848] sm:$0xf]  ;;  %v5309_v14 = vld [vmem:[%s19996_s15 + $0x830] sm:$0xf]  ;;  %5306 = vst [vmem:[#allocation3 + $0x840] sm:$0xf] %v5305_v12 }
 0x278   :  { %5308 = vst [vmem:[#allocation3 + $0x844] sm:$0xf] %v5307_v13  ;;  %5310 = vst [vmem:[#allocation3 + $0x848] sm:$0xf] %v5309_v14  ;;  %v5315_v16 = vld [vmem:[%s19996_s15 + $0x86c] sm:$0xf] }
 0x279   :  { %v5317_v17 = vld [vmem:[%s19996_s15 + $0x854] sm:$0xf]  ;;  %5312 = vst [vmem:[#allocation3 + $0x84c] sm:$0xff] %v5311_v15   ;;  %5316 = vst [vmem:[#allocation3 + $0x854] sm:$0xf] %v5315_v16  ;;  %v5367_v41 = vld [vmem:[%s19996_s15 + $0x8bc] sm:$0xff]  }
 0x27a   :  { %5318 = vst [vmem:[#allocation3 + $0x858] sm:$0xf] %v5317_v17  ;;  %v5319_v18 = vld [vmem:[%s19996_s15 + $0x870] sm:$0xf]  ;;  %v5321_v19 = vld [vmem:[%s19996_s15 + $0x858] sm:$0xf] }
 0x27b   :  { %v5323_v20 = vld [vmem:[%s19996_s15 + $0x874] sm:$0xf]  ;;  %5320 = vst [vmem:[#allocation3 + $0x85c] sm:$0xf] %v5319_v18  ;;  %5322 = vst [vmem:[#allocation3 + $0x860] sm:$0xf] %v5321_v19 }
 0x27c   :  { %5324 = vst [vmem:[#allocation3 + $0x864] sm:$0xf] %v5323_v20  ;;  %v5325_v21 = vld [vmem:[%s19996_s15 + $0x85c] sm:$0xf]  ;;  %v5327_v22 = vld [vmem:[%s19996_s15 + $0x878] sm:$0xf] }
 0x27d   :  { %v5329_v23 = vld [vmem:[%s19996_s15 + $0x860] sm:$0xf]  ;;  %5326 = vst [vmem:[#allocation3 + $0x868] sm:$0xf] %v5325_v21  ;;  %5328 = vst [vmem:[#allocation3 + $0x86c] sm:$0xf] %v5327_v22 }
 0x27e   :  { %5330 = vst [vmem:[#allocation3 + $0x870] sm:$0xf] %v5329_v23  ;;  %v5331_v24 = vld [vmem:[%s19996_s15 + $0x87c] sm:$0xf]  ;;  %v5333_v25 = vld [vmem:[%s19996_s15 + $0x864] sm:$0xf] }
 0x27f   :  { %v5335_v26 = vld [vmem:[%s19996_s15 + $0x880] sm:$0xf]  ;;  %5332 = vst [vmem:[#allocation3 + $0x874] sm:$0xf] %v5331_v24  ;;  %5334 = vst [vmem:[#allocation3 + $0x878] sm:$0xf] %v5333_v25 }
 0x280   :  { %5336 = vst [vmem:[#allocation3 + $0x87c] sm:$0xf] %v5335_v26  ;;  %v5337_v27 = vld [vmem:[%s19996_s15 + $0x868] sm:$0xf]  ;;  %v5343_v29 = vld [vmem:[%s19996_s15 + $0x8a4] sm:$0xf] }
 0x281   :  { %5338 = vst [vmem:[#allocation3 + $0x880] sm:$0xf] %v5337_v27  ;;  %5340 = vst [vmem:[#allocation3 + $0x884] sm:$0xff] %v5339_v28   ;;  %v5345_v30 = vld [vmem:[%s19996_s15 + $0x88c] sm:$0xf]  ;;  %v5395_v54 = vld [vmem:[%s19996_s15 + $0x8f4] sm:$0xff]  }
 0x282   :  { %5344 = vst [vmem:[#allocation3 + $0x88c] sm:$0xf] %v5343_v29  ;;  %v5347_v31 = vld [vmem:[%s19996_s15 + $0x8a8] sm:$0xf]  ;;  %v5349_v32 = vld [vmem:[%s19996_s15 + $0x890] sm:$0xf] }
 0x283   :  { %5346 = vst [vmem:[#allocation3 + $0x890] sm:$0xf] %v5345_v30  ;;  %5348 = vst [vmem:[#allocation3 + $0x894] sm:$0xf] %v5347_v31  ;;  %v5351_v33 = vld [vmem:[%s19996_s15 + $0x8ac] sm:$0xf] }
 0x284   :  { %5350 = vst [vmem:[#allocation3 + $0x898] sm:$0xf] %v5349_v32  ;;  %v5353_v34 = vld [vmem:[%s19996_s15 + $0x894] sm:$0xf]  ;;  %v5355_v35 = vld [vmem:[%s19996_s15 + $0x8b0] sm:$0xf] }
 0x285   :  { %5352 = vst [vmem:[#allocation3 + $0x89c] sm:$0xf] %v5351_v33  ;;  %5354 = vst [vmem:[#allocation3 + $0x8a0] sm:$0xf] %v5353_v34  ;;  %v5357_v36 = vld [vmem:[%s19996_s15 + $0x898] sm:$0xf] }
 0x286   :  { %5356 = vst [vmem:[#allocation3 + $0x8a4] sm:$0xf] %v5355_v35  ;;  %v5359_v37 = vld [vmem:[%s19996_s15 + $0x8b4] sm:$0xf]  ;;  %v5361_v38 = vld [vmem:[%s19996_s15 + $0x89c] sm:$0xf] }
 0x287   :  { %5358 = vst [vmem:[#allocation3 + $0x8a8] sm:$0xf] %v5357_v36  ;;  %5360 = vst [vmem:[#allocation3 + $0x8ac] sm:$0xf] %v5359_v37  ;;  %v5363_v39 = vld [vmem:[%s19996_s15 + $0x8b8] sm:$0xf] }
 0x288   :  { %5362 = vst [vmem:[#allocation3 + $0x8b0] sm:$0xf] %v5361_v38  ;;  %v5365_v40 = vld [vmem:[%s19996_s15 + $0x8a0] sm:$0xf]  ;;  %5364 = vst [vmem:[#allocation3 + $0x8b4] sm:$0xf] %v5363_v39 }
 0x289   :  { %5366 = vst [vmem:[#allocation3 + $0x8b8] sm:$0xf] %v5365_v40  ;;  %5368 = vst [vmem:[#allocation3 + $0x8bc] sm:$0xff] %v5367_v41   ;;  %v5371_v42 = vld [vmem:[%s19996_s15 + $0x8dc] sm:$0xf]  ;;  %v5423_v3 = vld [vmem:[%s19996_s15 + $0x92c] sm:$0xff]  }
 0x28a   :  { %v5373_v43 = vld [vmem:[%s19996_s15 + $0x8c4] sm:$0xf]  ;;  %v5375_v44 = vld [vmem:[%s19996_s15 + $0x8e0] sm:$0xf]  ;;  %5372 = vst [vmem:[#allocation3 + $0x8c4] sm:$0xf] %v5371_v42 }
 0x28b   :  { %5374 = vst [vmem:[#allocation3 + $0x8c8] sm:$0xf] %v5373_v43  ;;  %5376 = vst [vmem:[#allocation3 + $0x8cc] sm:$0xf] %v5375_v44  ;;  %v5377_v45 = vld [vmem:[%s19996_s15 + $0x8c8] sm:$0xf] }
 0x28c   :  { %v5379_v46 = vld [vmem:[%s19996_s15 + $0x8e4] sm:$0xf]  ;;  %v5381_v47 = vld [vmem:[%s19996_s15 + $0x8cc] sm:$0xf]  ;;  %5378 = vst [vmem:[#allocation3 + $0x8d0] sm:$0xf] %v5377_v45 }
 0x28d   :  { %5380 = vst [vmem:[#allocation3 + $0x8d4] sm:$0xf] %v5379_v46  ;;  %5382 = vst [vmem:[#allocation3 + $0x8d8] sm:$0xf] %v5381_v47  ;;  %v5383_v48 = vld [vmem:[%s19996_s15 + $0x8e8] sm:$0xf] }
 0x28e   :  { %v5385_v49 = vld [vmem:[%s19996_s15 + $0x8d0] sm:$0xf]  ;;  %v5387_v50 = vld [vmem:[%s19996_s15 + $0x8ec] sm:$0xf]  ;;  %5384 = vst [vmem:[#allocation3 + $0x8dc] sm:$0xf] %v5383_v48 }
 0x28f   :  { %5386 = vst [vmem:[#allocation3 + $0x8e0] sm:$0xf] %v5385_v49  ;;  %5388 = vst [vmem:[#allocation3 + $0x8e4] sm:$0xf] %v5387_v50  ;;  %v5389_v51 = vld [vmem:[%s19996_s15 + $0x8d4] sm:$0xf] }
 0x290   :  { %v5391_v52 = vld [vmem:[%s19996_s15 + $0x8f0] sm:$0xf]  ;;  %v5393_v53 = vld [vmem:[%s19996_s15 + $0x8d8] sm:$0xf]  ;;  %5390 = vst [vmem:[#allocation3 + $0x8e8] sm:$0xf] %v5389_v51 }
 0x291   :  { %5392 = vst [vmem:[#allocation3 + $0x8ec] sm:$0xf] %v5391_v52  ;;  %5394 = vst [vmem:[#allocation3 + $0x8f0] sm:$0xf] %v5393_v53  ;;  %v5399_v55 = vld [vmem:[%s19996_s15 + $0x914] sm:$0xf] }
 0x292   :  { %v5401_v56 = vld [vmem:[%s19996_s15 + $0x8fc] sm:$0xf]  ;;  %5396 = vst [vmem:[#allocation3 + $0x8f4] sm:$0xff] %v5395_v54   ;;  %5400 = vst [vmem:[#allocation3 + $0x8fc] sm:$0xf] %v5399_v55  ;;  %v5451_v16 = vld [vmem:[%s19996_s15 + $0x964] sm:$0xff]  }
 0x293   :  { %5402 = vst [vmem:[#allocation3 + $0x900] sm:$0xf] %v5401_v56  ;;  %v5403_v57 = vld [vmem:[%s19996_s15 + $0x918] sm:$0xf]  ;;  %v5405_v58 = vld [vmem:[%s19996_s15 + $0x900] sm:$0xf] }
 0x294   :  { %v5407_v59 = vld [vmem:[%s19996_s15 + $0x91c] sm:$0xf]  ;;  %5404 = vst [vmem:[#allocation3 + $0x904] sm:$0xf] %v5403_v57  ;;  %5406 = vst [vmem:[#allocation3 + $0x908] sm:$0xf] %v5405_v58 }
 0x295   :  { %5408 = vst [vmem:[#allocation3 + $0x90c] sm:$0xf] %v5407_v59  ;;  %v5409_v60 = vld [vmem:[%s19996_s15 + $0x904] sm:$0xf]  ;;  %v5411_v61 = vld [vmem:[%s19996_s15 + $0x920] sm:$0xf] }
 0x296   :  { %v5413_v62 = vld [vmem:[%s19996_s15 + $0x908] sm:$0xf]  ;;  %5410 = vst [vmem:[#allocation3 + $0x910] sm:$0xf] %v5409_v60  ;;  %5412 = vst [vmem:[#allocation3 + $0x914] sm:$0xf] %v5411_v61 }
 0x297   :  { %5414 = vst [vmem:[#allocation3 + $0x918] sm:$0xf] %v5413_v62  ;;  %v5415_v63 = vld [vmem:[%s19996_s15 + $0x924] sm:$0xf]  ;;  %v5417_v0 = vld [vmem:[%s19996_s15 + $0x90c] sm:$0xf] }
 0x298   :  { %v5419_v1 = vld [vmem:[%s19996_s15 + $0x928] sm:$0xf]  ;;  %5416 = vst [vmem:[#allocation3 + $0x91c] sm:$0xf] %v5415_v63  ;;  %5418 = vst [vmem:[#allocation3 + $0x920] sm:$0xf] %v5417_v0 }
 0x299   :  { %5420 = vst [vmem:[#allocation3 + $0x924] sm:$0xf] %v5419_v1  ;;  %v5421_v2 = vld [vmem:[%s19996_s15 + $0x910] sm:$0xf]  ;;  %v5427_v4 = vld [vmem:[%s19996_s15 + $0x94c] sm:$0xf] }
 0x29a   :  { %5422 = vst [vmem:[#allocation3 + $0x928] sm:$0xf] %v5421_v2  ;;  %5424 = vst [vmem:[#allocation3 + $0x92c] sm:$0xff] %v5423_v3   ;;  %v5429_v5 = vld [vmem:[%s19996_s15 + $0x934] sm:$0xf]  ;;  %v5479_v29 = vld [vmem:[%s19996_s15 + $0x99c] sm:$0xff]  }
 0x29b   :  { %5428 = vst [vmem:[#allocation3 + $0x934] sm:$0xf] %v5427_v4  ;;  %v5431_v6 = vld [vmem:[%s19996_s15 + $0x950] sm:$0xf]  ;;  %v5433_v7 = vld [vmem:[%s19996_s15 + $0x938] sm:$0xf] }
 0x29c   :  { %5430 = vst [vmem:[#allocation3 + $0x938] sm:$0xf] %v5429_v5  ;;  %5432 = vst [vmem:[#allocation3 + $0x93c] sm:$0xf] %v5431_v6  ;;  %v5435_v8 = vld [vmem:[%s19996_s15 + $0x954] sm:$0xf] }
 0x29d   :  { %5434 = vst [vmem:[#allocation3 + $0x940] sm:$0xf] %v5433_v7  ;;  %v5437_v9 = vld [vmem:[%s19996_s15 + $0x93c] sm:$0xf]  ;;  %v5439_v10 = vld [vmem:[%s19996_s15 + $0x958] sm:$0xf] }
 0x29e   :  { %5436 = vst [vmem:[#allocation3 + $0x944] sm:$0xf] %v5435_v8  ;;  %5438 = vst [vmem:[#allocation3 + $0x948] sm:$0xf] %v5437_v9  ;;  %v5441_v11 = vld [vmem:[%s19996_s15 + $0x940] sm:$0xf] }
 0x29f   :  { %5440 = vst [vmem:[#allocation3 + $0x94c] sm:$0xf] %v5439_v10  ;;  %v5443_v12 = vld [vmem:[%s19996_s15 + $0x95c] sm:$0xf]  ;;  %v5445_v13 = vld [vmem:[%s19996_s15 + $0x944] sm:$0xf] }
 0x2a0   :  { %5442 = vst [vmem:[#allocation3 + $0x950] sm:$0xf] %v5441_v11  ;;  %5444 = vst [vmem:[#allocation3 + $0x954] sm:$0xf] %v5443_v12  ;;  %v5447_v14 = vld [vmem:[%s19996_s15 + $0x960] sm:$0xf] }
 0x2a1   :  { %5446 = vst [vmem:[#allocation3 + $0x958] sm:$0xf] %v5445_v13  ;;  %v5449_v15 = vld [vmem:[%s19996_s15 + $0x948] sm:$0xf]  ;;  %5448 = vst [vmem:[#allocation3 + $0x95c] sm:$0xf] %v5447_v14 }
 0x2a2   :  { %5450 = vst [vmem:[#allocation3 + $0x960] sm:$0xf] %v5449_v15  ;;  %5452 = vst [vmem:[#allocation3 + $0x964] sm:$0xff] %v5451_v16   ;;  %v5455_v17 = vld [vmem:[%s19996_s15 + $0x984] sm:$0xf]  ;;  %v5507_v42 = vld [vmem:[%s19996_s15 + $0x9d4] sm:$0xff]  }
 0x2a3   :  { %v5457_v18 = vld [vmem:[%s19996_s15 + $0x96c] sm:$0xf]  ;;  %v5459_v19 = vld [vmem:[%s19996_s15 + $0x988] sm:$0xf]  ;;  %5456 = vst [vmem:[#allocation3 + $0x96c] sm:$0xf] %v5455_v17 }
 0x2a4   :  { %5458 = vst [vmem:[#allocation3 + $0x970] sm:$0xf] %v5457_v18  ;;  %5460 = vst [vmem:[#allocation3 + $0x974] sm:$0xf] %v5459_v19  ;;  %v5461_v20 = vld [vmem:[%s19996_s15 + $0x970] sm:$0xf] }
 0x2a5   :  { %v5463_v21 = vld [vmem:[%s19996_s15 + $0x98c] sm:$0xf]  ;;  %v5465_v22 = vld [vmem:[%s19996_s15 + $0x974] sm:$0xf]  ;;  %5462 = vst [vmem:[#allocation3 + $0x978] sm:$0xf] %v5461_v20 }
 0x2a6   :  { %5464 = vst [vmem:[#allocation3 + $0x97c] sm:$0xf] %v5463_v21  ;;  %5466 = vst [vmem:[#allocation3 + $0x980] sm:$0xf] %v5465_v22  ;;  %v5467_v23 = vld [vmem:[%s19996_s15 + $0x990] sm:$0xf] }
 0x2a7   :  { %v5469_v24 = vld [vmem:[%s19996_s15 + $0x978] sm:$0xf]  ;;  %v5471_v25 = vld [vmem:[%s19996_s15 + $0x994] sm:$0xf]  ;;  %5468 = vst [vmem:[#allocation3 + $0x984] sm:$0xf] %v5467_v23 }
 0x2a8   :  { %5470 = vst [vmem:[#allocation3 + $0x988] sm:$0xf] %v5469_v24  ;;  %5472 = vst [vmem:[#allocation3 + $0x98c] sm:$0xf] %v5471_v25  ;;  %v5473_v26 = vld [vmem:[%s19996_s15 + $0x97c] sm:$0xf] }
 0x2a9   :  { %v5475_v27 = vld [vmem:[%s19996_s15 + $0x998] sm:$0xf]  ;;  %v5477_v28 = vld [vmem:[%s19996_s15 + $0x980] sm:$0xf]  ;;  %5474 = vst [vmem:[#allocation3 + $0x990] sm:$0xf] %v5473_v26 }
 0x2aa   :  { %5476 = vst [vmem:[#allocation3 + $0x994] sm:$0xf] %v5475_v27  ;;  %5478 = vst [vmem:[#allocation3 + $0x998] sm:$0xf] %v5477_v28  ;;  %v5483_v30 = vld [vmem:[%s19996_s15 + $0x9bc] sm:$0xf] }
 0x2ab   :  { %v5485_v31 = vld [vmem:[%s19996_s15 + $0x9a4] sm:$0xf]  ;;  %5480 = vst [vmem:[#allocation3 + $0x99c] sm:$0xff] %v5479_v29   ;;  %5484 = vst [vmem:[#allocation3 + $0x9a4] sm:$0xf] %v5483_v30  ;;  %v5535_v55 = vld [vmem:[%s19996_s15 + $0xa0c] sm:$0xff]  }
 0x2ac   :  { %5486 = vst [vmem:[#allocation3 + $0x9a8] sm:$0xf] %v5485_v31  ;;  %v5487_v32 = vld [vmem:[%s19996_s15 + $0x9c0] sm:$0xf]  ;;  %v5489_v33 = vld [vmem:[%s19996_s15 + $0x9a8] sm:$0xf] }
 0x2ad   :  { %v5491_v34 = vld [vmem:[%s19996_s15 + $0x9c4] sm:$0xf]  ;;  %5488 = vst [vmem:[#allocation3 + $0x9ac] sm:$0xf] %v5487_v32  ;;  %5490 = vst [vmem:[#allocation3 + $0x9b0] sm:$0xf] %v5489_v33 }
 0x2ae   :  { %5492 = vst [vmem:[#allocation3 + $0x9b4] sm:$0xf] %v5491_v34  ;;  %v5493_v35 = vld [vmem:[%s19996_s15 + $0x9ac] sm:$0xf]  ;;  %v5495_v36 = vld [vmem:[%s19996_s15 + $0x9c8] sm:$0xf] }
 0x2af   :  { %v5497_v37 = vld [vmem:[%s19996_s15 + $0x9b0] sm:$0xf]  ;;  %5494 = vst [vmem:[#allocation3 + $0x9b8] sm:$0xf] %v5493_v35  ;;  %5496 = vst [vmem:[#allocation3 + $0x9bc] sm:$0xf] %v5495_v36 }
 0x2b0   :  { %5498 = vst [vmem:[#allocation3 + $0x9c0] sm:$0xf] %v5497_v37  ;;  %v5499_v38 = vld [vmem:[%s19996_s15 + $0x9cc] sm:$0xf]  ;;  %v5501_v39 = vld [vmem:[%s19996_s15 + $0x9b4] sm:$0xf] }
 0x2b1   :  { %v5503_v40 = vld [vmem:[%s19996_s15 + $0x9d0] sm:$0xf]  ;;  %5500 = vst [vmem:[#allocation3 + $0x9c4] sm:$0xf] %v5499_v38  ;;  %5502 = vst [vmem:[#allocation3 + $0x9c8] sm:$0xf] %v5501_v39 }
 0x2b2   :  { %5504 = vst [vmem:[#allocation3 + $0x9cc] sm:$0xf] %v5503_v40  ;;  %v5505_v41 = vld [vmem:[%s19996_s15 + $0x9b8] sm:$0xf]  ;;  %v5511_v43 = vld [vmem:[%s19996_s15 + $0x9f4] sm:$0xf] }
 0x2b3   :  { %5506 = vst [vmem:[#allocation3 + $0x9d0] sm:$0xf] %v5505_v41  ;;  %5508 = vst [vmem:[#allocation3 + $0x9d4] sm:$0xff] %v5507_v42   ;;  %v5513_v44 = vld [vmem:[%s19996_s15 + $0x9dc] sm:$0xf]  ;;  %v5563_v4 = vld [vmem:[%s19996_s15 + $0xa44] sm:$0xff]  }
 0x2b4   :  { %5512 = vst [vmem:[#allocation3 + $0x9dc] sm:$0xf] %v5511_v43  ;;  %v5515_v45 = vld [vmem:[%s19996_s15 + $0x9f8] sm:$0xf]  ;;  %v5517_v46 = vld [vmem:[%s19996_s15 + $0x9e0] sm:$0xf] }
 0x2b5   :  { %5514 = vst [vmem:[#allocation3 + $0x9e0] sm:$0xf] %v5513_v44  ;;  %5516 = vst [vmem:[#allocation3 + $0x9e4] sm:$0xf] %v5515_v45  ;;  %v5519_v47 = vld [vmem:[%s19996_s15 + $0x9fc] sm:$0xf] }
 0x2b6   :  { %5518 = vst [vmem:[#allocation3 + $0x9e8] sm:$0xf] %v5517_v46  ;;  %v5521_v48 = vld [vmem:[%s19996_s15 + $0x9e4] sm:$0xf]  ;;  %v5523_v49 = vld [vmem:[%s19996_s15 + $0xa00] sm:$0xf] }
 0x2b7   :  { %5520 = vst [vmem:[#allocation3 + $0x9ec] sm:$0xf] %v5519_v47  ;;  %5522 = vst [vmem:[#allocation3 + $0x9f0] sm:$0xf] %v5521_v48  ;;  %v5525_v50 = vld [vmem:[%s19996_s15 + $0x9e8] sm:$0xf] }
 0x2b8   :  { %5524 = vst [vmem:[#allocation3 + $0x9f4] sm:$0xf] %v5523_v49  ;;  %v5527_v51 = vld [vmem:[%s19996_s15 + $0xa04] sm:$0xf]  ;;  %v5529_v52 = vld [vmem:[%s19996_s15 + $0x9ec] sm:$0xf] }
 0x2b9   :  { %5526 = vst [vmem:[#allocation3 + $0x9f8] sm:$0xf] %v5525_v50  ;;  %5528 = vst [vmem:[#allocation3 + $0x9fc] sm:$0xf] %v5527_v51  ;;  %v5531_v53 = vld [vmem:[%s19996_s15 + $0xa08] sm:$0xf] }
 0x2ba   :  { %5530 = vst [vmem:[#allocation3 + $0xa00] sm:$0xf] %v5529_v52  ;;  %v5533_v54 = vld [vmem:[%s19996_s15 + $0x9f0] sm:$0xf]  ;;  %5532 = vst [vmem:[#allocation3 + $0xa04] sm:$0xf] %v5531_v53 }
 0x2bb   :  { %5534 = vst [vmem:[#allocation3 + $0xa08] sm:$0xf] %v5533_v54  ;;  %5536 = vst [vmem:[#allocation3 + $0xa0c] sm:$0xff] %v5535_v55   ;;  %v5539_v56 = vld [vmem:[%s19996_s15 + $0xa2c] sm:$0xf]  ;;  %v5591_v17 = vld [vmem:[%s19996_s15 + $0xa7c] sm:$0xff]  }
 0x2bc   :  { %v5541_v57 = vld [vmem:[%s19996_s15 + $0xa14] sm:$0xf]  ;;  %v5543_v58 = vld [vmem:[%s19996_s15 + $0xa30] sm:$0xf]  ;;  %5540 = vst [vmem:[#allocation3 + $0xa14] sm:$0xf] %v5539_v56 }
 0x2bd   :  { %5542 = vst [vmem:[#allocation3 + $0xa18] sm:$0xf] %v5541_v57  ;;  %5544 = vst [vmem:[#allocation3 + $0xa1c] sm:$0xf] %v5543_v58  ;;  %v5545_v59 = vld [vmem:[%s19996_s15 + $0xa18] sm:$0xf] }
 0x2be   :  { %v5547_v60 = vld [vmem:[%s19996_s15 + $0xa34] sm:$0xf]  ;;  %v5549_v61 = vld [vmem:[%s19996_s15 + $0xa1c] sm:$0xf]  ;;  %5546 = vst [vmem:[#allocation3 + $0xa20] sm:$0xf] %v5545_v59 }
 0x2bf   :  { %5548 = vst [vmem:[#allocation3 + $0xa24] sm:$0xf] %v5547_v60  ;;  %5550 = vst [vmem:[#allocation3 + $0xa28] sm:$0xf] %v5549_v61  ;;  %v5551_v62 = vld [vmem:[%s19996_s15 + $0xa38] sm:$0xf] }
 0x2c0   :  { %v5553_v63 = vld [vmem:[%s19996_s15 + $0xa20] sm:$0xf]  ;;  %v5555_v0 = vld [vmem:[%s19996_s15 + $0xa3c] sm:$0xf]  ;;  %5552 = vst [vmem:[#allocation3 + $0xa2c] sm:$0xf] %v5551_v62 }
 0x2c1   :  { %5554 = vst [vmem:[#allocation3 + $0xa30] sm:$0xf] %v5553_v63  ;;  %5556 = vst [vmem:[#allocation3 + $0xa34] sm:$0xf] %v5555_v0  ;;  %v5557_v1 = vld [vmem:[%s19996_s15 + $0xa24] sm:$0xf] }
 0x2c2   :  { %v5559_v2 = vld [vmem:[%s19996_s15 + $0xa40] sm:$0xf]  ;;  %v5561_v3 = vld [vmem:[%s19996_s15 + $0xa28] sm:$0xf]  ;;  %5558 = vst [vmem:[#allocation3 + $0xa38] sm:$0xf] %v5557_v1 }
 0x2c3   :  { %5560 = vst [vmem:[#allocation3 + $0xa3c] sm:$0xf] %v5559_v2  ;;  %5562 = vst [vmem:[#allocation3 + $0xa40] sm:$0xf] %v5561_v3  ;;  %v5567_v5 = vld [vmem:[%s19996_s15 + $0xa64] sm:$0xf] }
 0x2c4   :  { %v5569_v6 = vld [vmem:[%s19996_s15 + $0xa4c] sm:$0xf]  ;;  %5564 = vst [vmem:[#allocation3 + $0xa44] sm:$0xff] %v5563_v4   ;;  %5568 = vst [vmem:[#allocation3 + $0xa4c] sm:$0xf] %v5567_v5  ;;  %v5619_v30 = vld [vmem:[%s19996_s15 + $0xab4] sm:$0xff]  }
 0x2c5   :  { %5570 = vst [vmem:[#allocation3 + $0xa50] sm:$0xf] %v5569_v6  ;;  %v5571_v7 = vld [vmem:[%s19996_s15 + $0xa68] sm:$0xf]  ;;  %v5573_v8 = vld [vmem:[%s19996_s15 + $0xa50] sm:$0xf] }
 0x2c6   :  { %v5575_v9 = vld [vmem:[%s19996_s15 + $0xa6c] sm:$0xf]  ;;  %5572 = vst [vmem:[#allocation3 + $0xa54] sm:$0xf] %v5571_v7  ;;  %5574 = vst [vmem:[#allocation3 + $0xa58] sm:$0xf] %v5573_v8 }
 0x2c7   :  { %5576 = vst [vmem:[#allocation3 + $0xa5c] sm:$0xf] %v5575_v9  ;;  %v5577_v10 = vld [vmem:[%s19996_s15 + $0xa54] sm:$0xf]  ;;  %v5579_v11 = vld [vmem:[%s19996_s15 + $0xa70] sm:$0xf] }
 0x2c8   :  { %v5581_v12 = vld [vmem:[%s19996_s15 + $0xa58] sm:$0xf]  ;;  %5578 = vst [vmem:[#allocation3 + $0xa60] sm:$0xf] %v5577_v10  ;;  %5580 = vst [vmem:[#allocation3 + $0xa64] sm:$0xf] %v5579_v11 }
 0x2c9   :  { %5582 = vst [vmem:[#allocation3 + $0xa68] sm:$0xf] %v5581_v12  ;;  %v5583_v13 = vld [vmem:[%s19996_s15 + $0xa74] sm:$0xf]  ;;  %v5585_v14 = vld [vmem:[%s19996_s15 + $0xa5c] sm:$0xf] }
 0x2ca   :  { %v5587_v15 = vld [vmem:[%s19996_s15 + $0xa78] sm:$0xf]  ;;  %5584 = vst [vmem:[#allocation3 + $0xa6c] sm:$0xf] %v5583_v13  ;;  %5586 = vst [vmem:[#allocation3 + $0xa70] sm:$0xf] %v5585_v14 }
 0x2cb   :  { %5588 = vst [vmem:[#allocation3 + $0xa74] sm:$0xf] %v5587_v15  ;;  %v5589_v16 = vld [vmem:[%s19996_s15 + $0xa60] sm:$0xf]  ;;  %v5595_v18 = vld [vmem:[%s19996_s15 + $0xa9c] sm:$0xf] }
 0x2cc   :  { %5590 = vst [vmem:[#allocation3 + $0xa78] sm:$0xf] %v5589_v16  ;;  %5592 = vst [vmem:[#allocation3 + $0xa7c] sm:$0xff] %v5591_v17   ;;  %v5597_v19 = vld [vmem:[%s19996_s15 + $0xa84] sm:$0xf]  ;;  %v5647_v43 = vld [vmem:[%s19996_s15 + $0xaec] sm:$0xff]  }
 0x2cd   :  { %5596 = vst [vmem:[#allocation3 + $0xa84] sm:$0xf] %v5595_v18  ;;  %v5599_v20 = vld [vmem:[%s19996_s15 + $0xaa0] sm:$0xf]  ;;  %v5601_v21 = vld [vmem:[%s19996_s15 + $0xa88] sm:$0xf] }
 0x2ce   :  { %5598 = vst [vmem:[#allocation3 + $0xa88] sm:$0xf] %v5597_v19  ;;  %5600 = vst [vmem:[#allocation3 + $0xa8c] sm:$0xf] %v5599_v20  ;;  %v5603_v22 = vld [vmem:[%s19996_s15 + $0xaa4] sm:$0xf] }
 0x2cf   :  { %5602 = vst [vmem:[#allocation3 + $0xa90] sm:$0xf] %v5601_v21  ;;  %v5605_v23 = vld [vmem:[%s19996_s15 + $0xa8c] sm:$0xf]  ;;  %v5607_v24 = vld [vmem:[%s19996_s15 + $0xaa8] sm:$0xf] }
 0x2d0   :  { %5604 = vst [vmem:[#allocation3 + $0xa94] sm:$0xf] %v5603_v22  ;;  %5606 = vst [vmem:[#allocation3 + $0xa98] sm:$0xf] %v5605_v23  ;;  %v5609_v25 = vld [vmem:[%s19996_s15 + $0xa90] sm:$0xf] }
 0x2d1   :  { %5608 = vst [vmem:[#allocation3 + $0xa9c] sm:$0xf] %v5607_v24  ;;  %v5611_v26 = vld [vmem:[%s19996_s15 + $0xaac] sm:$0xf]  ;;  %v5613_v27 = vld [vmem:[%s19996_s15 + $0xa94] sm:$0xf] }
 0x2d2   :  { %5610 = vst [vmem:[#allocation3 + $0xaa0] sm:$0xf] %v5609_v25  ;;  %5612 = vst [vmem:[#allocation3 + $0xaa4] sm:$0xf] %v5611_v26  ;;  %v5615_v28 = vld [vmem:[%s19996_s15 + $0xab0] sm:$0xf] }
 0x2d3   :  { %5614 = vst [vmem:[#allocation3 + $0xaa8] sm:$0xf] %v5613_v27  ;;  %v5617_v29 = vld [vmem:[%s19996_s15 + $0xa98] sm:$0xf]  ;;  %5616 = vst [vmem:[#allocation3 + $0xaac] sm:$0xf] %v5615_v28 }
 0x2d4   :  { %5618 = vst [vmem:[#allocation3 + $0xab0] sm:$0xf] %v5617_v29  ;;  %5620 = vst [vmem:[#allocation3 + $0xab4] sm:$0xff] %v5619_v30   ;;  %v5623_v31 = vld [vmem:[%s19996_s15 + $0xad4] sm:$0xf]  ;;  %v5675_v56 = vld [vmem:[%s19996_s15 + $0xb24] sm:$0xff]  }
 0x2d5   :  { %v5625_v32 = vld [vmem:[%s19996_s15 + $0xabc] sm:$0xf]  ;;  %v5627_v33 = vld [vmem:[%s19996_s15 + $0xad8] sm:$0xf]  ;;  %5624 = vst [vmem:[#allocation3 + $0xabc] sm:$0xf] %v5623_v31 }
 0x2d6   :  { %5626 = vst [vmem:[#allocation3 + $0xac0] sm:$0xf] %v5625_v32  ;;  %5628 = vst [vmem:[#allocation3 + $0xac4] sm:$0xf] %v5627_v33  ;;  %v5629_v34 = vld [vmem:[%s19996_s15 + $0xac0] sm:$0xf] }
 0x2d7   :  { %v5631_v35 = vld [vmem:[%s19996_s15 + $0xadc] sm:$0xf]  ;;  %v5633_v36 = vld [vmem:[%s19996_s15 + $0xac4] sm:$0xf]  ;;  %5630 = vst [vmem:[#allocation3 + $0xac8] sm:$0xf] %v5629_v34 }
 0x2d8   :  { %5632 = vst [vmem:[#allocation3 + $0xacc] sm:$0xf] %v5631_v35  ;;  %5634 = vst [vmem:[#allocation3 + $0xad0] sm:$0xf] %v5633_v36  ;;  %v5635_v37 = vld [vmem:[%s19996_s15 + $0xae0] sm:$0xf] }
 0x2d9   :  { %v5637_v38 = vld [vmem:[%s19996_s15 + $0xac8] sm:$0xf]  ;;  %v5639_v39 = vld [vmem:[%s19996_s15 + $0xae4] sm:$0xf]  ;;  %5636 = vst [vmem:[#allocation3 + $0xad4] sm:$0xf] %v5635_v37 }
 0x2da   :  { %5638 = vst [vmem:[#allocation3 + $0xad8] sm:$0xf] %v5637_v38  ;;  %5640 = vst [vmem:[#allocation3 + $0xadc] sm:$0xf] %v5639_v39  ;;  %v5641_v40 = vld [vmem:[%s19996_s15 + $0xacc] sm:$0xf] }
 0x2db   :  { %v5643_v41 = vld [vmem:[%s19996_s15 + $0xae8] sm:$0xf]  ;;  %v5645_v42 = vld [vmem:[%s19996_s15 + $0xad0] sm:$0xf]  ;;  %5642 = vst [vmem:[#allocation3 + $0xae0] sm:$0xf] %v5641_v40 }
 0x2dc   :  { %5644 = vst [vmem:[#allocation3 + $0xae4] sm:$0xf] %v5643_v41  ;;  %5646 = vst [vmem:[#allocation3 + $0xae8] sm:$0xf] %v5645_v42  ;;  %v5651_v44 = vld [vmem:[%s19996_s15 + $0xb0c] sm:$0xf] }
 0x2dd   :  { %v5653_v45 = vld [vmem:[%s19996_s15 + $0xaf4] sm:$0xf]  ;;  %5648 = vst [vmem:[#allocation3 + $0xaec] sm:$0xff] %v5647_v43   ;;  %5652 = vst [vmem:[#allocation3 + $0xaf4] sm:$0xf] %v5651_v44  ;;  %v5703_v5 = vld [vmem:[%s19996_s15 + $0xb5c] sm:$0xff]  }
 0x2de   :  { %5654 = vst [vmem:[#allocation3 + $0xaf8] sm:$0xf] %v5653_v45  ;;  %v5655_v46 = vld [vmem:[%s19996_s15 + $0xb10] sm:$0xf]  ;;  %v5657_v47 = vld [vmem:[%s19996_s15 + $0xaf8] sm:$0xf] }
 0x2df   :  { %v5659_v48 = vld [vmem:[%s19996_s15 + $0xb14] sm:$0xf]  ;;  %5656 = vst [vmem:[#allocation3 + $0xafc] sm:$0xf] %v5655_v46  ;;  %5658 = vst [vmem:[#allocation3 + $0xb00] sm:$0xf] %v5657_v47 }
 0x2e0   :  { %5660 = vst [vmem:[#allocation3 + $0xb04] sm:$0xf] %v5659_v48  ;;  %v5661_v49 = vld [vmem:[%s19996_s15 + $0xafc] sm:$0xf]  ;;  %v5663_v50 = vld [vmem:[%s19996_s15 + $0xb18] sm:$0xf] }
 0x2e1   :  { %v5665_v51 = vld [vmem:[%s19996_s15 + $0xb00] sm:$0xf]  ;;  %5662 = vst [vmem:[#allocation3 + $0xb08] sm:$0xf] %v5661_v49  ;;  %5664 = vst [vmem:[#allocation3 + $0xb0c] sm:$0xf] %v5663_v50 }
 0x2e2   :  { %5666 = vst [vmem:[#allocation3 + $0xb10] sm:$0xf] %v5665_v51  ;;  %v5667_v52 = vld [vmem:[%s19996_s15 + $0xb1c] sm:$0xf]  ;;  %v5669_v53 = vld [vmem:[%s19996_s15 + $0xb04] sm:$0xf] }
 0x2e3   :  { %v5671_v54 = vld [vmem:[%s19996_s15 + $0xb20] sm:$0xf]  ;;  %5668 = vst [vmem:[#allocation3 + $0xb14] sm:$0xf] %v5667_v52  ;;  %5670 = vst [vmem:[#allocation3 + $0xb18] sm:$0xf] %v5669_v53 }
 0x2e4   :  { %5672 = vst [vmem:[#allocation3 + $0xb1c] sm:$0xf] %v5671_v54  ;;  %v5673_v55 = vld [vmem:[%s19996_s15 + $0xb08] sm:$0xf]  ;;  %v5679_v57 = vld [vmem:[%s19996_s15 + $0xb44] sm:$0xf] }
 0x2e5   :  { %5674 = vst [vmem:[#allocation3 + $0xb20] sm:$0xf] %v5673_v55  ;;  %5676 = vst [vmem:[#allocation3 + $0xb24] sm:$0xff] %v5675_v56   ;;  %v5681_v58 = vld [vmem:[%s19996_s15 + $0xb2c] sm:$0xf]  ;;  %v5731_v18 = vld [vmem:[%s19996_s15 + $0xb94] sm:$0xff]  }
 0x2e6   :  { %5680 = vst [vmem:[#allocation3 + $0xb2c] sm:$0xf] %v5679_v57  ;;  %v5683_v59 = vld [vmem:[%s19996_s15 + $0xb48] sm:$0xf]  ;;  %v5685_v60 = vld [vmem:[%s19996_s15 + $0xb30] sm:$0xf] }
 0x2e7   :  { %5682 = vst [vmem:[#allocation3 + $0xb30] sm:$0xf] %v5681_v58  ;;  %5684 = vst [vmem:[#allocation3 + $0xb34] sm:$0xf] %v5683_v59  ;;  %v5687_v61 = vld [vmem:[%s19996_s15 + $0xb4c] sm:$0xf] }
 0x2e8   :  { %5686 = vst [vmem:[#allocation3 + $0xb38] sm:$0xf] %v5685_v60  ;;  %v5689_v62 = vld [vmem:[%s19996_s15 + $0xb34] sm:$0xf]  ;;  %v5691_v63 = vld [vmem:[%s19996_s15 + $0xb50] sm:$0xf] }
 0x2e9   :  { %5688 = vst [vmem:[#allocation3 + $0xb3c] sm:$0xf] %v5687_v61  ;;  %5690 = vst [vmem:[#allocation3 + $0xb40] sm:$0xf] %v5689_v62  ;;  %v5693_v0 = vld [vmem:[%s19996_s15 + $0xb38] sm:$0xf] }
 0x2ea   :  { %5692 = vst [vmem:[#allocation3 + $0xb44] sm:$0xf] %v5691_v63  ;;  %v5695_v1 = vld [vmem:[%s19996_s15 + $0xb54] sm:$0xf]  ;;  %v5697_v2 = vld [vmem:[%s19996_s15 + $0xb3c] sm:$0xf] }
 0x2eb   :  { %5694 = vst [vmem:[#allocation3 + $0xb48] sm:$0xf] %v5693_v0  ;;  %5696 = vst [vmem:[#allocation3 + $0xb4c] sm:$0xf] %v5695_v1  ;;  %v5699_v3 = vld [vmem:[%s19996_s15 + $0xb58] sm:$0xf] }
 0x2ec   :  { %5698 = vst [vmem:[#allocation3 + $0xb50] sm:$0xf] %v5697_v2  ;;  %v5701_v4 = vld [vmem:[%s19996_s15 + $0xb40] sm:$0xf]  ;;  %5700 = vst [vmem:[#allocation3 + $0xb54] sm:$0xf] %v5699_v3 }
 0x2ed   :  { %5702 = vst [vmem:[#allocation3 + $0xb58] sm:$0xf] %v5701_v4  ;;  %5704 = vst [vmem:[#allocation3 + $0xb5c] sm:$0xff] %v5703_v5   ;;  %v5707_v6 = vld [vmem:[%s19996_s15 + $0xb7c] sm:$0xf]  ;;  %v5759_v31 = vld [vmem:[%s19996_s15 + $0xbcc] sm:$0xff]  }
 0x2ee   :  { %v5709_v7 = vld [vmem:[%s19996_s15 + $0xb64] sm:$0xf]  ;;  %v5711_v8 = vld [vmem:[%s19996_s15 + $0xb80] sm:$0xf]  ;;  %5708 = vst [vmem:[#allocation3 + $0xb64] sm:$0xf] %v5707_v6 }
 0x2ef   :  { %5710 = vst [vmem:[#allocation3 + $0xb68] sm:$0xf] %v5709_v7  ;;  %5712 = vst [vmem:[#allocation3 + $0xb6c] sm:$0xf] %v5711_v8  ;;  %v5713_v9 = vld [vmem:[%s19996_s15 + $0xb68] sm:$0xf] }
 0x2f0   :  { %v5715_v10 = vld [vmem:[%s19996_s15 + $0xb84] sm:$0xf]  ;;  %v5717_v11 = vld [vmem:[%s19996_s15 + $0xb6c] sm:$0xf]  ;;  %5714 = vst [vmem:[#allocation3 + $0xb70] sm:$0xf] %v5713_v9 }
 0x2f1   :  { %5716 = vst [vmem:[#allocation3 + $0xb74] sm:$0xf] %v5715_v10  ;;  %5718 = vst [vmem:[#allocation3 + $0xb78] sm:$0xf] %v5717_v11  ;;  %v5719_v12 = vld [vmem:[%s19996_s15 + $0xb88] sm:$0xf] }
 0x2f2   :  { %v5721_v13 = vld [vmem:[%s19996_s15 + $0xb70] sm:$0xf]  ;;  %v5723_v14 = vld [vmem:[%s19996_s15 + $0xb8c] sm:$0xf]  ;;  %5720 = vst [vmem:[#allocation3 + $0xb7c] sm:$0xf] %v5719_v12 }
 0x2f3   :  { %5722 = vst [vmem:[#allocation3 + $0xb80] sm:$0xf] %v5721_v13  ;;  %5724 = vst [vmem:[#allocation3 + $0xb84] sm:$0xf] %v5723_v14  ;;  %v5725_v15 = vld [vmem:[%s19996_s15 + $0xb74] sm:$0xf] }
 0x2f4   :  { %v5727_v16 = vld [vmem:[%s19996_s15 + $0xb90] sm:$0xf]  ;;  %v5729_v17 = vld [vmem:[%s19996_s15 + $0xb78] sm:$0xf]  ;;  %5726 = vst [vmem:[#allocation3 + $0xb88] sm:$0xf] %v5725_v15 }
 0x2f5   :  { %5728 = vst [vmem:[#allocation3 + $0xb8c] sm:$0xf] %v5727_v16  ;;  %5730 = vst [vmem:[#allocation3 + $0xb90] sm:$0xf] %v5729_v17  ;;  %v5735_v19 = vld [vmem:[%s19996_s15 + $0xbb4] sm:$0xf] }
 0x2f6   :  { %v5737_v20 = vld [vmem:[%s19996_s15 + $0xb9c] sm:$0xf]  ;;  %5732 = vst [vmem:[#allocation3 + $0xb94] sm:$0xff] %v5731_v18   ;;  %5736 = vst [vmem:[#allocation3 + $0xb9c] sm:$0xf] %v5735_v19  ;;  %v5787_v44 = vld [vmem:[%s19996_s15 + $0xc04] sm:$0xff]  }
 0x2f7   :  { %5738 = vst [vmem:[#allocation3 + $0xba0] sm:$0xf] %v5737_v20  ;;  %v5739_v21 = vld [vmem:[%s19996_s15 + $0xbb8] sm:$0xf]  ;;  %v5741_v22 = vld [vmem:[%s19996_s15 + $0xba0] sm:$0xf] }
 0x2f8   :  { %v5743_v23 = vld [vmem:[%s19996_s15 + $0xbbc] sm:$0xf]  ;;  %5740 = vst [vmem:[#allocation3 + $0xba4] sm:$0xf] %v5739_v21  ;;  %5742 = vst [vmem:[#allocation3 + $0xba8] sm:$0xf] %v5741_v22 }
 0x2f9   :  { %5744 = vst [vmem:[#allocation3 + $0xbac] sm:$0xf] %v5743_v23  ;;  %v5745_v24 = vld [vmem:[%s19996_s15 + $0xba4] sm:$0xf]  ;;  %v5747_v25 = vld [vmem:[%s19996_s15 + $0xbc0] sm:$0xf] }
 0x2fa   :  { %v5749_v26 = vld [vmem:[%s19996_s15 + $0xba8] sm:$0xf]  ;;  %5746 = vst [vmem:[#allocation3 + $0xbb0] sm:$0xf] %v5745_v24  ;;  %5748 = vst [vmem:[#allocation3 + $0xbb4] sm:$0xf] %v5747_v25 }
 0x2fb   :  { %5750 = vst [vmem:[#allocation3 + $0xbb8] sm:$0xf] %v5749_v26  ;;  %v5751_v27 = vld [vmem:[%s19996_s15 + $0xbc4] sm:$0xf]  ;;  %v5753_v28 = vld [vmem:[%s19996_s15 + $0xbac] sm:$0xf] }
 0x2fc   :  { %v5755_v29 = vld [vmem:[%s19996_s15 + $0xbc8] sm:$0xf]  ;;  %5752 = vst [vmem:[#allocation3 + $0xbbc] sm:$0xf] %v5751_v27  ;;  %5754 = vst [vmem:[#allocation3 + $0xbc0] sm:$0xf] %v5753_v28 }
 0x2fd   :  { %5756 = vst [vmem:[#allocation3 + $0xbc4] sm:$0xf] %v5755_v29  ;;  %v5757_v30 = vld [vmem:[%s19996_s15 + $0xbb0] sm:$0xf]  ;;  %v5763_v32 = vld [vmem:[%s19996_s15 + $0xbec] sm:$0xf] }
 0x2fe   :  { %5758 = vst [vmem:[#allocation3 + $0xbc8] sm:$0xf] %v5757_v30  ;;  %5760 = vst [vmem:[#allocation3 + $0xbcc] sm:$0xff] %v5759_v31   ;;  %v5765_v33 = vld [vmem:[%s19996_s15 + $0xbd4] sm:$0xf]  ;;  %v5815_v57 = vld [vmem:[%s19996_s15 + $0xc3c] sm:$0xff]  }
 0x2ff   :  { %5764 = vst [vmem:[#allocation3 + $0xbd4] sm:$0xf] %v5763_v32  ;;  %v5767_v34 = vld [vmem:[%s19996_s15 + $0xbf0] sm:$0xf]  ;;  %v5769_v35 = vld [vmem:[%s19996_s15 + $0xbd8] sm:$0xf] }
 0x300   :  { %5766 = vst [vmem:[#allocation3 + $0xbd8] sm:$0xf] %v5765_v33  ;;  %5768 = vst [vmem:[#allocation3 + $0xbdc] sm:$0xf] %v5767_v34  ;;  %v5771_v36 = vld [vmem:[%s19996_s15 + $0xbf4] sm:$0xf] }
 0x301   :  { %5770 = vst [vmem:[#allocation3 + $0xbe0] sm:$0xf] %v5769_v35  ;;  %v5773_v37 = vld [vmem:[%s19996_s15 + $0xbdc] sm:$0xf]  ;;  %v5775_v38 = vld [vmem:[%s19996_s15 + $0xbf8] sm:$0xf] }
 0x302   :  { %5772 = vst [vmem:[#allocation3 + $0xbe4] sm:$0xf] %v5771_v36  ;;  %5774 = vst [vmem:[#allocation3 + $0xbe8] sm:$0xf] %v5773_v37  ;;  %v5777_v39 = vld [vmem:[%s19996_s15 + $0xbe0] sm:$0xf] }
 0x303   :  { %5776 = vst [vmem:[#allocation3 + $0xbec] sm:$0xf] %v5775_v38  ;;  %v5779_v40 = vld [vmem:[%s19996_s15 + $0xbfc] sm:$0xf]  ;;  %v5781_v41 = vld [vmem:[%s19996_s15 + $0xbe4] sm:$0xf] }
 0x304   :  { %5778 = vst [vmem:[#allocation3 + $0xbf0] sm:$0xf] %v5777_v39  ;;  %5780 = vst [vmem:[#allocation3 + $0xbf4] sm:$0xf] %v5779_v40  ;;  %v5783_v42 = vld [vmem:[%s19996_s15 + $0xc00] sm:$0xf] }
 0x305   :  { %5782 = vst [vmem:[#allocation3 + $0xbf8] sm:$0xf] %v5781_v41  ;;  %v5785_v43 = vld [vmem:[%s19996_s15 + $0xbe8] sm:$0xf]  ;;  %5784 = vst [vmem:[#allocation3 + $0xbfc] sm:$0xf] %v5783_v42 }
 0x306   :  { %5786 = vst [vmem:[#allocation3 + $0xc00] sm:$0xf] %v5785_v43  ;;  %5788 = vst [vmem:[#allocation3 + $0xc04] sm:$0xff] %v5787_v44   ;;  %v5791_v45 = vld [vmem:[%s19996_s15 + $0xc24] sm:$0xf]  ;;  %v5843_v6 = vld [vmem:[%s19996_s15 + $0xc74] sm:$0xff]  }
 0x307   :  { %v5793_v46 = vld [vmem:[%s19996_s15 + $0xc0c] sm:$0xf]  ;;  %v5795_v47 = vld [vmem:[%s19996_s15 + $0xc28] sm:$0xf]  ;;  %5792 = vst [vmem:[#allocation3 + $0xc0c] sm:$0xf] %v5791_v45 }
 0x308   :  { %5794 = vst [vmem:[#allocation3 + $0xc10] sm:$0xf] %v5793_v46  ;;  %5796 = vst [vmem:[#allocation3 + $0xc14] sm:$0xf] %v5795_v47  ;;  %v5797_v48 = vld [vmem:[%s19996_s15 + $0xc10] sm:$0xf] }
 0x309   :  { %v5799_v49 = vld [vmem:[%s19996_s15 + $0xc2c] sm:$0xf]  ;;  %v5801_v50 = vld [vmem:[%s19996_s15 + $0xc14] sm:$0xf]  ;;  %5798 = vst [vmem:[#allocation3 + $0xc18] sm:$0xf] %v5797_v48 }
 0x30a   :  { %5800 = vst [vmem:[#allocation3 + $0xc1c] sm:$0xf] %v5799_v49  ;;  %5802 = vst [vmem:[#allocation3 + $0xc20] sm:$0xf] %v5801_v50  ;;  %v5803_v51 = vld [vmem:[%s19996_s15 + $0xc30] sm:$0xf] }
 0x30b   :  { %v5805_v52 = vld [vmem:[%s19996_s15 + $0xc18] sm:$0xf]  ;;  %v5807_v53 = vld [vmem:[%s19996_s15 + $0xc34] sm:$0xf]  ;;  %5804 = vst [vmem:[#allocation3 + $0xc24] sm:$0xf] %v5803_v51 }
 0x30c   :  { %5806 = vst [vmem:[#allocation3 + $0xc28] sm:$0xf] %v5805_v52  ;;  %5808 = vst [vmem:[#allocation3 + $0xc2c] sm:$0xf] %v5807_v53  ;;  %v5809_v54 = vld [vmem:[%s19996_s15 + $0xc1c] sm:$0xf] }
 0x30d   :  { %v5811_v55 = vld [vmem:[%s19996_s15 + $0xc38] sm:$0xf]  ;;  %v5813_v56 = vld [vmem:[%s19996_s15 + $0xc20] sm:$0xf]  ;;  %5810 = vst [vmem:[#allocation3 + $0xc30] sm:$0xf] %v5809_v54 }
 0x30e   :  { %5812 = vst [vmem:[#allocation3 + $0xc34] sm:$0xf] %v5811_v55  ;;  %5814 = vst [vmem:[#allocation3 + $0xc38] sm:$0xf] %v5813_v56  ;;  %v5819_v58 = vld [vmem:[%s19996_s15 + $0xc5c] sm:$0xf] }
 0x30f   :  { %v5821_v59 = vld [vmem:[%s19996_s15 + $0xc44] sm:$0xf]  ;;  %5816 = vst [vmem:[#allocation3 + $0xc3c] sm:$0xff] %v5815_v57   ;;  %5820 = vst [vmem:[#allocation3 + $0xc44] sm:$0xf] %v5819_v58  ;;  %v5871_v19 = vld [vmem:[%s19996_s15 + $0xcac] sm:$0xff]  }
 0x310   :  { %5822 = vst [vmem:[#allocation3 + $0xc48] sm:$0xf] %v5821_v59  ;;  %v5823_v60 = vld [vmem:[%s19996_s15 + $0xc60] sm:$0xf]  ;;  %v5825_v61 = vld [vmem:[%s19996_s15 + $0xc48] sm:$0xf] }
 0x311   :  { %v5827_v62 = vld [vmem:[%s19996_s15 + $0xc64] sm:$0xf]  ;;  %5824 = vst [vmem:[#allocation3 + $0xc4c] sm:$0xf] %v5823_v60  ;;  %5826 = vst [vmem:[#allocation3 + $0xc50] sm:$0xf] %v5825_v61 }
 0x312   :  { %5828 = vst [vmem:[#allocation3 + $0xc54] sm:$0xf] %v5827_v62  ;;  %v5829_v63 = vld [vmem:[%s19996_s15 + $0xc4c] sm:$0xf]  ;;  %v5831_v0 = vld [vmem:[%s19996_s15 + $0xc68] sm:$0xf] }
 0x313   :  { %v5833_v1 = vld [vmem:[%s19996_s15 + $0xc50] sm:$0xf]  ;;  %5830 = vst [vmem:[#allocation3 + $0xc58] sm:$0xf] %v5829_v63  ;;  %5832 = vst [vmem:[#allocation3 + $0xc5c] sm:$0xf] %v5831_v0 }
 0x314   :  { %5834 = vst [vmem:[#allocation3 + $0xc60] sm:$0xf] %v5833_v1  ;;  %v5835_v2 = vld [vmem:[%s19996_s15 + $0xc6c] sm:$0xf]  ;;  %v5837_v3 = vld [vmem:[%s19996_s15 + $0xc54] sm:$0xf] }
 0x315   :  { %v5839_v4 = vld [vmem:[%s19996_s15 + $0xc70] sm:$0xf]  ;;  %5836 = vst [vmem:[#allocation3 + $0xc64] sm:$0xf] %v5835_v2  ;;  %5838 = vst [vmem:[#allocation3 + $0xc68] sm:$0xf] %v5837_v3 }
 0x316   :  { %5840 = vst [vmem:[#allocation3 + $0xc6c] sm:$0xf] %v5839_v4  ;;  %v5841_v5 = vld [vmem:[%s19996_s15 + $0xc58] sm:$0xf]  ;;  %v5847_v7 = vld [vmem:[%s19996_s15 + $0xc94] sm:$0xf] }
 0x317   :  { %5842 = vst [vmem:[#allocation3 + $0xc70] sm:$0xf] %v5841_v5  ;;  %5844 = vst [vmem:[#allocation3 + $0xc74] sm:$0xff] %v5843_v6   ;;  %v5849_v8 = vld [vmem:[%s19996_s15 + $0xc7c] sm:$0xf]  ;;  %v5899_v32 = vld [vmem:[%s19996_s15 + $0xce4] sm:$0xff]  }
 0x318   :  { %5848 = vst [vmem:[#allocation3 + $0xc7c] sm:$0xf] %v5847_v7  ;;  %v5851_v9 = vld [vmem:[%s19996_s15 + $0xc98] sm:$0xf]  ;;  %v5853_v10 = vld [vmem:[%s19996_s15 + $0xc80] sm:$0xf] }
 0x319   :  { %5850 = vst [vmem:[#allocation3 + $0xc80] sm:$0xf] %v5849_v8  ;;  %5852 = vst [vmem:[#allocation3 + $0xc84] sm:$0xf] %v5851_v9  ;;  %v5855_v11 = vld [vmem:[%s19996_s15 + $0xc9c] sm:$0xf] }
 0x31a   :  { %5854 = vst [vmem:[#allocation3 + $0xc88] sm:$0xf] %v5853_v10  ;;  %v5857_v12 = vld [vmem:[%s19996_s15 + $0xc84] sm:$0xf]  ;;  %v5859_v13 = vld [vmem:[%s19996_s15 + $0xca0] sm:$0xf] }
 0x31b   :  { %5856 = vst [vmem:[#allocation3 + $0xc8c] sm:$0xf] %v5855_v11  ;;  %5858 = vst [vmem:[#allocation3 + $0xc90] sm:$0xf] %v5857_v12  ;;  %v5861_v14 = vld [vmem:[%s19996_s15 + $0xc88] sm:$0xf] }
 0x31c   :  { %5860 = vst [vmem:[#allocation3 + $0xc94] sm:$0xf] %v5859_v13  ;;  %v5863_v15 = vld [vmem:[%s19996_s15 + $0xca4] sm:$0xf]  ;;  %v5865_v16 = vld [vmem:[%s19996_s15 + $0xc8c] sm:$0xf] }
 0x31d   :  { %5862 = vst [vmem:[#allocation3 + $0xc98] sm:$0xf] %v5861_v14  ;;  %5864 = vst [vmem:[#allocation3 + $0xc9c] sm:$0xf] %v5863_v15  ;;  %v5867_v17 = vld [vmem:[%s19996_s15 + $0xca8] sm:$0xf] }
 0x31e   :  { %5866 = vst [vmem:[#allocation3 + $0xca0] sm:$0xf] %v5865_v16  ;;  %v5869_v18 = vld [vmem:[%s19996_s15 + $0xc90] sm:$0xf]  ;;  %5868 = vst [vmem:[#allocation3 + $0xca4] sm:$0xf] %v5867_v17 }
 0x31f   :  { %5870 = vst [vmem:[#allocation3 + $0xca8] sm:$0xf] %v5869_v18  ;;  %5872 = vst [vmem:[#allocation3 + $0xcac] sm:$0xff] %v5871_v19   ;;  %v5875_v20 = vld [vmem:[%s19996_s15 + $0xccc] sm:$0xf]  ;;  %v5927_v45 = vld [vmem:[%s19996_s15 + $0xd1c] sm:$0xff]  }
 0x320   :  { %v5877_v21 = vld [vmem:[%s19996_s15 + $0xcb4] sm:$0xf]  ;;  %v5879_v22 = vld [vmem:[%s19996_s15 + $0xcd0] sm:$0xf]  ;;  %5876 = vst [vmem:[#allocation3 + $0xcb4] sm:$0xf] %v5875_v20 }
 0x321   :  { %5878 = vst [vmem:[#allocation3 + $0xcb8] sm:$0xf] %v5877_v21  ;;  %5880 = vst [vmem:[#allocation3 + $0xcbc] sm:$0xf] %v5879_v22  ;;  %v5881_v23 = vld [vmem:[%s19996_s15 + $0xcb8] sm:$0xf] }
 0x322   :  { %v5883_v24 = vld [vmem:[%s19996_s15 + $0xcd4] sm:$0xf]  ;;  %v5885_v25 = vld [vmem:[%s19996_s15 + $0xcbc] sm:$0xf]  ;;  %5882 = vst [vmem:[#allocation3 + $0xcc0] sm:$0xf] %v5881_v23 }
 0x323   :  { %5884 = vst [vmem:[#allocation3 + $0xcc4] sm:$0xf] %v5883_v24  ;;  %5886 = vst [vmem:[#allocation3 + $0xcc8] sm:$0xf] %v5885_v25  ;;  %v5887_v26 = vld [vmem:[%s19996_s15 + $0xcd8] sm:$0xf] }
 0x324   :  { %v5889_v27 = vld [vmem:[%s19996_s15 + $0xcc0] sm:$0xf]  ;;  %v5891_v28 = vld [vmem:[%s19996_s15 + $0xcdc] sm:$0xf]  ;;  %5888 = vst [vmem:[#allocation3 + $0xccc] sm:$0xf] %v5887_v26 }
 0x325   :  { %5890 = vst [vmem:[#allocation3 + $0xcd0] sm:$0xf] %v5889_v27  ;;  %5892 = vst [vmem:[#allocation3 + $0xcd4] sm:$0xf] %v5891_v28  ;;  %v5893_v29 = vld [vmem:[%s19996_s15 + $0xcc4] sm:$0xf] }
 0x326   :  { %v5895_v30 = vld [vmem:[%s19996_s15 + $0xce0] sm:$0xf]  ;;  %v5897_v31 = vld [vmem:[%s19996_s15 + $0xcc8] sm:$0xf]  ;;  %5894 = vst [vmem:[#allocation3 + $0xcd8] sm:$0xf] %v5893_v29 }
 0x327   :  { %5896 = vst [vmem:[#allocation3 + $0xcdc] sm:$0xf] %v5895_v30  ;;  %5898 = vst [vmem:[#allocation3 + $0xce0] sm:$0xf] %v5897_v31  ;;  %v5903_v33 = vld [vmem:[%s19996_s15 + $0xd04] sm:$0xf] }
 0x328   :  { %v5905_v34 = vld [vmem:[%s19996_s15 + $0xcec] sm:$0xf]  ;;  %5900 = vst [vmem:[#allocation3 + $0xce4] sm:$0xff] %v5899_v32   ;;  %5904 = vst [vmem:[#allocation3 + $0xcec] sm:$0xf] %v5903_v33  ;;  %v5955_v58 = vld [vmem:[%s19996_s15 + $0xd54] sm:$0xff]  }
 0x329   :  { %5906 = vst [vmem:[#allocation3 + $0xcf0] sm:$0xf] %v5905_v34  ;;  %v5907_v35 = vld [vmem:[%s19996_s15 + $0xd08] sm:$0xf]  ;;  %v5909_v36 = vld [vmem:[%s19996_s15 + $0xcf0] sm:$0xf] }
 0x32a   :  { %v5911_v37 = vld [vmem:[%s19996_s15 + $0xd0c] sm:$0xf]  ;;  %5908 = vst [vmem:[#allocation3 + $0xcf4] sm:$0xf] %v5907_v35  ;;  %5910 = vst [vmem:[#allocation3 + $0xcf8] sm:$0xf] %v5909_v36 }
 0x32b   :  { %5912 = vst [vmem:[#allocation3 + $0xcfc] sm:$0xf] %v5911_v37  ;;  %v5913_v38 = vld [vmem:[%s19996_s15 + $0xcf4] sm:$0xf]  ;;  %v5915_v39 = vld [vmem:[%s19996_s15 + $0xd10] sm:$0xf] }
 0x32c   :  { %v5917_v40 = vld [vmem:[%s19996_s15 + $0xcf8] sm:$0xf]  ;;  %5914 = vst [vmem:[#allocation3 + $0xd00] sm:$0xf] %v5913_v38  ;;  %5916 = vst [vmem:[#allocation3 + $0xd04] sm:$0xf] %v5915_v39 }
 0x32d   :  { %5918 = vst [vmem:[#allocation3 + $0xd08] sm:$0xf] %v5917_v40  ;;  %v5919_v41 = vld [vmem:[%s19996_s15 + $0xd14] sm:$0xf]  ;;  %v5921_v42 = vld [vmem:[%s19996_s15 + $0xcfc] sm:$0xf] }
 0x32e   :  { %v5923_v43 = vld [vmem:[%s19996_s15 + $0xd18] sm:$0xf]  ;;  %5920 = vst [vmem:[#allocation3 + $0xd0c] sm:$0xf] %v5919_v41  ;;  %5922 = vst [vmem:[#allocation3 + $0xd10] sm:$0xf] %v5921_v42 }
 0x32f   :  { %5924 = vst [vmem:[#allocation3 + $0xd14] sm:$0xf] %v5923_v43  ;;  %v5925_v44 = vld [vmem:[%s19996_s15 + $0xd00] sm:$0xf]  ;;  %v5931_v46 = vld [vmem:[%s19996_s15 + $0xd3c] sm:$0xf] }
 0x330   :  { %5926 = vst [vmem:[#allocation3 + $0xd18] sm:$0xf] %v5925_v44  ;;  %5928 = vst [vmem:[#allocation3 + $0xd1c] sm:$0xff] %v5927_v45   ;;  %v5933_v47 = vld [vmem:[%s19996_s15 + $0xd24] sm:$0xf]  ;;  %v5983_v7 = vld [vmem:[%s19996_s15 + $0xd8c] sm:$0xff]  }
 0x331   :  { %5932 = vst [vmem:[#allocation3 + $0xd24] sm:$0xf] %v5931_v46  ;;  %v5935_v48 = vld [vmem:[%s19996_s15 + $0xd40] sm:$0xf]  ;;  %v5937_v49 = vld [vmem:[%s19996_s15 + $0xd28] sm:$0xf] }
 0x332   :  { %5934 = vst [vmem:[#allocation3 + $0xd28] sm:$0xf] %v5933_v47  ;;  %5936 = vst [vmem:[#allocation3 + $0xd2c] sm:$0xf] %v5935_v48  ;;  %v5939_v50 = vld [vmem:[%s19996_s15 + $0xd44] sm:$0xf] }
 0x333   :  { %5938 = vst [vmem:[#allocation3 + $0xd30] sm:$0xf] %v5937_v49  ;;  %v5941_v51 = vld [vmem:[%s19996_s15 + $0xd2c] sm:$0xf]  ;;  %v5943_v52 = vld [vmem:[%s19996_s15 + $0xd48] sm:$0xf] }
 0x334   :  { %5940 = vst [vmem:[#allocation3 + $0xd34] sm:$0xf] %v5939_v50  ;;  %5942 = vst [vmem:[#allocation3 + $0xd38] sm:$0xf] %v5941_v51  ;;  %v5945_v53 = vld [vmem:[%s19996_s15 + $0xd30] sm:$0xf] }
 0x335   :  { %5944 = vst [vmem:[#allocation3 + $0xd3c] sm:$0xf] %v5943_v52  ;;  %v5947_v54 = vld [vmem:[%s19996_s15 + $0xd4c] sm:$0xf]  ;;  %v5949_v55 = vld [vmem:[%s19996_s15 + $0xd34] sm:$0xf] }
 0x336   :  { %5946 = vst [vmem:[#allocation3 + $0xd40] sm:$0xf] %v5945_v53  ;;  %5948 = vst [vmem:[#allocation3 + $0xd44] sm:$0xf] %v5947_v54  ;;  %v5951_v56 = vld [vmem:[%s19996_s15 + $0xd50] sm:$0xf] }
 0x337   :  { %5950 = vst [vmem:[#allocation3 + $0xd48] sm:$0xf] %v5949_v55  ;;  %v5953_v57 = vld [vmem:[%s19996_s15 + $0xd38] sm:$0xf]  ;;  %5952 = vst [vmem:[#allocation3 + $0xd4c] sm:$0xf] %v5951_v56 }
 0x338   :  { %5954 = vst [vmem:[#allocation3 + $0xd50] sm:$0xf] %v5953_v57  ;;  %5956 = vst [vmem:[#allocation3 + $0xd54] sm:$0xff] %v5955_v58   ;;  %v5959_v59 = vld [vmem:[%s19996_s15 + $0xd74] sm:$0xf]  ;;  %v6011_v20 = vld [vmem:[%s19996_s15 + $0xdc4] sm:$0xff]  }
 0x339   :  { %v5961_v60 = vld [vmem:[%s19996_s15 + $0xd5c] sm:$0xf]  ;;  %v5963_v61 = vld [vmem:[%s19996_s15 + $0xd78] sm:$0xf]  ;;  %5960 = vst [vmem:[#allocation3 + $0xd5c] sm:$0xf] %v5959_v59 }
 0x33a   :  { %5962 = vst [vmem:[#allocation3 + $0xd60] sm:$0xf] %v5961_v60  ;;  %5964 = vst [vmem:[#allocation3 + $0xd64] sm:$0xf] %v5963_v61  ;;  %v5965_v62 = vld [vmem:[%s19996_s15 + $0xd60] sm:$0xf] }
 0x33b   :  { %v5967_v63 = vld [vmem:[%s19996_s15 + $0xd7c] sm:$0xf]  ;;  %v5969_v0 = vld [vmem:[%s19996_s15 + $0xd64] sm:$0xf]  ;;  %5966 = vst [vmem:[#allocation3 + $0xd68] sm:$0xf] %v5965_v62 }
 0x33c   :  { %5968 = vst [vmem:[#allocation3 + $0xd6c] sm:$0xf] %v5967_v63  ;;  %5970 = vst [vmem:[#allocation3 + $0xd70] sm:$0xf] %v5969_v0  ;;  %v5971_v1 = vld [vmem:[%s19996_s15 + $0xd80] sm:$0xf] }
 0x33d   :  { %v5973_v2 = vld [vmem:[%s19996_s15 + $0xd68] sm:$0xf]  ;;  %v5975_v3 = vld [vmem:[%s19996_s15 + $0xd84] sm:$0xf]  ;;  %5972 = vst [vmem:[#allocation3 + $0xd74] sm:$0xf] %v5971_v1 }
 0x33e   :  { %5974 = vst [vmem:[#allocation3 + $0xd78] sm:$0xf] %v5973_v2  ;;  %5976 = vst [vmem:[#allocation3 + $0xd7c] sm:$0xf] %v5975_v3  ;;  %v5977_v4 = vld [vmem:[%s19996_s15 + $0xd6c] sm:$0xf] }
 0x33f   :  { %v5979_v5 = vld [vmem:[%s19996_s15 + $0xd88] sm:$0xf]  ;;  %v5981_v6 = vld [vmem:[%s19996_s15 + $0xd70] sm:$0xf]  ;;  %5978 = vst [vmem:[#allocation3 + $0xd80] sm:$0xf] %v5977_v4 }
 0x340   :  { %5980 = vst [vmem:[#allocation3 + $0xd84] sm:$0xf] %v5979_v5  ;;  %5982 = vst [vmem:[#allocation3 + $0xd88] sm:$0xf] %v5981_v6  ;;  %v5987_v8 = vld [vmem:[%s19996_s15 + $0xdac] sm:$0xf] }
 0x341   :  { %v5989_v9 = vld [vmem:[%s19996_s15 + $0xd94] sm:$0xf]  ;;  %5984 = vst [vmem:[#allocation3 + $0xd8c] sm:$0xff] %v5983_v7   ;;  %5988 = vst [vmem:[#allocation3 + $0xd94] sm:$0xf] %v5987_v8 }
 0x342   :  { %5990 = vst [vmem:[#allocation3 + $0xd98] sm:$0xf] %v5989_v9  ;;  %v5991_v10 = vld [vmem:[%s19996_s15 + $0xdb0] sm:$0xf]  ;;  %v5993_v11 = vld [vmem:[%s19996_s15 + $0xd98] sm:$0xf] }
 0x343   :  { %v5995_v12 = vld [vmem:[%s19996_s15 + $0xdb4] sm:$0xf]  ;;  %5992 = vst [vmem:[#allocation3 + $0xd9c] sm:$0xf] %v5991_v10  ;;  %5994 = vst [vmem:[#allocation3 + $0xda0] sm:$0xf] %v5993_v11 }
 0x344   :  { %5996 = vst [vmem:[#allocation3 + $0xda4] sm:$0xf] %v5995_v12  ;;  %v5997_v13 = vld [vmem:[%s19996_s15 + $0xd9c] sm:$0xf]  ;;  %v5999_v14 = vld [vmem:[%s19996_s15 + $0xdb8] sm:$0xf] }
 0x345   :  { %v6001_v15 = vld [vmem:[%s19996_s15 + $0xda0] sm:$0xf]  ;;  %5998 = vst [vmem:[#allocation3 + $0xda8] sm:$0xf] %v5997_v13  ;;  %6000 = vst [vmem:[#allocation3 + $0xdac] sm:$0xf] %v5999_v14 }
 0x346   :  { %6002 = vst [vmem:[#allocation3 + $0xdb0] sm:$0xf] %v6001_v15  ;;  %v6003_v16 = vld [vmem:[%s19996_s15 + $0xdbc] sm:$0xf]  ;;  %v6005_v17 = vld [vmem:[%s19996_s15 + $0xda4] sm:$0xf] }
 0x347   :  { %v6007_v18 = vld [vmem:[%s19996_s15 + $0xdc0] sm:$0xf]  ;;  %6004 = vst [vmem:[#allocation3 + $0xdb4] sm:$0xf] %v6003_v16  ;;  %6006 = vst [vmem:[#allocation3 + $0xdb8] sm:$0xf] %v6005_v17 }
 0x348   :  { %6008 = vst [vmem:[#allocation3 + $0xdbc] sm:$0xf] %v6007_v18  ;;  %v6009_v19 = vld [vmem:[%s19996_s15 + $0xda8] sm:$0xf]  ;;  %v6015_v21 = vld [vmem:[%s19996_s15 + $0xde4] sm:$0xf] }
 0x349   :  { %6010 = vst [vmem:[#allocation3 + $0xdc0] sm:$0xf] %v6009_v19  ;;  %6012 = vst [vmem:[#allocation3 + $0xdc4] sm:$0xff] %v6011_v20   ;;  %v6017_v22 = vld [vmem:[%s19996_s15 + $0xdcc] sm:$0xf] }
 0x34a   :  { %6016 = vst [vmem:[#allocation3 + $0xdcc] sm:$0xf] %v6015_v21  ;;  %v6019_v23 = vld [vmem:[%s19996_s15 + $0xde8] sm:$0xf]  ;;  %v6021_v24 = vld [vmem:[%s19996_s15 + $0xdd0] sm:$0xf] }
 0x34b   :  { %6018 = vst [vmem:[#allocation3 + $0xdd0] sm:$0xf] %v6017_v22  ;;  %6020 = vst [vmem:[#allocation3 + $0xdd4] sm:$0xf] %v6019_v23  ;;  %v6023_v25 = vld [vmem:[%s19996_s15 + $0xdec] sm:$0xf] }
 0x34c   :  { %6022 = vst [vmem:[#allocation3 + $0xdd8] sm:$0xf] %v6021_v24  ;;  %v6025_v26 = vld [vmem:[%s19996_s15 + $0xdd4] sm:$0xf]  ;;  %v6027_v27 = vld [vmem:[%s19996_s15 + $0xdf0] sm:$0xf] }
 0x34d   :  { %6024 = vst [vmem:[#allocation3 + $0xddc] sm:$0xf] %v6023_v25  ;;  %6026 = vst [vmem:[#allocation3 + $0xde0] sm:$0xf] %v6025_v26  ;;  %v6029_v28 = vld [vmem:[%s19996_s15 + $0xdd8] sm:$0xf] }
 0x34e   :  { %6028 = vst [vmem:[#allocation3 + $0xde4] sm:$0xf] %v6027_v27  ;;  %v6031_v29 = vld [vmem:[%s19996_s15 + $0xdf4] sm:$0xf]  ;;  %v6033_v30 = vld [vmem:[%s19996_s15 + $0xddc] sm:$0xf] }
 0x34f   :  { %6030 = vst [vmem:[#allocation3 + $0xde8] sm:$0xf] %v6029_v28  ;;  %6032 = vst [vmem:[#allocation3 + $0xdec] sm:$0xf] %v6031_v29  ;;  %v6035_v31 = vld [vmem:[%s19996_s15 + $0xdf8] sm:$0xf] }
 0x350   :  { %6034 = vst [vmem:[#allocation3 + $0xdf0] sm:$0xf] %v6033_v30  ;;  %v6037_v32 = vld [vmem:[%s19996_s15 + $0xde0] sm:$0xf]  ;;  %v6039_v33 = vld [vmem:[%s19996_s15 + $0xdfc] sm:$0xf] }
 0x351   :  { %6036 = vst [vmem:[#allocation3 + $0xdf4] sm:$0xf] %v6035_v31  ;;  %6038 = vst [vmem:[#allocation3 + $0xdf8] sm:$0xf] %v6037_v32 }
 0x352   :  { %6040 = vst [vmem:[#allocation3 + $0xdfc] sm:$0xf] %v6039_v33 }
 0x353   :  { %11480 = vsyncadd [#allocation4 + $0x1], 57344  ;;  %s20002_s0 = sld [smem:[#allocation13_spill]]  ;;  %v15310_v35 = vmov 0.0   ;;  %vm15311_vm0 = vmmov 0   ;;  %vm11546_vm1 = vcmask 1041408  }
 0x354   :  { %15024 = vmatprep.subr.bf16.mxu0 %v15310_v35  ;;  %15038 = vmatprep.mubr.msk.bf16.mxu0 %vm15311_vm0, %v15310_v35  ;;  %v15120_v38 = vld [vmem:[%s19984_s3 + $0x4] ss:$8 sps:$4 sm:$0xff]   ;;  %v15122_v39 = vld [vmem:[%s19984_s3] ss:$8 sps:$4 sm:$0xff]   ;;  %v15123_v40 = vld [vmem:[%s19984_s3 + $0x14] ss:$8 sps:$4 sm:$0xff]  }
 0x355   :  { %11701 = vmatprep.subr.bf16.mxu1 %v15120_v38  ;;  %v15125_v42 = vld [vmem:[%s19984_s3 + $0x10] ss:$8 sps:$4 sm:$0xff]   ;;  %v15126_v43 = vld [vmem:[%s19984_s3 + $0x24] ss:$8 sps:$4 sm:$0xff]   ;;  %v15128_v45 = vld [vmem:[%s19984_s3 + $0x20] ss:$8 sps:$4 sm:$0xff]  }
 0x356   :  { %11702 = vmatpush1.bf16.msra.mxu1 %v15122_v39  ;;  %v15129_v46 = vld [vmem:[%s19984_s3 + $0x34] ss:$8 sps:$4 sm:$0xff]   ;;  %v15131_v49 = vld [vmem:[%s19984_s3 + $0x30] ss:$8 sps:$4 sm:$0xff]   ;;  %v15132_v50 = vld [vmem:[%s19984_s3 + $0x44] ss:$8 sps:$4 sm:$0xff]  }
 0x357   :  { %11703 = vmatprep.subr.bf16.mxu1 %v15123_v40  ;;  %s20003_s30 = sld [smem:[#allocation12_spill]]  ;;  %v15134_v52 = vld [vmem:[%s19984_s3 + $0x40] ss:$8 sps:$4 sm:$0xff]   ;;  %v15135_v53 = vld [vmem:[%s19984_s3 + $0x54] ss:$8 sps:$4 sm:$0xff]   ;;  %vm11542_vm2 = vcmask 818176   ;;  %v11611_v40 = vlaneseq }
 0x358   :  { %v15137_v56 = vld [vmem:[%s19984_s3 + $0x50] ss:$8 sps:$4 sm:$0xff]   ;;  %v15138_v57 = vld [vmem:[%s19984_s3 + $0x64] ss:$8 sps:$4 sm:$0xff]   ;;  %v15140_v58 = vld [vmem:[%s19984_s3 + $0x60] ss:$8 sps:$4 sm:$0xff]  }
 0x359   :  { %v15113_v34 = vld [vmem:[%s20002_s0] sm:$0xff]   ;;  %v15114_v36 = vld [vmem:[%s20002_s0 + $0x8] sm:$0xff]   ;;  %v15115_v37 = vld [vmem:[%s20002_s0 + $0x10] sm:$0xff]   ;;  %v15312_v61 = vmov 0  }
 0x35a   :  { %15025 = vmatpush3.bf16.msra.mxu0 %v15113_v34  ;;  %v15116_v41 = vld [vmem:[%s20002_s0 + $0x18] sm:$0xff]   ;;  %v15117_v44 = vld [vmem:[%s20002_s0 + $0x20] sm:$0xff]   ;;  %11704 = vmatpush1.bf16.msra.mxu1 %v15125_v42  ;;  %v15118_v47 = vld [vmem:[%s20002_s0 + $0x28] sm:$0xff]  }
 0x35b   :  { %15026 = vmatprep.subr.bf16.mxu0 %v15310_v35  ;;  %11705 = vmatprep.subr.bf16.mxu1 %v15126_v43  ;;  %v15119_v48 = vld [vmem:[%s20002_s0 + $0x30] ss:$0 sps:$4 sm:$0x33]   ;;  %v15141_v59 = vld [vmem:[%s19984_s3 + $0x74] ss:$8 sps:$4 sm:$0xff]  }
 0x35c   :  { %v11548_v54 = vsel %vm11546_vm1, %v15119_v48, 0  ;;  %v15143_v60 = vld [vmem:[%s19984_s3 + $0x70] ss:$8 sps:$4 sm:$0xff]   ;;  %11733 = vmatprep.mubr.bf16.mxu1 %v15312_v61  ;;  %v14837_v62 = vld [vmem:[%s19983_s2] ss:$0 sm:$0xff] }
 0x35d   :  { %v11481_v51 = vld [vmem:[%s20003_s30] sm:$0xff]  ;;  %v15194_v39 = vld [vmem:[%s19988_s7 + $0xc] ss:$16 sps:$4 sm:$0xff]  }
 0x35e   :  { %15027 = vmatpush3.bf16.msra.mxu0 %v15114_v36  ;;  %11706 = vmatpush1.bf16.msra.mxu1 %v15128_v45  ;;  %v11495_v55 = vpack.c.bf16 %v11481_v51, %v11481_v51  ;;  %v15146_v7 = vld [vmem:[%s19988_s7 + $0x4] ss:$16 sps:$4 sm:$0xff]   ;;  %v15144_v8 = vld [vmem:[%s19988_s7] ss:$16 sps:$4 sm:$0xff]  }
 0x35f   :  { %15028 = vmatprep.subr.bf16.mxu0 %v15310_v35  ;;  %11707 = vmatprep.subr.bf16.mxu1 %v15129_v46  ;;  %v15149_v9 = vld [vmem:[%s19988_s7 + $0x24] ss:$16 sps:$4 sm:$0xff]   ;;  %v15147_v10 = vld [vmem:[%s19988_s7 + $0x20] ss:$16 sps:$4 sm:$0xff]  }
 0x360   :  { %v15152_v11 = vld [vmem:[%s19988_s7 + $0x44] ss:$16 sps:$4 sm:$0xff]   ;;  %v15150_v12 = vld [vmem:[%s19988_s7 + $0x40] ss:$16 sps:$4 sm:$0xff]  }
 0x361   :  { %v15155_v13 = vld [vmem:[%s19988_s7 + $0x64] ss:$16 sps:$4 sm:$0xff]   ;;  %v15153_v14 = vld [vmem:[%s19988_s7 + $0x60] ss:$16 sps:$4 sm:$0xff]  }
 0x362   :  { %15029 = vmatpush3.bf16.msra.mxu0 %v15115_v37  ;;  %11708 = vmatpush1.bf16.msra.mxu1 %v15131_v49  ;;  %v15158_v15 = vld [vmem:[%s19988_s7 + $0x84] ss:$16 sps:$4 sm:$0xff]   ;;  %v15156_v16 = vld [vmem:[%s19988_s7 + $0x80] ss:$16 sps:$4 sm:$0xff]  }
 0x363   :  { %15030 = vmatprep.subr.bf16.mxu0 %v15310_v35  ;;  %11709 = vmatprep.subr.bf16.mxu1 %v15132_v50  ;;  %v15161_v17 = vld [vmem:[%s19988_s7 + $0xa4] ss:$16 sps:$4 sm:$0xff]   ;;  %v15159_v18 = vld [vmem:[%s19988_s7 + $0xa0] ss:$16 sps:$4 sm:$0xff]  }
 0x364   :  { %v15164_v19 = vld [vmem:[%s19988_s7 + $0xc4] ss:$16 sps:$4 sm:$0xff]   ;;  %v15162_v20 = vld [vmem:[%s19988_s7 + $0xc0] ss:$16 sps:$4 sm:$0xff]  }
 0x365   :  { %v15167_v21 = vld [vmem:[%s19988_s7 + $0xe4] ss:$16 sps:$4 sm:$0xff]   ;;  %v15165_v22 = vld [vmem:[%s19988_s7 + $0xe0] ss:$16 sps:$4 sm:$0xff]  }
 0x366   :  { %15031 = vmatpush3.bf16.msra.mxu0 %v15116_v41  ;;  %11710 = vmatpush1.bf16.msra.mxu1 %v15134_v52  ;;  %v15170_v23 = vld [vmem:[%s19988_s7 + $0x104] ss:$16 sps:$4 sm:$0xff]   ;;  %v15168_v24 = vld [vmem:[%s19988_s7 + $0x100] ss:$16 sps:$4 sm:$0xff]   ;;  %v19521_v41 = vshrl.u32 %v11611_v40, 7 }
 0x367   :  { %15032 = vmatprep.subr.bf16.mxu0 %v15310_v35  ;;  %11711 = vmatprep.subr.bf16.mxu1 %v15135_v53  ;;  %v15173_v25 = vld [vmem:[%s19988_s7 + $0x124] ss:$16 sps:$4 sm:$0xff]   ;;  %v15171_v26 = vld [vmem:[%s19988_s7 + $0x120] ss:$16 sps:$4 sm:$0xff]  }
 0x368   :  { %v15176_v27 = vld [vmem:[%s19988_s7 + $0x144] ss:$16 sps:$4 sm:$0xff]   ;;  %v15174_v28 = vld [vmem:[%s19988_s7 + $0x140] ss:$16 sps:$4 sm:$0xff]   ;;  %v19524_v42 = vsub.s32 0, %v19521_v41 }
 0x369   :  { %v15179_v29 = vld [vmem:[%s19988_s7 + $0x164] ss:$16 sps:$4 sm:$0xff]   ;;  %v15177_v30 = vld [vmem:[%s19988_s7 + $0x160] ss:$16 sps:$4 sm:$0xff]  }
 0x36a   :  { %15033 = vmatpush3.bf16.msra.mxu0 %v15117_v44  ;;  %11712 = vmatpush1.bf16.msra.mxu1 %v15137_v56  ;;  %v15182_v31 = vld [vmem:[%s19988_s7 + $0x184] ss:$16 sps:$4 sm:$0xff]   ;;  %v15180_v32 = vld [vmem:[%s19988_s7 + $0x180] ss:$16 sps:$4 sm:$0xff]   ;;  %v19530_v44 = vsub.s32 1, %v19521_v41 }
 0x36b   :  { %15034 = vmatprep.subr.bf16.mxu0 %v15310_v35  ;;  %11713 = vmatprep.subr.bf16.mxu1 %v15138_v57  ;;  %v15185_v33 = vld [vmem:[%s19988_s7 + $0x1a4] ss:$16 sps:$4 sm:$0xff]   ;;  %v15183_v34 = vld [vmem:[%s19988_s7 + $0x1a0] ss:$16 sps:$4 sm:$0xff]  }
 0x36c   :  { %v15186_v36 = vld [vmem:[%s19988_s7 + $0x1c0] ss:$16 sps:$4 sm:$0xff]   ;;  %v15191_v37 = vld [vmem:[%s19988_s7 + $0x1e4] ss:$16 sps:$4 sm:$0xff]  }
 0x36d   :  { %v15189_v38 = vld [vmem:[%s19988_s7 + $0x1e0] ss:$16 sps:$4 sm:$0xff]  }
 0x36e   :  { %15035 = vmatpush3.bf16.msra.mxu0 %v15118_v47  ;;  %11714 = vmatpush1.bf16.msra.mxu1 %v15140_v58  ;;  %v11609_v43 = vld [vmem:[%s19985_s4] sm:$0x3] }
 0x36f   :  { %15036 = vmatprep.subr.bf16.mxu0 %v15310_v35  ;;  %11715 = vmatprep.subr.bf16.mxu1 %v15141_v59  ;;  %v15188_v35 = vld [vmem:[%s19988_s7 + $0x1c4] ss:$16 sps:$4 sm:$0xff]   ;;  %v11614_v45 = vrot.slane %v11609_v43, %v19524_v42  ;;  %v11618_v46 = vrot.slane %v11609_v43, %v19530_v44 }
 0x372   :  { %15037 = vmatpush3.bf16.msra.mxu0 %v11548_v54  ;;  %11716 = vmatpush1.bf16.msra.mxu1 %v15143_v60 }
 0x373   :  { %12258 = vmatprep.subr.bf16.mxu1 %v15146_v7 }
 0x375   :  { %15039 = vmatmul.mubr.msk.bf16.vlgmr.msra.gmra.mrb[0].mxu0 %vm11542_vm2, %v11495_v55 }
 0x448   :  { %v11584_v63 = vpop.f32.mrb[0].mxu0 }
 0x449   :  { %v11585_v0 = vadd.f32 %v14837_v62, %v11584_v63  ;;  %v15040_v1 = vpop.f32.mrb[1].mxu0 }
 0x44a   :  { %v11587_v2 = vpop.f32.mrb[2].mxu0 }
 0x44b   :  { %v11590_v3 = vmul.f32 0.2, %v11585_v0  ;;  %v15041_v4 = vpop.f32.mrb[3].mxu0 }
 0x44d   :  { %v11591_v5 = vmax.f32 %v11585_v0, %v11590_v3 }
 0x44f   :  { %v11608_v6 = vpack.c.bf16 %v11591_v5, %v11591_v5 }
 0x451   :  { %11734 = vmatmul.mubr.bf16.vlgmr.msra.gmra.mrb[0].mxu1 %v11608_v6 }
 0x452   :  { %12259 = vmatpush1.bf16.msra.mxu1 %v15144_v8 }
 0x453   :  { %12260 = vmatprep.subr.bf16.mxu1 %v15149_v9 }
 0x456   :  { %12261 = vmatpush1.bf16.msra.mxu1 %v15147_v10 }
 0x457   :  { %12262 = vmatprep.subr.bf16.mxu1 %v15152_v11 }
 0x45a   :  { %12263 = vmatpush1.bf16.msra.mxu1 %v15150_v12 }
 0x45b   :  { %12264 = vmatprep.subr.bf16.mxu1 %v15155_v13 }
 0x45e   :  { %12265 = vmatpush1.bf16.msra.mxu1 %v15153_v14 }
 0x45f   :  { %12266 = vmatprep.subr.bf16.mxu1 %v15158_v15 }
 0x462   :  { %12267 = vmatpush1.bf16.msra.mxu1 %v15156_v16 }
 0x463   :  { %12268 = vmatprep.subr.bf16.mxu1 %v15161_v17 }
 0x466   :  { %12269 = vmatpush1.bf16.msra.mxu1 %v15159_v18 }
 0x467   :  { %12270 = vmatprep.subr.bf16.mxu1 %v15164_v19 }
 0x46a   :  { %12271 = vmatpush1.bf16.msra.mxu1 %v15162_v20 }
 0x46b   :  { %12272 = vmatprep.subr.bf16.mxu1 %v15167_v21 }
 0x46e   :  { %12273 = vmatpush1.bf16.msra.mxu1 %v15165_v22 }
 0x46f   :  { %12274 = vmatprep.subr.bf16.mxu1 %v15170_v23 }
 0x472   :  { %12275 = vmatpush1.bf16.msra.mxu1 %v15168_v24  ;;  %v15313_v24 = vmov 1966171168  }
 0x473   :  { %12276 = vmatprep.subr.bf16.mxu1 %v15173_v25  ;;  %v11784_v25 = vunpack.c.l.s4 %v15313_v24  ;;  %v11916_v24 = vld [vmem:[%s19989_s8] sm:$0xf] }
 0x476   :  { %12277 = vmatpush1.bf16.msra.mxu1 %v15171_v26  ;;  %v11785_v26 = vunpack.c.0.s8 %v11784_v25  ;;  %v11921_v25 = vrot.slane %v11916_v24, %v19524_v42 }
 0x477   :  { %12278 = vmatprep.subr.bf16.mxu1 %v15176_v27 }
 0x47a   :  { %12279 = vmatpush1.bf16.msra.mxu1 %v15174_v28  ;;  %v19535_v28 = vsub.s32 %v11785_v26, %v19521_v41  ;;  %v11925_v26 = vrot.slane %v11916_v24, %v19530_v44 }
 0x47b   :  { %12280 = vmatprep.subr.bf16.mxu1 %v15179_v29 }
 0x47e   :  { %12281 = vmatpush1.bf16.msra.mxu1 %v15177_v30 }
 0x47f   :  { %12282 = vmatprep.subr.bf16.mxu1 %v15182_v31 }
 0x482   :  { %12283 = vmatpush1.bf16.msra.mxu1 %v15180_v32 }
 0x483   :  { %12284 = vmatprep.subr.bf16.mxu1 %v15185_v33  ;;  %v11775_v33 = vld [vmem:[%s19986_s5] sm:$0x3] }
 0x486   :  { %12285 = vmatpush1.bf16.msra.mxu1 %v15183_v34 }
 0x487   :  { %12286 = vmatprep.subr.bf16.mxu1 %v15188_v35 }
 0x48a   :  { %12287 = vmatpush1.bf16.msra.mxu1 %v15186_v36 }
 0x48b   :  { %12288 = vmatprep.subr.bf16.mxu1 %v15191_v37  ;;  %v11799_v37 = vld [vmem:[%s19987_s6] sm:$0x3] }
 0x48e   :  { %12289 = vmatpush1.bf16.msra.mxu1 %v15189_v38 }
 0x48f   :  { %12299 = vmatprep.subr.bf16.mxu1 %v15194_v39 }
 0x524   :  { %v11735_v47 = vpop.f32.mrb[0].mxu1 }
 0x525   :  { %v11736_v48 = vadd.f32 %v11735_v47, %v11614_v45  ;;  %v11737_v49 = vpop.f32.mrb[1].mxu1 }
 0x526   :  { %v11738_v50 = vadd.f32 %v11737_v49, %v11618_v46  ;;  %v11739_v51 = vpop.f32.mrb[2].mxu1 }
 0x527   :  { %v11742_v52 = vrot.slane %v11736_v48, 4  ;;  %v11740_v53 = vpop.f32.mrb[3].mxu1 }
 0x528   :  { %v11748_v54 = vrot.slane %v11738_v50, 4 }
 0x529   :  { %v11743_v55 = vadd.f32 %v11742_v52, %v11736_v48 }
 0x52a   :  { %v11749_v56 = vadd.f32 %v11748_v54, %v11738_v50 }
 0x52b   :  { %v11744_v57 = vrot.slane %v11743_v55, 2 }
 0x52c   :  { %v11750_v58 = vrot.slane %v11749_v56, 2 }
 0x52d   :  { %v11745_v59 = vadd.f32 %v11744_v57, %v11743_v55 }
 0x52e   :  { %v11751_v60 = vadd.f32 %v11750_v58, %v11749_v56  ;;  %v15192_v58 = vld [vmem:[%s19988_s7 + $0x8] ss:$16 sps:$4 sm:$0xff]  }
 0x52f   :  { %v11746_v61 = vrot.slane %v11745_v59, 1 }
 0x530   :  { %v11752_v62 = vrot.slane %v11751_v60, 1 }
 0x531   :  { %v11747_v63 = vadd.f32 %v11746_v61, %v11745_v59  ;;  %v15198_v61 = vld [vmem:[%s19988_s7 + $0x48] ss:$16 sps:$4 sm:$0xff]  }
 0x532   :  { %v11753_v0 = vadd.f32 %v11752_v62, %v11751_v60  ;;  %v15200_v60 = vld [vmem:[%s19988_s7 + $0x4c] ss:$16 sps:$4 sm:$0xff]  }
 0x533   :  { %v11755_v1 = vmul.f32 0.125, %v11747_v63  ;;  %v15203_v62 = vld [vmem:[%s19988_s7 + $0x6c] ss:$16 sps:$4 sm:$0xff]   ;;  %v15201_v63 = vld [vmem:[%s19988_s7 + $0x68] ss:$16 sps:$4 sm:$0xff]  }
 0x534   :  { %v11756_v2 = vmul.f32 0.125, %v11753_v0  ;;  %v15206_v0 = vld [vmem:[%s19988_s7 + $0x8c] ss:$16 sps:$4 sm:$0xff]  }
 0x535   :  { %v11757_v3 = vsub.f32 %v11736_v48, %v11755_v1 }
 0x536   :  { %v11758_v4 = vsub.f32 %v11738_v50, %v11756_v2  ;;  %v11802_v5 = vcombine.low %v11755_v1, %v11756_v2  ;;  %v15204_v1 = vld [vmem:[%s19988_s7 + $0x88] ss:$16 sps:$4 sm:$0xff]   ;;  %v15209_v2 = vld [vmem:[%s19988_s7 + $0xac] ss:$16 sps:$4 sm:$0xff]  }
 0x537   :  { %v11759_v6 = vmul.f32 %v11757_v3, %v11757_v3  ;;  %v15207_v3 = vld [vmem:[%s19988_s7 + $0xa8] ss:$16 sps:$4 sm:$0xff]  }
 0x538   :  { %v11760_v7 = vmul.f32 %v11758_v4, %v11758_v4  ;;  %v11809_v31 = vrot.slane %v11802_v5, %v19535_v28  ;;  %v15212_v4 = vld [vmem:[%s19988_s7 + $0xcc] ss:$16 sps:$4 sm:$0xff]   ;;  %v15210_v5 = vld [vmem:[%s19988_s7 + $0xc8] ss:$16 sps:$4 sm:$0xff]  }
 0x539   :  { %v11761_v8 = vrot.slane %v11759_v6, 4 }
 0x53a   :  { %v11767_v9 = vrot.slane %v11760_v7, 4  ;;  %v11816_v36 = vrot.slane %v11809_v31, %v19535_v28 }
 0x53b   :  { %v11762_v10 = vadd.f32 %v11761_v8, %v11759_v6  ;;  %v15215_v6 = vld [vmem:[%s19988_s7 + $0xec] ss:$16 sps:$4 sm:$0xff]  }
 0x53c   :  { %v11768_v11 = vadd.f32 %v11767_v9, %v11760_v7  ;;  %v15213_v7 = vld [vmem:[%s19988_s7 + $0xe8] ss:$16 sps:$4 sm:$0xff]   ;;  %v15218_v8 = vld [vmem:[%s19988_s7 + $0x10c] ss:$16 sps:$4 sm:$0xff]  }
 0x53d   :  { %v11763_v12 = vrot.slane %v11762_v10, 2  ;;  %v15216_v9 = vld [vmem:[%s19988_s7 + $0x108] ss:$16 sps:$4 sm:$0xff]  }
 0x53e   :  { %v11769_v13 = vrot.slane %v11768_v11, 2 }
 0x53f   :  { %v11764_v14 = vadd.f32 %v11763_v12, %v11762_v10  ;;  %v15221_v10 = vld [vmem:[%s19988_s7 + $0x12c] ss:$16 sps:$4 sm:$0xff]  }
 0x540   :  { %v11770_v15 = vadd.f32 %v11769_v13, %v11768_v11  ;;  %v15219_v11 = vld [vmem:[%s19988_s7 + $0x128] ss:$16 sps:$4 sm:$0xff]   ;;  %v15224_v12 = vld [vmem:[%s19988_s7 + $0x14c] ss:$16 sps:$4 sm:$0xff]  }
 0x541   :  { %v11765_v16 = vrot.slane %v11764_v14, 1  ;;  %v15222_v13 = vld [vmem:[%s19988_s7 + $0x148] ss:$16 sps:$4 sm:$0xff]  }
 0x542   :  { %v11771_v17 = vrot.slane %v11770_v15, 1 }
 0x543   :  { %v11766_v18 = vadd.f32 %v11765_v16, %v11764_v14  ;;  %v15227_v14 = vld [vmem:[%s19988_s7 + $0x16c] ss:$16 sps:$4 sm:$0xff]  }
 0x544   :  { %v11772_v19 = vadd.f32 %v11771_v17, %v11770_v15  ;;  %v15225_v15 = vld [vmem:[%s19988_s7 + $0x168] ss:$16 sps:$4 sm:$0xff]   ;;  %v15230_v16 = vld [vmem:[%s19988_s7 + $0x18c] ss:$16 sps:$4 sm:$0xff]  }
 0x545   :  { %v11773_v20 = vmul.f32 0.125, %v11766_v18  ;;  %v15228_v17 = vld [vmem:[%s19988_s7 + $0x188] ss:$16 sps:$4 sm:$0xff]   ;;  %v15233_v18 = vld [vmem:[%s19988_s7 + $0x1ac] ss:$16 sps:$4 sm:$0xff]  }
 0x546   :  { %v11774_v21 = vmul.f32 0.125, %v11772_v19  ;;  %v15231_v19 = vld [vmem:[%s19988_s7 + $0x1a8] ss:$16 sps:$4 sm:$0xff]  }
 0x547   :  { %v11776_v22 = vadd.f32 0.8, %v11773_v20  ;;  %v15236_v20 = vld [vmem:[%s19988_s7 + $0x1cc] ss:$16 sps:$4 sm:$0xff]  }
 0x548   :  { %v11777_v23 = vadd.f32 0.8, %v11774_v21  ;;  %v15234_v21 = vld [vmem:[%s19988_s7 + $0x1c8] ss:$16 sps:$4 sm:$0xff]  }
 0x549   :  { %15240 = vrsqrt.f32 %v11776_v22  ;;  %v15239_v22 = vld [vmem:[%s19988_s7 + $0x1ec] ss:$16 sps:$4 sm:$0xff]  }
 0x54a   :  { %15242 = vrsqrt.f32 %v11777_v23  ;;  %v15237_v23 = vld [vmem:[%s19988_s7 + $0x1e8] ss:$16 sps:$4 sm:$0xff]  }
 0x553   :  { %v15241_v27 = vpop.eup %15240 }
 0x554   :  { %v15243_v29 = vpop.eup %15242 }
 0x555   :  { %v11782_v30 = vcombine.low %v15241_v27, %v15243_v29 }
 0x557   :  { %v11789_v32 = vrot.slane %v11782_v30, %v19535_v28 }
 0x559   :  { %v11796_v34 = vrot.slane %v11789_v32, %v19535_v28 }
 0x55b   :  { %v11798_v35 = vmul.f32 %v11796_v34, %v11775_v33 }
 0x55d   :  { %v11818_v38 = vmul.f32 %v11816_v36, %v11798_v35  ;;  %v11828_v39 = vrot.slane %v11798_v35, %v19530_v44  ;;  %v11824_v40 = vrot.slane %v11798_v35, %v19524_v42 }
 0x55f   :  { %v11819_v43 = vsub.f32 %v11799_v37, %v11818_v38  ;;  %v11832_v45 = vmul.f32 %v11828_v39, %v11738_v50  ;;  %v11831_v46 = vmul.f32 %v11824_v40, %v11736_v48  ;;  %v15197_v48 = vld [vmem:[%s19988_s7 + $0x2c] ss:$16 sps:$4 sm:$0xff]   ;;  %v15195_v50 = vld [vmem:[%s19988_s7 + $0x28] ss:$16 sps:$4 sm:$0xff]  }
 0x561   :  { %v11841_v47 = vrot.slane %v11819_v43, %v19530_v44  ;;  %v11837_v49 = vrot.slane %v11819_v43, %v19524_v42 }
 0x563   :  { %v11845_v51 = vadd.f32 %v11841_v47, %v11832_v45  ;;  %v11844_v52 = vadd.f32 %v11837_v49, %v11831_v46 }
 0x565   :  { %v11847_v53 = vmul.f32 0.2, %v11845_v51  ;;  %v11846_v54 = vmul.f32 0.2, %v11844_v52 }
 0x567   :  { %v11849_v55 = vmax.f32 %v11845_v51, %v11847_v53  ;;  %v11848_v56 = vmax.f32 %v11844_v52, %v11846_v54 }
 0x569   :  { %v11915_v57 = vpack.c.bf16 %v11849_v55, %v11849_v55  ;;  %v19554_v59 = vpack.c.bf16 %v11848_v56, %v11848_v56 }
 0x56b   :  { %12290 = vmatprep.mubr.bf16.mxu1 %v11915_v57 }
 0x56c   :  { %12291 = vmatmul.mubr.bf16.vlgmr.msra.gmra.mrb[4].mxu1 %v19554_v59 }
 0x56d   :  { %12300 = vmatpush1.bf16.msra.mxu1 %v15192_v58  ;;  %12331 = vmatprep.mubr.bf16.mxu1 %v11915_v57 }
 0x56e   :  { %12301 = vmatprep.subr.bf16.mxu1 %v15197_v48 }
 0x571   :  { %12302 = vmatpush1.bf16.msra.mxu1 %v15195_v50 }
 0x572   :  { %12303 = vmatprep.subr.bf16.mxu1 %v15200_v60 }
 0x575   :  { %12304 = vmatpush1.bf16.msra.mxu1 %v15198_v61 }
 0x576   :  { %12305 = vmatprep.subr.bf16.mxu1 %v15203_v62 }
 0x579   :  { %12306 = vmatpush1.bf16.msra.mxu1 %v15201_v63 }
 0x57a   :  { %12307 = vmatprep.subr.bf16.mxu1 %v15206_v0 }
 0x57d   :  { %12308 = vmatpush1.bf16.msra.mxu1 %v15204_v1 }
 0x57e   :  { %12309 = vmatprep.subr.bf16.mxu1 %v15209_v2 }
 0x581   :  { %12310 = vmatpush1.bf16.msra.mxu1 %v15207_v3 }
 0x582   :  { %12311 = vmatprep.subr.bf16.mxu1 %v15212_v4 }
 0x585   :  { %12312 = vmatpush1.bf16.msra.mxu1 %v15210_v5 }
 0x586   :  { %12313 = vmatprep.subr.bf16.mxu1 %v15215_v6 }
 0x589   :  { %12314 = vmatpush1.bf16.msra.mxu1 %v15213_v7 }
 0x58a   :  { %12315 = vmatprep.subr.bf16.mxu1 %v15218_v8 }
 0x58d   :  { %12316 = vmatpush1.bf16.msra.mxu1 %v15216_v9 }
 0x58e   :  { %12317 = vmatprep.subr.bf16.mxu1 %v15221_v10 }
 0x591   :  { %12318 = vmatpush1.bf16.msra.mxu1 %v15219_v11  ;;  %v19664_v11 = vsub.s32 2, %v19521_v41 }
 0x592   :  { %12319 = vmatprep.subr.bf16.mxu1 %v15224_v12  ;;  %v19667_v12 = vsub.s32 3, %v19521_v41 }
 0x595   :  { %12320 = vmatpush1.bf16.msra.mxu1 %v15222_v13  ;;  %v11929_v13 = vrot.slane %v11916_v24, %v19664_v11 }
 0x596   :  { %12321 = vmatprep.subr.bf16.mxu1 %v15227_v14  ;;  %v11933_v14 = vrot.slane %v11916_v24, %v19667_v12 }
 0x599   :  { %12322 = vmatpush1.bf16.msra.mxu1 %v15225_v15 }
 0x59a   :  { %12323 = vmatprep.subr.bf16.mxu1 %v15230_v16 }
 0x59d   :  { %12324 = vmatpush1.bf16.msra.mxu1 %v15228_v17 }
 0x59e   :  { %12325 = vmatprep.subr.bf16.mxu1 %v15233_v18 }
 0x5a1   :  { %12326 = vmatpush1.bf16.msra.mxu1 %v15231_v19 }
 0x5a2   :  { %12327 = vmatprep.subr.bf16.mxu1 %v15236_v20 }
 0x5a5   :  { %12328 = vmatpush1.bf16.msra.mxu1 %v15234_v21 }
 0x5a6   :  { %12329 = vmatprep.subr.bf16.mxu1 %v15239_v22 }
 0x5a9   :  { %12330 = vmatpush1.bf16.msra.mxu1 %v15237_v23 }
 0x5ac   :  { %12332 = vmatmul.mubr.bf16.vlgmr.msra.gmra.mrb[8].mxu1 %v19554_v59 }
 0x63f   :  { %v12292_v27 = vpop.f32.mrb[4].mxu1 }
 0x640   :  { %v19653_v29 = vadd.f32 %v12292_v27, %v11921_v25  ;;  %v12294_v30 = vpop.f32.mrb[5].mxu1 }
 0x641   :  { %v19655_v31 = vadd.f32 %v12294_v30, %v11925_v26  ;;  %v12296_v32 = vpop.f32.mrb[6].mxu1 }
 0x642   :  { %v12340_v33 = vrot.slane %v19653_v29, 4  ;;  %v12297_v34 = vpop.f32.mrb[7].mxu1 }
 0x643   :  { %v12346_v35 = vrot.slane %v19655_v31, 4 }
 0x644   :  { %v12341_v36 = vadd.f32 %v12340_v33, %v19653_v29 }
 0x645   :  { %v12347_v37 = vadd.f32 %v12346_v35, %v19655_v31 }
 0x646   :  { %v12342_v38 = vrot.slane %v12341_v36, 2 }
 0x647   :  { %v12348_v39 = vrot.slane %v12347_v37, 2 }
 0x648   :  { %v12343_v40 = vadd.f32 %v12342_v38, %v12341_v36 }
 0x649   :  { %v12349_v43 = vadd.f32 %v12348_v39, %v12347_v37 }
 0x64a   :  { %v12344_v45 = vrot.slane %v12343_v40, 1 }
 0x64b   :  { %v12350_v46 = vrot.slane %v12349_v43, 1 }
 0x64c   :  { %v12345_v47 = vadd.f32 %v12344_v45, %v12343_v40 }
 0x64d   :  { %v12351_v49 = vadd.f32 %v12350_v46, %v12349_v43 }
 0x64e   :  { %v12364_v51 = vmul.f32 0.125, %v12345_v47 }
 0x64f   :  { %v12365_v52 = vmul.f32 0.125, %v12351_v49 }
 0x650   :  { %v12368_v53 = vsub.f32 %v19653_v29, %v12364_v51 }
 0x651   :  { %v12369_v54 = vsub.f32 %v19655_v31, %v12365_v52  ;;  %v12448_v55 = vcombine.low %v12364_v51, %v12365_v52 }
 0x652   :  { %v12372_v56 = vmul.f32 %v12368_v53, %v12368_v53 }
 0x653   :  { %v12373_v57 = vmul.f32 %v12369_v54, %v12369_v54  ;;  %v12456_v45 = vrot.slane %v12448_v55, %v19535_v28 }
 0x654   :  { %v12376_v58 = vrot.slane %v12372_v56, 4 }
 0x655   :  { %v12382_v59 = vrot.slane %v12373_v57, 4 }
 0x656   :  { %v12377_v48 = vadd.f32 %v12376_v58, %v12372_v56 }
 0x657   :  { %v12383_v50 = vadd.f32 %v12382_v59, %v12373_v57 }
 0x658   :  { %v12378_v60 = vrot.slane %v12377_v48, 2 }
 0x659   :  { %v12384_v61 = vrot.slane %v12383_v50, 2 }
 0x65a   :  { %v12379_v62 = vadd.f32 %v12378_v60, %v12377_v48 }
 0x65b   :  { %v12385_v63 = vadd.f32 %v12384_v61, %v12383_v50 }
 0x65c   :  { %v12380_v0 = vrot.slane %v12379_v62, 1 }
 0x65d   :  { %v12386_v1 = vrot.slane %v12385_v63, 1 }
 0x65e   :  { %v12381_v2 = vadd.f32 %v12380_v0, %v12379_v62 }
 0x65f   :  { %v12387_v3 = vadd.f32 %v12386_v1, %v12385_v63 }
 0x660   :  { %v12400_v4 = vmul.f32 0.125, %v12381_v2 }
 0x661   :  { %v12401_v5 = vmul.f32 0.125, %v12387_v3 }
 0x662   :  { %v12405_v6 = vadd.f32 0.8, %v12400_v4 }
 0x663   :  { %v12406_v7 = vadd.f32 0.8, %v12401_v5 }
 0x664   :  { %15244 = vrsqrt.f32 %v12405_v6 }
 0x665   :  { %15246 = vrsqrt.f32 %v12406_v7  ;;  %v12404_v7 = vld [vmem:[%s19990_s9] sm:$0xf] }
 0x66e   :  { %v15245_v8 = vpop.eup %15244 }
 0x66f   :  { %v15247_v9 = vpop.eup %15246 }
 0x670   :  { %v12417_v10 = vcombine.low %v15245_v8, %v15247_v9 }
 0x672   :  { %v12425_v4 = vrot.slane %v12417_v10, %v19535_v28 }
 0x67f   :  { %v12333_v15 = vpop.f32.mrb[8].mxu1 }
 0x680   :  { %v19671_v16 = vadd.f32 %v12333_v15, %v11929_v13  ;;  %v12335_v17 = vpop.f32.mrb[9].mxu1 }
 0x681   :  { %v19673_v18 = vadd.f32 %v12335_v17, %v11933_v14  ;;  %v12337_v19 = vpop.f32.mrb[10].mxu1  ;;  %v12443_v14 = vld [vmem:[%s19991_s10] sm:$0xf] }
 0x682   :  { %v12352_v20 = vrot.slane %v19671_v16, 4  ;;  %v12338_v21 = vpop.f32.mrb[11].mxu1 }
 0x683   :  { %v12358_v22 = vrot.slane %v19673_v18, 4 }
 0x684   :  { %v12353_v23 = vadd.f32 %v12352_v20, %v19671_v16 }
 0x685   :  { %v12359_v25 = vadd.f32 %v12358_v22, %v19673_v18 }
 0x686   :  { %v12354_v26 = vrot.slane %v12353_v23, 2 }
 0x687   :  { %v12360_v27 = vrot.slane %v12359_v25, 2 }
 0x688   :  { %v12355_v30 = vadd.f32 %v12354_v26, %v12353_v23 }
 0x689   :  { %v12361_v24 = vadd.f32 %v12360_v27, %v12359_v25 }
 0x68a   :  { %v12356_v32 = vrot.slane %v12355_v30, 1 }
 0x68b   :  { %v12362_v33 = vrot.slane %v12361_v24, 1 }
 0x68c   :  { %v12357_v34 = vadd.f32 %v12356_v32, %v12355_v30 }
 0x68d   :  { %v12363_v35 = vadd.f32 %v12362_v33, %v12361_v24 }
 0x68e   :  { %v12366_v36 = vmul.f32 0.125, %v12357_v34 }
 0x68f   :  { %v12367_v37 = vmul.f32 0.125, %v12363_v35 }
 0x690   :  { %v12370_v38 = vsub.f32 %v19671_v16, %v12366_v36 }
 0x691   :  { %v12371_v39 = vsub.f32 %v19673_v18, %v12367_v37  ;;  %v12449_v40 = vcombine.low %v12366_v36, %v12367_v37 }
 0x692   :  { %v12374_v43 = vmul.f32 %v12370_v38, %v12370_v38 }
 0x693   :  { %v12375_v46 = vmul.f32 %v12371_v39, %v12371_v39  ;;  %v12463_v47 = vrot.slane %v12449_v40, %v19535_v28 }
 0x694   :  { %v12388_v49 = vrot.slane %v12374_v43, 4 }
 0x695   :  { %v12394_v51 = vrot.slane %v12375_v46, 4  ;;  %v12464_v52 = vcombine.low %v12456_v45, %v12463_v47 }
 0x696   :  { %v12389_v53 = vadd.f32 %v12388_v49, %v12374_v43 }
 0x697   :  { %v12395_v54 = vadd.f32 %v12394_v51, %v12375_v46  ;;  %v12471_v13 = vrot.slane %v12464_v52, %v19535_v28 }
 0x698   :  { %v12390_v56 = vrot.slane %v12389_v53, 2 }
 0x699   :  { %v12396_v57 = vrot.slane %v12395_v54, 2 }
 0x69a   :  { %v12391_v58 = vadd.f32 %v12390_v56, %v12389_v53 }
 0x69b   :  { %v12397_v59 = vadd.f32 %v12396_v57, %v12395_v54 }
 0x69c   :  { %v12392_v48 = vrot.slane %v12391_v58, 1 }
 0x69d   :  { %v12398_v50 = vrot.slane %v12397_v59, 1 }
 0x69e   :  { %v12393_v60 = vadd.f32 %v12392_v48, %v12391_v58 }
 0x69f   :  { %v12399_v61 = vadd.f32 %v12398_v50, %v12397_v59 }
 0x6a0   :  { %v12402_v62 = vmul.f32 0.125, %v12393_v60 }
 0x6a1   :  { %v12403_v63 = vmul.f32 0.125, %v12399_v61 }
 0x6a2   :  { %v12407_v0 = vadd.f32 0.8, %v12402_v62 }
 0x6a3   :  { %v12408_v55 = vadd.f32 0.8, %v12403_v63 }
 0x6a4   :  { %15248 = vrsqrt.f32 %v12407_v0 }
 0x6a5   :  { %15250 = vrsqrt.f32 %v12408_v55 }
 0x6ae   :  { %v15249_v1 = vpop.eup %15248 }
 0x6af   :  { %v15251_v2 = vpop.eup %15250 }
 0x6b0   :  { %v12418_v3 = vcombine.low %v15249_v1, %v15251_v2 }
 0x6b2   :  { %v12432_v5 = vrot.slane %v12418_v3, %v19535_v28 }
 0x6b4   :  { %v12433_v6 = vcombine.low %v12425_v4, %v12432_v5 }
 0x6b6   :  { %v12440_v8 = vrot.slane %v12433_v6, %v19535_v28 }
 0x6b8   :  { %v12442_v9 = vmul.f32 %v12440_v8, %v12404_v7 }
 0x6ba   :  { %v12473_v15 = vmul.f32 %v12471_v13, %v12442_v9  ;;  %v12479_v17 = vrot.slane %v12442_v9, %v19524_v42  ;;  %v12483_v10 = vrot.slane %v12442_v9, %v19530_v44  ;;  %v12487_v19 = vrot.slane %v12442_v9, %v19664_v11 }
 0x6bb   :  { %v12491_v20 = vrot.slane %v12442_v9, %v19667_v12 }
 0x6bc   :  { %v12474_v21 = vsub.f32 %v12443_v14, %v12473_v15  ;;  %v12496_v22 = vmul.f32 %v12479_v17, %v19653_v29  ;;  %v12497_v23 = vmul.f32 %v12483_v10, %v19655_v31  ;;  %v12498_v25 = vmul.f32 %v12487_v19, %v19671_v16 }
 0x6bd   :  { %v12499_v26 = vmul.f32 %v12491_v20, %v19673_v18 }
 0x6be   :  { %v12504_v27 = vrot.slane %v12474_v21, %v19524_v42  ;;  %v12508_v30 = vrot.slane %v12474_v21, %v19530_v44  ;;  %v12512_v24 = vrot.slane %v12474_v21, %v19664_v11  ;;  %v12516_v32 = vrot.slane %v12474_v21, %v19667_v12 }
 0x6c0   :  { %v12521_v33 = vadd.f32 %v12504_v27, %v12496_v22  ;;  %v12522_v34 = vadd.f32 %v12508_v30, %v12497_v23  ;;  %v12523_v35 = vadd.f32 %v12512_v24, %v12498_v25  ;;  %v12524_v36 = vadd.f32 %v12516_v32, %v12499_v26 }
 0x6c2   :  { %v12525_v37 = vmul.f32 0.2, %v12521_v33  ;;  %v12526_v29 = vmul.f32 0.2, %v12522_v34  ;;  %v12527_v38 = vmul.f32 0.2, %v12523_v35 }
 0x6c3   :  { %v12528_v31 = vmul.f32 0.2, %v12524_v36 }
 0x6c4   :  { %v19705_v39 = vmax.f32 %v12521_v33, %v12525_v37  ;;  %v12530_v16 = vmax.f32 %v12522_v34, %v12526_v29  ;;  %v19707_v18 = vmax.f32 %v12523_v35, %v12527_v38 }
 0x6c5   :  { %v19709_v40 = vmax.f32 %v12524_v36, %v12528_v31 }
 0x6c6   :  { %15304 = dma.done.wait [#allocation4], 32768 }
 0x6c7   :  { %15305 = vsyncadd [#allocation4], 4294934528  ;;  %v19711_v43 = vpack.c.bf16 %v12530_v16, %v12530_v16  ;;  %v12538_v45 = vld [vmem:[#allocation2 + $0x8] sm:$0xff]  ;;  %v12540_v46 = vld [vmem:[#allocation2 + $0x18] sm:$0xff] }
 0x6c8   :  { %v12537_v47 = vld [vmem:[#allocation2] sm:$0xff]  ;;  %12839 = vmatprep.subr.bf16.mxu0 %v12538_v45  ;;  %12921 = vmatprep.subr.bf16.mxu1 %v12540_v46  ;;  %v12539_v49 = vld [vmem:[#allocation2 + $0x10] sm:$0xff]  ;;  %v12546_v51 = vld [vmem:[#allocation2 + $0x48] sm:$0xff] }
 0x6c9   :  { %12871 = vmatprep.mubr.bf16.mxu0 %v19711_v43  ;;  %12953 = vmatprep.mubr.bf16.mxu1 %v19711_v43  ;;  %v12548_v52 = vld [vmem:[#allocation2 + $0x58] sm:$0xff]  ;;  %v12545_v53 = vld [vmem:[#allocation2 + $0x40] sm:$0xff]  ;;  %v12547_v54 = vld [vmem:[#allocation2 + $0x50] sm:$0xff] }
 0x6ca   :  { %12840 = vmatpush1.bf16.msra.mxu0 %v12537_v47  ;;  %12922 = vmatpush1.bf16.msra.mxu1 %v12539_v49  ;;  %v12554_v56 = vld [vmem:[#allocation2 + $0x88] sm:$0xff]  ;;  %v12556_v57 = vld [vmem:[#allocation2 + $0x98] sm:$0xff]  ;;  %v12553_v58 = vld [vmem:[#allocation2 + $0x80] sm:$0xff] }
 0x6cb   :  { %12841 = vmatprep.subr.bf16.mxu0 %v12546_v51  ;;  %12923 = vmatprep.subr.bf16.mxu1 %v12548_v52  ;;  %v12555_v59 = vld [vmem:[#allocation2 + $0x90] sm:$0xff]  ;;  %v12562_v48 = vld [vmem:[#allocation2 + $0xc8] sm:$0xff]  ;;  %v12564_v50 = vld [vmem:[#allocation2 + $0xd8] sm:$0xff] }
 0x6cc   :  { %v12561_v60 = vld [vmem:[#allocation2 + $0xc0] sm:$0xff]  ;;  %v12563_v61 = vld [vmem:[#allocation2 + $0xd0] sm:$0xff]  ;;  %v12570_v62 = vld [vmem:[#allocation2 + $0x108] sm:$0xff] }
 0x6cd   :  { %v12572_v63 = vld [vmem:[#allocation2 + $0x118] sm:$0xff]  ;;  %v12569_v0 = vld [vmem:[#allocation2 + $0x100] sm:$0xff]  ;;  %v12571_v55 = vld [vmem:[#allocation2 + $0x110] sm:$0xff] }
 0x6ce   :  { %12842 = vmatpush1.bf16.msra.mxu0 %v12545_v53  ;;  %12924 = vmatpush1.bf16.msra.mxu1 %v12547_v54  ;;  %v12578_v1 = vld [vmem:[#allocation2 + $0x148] sm:$0xff]  ;;  %v12580_v2 = vld [vmem:[#allocation2 + $0x158] sm:$0xff]  ;;  %v12577_v3 = vld [vmem:[#allocation2 + $0x140] sm:$0xff] }
 0x6cf   :  { %12843 = vmatprep.subr.bf16.mxu0 %v12554_v56  ;;  %12925 = vmatprep.subr.bf16.mxu1 %v12556_v57  ;;  %v12579_v4 = vld [vmem:[#allocation2 + $0x150] sm:$0xff]  ;;  %v12586_v5 = vld [vmem:[#allocation2 + $0x188] sm:$0xff]  ;;  %v12588_v6 = vld [vmem:[#allocation2 + $0x198] sm:$0xff] }
 0x6d0   :  { %v12585_v7 = vld [vmem:[#allocation2 + $0x180] sm:$0xff]  ;;  %v12587_v8 = vld [vmem:[#allocation2 + $0x190] sm:$0xff]  ;;  %v12594_v9 = vld [vmem:[#allocation2 + $0x1c8] sm:$0xff] }
 0x6d1   :  { %v12596_v13 = vld [vmem:[#allocation2 + $0x1d8] sm:$0xff]  ;;  %v12593_v14 = vld [vmem:[#allocation2 + $0x1c0] sm:$0xff]  ;;  %v12595_v15 = vld [vmem:[#allocation2 + $0x1d0] sm:$0xff] }
 0x6d2   :  { %12844 = vmatpush1.bf16.msra.mxu0 %v12553_v58  ;;  %12926 = vmatpush1.bf16.msra.mxu1 %v12555_v59  ;;  %v12602_v17 = vld [vmem:[#allocation2 + $0x208] sm:$0xff]  ;;  %v12604_v10 = vld [vmem:[#allocation2 + $0x218] sm:$0xff]  ;;  %v12601_v19 = vld [vmem:[#allocation2 + $0x200] sm:$0xff] }
 0x6d3   :  { %12845 = vmatprep.subr.bf16.mxu0 %v12562_v48  ;;  %12927 = vmatprep.subr.bf16.mxu1 %v12564_v50  ;;  %v12603_v20 = vld [vmem:[#allocation2 + $0x210] sm:$0xff]  ;;  %v12610_v21 = vld [vmem:[#allocation2 + $0x248] sm:$0xff]  ;;  %v12612_v22 = vld [vmem:[#allocation2 + $0x258] sm:$0xff]  ;;  %v19717_v48 = vpack.c.bf16 %v19705_v39, %v19705_v39 }
 0x6d4   :  { %v12609_v23 = vld [vmem:[#allocation2 + $0x240] sm:$0xff]  ;;  %v12611_v25 = vld [vmem:[#allocation2 + $0x250] sm:$0xff]  ;;  %v12618_v26 = vld [vmem:[#allocation2 + $0x288] sm:$0xff] }
 0x6d5   :  { %v12620_v27 = vld [vmem:[#allocation2 + $0x298] sm:$0xff]  ;;  %v12617_v30 = vld [vmem:[#allocation2 + $0x280] sm:$0xff]  ;;  %v12619_v24 = vld [vmem:[#allocation2 + $0x290] sm:$0xff] }
 0x6d6   :  { %12846 = vmatpush1.bf16.msra.mxu0 %v12561_v60  ;;  %12928 = vmatpush1.bf16.msra.mxu1 %v12563_v61  ;;  %v12626_v32 = vld [vmem:[#allocation2 + $0x2c8] sm:$0xff]  ;;  %v12628_v33 = vld [vmem:[#allocation2 + $0x2d8] sm:$0xff]  ;;  %v12625_v34 = vld [vmem:[#allocation2 + $0x2c0] sm:$0xff] }
 0x6d7   :  { %12847 = vmatprep.subr.bf16.mxu0 %v12570_v62  ;;  %12929 = vmatprep.subr.bf16.mxu1 %v12572_v63  ;;  %v12627_v35 = vld [vmem:[#allocation2 + $0x2d0] sm:$0xff]  ;;  %v12634_v36 = vld [vmem:[#allocation2 + $0x308] sm:$0xff]  ;;  %v12636_v37 = vld [vmem:[#allocation2 + $0x318] sm:$0xff]  ;;  %v19721_v63 = vpack.c.bf16 %v19709_v40, %v19709_v40 }
 0x6d8   :  { %v12633_v29 = vld [vmem:[#allocation2 + $0x300] sm:$0xff]  ;;  %v12635_v38 = vld [vmem:[#allocation2 + $0x310] sm:$0xff]  ;;  %v12642_v31 = vld [vmem:[#allocation2 + $0x348] sm:$0xff] }
 0x6d9   :  { %v12644_v16 = vld [vmem:[#allocation2 + $0x358] sm:$0xff]  ;;  %v12641_v45 = vld [vmem:[#allocation2 + $0x340] sm:$0xff]  ;;  %v12643_v46 = vld [vmem:[#allocation2 + $0x350] sm:$0xff] }
 0x6da   :  { %12848 = vmatpush1.bf16.msra.mxu0 %v12569_v0  ;;  %12930 = vmatpush1.bf16.msra.mxu1 %v12571_v55  ;;  %v12650_v47 = vld [vmem:[#allocation2 + $0x388] sm:$0xff]  ;;  %v12652_v49 = vld [vmem:[#allocation2 + $0x398] sm:$0xff]  ;;  %v12649_v51 = vld [vmem:[#allocation2 + $0x380] sm:$0xff] }
 0x6db   :  { %12849 = vmatprep.subr.bf16.mxu0 %v12578_v1  ;;  %12931 = vmatprep.subr.bf16.mxu1 %v12580_v2  ;;  %v12651_v52 = vld [vmem:[#allocation2 + $0x390] sm:$0xff]  ;;  %v12658_v53 = vld [vmem:[#allocation2 + $0x3c8] sm:$0xff]  ;;  %v12660_v54 = vld [vmem:[#allocation2 + $0x3d8] sm:$0xff] }
 0x6dc   :  { %v12657_v56 = vld [vmem:[#allocation2 + $0x3c0] sm:$0xff]  ;;  %v12659_v57 = vld [vmem:[#allocation2 + $0x3d0] sm:$0xff]  ;;  %v12666_v58 = vld [vmem:[#allocation2 + $0x408] sm:$0xff] }
 0x6dd   :  { %v12668_v59 = vld [vmem:[#allocation2 + $0x418] sm:$0xff]  ;;  %v12665_v50 = vld [vmem:[#allocation2 + $0x400] sm:$0xff]  ;;  %v12667_v60 = vld [vmem:[#allocation2 + $0x410] sm:$0xff] }
 0x6de   :  { %12850 = vmatpush1.bf16.msra.mxu0 %v12577_v3  ;;  %12932 = vmatpush1.bf16.msra.mxu1 %v12579_v4  ;;  %v12674_v61 = vld [vmem:[#allocation2 + $0x448] sm:$0xff]  ;;  %v12676_v62 = vld [vmem:[#allocation2 + $0x458] sm:$0xff]  ;;  %v12673_v39 = vld [vmem:[#allocation2 + $0x440] sm:$0xff] }
 0x6df   :  { %12851 = vmatprep.subr.bf16.mxu0 %v12586_v5  ;;  %12933 = vmatprep.subr.bf16.mxu1 %v12588_v6  ;;  %v12675_v0 = vld [vmem:[#allocation2 + $0x450] sm:$0xff]  ;;  %v12682_v55 = vld [vmem:[#allocation2 + $0x488] sm:$0xff]  ;;  %v12684_v1 = vld [vmem:[#allocation2 + $0x498] sm:$0xff] }
 0x6e0   :  { %v12681_v40 = vld [vmem:[#allocation2 + $0x480] sm:$0xff]  ;;  %v12683_v2 = vld [vmem:[#allocation2 + $0x490] sm:$0xff]  ;;  %v12690_v3 = vld [vmem:[#allocation2 + $0x4c8] sm:$0xff] }
 0x6e1   :  { %v12692_v4 = vld [vmem:[#allocation2 + $0x4d8] sm:$0xff]  ;;  %v12689_v5 = vld [vmem:[#allocation2 + $0x4c0] sm:$0xff]  ;;  %v12691_v6 = vld [vmem:[#allocation2 + $0x4d0] sm:$0xff] }
 0x6e2   :  { %12852 = vmatpush1.bf16.msra.mxu0 %v12585_v7  ;;  %12934 = vmatpush1.bf16.msra.mxu1 %v12587_v8  ;;  %v12698_v7 = vld [vmem:[#allocation2 + $0x508] sm:$0xff]  ;;  %v12700_v8 = vld [vmem:[#allocation2 + $0x518] sm:$0xff] }
 0x6e3   :  { %12853 = vmatprep.subr.bf16.mxu0 %v12594_v9  ;;  %12935 = vmatprep.subr.bf16.mxu1 %v12596_v13  ;;  %v12697_v9 = vld [vmem:[#allocation2 + $0x500] sm:$0xff]  ;;  %v12699_v13 = vld [vmem:[#allocation2 + $0x510] sm:$0xff] }
 0x6e6   :  { %12854 = vmatpush1.bf16.msra.mxu0 %v12593_v14  ;;  %12936 = vmatpush1.bf16.msra.mxu1 %v12595_v15  ;;  %v12706_v14 = vld [vmem:[#allocation2 + $0x548] sm:$0xff]  ;;  %v12708_v15 = vld [vmem:[#allocation2 + $0x558] sm:$0xff] }
 0x6e7   :  { %12855 = vmatprep.subr.bf16.mxu0 %v12602_v17  ;;  %12937 = vmatprep.subr.bf16.mxu1 %v12604_v10  ;;  %v12705_v17 = vld [vmem:[#allocation2 + $0x540] sm:$0xff]  ;;  %v12707_v10 = vld [vmem:[#allocation2 + $0x550] sm:$0xff] }
 0x6ea   :  { %12856 = vmatpush1.bf16.msra.mxu0 %v12601_v19  ;;  %12938 = vmatpush1.bf16.msra.mxu1 %v12603_v20  ;;  %v12714_v19 = vld [vmem:[#allocation2 + $0x588] sm:$0xff]  ;;  %v12716_v20 = vld [vmem:[#allocation2 + $0x598] sm:$0xff] }
 0x6eb   :  { %12857 = vmatprep.subr.bf16.mxu0 %v12610_v21  ;;  %12939 = vmatprep.subr.bf16.mxu1 %v12612_v22  ;;  %v12713_v21 = vld [vmem:[#allocation2 + $0x580] sm:$0xff]  ;;  %v12715_v22 = vld [vmem:[#allocation2 + $0x590] sm:$0xff] }
 0x6ee   :  { %12858 = vmatpush1.bf16.msra.mxu0 %v12609_v23  ;;  %12940 = vmatpush1.bf16.msra.mxu1 %v12611_v25  ;;  %v12722_v23 = vld [vmem:[#allocation2 + $0x5c8] sm:$0xff]  ;;  %v12724_v25 = vld [vmem:[#allocation2 + $0x5d8] sm:$0xff] }
 0x6ef   :  { %12859 = vmatprep.subr.bf16.mxu0 %v12618_v26  ;;  %12941 = vmatprep.subr.bf16.mxu1 %v12620_v27  ;;  %v12721_v26 = vld [vmem:[#allocation2 + $0x5c0] sm:$0xff]  ;;  %v12723_v27 = vld [vmem:[#allocation2 + $0x5d0] sm:$0xff] }
 0x6f2   :  { %12860 = vmatpush1.bf16.msra.mxu0 %v12617_v30  ;;  %12942 = vmatpush1.bf16.msra.mxu1 %v12619_v24  ;;  %v12730_v30 = vld [vmem:[#allocation2 + $0x608] sm:$0xff]  ;;  %v12732_v24 = vld [vmem:[#allocation2 + $0x618] sm:$0xff] }
 0x6f3   :  { %12861 = vmatprep.subr.bf16.mxu0 %v12626_v32  ;;  %12943 = vmatprep.subr.bf16.mxu1 %v12628_v33  ;;  %v12729_v32 = vld [vmem:[#allocation2 + $0x600] sm:$0xff]  ;;  %v12731_v33 = vld [vmem:[#allocation2 + $0x610] sm:$0xff] }
 0x6f6   :  { %12862 = vmatpush1.bf16.msra.mxu0 %v12625_v34  ;;  %12944 = vmatpush1.bf16.msra.mxu1 %v12627_v35  ;;  %v12738_v34 = vld [vmem:[#allocation2 + $0x648] sm:$0xff]  ;;  %v12740_v35 = vld [vmem:[#allocation2 + $0x658] sm:$0xff] }
 0x6f7   :  { %12863 = vmatprep.subr.bf16.mxu0 %v12634_v36  ;;  %12945 = vmatprep.subr.bf16.mxu1 %v12636_v37  ;;  %v12737_v36 = vld [vmem:[#allocation2 + $0x640] sm:$0xff]  ;;  %v12739_v37 = vld [vmem:[#allocation2 + $0x650] sm:$0xff] }
 0x6fa   :  { %12864 = vmatpush1.bf16.msra.mxu0 %v12633_v29  ;;  %12946 = vmatpush1.bf16.msra.mxu1 %v12635_v38  ;;  %v12746_v29 = vld [vmem:[#allocation2 + $0x688] sm:$0xff]  ;;  %v12748_v38 = vld [vmem:[#allocation2 + $0x698] sm:$0xff] }
 0x6fb   :  { %12865 = vmatprep.subr.bf16.mxu0 %v12642_v31  ;;  %12947 = vmatprep.subr.bf16.mxu1 %v12644_v16  ;;  %v12745_v31 = vld [vmem:[#allocation2 + $0x680] sm:$0xff]  ;;  %v12747_v16 = vld [vmem:[#allocation2 + $0x690] sm:$0xff] }
 0x6fe   :  { %12866 = vmatpush1.bf16.msra.mxu0 %v12641_v45  ;;  %12948 = vmatpush1.bf16.msra.mxu1 %v12643_v46  ;;  %v12754_v45 = vld [vmem:[#allocation2 + $0x6c8] sm:$0xff]  ;;  %v12756_v46 = vld [vmem:[#allocation2 + $0x6d8] sm:$0xff] }
 0x6ff   :  { %12867 = vmatprep.subr.bf16.mxu0 %v12650_v47  ;;  %12949 = vmatprep.subr.bf16.mxu1 %v12652_v49  ;;  %v12753_v47 = vld [vmem:[#allocation2 + $0x6c0] sm:$0xff]  ;;  %v12755_v49 = vld [vmem:[#allocation2 + $0x6d0] sm:$0xff] }
 0x702   :  { %12868 = vmatpush1.bf16.msra.mxu0 %v12649_v51  ;;  %12950 = vmatpush1.bf16.msra.mxu1 %v12651_v52  ;;  %v12762_v51 = vld [vmem:[#allocation2 + $0x708] sm:$0xff]  ;;  %v12764_v52 = vld [vmem:[#allocation2 + $0x718] sm:$0xff] }
 0x703   :  { %12869 = vmatprep.subr.bf16.mxu0 %v12658_v53  ;;  %12951 = vmatprep.subr.bf16.mxu1 %v12660_v54  ;;  %v12761_v53 = vld [vmem:[#allocation2 + $0x700] sm:$0xff]  ;;  %v12763_v54 = vld [vmem:[#allocation2 + $0x710] sm:$0xff] }
 0x706   :  { %12870 = vmatpush1.bf16.msra.mxu0 %v12657_v56  ;;  %12952 = vmatpush1.bf16.msra.mxu1 %v12659_v57  ;;  %v12770_v56 = vld [vmem:[#allocation2 + $0x748] sm:$0xff]  ;;  %v12772_v57 = vld [vmem:[#allocation2 + $0x758] sm:$0xff] }
 0x707   :  { %12880 = vmatprep.subr.bf16.mxu0 %v12666_v58  ;;  %12962 = vmatprep.subr.bf16.mxu1 %v12668_v59  ;;  %v12769_v58 = vld [vmem:[#allocation2 + $0x740] sm:$0xff]  ;;  %v12771_v59 = vld [vmem:[#allocation2 + $0x750] sm:$0xff] }
 0x709   :  { %12872 = vmatmul.mubr.bf16.vlgmr.msra.gmra.mrb[4].mxu0 %v19717_v48  ;;  %12954 = vmatmul.mubr.bf16.vlgmr.msra.gmra.mrb[12].mxu1 %v19717_v48 }
 0x70a   :  { %12881 = vmatpush1.bf16.msra.mxu0 %v12665_v50  ;;  %12963 = vmatpush1.bf16.msra.mxu1 %v12667_v60  ;;  %v12778_v50 = vld [vmem:[#allocation2 + $0x788] sm:$0xff]  ;;  %v12780_v60 = vld [vmem:[#allocation2 + $0x798] sm:$0xff] }
 0x70b   :  { %12882 = vmatprep.subr.bf16.mxu0 %v12674_v61  ;;  %12964 = vmatprep.subr.bf16.mxu1 %v12676_v62  ;;  %v12777_v61 = vld [vmem:[#allocation2 + $0x780] sm:$0xff]  ;;  %v12779_v62 = vld [vmem:[#allocation2 + $0x790] sm:$0xff] }
 0x70c   :  { %12912 = vmatprep.mubr.bf16.mxu0 %v19721_v63  ;;  %12994 = vmatprep.mubr.bf16.mxu1 %v19721_v63 }
 0x70e   :  { %12883 = vmatpush1.bf16.msra.mxu0 %v12673_v39  ;;  %12965 = vmatpush1.bf16.msra.mxu1 %v12675_v0  ;;  %v12786_v39 = vld [vmem:[#allocation2 + $0x7c8] sm:$0xff]  ;;  %v12788_v0 = vld [vmem:[#allocation2 + $0x7d8] sm:$0xff] }
 0x70f   :  { %12884 = vmatprep.subr.bf16.mxu0 %v12682_v55  ;;  %12966 = vmatprep.subr.bf16.mxu1 %v12684_v1  ;;  %v12785_v55 = vld [vmem:[#allocation2 + $0x7c0] sm:$0xff]  ;;  %v12787_v1 = vld [vmem:[#allocation2 + $0x7d0] sm:$0xff] }
 0x712   :  { %12885 = vmatpush1.bf16.msra.mxu0 %v12681_v40  ;;  %12967 = vmatpush1.bf16.msra.mxu1 %v12683_v2  ;;  %v12542_v40 = vld [vmem:[#allocation2 + $0x28] sm:$0xff]  ;;  %v12544_v2 = vld [vmem:[#allocation2 + $0x38] sm:$0xff] }
 0x713   :  { %12886 = vmatprep.subr.bf16.mxu0 %v12690_v3  ;;  %12968 = vmatprep.subr.bf16.mxu1 %v12692_v4  ;;  %v19729_v3 = vpack.c.bf16 %v19707_v18, %v19707_v18  ;;  %v12541_v4 = vld [vmem:[#allocation2 + $0x20] sm:$0xff]  ;;  %v12558_v18 = vld [vmem:[#allocation2 + $0xa8] sm:$0xff] }
 0x716   :  { %12887 = vmatpush1.bf16.msra.mxu0 %v12689_v5  ;;  %12969 = vmatpush1.bf16.msra.mxu1 %v12691_v6  ;;  %v12543_v5 = vld [vmem:[#allocation2 + $0x30] sm:$0xff]  ;;  %v12550_v6 = vld [vmem:[#allocation2 + $0x68] sm:$0xff] }
 0x717   :  { %12888 = vmatprep.subr.bf16.mxu0 %v12698_v7  ;;  %12970 = vmatprep.subr.bf16.mxu1 %v12700_v8  ;;  %v12552_v7 = vld [vmem:[#allocation2 + $0x78] sm:$0xff]  ;;  %v12549_v8 = vld [vmem:[#allocation2 + $0x60] sm:$0xff] }
 0x71a   :  { %12889 = vmatpush1.bf16.msra.mxu0 %v12697_v9  ;;  %12971 = vmatpush1.bf16.msra.mxu1 %v12699_v13  ;;  %v12551_v9 = vld [vmem:[#allocation2 + $0x70] sm:$0xff]  ;;  %v12560_v13 = vld [vmem:[#allocation2 + $0xb8] sm:$0xff] }
 0x71b   :  { %12890 = vmatprep.subr.bf16.mxu0 %v12706_v14  ;;  %12972 = vmatprep.subr.bf16.mxu1 %v12708_v15  ;;  %v12557_v14 = vld [vmem:[#allocation2 + $0xa0] sm:$0xff]  ;;  %v12559_v15 = vld [vmem:[#allocation2 + $0xb0] sm:$0xff] }
 0x71e   :  { %12891 = vmatpush1.bf16.msra.mxu0 %v12705_v17  ;;  %12973 = vmatpush1.bf16.msra.mxu1 %v12707_v10  ;;  %v12566_v17 = vld [vmem:[#allocation2 + $0xe8] sm:$0xff]  ;;  %v12568_v10 = vld [vmem:[#allocation2 + $0xf8] sm:$0xff] }
 0x71f   :  { %12892 = vmatprep.subr.bf16.mxu0 %v12714_v19  ;;  %12974 = vmatprep.subr.bf16.mxu1 %v12716_v20  ;;  %v12565_v19 = vld [vmem:[#allocation2 + $0xe0] sm:$0xff]  ;;  %v12567_v20 = vld [vmem:[#allocation2 + $0xf0] sm:$0xff] }
 0x722   :  { %12893 = vmatpush1.bf16.msra.mxu0 %v12713_v21  ;;  %12975 = vmatpush1.bf16.msra.mxu1 %v12715_v22  ;;  %v12574_v21 = vld [vmem:[#allocation2 + $0x128] sm:$0xff]  ;;  %v12576_v22 = vld [vmem:[#allocation2 + $0x138] sm:$0xff] }
 0x723   :  { %12894 = vmatprep.subr.bf16.mxu0 %v12722_v23  ;;  %12976 = vmatprep.subr.bf16.mxu1 %v12724_v25  ;;  %v12575_v23 = vld [vmem:[#allocation2 + $0x130] sm:$0xff]  ;;  %v12582_v25 = vld [vmem:[#allocation2 + $0x168] sm:$0xff] }
 0x726   :  { %12895 = vmatpush1.bf16.msra.mxu0 %v12721_v26  ;;  %12977 = vmatpush1.bf16.msra.mxu1 %v12723_v27  ;;  %v12584_v26 = vld [vmem:[#allocation2 + $0x178] sm:$0xff]  ;;  %v12581_v27 = vld [vmem:[#allocation2 + $0x160] sm:$0xff] }
 0x727   :  { %12896 = vmatprep.subr.bf16.mxu0 %v12730_v30  ;;  %12978 = vmatprep.subr.bf16.mxu1 %v12732_v24  ;;  %v12583_v30 = vld [vmem:[#allocation2 + $0x170] sm:$0xff]  ;;  %v12590_v24 = vld [vmem:[#allocation2 + $0x1a8] sm:$0xff] }
 0x72a   :  { %12897 = vmatpush1.bf16.msra.mxu0 %v12729_v32  ;;  %12979 = vmatpush1.bf16.msra.mxu1 %v12731_v33  ;;  %v12592_v32 = vld [vmem:[#allocation2 + $0x1b8] sm:$0xff]  ;;  %v12589_v33 = vld [vmem:[#allocation2 + $0x1a0] sm:$0xff] }
 0x72b   :  { %12898 = vmatprep.subr.bf16.mxu0 %v12738_v34  ;;  %12980 = vmatprep.subr.bf16.mxu1 %v12740_v35  ;;  %v12591_v34 = vld [vmem:[#allocation2 + $0x1b0] sm:$0xff]  ;;  %v12598_v35 = vld [vmem:[#allocation2 + $0x1e8] sm:$0xff] }
 0x72e   :  { %12899 = vmatpush1.bf16.msra.mxu0 %v12737_v36  ;;  %12981 = vmatpush1.bf16.msra.mxu1 %v12739_v37  ;;  %v12600_v36 = vld [vmem:[#allocation2 + $0x1f8] sm:$0xff]  ;;  %v12597_v37 = vld [vmem:[#allocation2 + $0x1e0] sm:$0xff] }
 0x72f   :  { %12900 = vmatprep.subr.bf16.mxu0 %v12746_v29  ;;  %12982 = vmatprep.subr.bf16.mxu1 %v12748_v38  ;;  %v12599_v29 = vld [vmem:[#allocation2 + $0x1f0] sm:$0xff]  ;;  %v12606_v38 = vld [vmem:[#allocation2 + $0x228] sm:$0xff] }
 0x732   :  { %12901 = vmatpush1.bf16.msra.mxu0 %v12745_v31  ;;  %12983 = vmatpush1.bf16.msra.mxu1 %v12747_v16  ;;  %v12608_v31 = vld [vmem:[#allocation2 + $0x238] sm:$0xff]  ;;  %v12605_v16 = vld [vmem:[#allocation2 + $0x220] sm:$0xff] }
 0x733   :  { %12902 = vmatprep.subr.bf16.mxu0 %v12754_v45  ;;  %12984 = vmatprep.subr.bf16.mxu1 %v12756_v46  ;;  %v12607_v45 = vld [vmem:[#allocation2 + $0x230] sm:$0xff]  ;;  %v12614_v46 = vld [vmem:[#allocation2 + $0x268] sm:$0xff] }
 0x736   :  { %12903 = vmatpush1.bf16.msra.mxu0 %v12753_v47  ;;  %12985 = vmatpush1.bf16.msra.mxu1 %v12755_v49  ;;  %v12616_v47 = vld [vmem:[#allocation2 + $0x278] sm:$0xff]  ;;  %v12613_v49 = vld [vmem:[#allocation2 + $0x260] sm:$0xff] }
 0x737   :  { %12904 = vmatprep.subr.bf16.mxu0 %v12762_v51  ;;  %12986 = vmatprep.subr.bf16.mxu1 %v12764_v52  ;;  %v12615_v51 = vld [vmem:[#allocation2 + $0x270] sm:$0xff]  ;;  %v12622_v52 = vld [vmem:[#allocation2 + $0x2a8] sm:$0xff] }
 0x73a   :  { %12905 = vmatpush1.bf16.msra.mxu0 %v12761_v53  ;;  %12987 = vmatpush1.bf16.msra.mxu1 %v12763_v54  ;;  %v12624_v53 = vld [vmem:[#allocation2 + $0x2b8] sm:$0xff]  ;;  %v12621_v54 = vld [vmem:[#allocation2 + $0x2a0] sm:$0xff] }
 0x73b   :  { %12906 = vmatprep.subr.bf16.mxu0 %v12770_v56  ;;  %12988 = vmatprep.subr.bf16.mxu1 %v12772_v57  ;;  %v12623_v56 = vld [vmem:[#allocation2 + $0x2b0] sm:$0xff]  ;;  %v12630_v57 = vld [vmem:[#allocation2 + $0x2e8] sm:$0xff] }
 0x73e   :  { %12907 = vmatpush1.bf16.msra.mxu0 %v12769_v58  ;;  %12989 = vmatpush1.bf16.msra.mxu1 %v12771_v59  ;;  %v12632_v58 = vld [vmem:[#allocation2 + $0x2f8] sm:$0xff]  ;;  %v12629_v59 = vld [vmem:[#allocation2 + $0x2e0] sm:$0xff] }
 0x73f   :  { %12908 = vmatprep.subr.bf16.mxu0 %v12778_v50  ;;  %12990 = vmatprep.subr.bf16.mxu1 %v12780_v60  ;;  %v12631_v50 = vld [vmem:[#allocation2 + $0x2f0] sm:$0xff]  ;;  %v12638_v60 = vld [vmem:[#allocation2 + $0x328] sm:$0xff] }
 0x742   :  { %12909 = vmatpush1.bf16.msra.mxu0 %v12777_v61  ;;  %12991 = vmatpush1.bf16.msra.mxu1 %v12779_v62  ;;  %v12640_v61 = vld [vmem:[#allocation2 + $0x338] sm:$0xff]  ;;  %v12637_v62 = vld [vmem:[#allocation2 + $0x320] sm:$0xff] }
 0x743   :  { %12910 = vmatprep.subr.bf16.mxu0 %v12786_v39  ;;  %12992 = vmatprep.subr.bf16.mxu1 %v12788_v0  ;;  %v12639_v39 = vld [vmem:[#allocation2 + $0x330] sm:$0xff]  ;;  %v12646_v0 = vld [vmem:[#allocation2 + $0x368] sm:$0xff] }
 0x746   :  { %12911 = vmatpush1.bf16.msra.mxu0 %v12785_v55  ;;  %12993 = vmatpush1.bf16.msra.mxu1 %v12787_v1  ;;  %v12648_v55 = vld [vmem:[#allocation2 + $0x378] sm:$0xff]  ;;  %v12645_v1 = vld [vmem:[#allocation2 + $0x360] sm:$0xff] }
 0x747   :  { %13003 = vmatprep.subr.bf16.mxu0 %v12542_v40  ;;  %13085 = vmatprep.subr.bf16.mxu1 %v12544_v2  ;;  %v12647_v40 = vld [vmem:[#allocation2 + $0x370] sm:$0xff]  ;;  %v12654_v2 = vld [vmem:[#allocation2 + $0x3a8] sm:$0xff] }
 0x749   :  { %12913 = vmatmul.mubr.bf16.vlgmr.msra.gmra.mrb[4].mxu0 %v19729_v3  ;;  %12995 = vmatmul.mubr.bf16.vlgmr.msra.gmra.mrb[12].mxu1 %v19729_v3 }
 0x74a   :  { %13004 = vmatpush1.bf16.msra.mxu0 %v12541_v4  ;;  %13086 = vmatpush1.bf16.msra.mxu1 %v12543_v5  ;;  %v12656_v4 = vld [vmem:[#allocation2 + $0x3b8] sm:$0xff]  ;;  %v12653_v5 = vld [vmem:[#allocation2 + $0x3a0] sm:$0xff] }
 0x74b   :  { %13005 = vmatprep.subr.bf16.mxu0 %v12550_v6  ;;  %13087 = vmatprep.subr.bf16.mxu1 %v12552_v7  ;;  %v12655_v6 = vld [vmem:[#allocation2 + $0x3b0] sm:$0xff]  ;;  %v12662_v7 = vld [vmem:[#allocation2 + $0x3e8] sm:$0xff] }
 0x74c   :  { %13035 = vmatprep.mubr.bf16.mxu0 %v19711_v43  ;;  %13117 = vmatprep.mubr.bf16.mxu1 %v19711_v43  ;;  %v12573_v43 = vld [vmem:[#allocation2 + $0x120] sm:$0xff] }
 0x74e   :  { %13006 = vmatpush1.bf16.msra.mxu0 %v12549_v8  ;;  %13088 = vmatpush1.bf16.msra.mxu1 %v12551_v9  ;;  %v12664_v8 = vld [vmem:[#allocation2 + $0x3f8] sm:$0xff]  ;;  %v12661_v9 = vld [vmem:[#allocation2 + $0x3e0] sm:$0xff] }
 0x74f   :  { %13007 = vmatprep.subr.bf16.mxu0 %v12558_v18  ;;  %13089 = vmatprep.subr.bf16.mxu1 %v12560_v13  ;;  %v12663_v18 = vld [vmem:[#allocation2 + $0x3f0] sm:$0xff]  ;;  %v12670_v13 = vld [vmem:[#allocation2 + $0x428] sm:$0xff] }
 0x752   :  { %13008 = vmatpush1.bf16.msra.mxu0 %v12557_v14  ;;  %13090 = vmatpush1.bf16.msra.mxu1 %v12559_v15  ;;  %v12672_v14 = vld [vmem:[#allocation2 + $0x438] sm:$0xff]  ;;  %v12669_v15 = vld [vmem:[#allocation2 + $0x420] sm:$0xff] }
 0x753   :  { %13009 = vmatprep.subr.bf16.mxu0 %v12566_v17  ;;  %13091 = vmatprep.subr.bf16.mxu1 %v12568_v10  ;;  %v12671_v17 = vld [vmem:[#allocation2 + $0x430] sm:$0xff]  ;;  %v12678_v10 = vld [vmem:[#allocation2 + $0x468] sm:$0xff] }
 0x756   :  { %13010 = vmatpush1.bf16.msra.mxu0 %v12565_v19  ;;  %13092 = vmatpush1.bf16.msra.mxu1 %v12567_v20  ;;  %v12680_v19 = vld [vmem:[#allocation2 + $0x478] sm:$0xff]  ;;  %v12677_v20 = vld [vmem:[#allocation2 + $0x460] sm:$0xff] }
 0x757   :  { %13011 = vmatprep.subr.bf16.mxu0 %v12574_v21  ;;  %13093 = vmatprep.subr.bf16.mxu1 %v12576_v22  ;;  %v12679_v21 = vld [vmem:[#allocation2 + $0x470] sm:$0xff]  ;;  %v12686_v22 = vld [vmem:[#allocation2 + $0x4a8] sm:$0xff] }
 0x75a   :  { %13012 = vmatpush1.bf16.msra.mxu0 %v12573_v43  ;;  %13094 = vmatpush1.bf16.msra.mxu1 %v12575_v23  ;;  %v12688_v43 = vld [vmem:[#allocation2 + $0x4b8] sm:$0xff]  ;;  %v12685_v23 = vld [vmem:[#allocation2 + $0x4a0] sm:$0xff] }
 0x75b   :  { %13013 = vmatprep.subr.bf16.mxu0 %v12582_v25  ;;  %13095 = vmatprep.subr.bf16.mxu1 %v12584_v26  ;;  %v12687_v25 = vld [vmem:[#allocation2 + $0x4b0] sm:$0xff]  ;;  %v12694_v26 = vld [vmem:[#allocation2 + $0x4e8] sm:$0xff] }
 0x75e   :  { %13014 = vmatpush1.bf16.msra.mxu0 %v12581_v27  ;;  %13096 = vmatpush1.bf16.msra.mxu1 %v12583_v30  ;;  %v12693_v27 = vld [vmem:[#allocation2 + $0x4e0] sm:$0xff]  ;;  %v12695_v30 = vld [vmem:[#allocation2 + $0x4f0] sm:$0xff] }
 0x75f   :  { %13015 = vmatprep.subr.bf16.mxu0 %v12590_v24  ;;  %13097 = vmatprep.subr.bf16.mxu1 %v12592_v32  ;;  %v12702_v24 = vld [vmem:[#allocation2 + $0x528] sm:$0xff]  ;;  %v12704_v32 = vld [vmem:[#allocation2 + $0x538] sm:$0xff] }
 0x762   :  { %13016 = vmatpush1.bf16.msra.mxu0 %v12589_v33  ;;  %13098 = vmatpush1.bf16.msra.mxu1 %v12591_v34  ;;  %v12703_v33 = vld [vmem:[#allocation2 + $0x530] sm:$0xff]  ;;  %v12710_v34 = vld [vmem:[#allocation2 + $0x568] sm:$0xff] }
 0x763   :  { %13017 = vmatprep.subr.bf16.mxu0 %v12598_v35  ;;  %13099 = vmatprep.subr.bf16.mxu1 %v12600_v36  ;;  %v12712_v35 = vld [vmem:[#allocation2 + $0x578] sm:$0xff]  ;;  %v12709_v36 = vld [vmem:[#allocation2 + $0x560] sm:$0xff] }
 0x766   :  { %13018 = vmatpush1.bf16.msra.mxu0 %v12597_v37  ;;  %13100 = vmatpush1.bf16.msra.mxu1 %v12599_v29  ;;  %v12711_v37 = vld [vmem:[#allocation2 + $0x570] sm:$0xff]  ;;  %v12718_v29 = vld [vmem:[#allocation2 + $0x5a8] sm:$0xff] }
 0x767   :  { %13019 = vmatprep.subr.bf16.mxu0 %v12606_v38  ;;  %13101 = vmatprep.subr.bf16.mxu1 %v12608_v31  ;;  %v12720_v38 = vld [vmem:[#allocation2 + $0x5b8] sm:$0xff]  ;;  %v12717_v31 = vld [vmem:[#allocation2 + $0x5a0] sm:$0xff] }
 0x76a   :  { %13020 = vmatpush1.bf16.msra.mxu0 %v12605_v16  ;;  %13102 = vmatpush1.bf16.msra.mxu1 %v12607_v45  ;;  %v12719_v16 = vld [vmem:[#allocation2 + $0x5b0] sm:$0xff]  ;;  %v12726_v45 = vld [vmem:[#allocation2 + $0x5e8] sm:$0xff] }
 0x76b   :  { %13021 = vmatprep.subr.bf16.mxu0 %v12614_v46  ;;  %13103 = vmatprep.subr.bf16.mxu1 %v12616_v47  ;;  %v12728_v46 = vld [vmem:[#allocation2 + $0x5f8] sm:$0xff]  ;;  %v12725_v47 = vld [vmem:[#allocation2 + $0x5e0] sm:$0xff] }
 0x76e   :  { %13022 = vmatpush1.bf16.msra.mxu0 %v12613_v49  ;;  %13104 = vmatpush1.bf16.msra.mxu1 %v12615_v51  ;;  %v12727_v49 = vld [vmem:[#allocation2 + $0x5f0] sm:$0xff]  ;;  %v12734_v51 = vld [vmem:[#allocation2 + $0x628] sm:$0xff] }
 0x76f   :  { %13023 = vmatprep.subr.bf16.mxu0 %v12622_v52  ;;  %13105 = vmatprep.subr.bf16.mxu1 %v12624_v53  ;;  %v12736_v52 = vld [vmem:[#allocation2 + $0x638] sm:$0xff]  ;;  %v12733_v53 = vld [vmem:[#allocation2 + $0x620] sm:$0xff] }
 0x772   :  { %13024 = vmatpush1.bf16.msra.mxu0 %v12621_v54  ;;  %13106 = vmatpush1.bf16.msra.mxu1 %v12623_v56  ;;  %v12735_v54 = vld [vmem:[#allocation2 + $0x630] sm:$0xff]  ;;  %v12742_v56 = vld [vmem:[#allocation2 + $0x668] sm:$0xff] }
 0x773   :  { %13025 = vmatprep.subr.bf16.mxu0 %v12630_v57  ;;  %13107 = vmatprep.subr.bf16.mxu1 %v12632_v58  ;;  %v12744_v57 = vld [vmem:[#allocation2 + $0x678] sm:$0xff]  ;;  %v12741_v58 = vld [vmem:[#allocation2 + $0x660] sm:$0xff] }
 0x776   :  { %13026 = vmatpush1.bf16.msra.mxu0 %v12629_v59  ;;  %13108 = vmatpush1.bf16.msra.mxu1 %v12631_v50  ;;  %v12743_v59 = vld [vmem:[#allocation2 + $0x670] sm:$0xff]  ;;  %v12750_v50 = vld [vmem:[#allocation2 + $0x6a8] sm:$0xff] }
 0x777   :  { %13027 = vmatprep.subr.bf16.mxu0 %v12638_v60  ;;  %13109 = vmatprep.subr.bf16.mxu1 %v12640_v61  ;;  %v12752_v60 = vld [vmem:[#allocation2 + $0x6b8] sm:$0xff]  ;;  %v12749_v61 = vld [vmem:[#allocation2 + $0x6a0] sm:$0xff] }
 0x77a   :  { %13028 = vmatpush1.bf16.msra.mxu0 %v12637_v62  ;;  %13110 = vmatpush1.bf16.msra.mxu1 %v12639_v39  ;;  %v12751_v62 = vld [vmem:[#allocation2 + $0x6b0] sm:$0xff]  ;;  %v12758_v39 = vld [vmem:[#allocation2 + $0x6e8] sm:$0xff] }
 0x77b   :  { %13029 = vmatprep.subr.bf16.mxu0 %v12646_v0  ;;  %13111 = vmatprep.subr.bf16.mxu1 %v12648_v55  ;;  %v12760_v0 = vld [vmem:[#allocation2 + $0x6f8] sm:$0xff]  ;;  %v12757_v55 = vld [vmem:[#allocation2 + $0x6e0] sm:$0xff] }
 0x77e   :  { %13030 = vmatpush1.bf16.msra.mxu0 %v12645_v1  ;;  %13112 = vmatpush1.bf16.msra.mxu1 %v12647_v40  ;;  %v12759_v1 = vld [vmem:[#allocation2 + $0x6f0] sm:$0xff]  ;;  %v12766_v40 = vld [vmem:[#allocation2 + $0x728] sm:$0xff] }
 0x77f   :  { %13031 = vmatprep.subr.bf16.mxu0 %v12654_v2  ;;  %13113 = vmatprep.subr.bf16.mxu1 %v12656_v4  ;;  %v12768_v2 = vld [vmem:[#allocation2 + $0x738] sm:$0xff]  ;;  %v12765_v4 = vld [vmem:[#allocation2 + $0x720] sm:$0xff] }
 0x782   :  { %13032 = vmatpush1.bf16.msra.mxu0 %v12653_v5  ;;  %13114 = vmatpush1.bf16.msra.mxu1 %v12655_v6  ;;  %v12767_v5 = vld [vmem:[#allocation2 + $0x730] sm:$0xff]  ;;  %v12774_v6 = vld [vmem:[#allocation2 + $0x768] sm:$0xff] }
 0x783   :  { %13033 = vmatprep.subr.bf16.mxu0 %v12662_v7  ;;  %13115 = vmatprep.subr.bf16.mxu1 %v12664_v8  ;;  %v12776_v7 = vld [vmem:[#allocation2 + $0x778] sm:$0xff]  ;;  %v12773_v8 = vld [vmem:[#allocation2 + $0x760] sm:$0xff] }
 0x786   :  { %13034 = vmatpush1.bf16.msra.mxu0 %v12661_v9  ;;  %13116 = vmatpush1.bf16.msra.mxu1 %v12663_v18  ;;  %v12775_v9 = vld [vmem:[#allocation2 + $0x770] sm:$0xff]  ;;  %v12782_v18 = vld [vmem:[#allocation2 + $0x7a8] sm:$0xff] }
 0x787   :  { %13044 = vmatprep.subr.bf16.mxu0 %v12670_v13  ;;  %13126 = vmatprep.subr.bf16.mxu1 %v12672_v14  ;;  %v12784_v13 = vld [vmem:[#allocation2 + $0x7b8] sm:$0xff]  ;;  %v12781_v14 = vld [vmem:[#allocation2 + $0x7a0] sm:$0xff] }
 0x789   :  { %13036 = vmatmul.mubr.bf16.vlgmr.msra.gmra.mrb[8].mxu0 %v19717_v48  ;;  %13118 = vmatmul.mubr.bf16.vlgmr.msra.gmra.mrb[16].mxu1 %v19717_v48  ;;  %v12696_v48 = vld [vmem:[#allocation2 + $0x4f8] sm:$0xff] }
 0x78a   :  { %13045 = vmatpush1.bf16.msra.mxu0 %v12669_v15  ;;  %13127 = vmatpush1.bf16.msra.mxu1 %v12671_v17  ;;  %v12783_v15 = vld [vmem:[#allocation2 + $0x7b0] sm:$0xff]  ;;  %v12790_v17 = vld [vmem:[#allocation2 + $0x7e8] sm:$0xff] }
 0x78b   :  { %13046 = vmatprep.subr.bf16.mxu0 %v12678_v10  ;;  %13128 = vmatprep.subr.bf16.mxu1 %v12680_v19  ;;  %v12792_v10 = vld [vmem:[#allocation2 + $0x7f8] sm:$0xff]  ;;  %v12789_v19 = vld [vmem:[#allocation2 + $0x7e0] sm:$0xff] }
 0x78c   :  { %13076 = vmatprep.mubr.bf16.mxu0 %v19721_v63  ;;  %13158 = vmatprep.mubr.bf16.mxu1 %v19721_v63  ;;  %v12701_v63 = vld [vmem:[#allocation2 + $0x520] sm:$0xff] }
 0x78e   :  { %13047 = vmatpush1.bf16.msra.mxu0 %v12677_v20  ;;  %13129 = vmatpush1.bf16.msra.mxu1 %v12679_v21  ;;  %v12791_v20 = vld [vmem:[#allocation2 + $0x7f0] sm:$0xff]  ;;  %v19744_v21 = vld [vmem:[%s19993_s12] sm:$0xff] }
 0x78f   :  { %13048 = vmatprep.subr.bf16.mxu0 %v12686_v22  ;;  %13130 = vmatprep.subr.bf16.mxu1 %v12688_v43  ;;  %v12802_v22 = vrot.slane %v19744_v21, %v19524_v42  ;;  %v12810_v43 = vrot.slane %v19744_v21, %v19664_v11 }
 0x792   :  { %13049 = vmatpush1.bf16.msra.mxu0 %v12685_v23  ;;  %13131 = vmatpush1.bf16.msra.mxu1 %v12687_v25  ;;  %v12806_v23 = vrot.slane %v19744_v21, %v19530_v44  ;;  %v12814_v25 = vrot.slane %v19744_v21, %v19667_v12 }
 0x793   :  { %13050 = vmatprep.subr.bf16.mxu0 %v12694_v26  ;;  %13132 = vmatprep.subr.bf16.mxu1 %v12696_v48 }
 0x796   :  { %13051 = vmatpush1.bf16.msra.mxu0 %v12693_v27  ;;  %13133 = vmatpush1.bf16.msra.mxu1 %v12695_v30 }
 0x797   :  { %13052 = vmatprep.subr.bf16.mxu0 %v12702_v24  ;;  %13134 = vmatprep.subr.bf16.mxu1 %v12704_v32 }
 0x79a   :  { %13053 = vmatpush1.bf16.msra.mxu0 %v12701_v63  ;;  %13135 = vmatpush1.bf16.msra.mxu1 %v12703_v33 }
 0x79b   :  { %13054 = vmatprep.subr.bf16.mxu0 %v12710_v34  ;;  %13136 = vmatprep.subr.bf16.mxu1 %v12712_v35 }
 0x79e   :  { %13055 = vmatpush1.bf16.msra.mxu0 %v12709_v36  ;;  %13137 = vmatpush1.bf16.msra.mxu1 %v12711_v37 }
 0x79f   :  { %13056 = vmatprep.subr.bf16.mxu0 %v12718_v29  ;;  %13138 = vmatprep.subr.bf16.mxu1 %v12720_v38 }
 0x7a2   :  { %13057 = vmatpush1.bf16.msra.mxu0 %v12717_v31  ;;  %13139 = vmatpush1.bf16.msra.mxu1 %v12719_v16 }
 0x7a3   :  { %13058 = vmatprep.subr.bf16.mxu0 %v12726_v45  ;;  %13140 = vmatprep.subr.bf16.mxu1 %v12728_v46 }
 0x7a6   :  { %13059 = vmatpush1.bf16.msra.mxu0 %v12725_v47  ;;  %13141 = vmatpush1.bf16.msra.mxu1 %v12727_v49 }
 0x7a7   :  { %13060 = vmatprep.subr.bf16.mxu0 %v12734_v51  ;;  %13142 = vmatprep.subr.bf16.mxu1 %v12736_v52 }
 0x7aa   :  { %13061 = vmatpush1.bf16.msra.mxu0 %v12733_v53  ;;  %13143 = vmatpush1.bf16.msra.mxu1 %v12735_v54 }
 0x7ab   :  { %13062 = vmatprep.subr.bf16.mxu0 %v12742_v56  ;;  %13144 = vmatprep.subr.bf16.mxu1 %v12744_v57 }
 0x7ae   :  { %13063 = vmatpush1.bf16.msra.mxu0 %v12741_v58  ;;  %13145 = vmatpush1.bf16.msra.mxu1 %v12743_v59 }
 0x7af   :  { %13064 = vmatprep.subr.bf16.mxu0 %v12750_v50  ;;  %13146 = vmatprep.subr.bf16.mxu1 %v12752_v60 }
 0x7b2   :  { %13065 = vmatpush1.bf16.msra.mxu0 %v12749_v61  ;;  %13147 = vmatpush1.bf16.msra.mxu1 %v12751_v62 }
 0x7b3   :  { %13066 = vmatprep.subr.bf16.mxu0 %v12758_v39  ;;  %13148 = vmatprep.subr.bf16.mxu1 %v12760_v0 }
 0x7b6   :  { %13067 = vmatpush1.bf16.msra.mxu0 %v12757_v55  ;;  %13149 = vmatpush1.bf16.msra.mxu1 %v12759_v1 }
 0x7b7   :  { %13068 = vmatprep.subr.bf16.mxu0 %v12766_v40  ;;  %13150 = vmatprep.subr.bf16.mxu1 %v12768_v2 }
 0x7ba   :  { %13069 = vmatpush1.bf16.msra.mxu0 %v12765_v4  ;;  %13151 = vmatpush1.bf16.msra.mxu1 %v12767_v5 }
 0x7bb   :  { %13070 = vmatprep.subr.bf16.mxu0 %v12774_v6  ;;  %13152 = vmatprep.subr.bf16.mxu1 %v12776_v7 }
 0x7be   :  { %13071 = vmatpush1.bf16.msra.mxu0 %v12773_v8  ;;  %13153 = vmatpush1.bf16.msra.mxu1 %v12775_v9 }
 0x7bf   :  { %13072 = vmatprep.subr.bf16.mxu0 %v12782_v18  ;;  %13154 = vmatprep.subr.bf16.mxu1 %v12784_v13 }
 0x7c2   :  { %13073 = vmatpush1.bf16.msra.mxu0 %v12781_v14  ;;  %13155 = vmatpush1.bf16.msra.mxu1 %v12783_v15 }
 0x7c3   :  { %13074 = vmatprep.subr.bf16.mxu0 %v12790_v17  ;;  %13156 = vmatprep.subr.bf16.mxu1 %v12792_v10 }
 0x7c6   :  { %13075 = vmatpush1.bf16.msra.mxu0 %v12789_v19  ;;  %13157 = vmatpush1.bf16.msra.mxu1 %v12791_v20 }
 0x7c9   :  { %13077 = vmatmul.mubr.bf16.vlgmr.msra.gmra.mrb[8].mxu0 %v19729_v3  ;;  %13159 = vmatmul.mubr.bf16.vlgmr.msra.gmra.mrb[16].mxu1 %v19729_v3 }
 0x81c   :  { %v12914_v26 = vpop.f32.mrb[4].mxu0  ;;  %v12996_v48 = vpop.f32.mrb[12].mxu1 }
 0x81d   :  { %v19754_v3 = vadd.f32 %v12914_v26, %v12802_v22  ;;  %v19756_v27 = vadd.f32 %v12996_v48, %v12810_v43  ;;  %v12916_v30 = vpop.f32.mrb[5].mxu0  ;;  %v12998_v24 = vpop.f32.mrb[13].mxu1 }
 0x81e   :  { %v19758_v32 = vadd.f32 %v12916_v30, %v12806_v23  ;;  %v19760_v63 = vadd.f32 %v12998_v24, %v12814_v25  ;;  %v12918_v33 = vpop.f32.mrb[6].mxu0  ;;  %v13000_v34 = vpop.f32.mrb[14].mxu1 }
 0x81f   :  { %v13167_v35 = vrot.slane %v19754_v3, 4  ;;  %v13179_v36 = vrot.slane %v19756_v27, 4  ;;  %v12919_v37 = vpop.f32.mrb[7].mxu0  ;;  %v13001_v29 = vpop.f32.mrb[15].mxu1 }
 0x820   :  { %v13173_v38 = vrot.slane %v19758_v32, 4  ;;  %v13185_v31 = vrot.slane %v19760_v63, 4 }
 0x821   :  { %v13168_v16 = vadd.f32 %v19754_v3, %v13167_v35  ;;  %v13180_v45 = vadd.f32 %v19756_v27, %v13179_v36 }
 0x822   :  { %v13174_v46 = vadd.f32 %v19758_v32, %v13173_v38  ;;  %v13186_v47 = vadd.f32 %v19760_v63, %v13185_v31 }
 0x823   :  { %v13169_v49 = vrot.slane %v13168_v16, 2  ;;  %v13181_v51 = vrot.slane %v13180_v45, 2 }
 0x824   :  { %v13175_v52 = vrot.slane %v13174_v46, 2  ;;  %v13187_v53 = vrot.slane %v13186_v47, 2 }
 0x825   :  { %v13170_v54 = vadd.f32 %v13169_v49, %v13168_v16  ;;  %v13182_v56 = vadd.f32 %v13181_v51, %v13180_v45 }
 0x826   :  { %v13176_v57 = vadd.f32 %v13175_v52, %v13174_v46  ;;  %v13188_v58 = vadd.f32 %v13187_v53, %v13186_v47 }
 0x827   :  { %v13171_v59 = vrot.slane %v13170_v54, 1  ;;  %v13183_v50 = vrot.slane %v13182_v56, 1 }
 0x828   :  { %v13177_v60 = vrot.slane %v13176_v57, 1  ;;  %v13189_v61 = vrot.slane %v13188_v58, 1 }
 0x829   :  { %v13172_v62 = vadd.f32 %v13171_v59, %v13170_v54  ;;  %v13184_v39 = vadd.f32 %v13183_v50, %v13182_v56 }
 0x82a   :  { %v13178_v0 = vadd.f32 %v13177_v60, %v13176_v57  ;;  %v13190_v55 = vadd.f32 %v13189_v61, %v13188_v58 }
 0x82b   :  { %v13215_v1 = vmul.f32 0.125, %v13172_v62  ;;  %v13217_v40 = vmul.f32 0.125, %v13184_v39 }
 0x82c   :  { %v13216_v2 = vmul.f32 0.125, %v13178_v0  ;;  %v13218_v4 = vmul.f32 0.125, %v13190_v55 }
 0x82d   :  { %v13223_v5 = vsub.f32 %v19754_v3, %v13215_v1  ;;  %v13225_v6 = vsub.f32 %v19756_v27, %v13217_v40 }
 0x82e   :  { %v13224_v7 = vsub.f32 %v19758_v32, %v13216_v2  ;;  %v13380_v8 = vcombine.low %v13215_v1, %v13216_v2  ;;  %v13226_v9 = vsub.f32 %v19760_v63, %v13218_v4  ;;  %v13381_v18 = vcombine.low %v13217_v40, %v13218_v4 }
 0x82f   :  { %v13231_v13 = vmul.f32 %v13223_v5, %v13223_v5  ;;  %v13233_v14 = vmul.f32 %v13225_v6, %v13225_v6  ;;  %v19791_v6 = vsub.s32 4, %v19521_v41 }
 0x830   :  { %v13232_v15 = vmul.f32 %v13224_v7, %v13224_v7  ;;  %v19775_v17 = vrot.slane %v13380_v8, %v19535_v28  ;;  %v13234_v10 = vmul.f32 %v13226_v9, %v13226_v9  ;;  %v19778_v19 = vrot.slane %v13381_v18, %v19535_v28 }
 0x831   :  { %v13239_v20 = vrot.slane %v13231_v13, 4  ;;  %v13251_v22 = vrot.slane %v13233_v14, 4  ;;  %v19794_v7 = vsub.s32 6, %v19521_v41  ;;  %v19797_v8 = vsub.s32 5, %v19521_v41 }
 0x832   :  { %v13245_v43 = vrot.slane %v13232_v15, 4  ;;  %v13257_v23 = vrot.slane %v13234_v10, 4  ;;  %v13412_v25 = vcombine.low %v19775_v17, %v19778_v19  ;;  %v19800_v9 = vsub.s32 7, %v19521_v41 }
 0x833   :  { %v13240_v26 = vadd.f32 %v13239_v20, %v13231_v13  ;;  %v13252_v48 = vadd.f32 %v13251_v22, %v13233_v14  ;;  %v12818_v18 = vrot.slane %v19744_v21, %v19791_v6  ;;  %v12826_v13 = vrot.slane %v19744_v21, %v19794_v7 }
 0x834   :  { %v13246_v30 = vadd.f32 %v13245_v43, %v13232_v15  ;;  %v13258_v24 = vadd.f32 %v13257_v23, %v13234_v10  ;;  %v12822_v14 = vrot.slane %v19744_v21, %v19797_v8  ;;  %v12830_v15 = vrot.slane %v19744_v21, %v19800_v9 }
 0x835   :  { %v13241_v33 = vrot.slane %v13240_v26, 2  ;;  %v13253_v34 = vrot.slane %v13252_v48, 2 }
 0x836   :  { %v13247_v35 = vrot.slane %v13246_v30, 2  ;;  %v13259_v36 = vrot.slane %v13258_v24, 2 }
 0x837   :  { %v13242_v37 = vadd.f32 %v13241_v33, %v13240_v26  ;;  %v13254_v29 = vadd.f32 %v13253_v34, %v13252_v48 }
 0x838   :  { %v13248_v38 = vadd.f32 %v13247_v35, %v13246_v30  ;;  %v13260_v31 = vadd.f32 %v13259_v36, %v13258_v24 }
 0x839   :  { %v13243_v16 = vrot.slane %v13242_v37, 1  ;;  %v13255_v45 = vrot.slane %v13254_v29, 1 }
 0x83a   :  { %v13249_v46 = vrot.slane %v13248_v38, 1  ;;  %v13261_v47 = vrot.slane %v13260_v31, 1 }
 0x83b   :  { %v13244_v49 = vadd.f32 %v13243_v16, %v13242_v37  ;;  %v13256_v51 = vadd.f32 %v13255_v45, %v13254_v29 }
 0x83c   :  { %v13250_v52 = vadd.f32 %v13249_v46, %v13248_v38  ;;  %v13262_v53 = vadd.f32 %v13261_v47, %v13260_v31 }
 0x83d   :  { %v13287_v54 = vmul.f32 0.125, %v13244_v49  ;;  %v13289_v56 = vmul.f32 0.125, %v13256_v51 }
 0x83e   :  { %v13288_v57 = vmul.f32 0.125, %v13250_v52  ;;  %v13290_v58 = vmul.f32 0.125, %v13262_v53 }
 0x83f   :  { %v13296_v59 = vadd.f32 0.8, %v13287_v54  ;;  %v13298_v50 = vadd.f32 0.8, %v13289_v56 }
 0x840   :  { %v13297_v60 = vadd.f32 0.8, %v13288_v57  ;;  %v13299_v61 = vadd.f32 0.8, %v13290_v58 }
 0x841   :  { %15252 = vrsqrt.f32 %v13296_v59 }
 0x842   :  { %15254 = vrsqrt.f32 %v13298_v50 }
 0x843   :  { %15256 = vrsqrt.f32 %v13297_v60 }
 0x844   :  { %15258 = vrsqrt.f32 %v13299_v61 }
 0x84b   :  { %v15253_v62 = vpop.eup %15252 }
 0x84c   :  { %v15255_v39 = vpop.eup %15254 }
 0x84d   :  { %v15257_v0 = vpop.eup %15256 }
 0x84e   :  { %v15259_v55 = vpop.eup %15258  ;;  %v13320_v1 = vcombine.low %v15253_v62, %v15257_v0 }
 0x84f   :  { %v13321_v40 = vcombine.low %v15255_v39, %v15259_v55 }
 0x850   :  { %v19783_v2 = vrot.slane %v13320_v1, %v19535_v28 }
 0x851   :  { %v19786_v4 = vrot.slane %v13321_v40, %v19535_v28 }
 0x853   :  { %v13352_v5 = vcombine.low %v19783_v2, %v19786_v4 }
 0x89c   :  { %v13078_v10 = vpop.f32.mrb[8].mxu0  ;;  %v13160_v20 = vpop.f32.mrb[16].mxu1 }
 0x89d   :  { %v19810_v22 = vadd.f32 %v13078_v10, %v12818_v18  ;;  %v19812_v43 = vadd.f32 %v13160_v20, %v12826_v13  ;;  %v13080_v41 = vpop.f32.mrb[9].mxu0  ;;  %v13162_v23 = vpop.f32.mrb[17].mxu1 }
 0x89e   :  { %v19814_v26 = vadd.f32 %v13080_v41, %v12822_v14  ;;  %v19816_v48 = vadd.f32 %v13162_v23, %v12830_v15  ;;  %v13082_v30 = vpop.f32.mrb[10].mxu0  ;;  %v13164_v24 = vpop.f32.mrb[18].mxu1 }
 0x89f   :  { %v13191_v33 = vrot.slane %v19810_v22, 4  ;;  %v13203_v34 = vrot.slane %v19812_v43, 4  ;;  %v13083_v35 = vpop.f32.mrb[11].mxu0  ;;  %v13165_v21 = vpop.f32.mrb[19].mxu1 }
 0x8a0   :  { %v13197_v36 = vrot.slane %v19814_v26, 4  ;;  %v13209_v37 = vrot.slane %v19816_v48, 4 }
 0x8a1   :  { %v13192_v29 = vadd.f32 %v19810_v22, %v13191_v33  ;;  %v13204_v38 = vadd.f32 %v19812_v43, %v13203_v34 }
 0x8a2   :  { %v13198_v31 = vadd.f32 %v19814_v26, %v13197_v36  ;;  %v13210_v16 = vadd.f32 %v19816_v48, %v13209_v37 }
 0x8a3   :  { %v13193_v45 = vrot.slane %v13192_v29, 2  ;;  %v13205_v46 = vrot.slane %v13204_v38, 2 }
 0x8a4   :  { %v13199_v47 = vrot.slane %v13198_v31, 2  ;;  %v13211_v49 = vrot.slane %v13210_v16, 2 }
 0x8a5   :  { %v13194_v51 = vadd.f32 %v13193_v45, %v13192_v29  ;;  %v13206_v52 = vadd.f32 %v13205_v46, %v13204_v38 }
 0x8a6   :  { %v13200_v53 = vadd.f32 %v13199_v47, %v13198_v31  ;;  %v13212_v54 = vadd.f32 %v13211_v49, %v13210_v16  ;;  %v13420_v31 = vrot.slane %v13412_v25, %v19535_v28 }
 0x8a7   :  { %v13195_v56 = vrot.slane %v13194_v51, 1  ;;  %v13207_v57 = vrot.slane %v13206_v52, 1 }
 0x8a8   :  { %v13201_v58 = vrot.slane %v13200_v53, 1  ;;  %v13213_v59 = vrot.slane %v13212_v54, 1 }
 0x8a9   :  { %v13196_v50 = vadd.f32 %v13195_v56, %v13194_v51  ;;  %v13208_v60 = vadd.f32 %v13207_v57, %v13206_v52 }
 0x8aa   :  { %v13202_v61 = vadd.f32 %v13201_v58, %v13200_v53  ;;  %v13214_v62 = vadd.f32 %v13213_v59, %v13212_v54 }
 0x8ab   :  { %v13219_v39 = vmul.f32 0.125, %v13196_v50  ;;  %v13221_v0 = vmul.f32 0.125, %v13208_v60 }
 0x8ac   :  { %v13220_v55 = vmul.f32 0.125, %v13202_v61  ;;  %v13222_v1 = vmul.f32 0.125, %v13214_v62 }
 0x8ad   :  { %v13227_v40 = vsub.f32 %v19810_v22, %v13219_v39  ;;  %v13229_v18 = vsub.f32 %v19812_v43, %v13221_v0 }
 0x8ae   :  { %v13228_v13 = vsub.f32 %v19814_v26, %v13220_v55  ;;  %v13382_v14 = vcombine.low %v13219_v39, %v13220_v55  ;;  %v13230_v15 = vsub.f32 %v19816_v48, %v13222_v1  ;;  %v13383_v10 = vcombine.low %v13221_v0, %v13222_v1 }
 0x8af   :  { %v13235_v20 = vmul.f32 %v13227_v40, %v13227_v40  ;;  %v13237_v41 = vmul.f32 %v13229_v18, %v13229_v18 }
 0x8b0   :  { %v13236_v23 = vmul.f32 %v13228_v13, %v13228_v13  ;;  %v13404_v30 = vrot.slane %v13382_v14, %v19535_v28  ;;  %v13238_v24 = vmul.f32 %v13230_v15, %v13230_v15  ;;  %v13411_v33 = vrot.slane %v13383_v10, %v19535_v28 }
 0x8b1   :  { %v13263_v34 = vrot.slane %v13235_v20, 4  ;;  %v13275_v35 = vrot.slane %v13237_v41, 4 }
 0x8b2   :  { %v13269_v21 = vrot.slane %v13236_v23, 4  ;;  %v13281_v36 = vrot.slane %v13238_v24, 4  ;;  %v13413_v37 = vcombine.low %v13404_v30, %v13411_v33 }
 0x8b3   :  { %v13264_v29 = vadd.f32 %v13263_v34, %v13235_v20  ;;  %v13276_v38 = vadd.f32 %v13275_v35, %v13237_v41  ;;  %v13360_v35 = vrot.slane %v13352_v5, %v19535_v28 }
 0x8b4   :  { %v13270_v16 = vadd.f32 %v13269_v21, %v13236_v23  ;;  %v13282_v45 = vadd.f32 %v13281_v36, %v13238_v24  ;;  %v13427_v46 = vrot.slane %v13413_v37, %v19535_v28  ;;  %v13295_v36 = vld [vmem:[%s19994_s13] sm:$0xff] }
 0x8b5   :  { %v13265_v47 = vrot.slane %v13264_v29, 2  ;;  %v13277_v49 = vrot.slane %v13276_v38, 2 }
 0x8b6   :  { %v13271_v51 = vrot.slane %v13270_v16, 2  ;;  %v13283_v52 = vrot.slane %v13282_v45, 2  ;;  %v13428_v53 = vcombine.low %v13420_v31, %v13427_v46 }
 0x8b7   :  { %v13266_v54 = vadd.f32 %v13265_v47, %v13264_v29  ;;  %v13278_v56 = vadd.f32 %v13277_v49, %v13276_v38  ;;  %v13371_v38 = vld [vmem:[%s19995_s14] sm:$0xff] }
 0x8b8   :  { %v13272_v57 = vadd.f32 %v13271_v51, %v13270_v16  ;;  %v13284_v58 = vadd.f32 %v13283_v52, %v13282_v45 }
 0x8b9   :  { %v13267_v59 = vrot.slane %v13266_v54, 1  ;;  %v13279_v50 = vrot.slane %v13278_v56, 1 }
 0x8ba   :  { %v13273_v60 = vrot.slane %v13272_v57, 1  ;;  %v13285_v61 = vrot.slane %v13284_v58, 1 }
 0x8bb   :  { %v13268_v62 = vadd.f32 %v13267_v59, %v13266_v54  ;;  %v13280_v17 = vadd.f32 %v13279_v50, %v13278_v56 }
 0x8bc   :  { %v13274_v19 = vadd.f32 %v13273_v60, %v13272_v57  ;;  %v13286_v25 = vadd.f32 %v13285_v61, %v13284_v58 }
 0x8bd   :  { %v13291_v39 = vmul.f32 0.125, %v13268_v62  ;;  %v13293_v0 = vmul.f32 0.125, %v13280_v17 }
 0x8be   :  { %v13292_v55 = vmul.f32 0.125, %v13274_v19  ;;  %v13294_v1 = vmul.f32 0.125, %v13286_v25 }
 0x8bf   :  { %v13300_v40 = vadd.f32 0.8, %v13291_v39  ;;  %v13302_v18 = vadd.f32 0.8, %v13293_v0 }
 0x8c0   :  { %v13301_v13 = vadd.f32 0.8, %v13292_v55  ;;  %v13303_v14 = vadd.f32 0.8, %v13294_v1 }
 0x8c1   :  { %15260 = vrsqrt.f32 %v13300_v40 }
 0x8c2   :  { %15262 = vrsqrt.f32 %v13302_v18 }
 0x8c3   :  { %15264 = vrsqrt.f32 %v13301_v13 }
 0x8c4   :  { %15266 = vrsqrt.f32 %v13303_v14 }
 0x8cb   :  { %v15261_v15 = vpop.eup %15260 }
 0x8cc   :  { %v15263_v10 = vpop.eup %15262 }
 0x8cd   :  { %v15265_v20 = vpop.eup %15264 }
 0x8ce   :  { %v15267_v41 = vpop.eup %15266  ;;  %v13322_v23 = vcombine.low %v15261_v15, %v15265_v20 }
 0x8cf   :  { %v13323_v30 = vcombine.low %v15263_v10, %v15267_v41 }
 0x8d0   :  { %v13344_v24 = vrot.slane %v13322_v23, %v19535_v28 }
 0x8d1   :  { %v13351_v33 = vrot.slane %v13323_v30, %v19535_v28 }
 0x8d3   :  { %v13353_v34 = vcombine.low %v13344_v24, %v13351_v33 }
 0x8d5   :  { %v13367_v21 = vrot.slane %v13353_v34, %v19535_v28 }
 0x8d7   :  { %v13368_v37 = vcombine.low %v13360_v35, %v13367_v21 }
 0x8d9   :  { %v13370_v29 = vmul.f32 %v13368_v37, %v13295_v36 }
 0x8db   :  { %v13430_v31 = vmul.f32 %v13428_v53, %v13370_v29  ;;  %v13436_v16 = vrot.slane %v13370_v29, %v19524_v42  ;;  %v13440_v45 = vrot.slane %v13370_v29, %v19530_v44  ;;  %v13444_v2 = vrot.slane %v13370_v29, %v19664_v11 }
 0x8dc   :  { %v13448_v4 = vrot.slane %v13370_v29, %v19667_v12  ;;  %v13452_v28 = vrot.slane %v13370_v29, %v19791_v6  ;;  %v13456_v5 = vrot.slane %v13370_v29, %v19797_v8  ;;  %v13460_v46 = vrot.slane %v13370_v29, %v19794_v7 }
 0x8dd   :  { %v13431_v47 = vsub.f32 %v13371_v38, %v13430_v31  ;;  %v13464_v49 = vrot.slane %v13370_v29, %v19800_v9  ;;  %v13473_v51 = vmul.f32 %v19754_v3, %v13436_v16  ;;  %v13474_v52 = vmul.f32 %v19758_v32, %v13440_v45 }
 0x8de   :  { %v13475_v53 = vmul.f32 %v19756_v27, %v13444_v2  ;;  %v13476_v54 = vmul.f32 %v19760_v63, %v13448_v4  ;;  %v13477_v56 = vmul.f32 %v19810_v22, %v13452_v28  ;;  %v13478_v57 = vmul.f32 %v19814_v26, %v13456_v5 }
 0x8df   :  { %v13479_v58 = vmul.f32 %v19812_v43, %v13460_v46  ;;  %v13480_v59 = vmul.f32 %v19816_v48, %v13464_v49  ;;  %v13485_v50 = vrot.slane %v13431_v47, %v19524_v42  ;;  %v13489_v60 = vrot.slane %v13431_v47, %v19530_v44 }
 0x8e0   :  { %v13493_v3 = vrot.slane %v13431_v47, %v19664_v11  ;;  %v13497_v32 = vrot.slane %v13431_v47, %v19667_v12  ;;  %v13501_v27 = vrot.slane %v13431_v47, %v19791_v6  ;;  %v13505_v63 = vrot.slane %v13431_v47, %v19797_v8 }
 0x8e1   :  { %v13509_v22 = vrot.slane %v13431_v47, %v19794_v7  ;;  %v13513_v26 = vrot.slane %v13431_v47, %v19800_v9  ;;  %v13522_v61 = vadd.f32 %v13485_v50, %v13473_v51  ;;  %v13523_v43 = vadd.f32 %v13489_v60, %v13474_v52 }
 0x8e2   :  { %v13524_v62 = vadd.f32 %v13493_v3, %v13475_v53  ;;  %v13525_v48 = vadd.f32 %v13497_v32, %v13476_v54  ;;  %v13526_v17 = vadd.f32 %v13501_v27, %v13477_v56  ;;  %v13527_v19 = vadd.f32 %v13505_v63, %v13478_v57 }
 0x8e3   :  { %v13528_v25 = vadd.f32 %v13509_v22, %v13479_v58  ;;  %v13529_v39 = vadd.f32 %v13513_v26, %v13480_v59  ;;  %v13530_v0 = vmul.f32 0.2, %v13522_v61  ;;  %v13531_v55 = vmul.f32 0.2, %v13523_v43 }
 0x8e4   :  { %v13532_v1 = vmul.f32 0.2, %v13524_v62  ;;  %v13533_v40 = vmul.f32 0.2, %v13525_v48  ;;  %v13534_v18 = vmul.f32 0.2, %v13526_v17 }
 0x8e5   :  { %v13535_v13 = vmul.f32 0.2, %v13527_v19  ;;  %v13536_v14 = vmul.f32 0.2, %v13528_v25  ;;  %v13537_v15 = vmul.f32 0.2, %v13529_v39  ;;  %v19874_v10 = vmax.f32 %v13522_v61, %v13530_v0 }
 0x8e6   :  { %v13539_v20 = vmax.f32 %v13523_v43, %v13531_v55  ;;  %v19876_v9 = vmax.f32 %v13524_v62, %v13532_v1  ;;  %v19878_v41 = vmax.f32 %v13525_v48, %v13533_v40  ;;  %v19880_v23 = vmax.f32 %v13526_v17, %v13534_v18 }
 0x8e7   :  { %v19882_v30 = vmax.f32 %v13527_v19, %v13535_v13  ;;  %v19884_v24 = vmax.f32 %v13528_v25, %v13536_v14  ;;  %v19886_v33 = vmax.f32 %v13529_v39, %v13537_v15 }
 0x8e8   :  { %15306 = dma.done.wait [#allocation4 + $0x1], 57344 }
 0x8e9   :  { %15307 = vsyncadd [#allocation4 + $0x1], 4294909952  ;;  %v19888_v34 = vpack.c.bf16 %v13539_v20, %v13539_v20  ;;  %v13551_v35 = vld [vmem:[#allocation3 + $0x8] sm:$0xff]  ;;  %v13553_v21 = vld [vmem:[#allocation3 + $0x18] sm:$0xff]  ;;  %vm14708_vm3 = vcmask 130048  }
 0x8ea   :  { %v13550_v36 = vld [vmem:[#allocation3] sm:$0xff]  ;;  %14043 = vmatprep.subr.bf16.mxu0 %v13551_v35  ;;  %14207 = vmatprep.subr.bf16.mxu1 %v13553_v21  ;;  %v13552_v37 = vld [vmem:[#allocation3 + $0x10] sm:$0xff]  ;;  %v13557_v31 = vld [vmem:[#allocation3 + $0x38] sm:$0xff] }
 0x8eb   :  { %14075 = vmatprep.mubr.bf16.mxu0 %v19888_v34  ;;  %14239 = vmatprep.mubr.bf16.mxu1 %v19888_v34  ;;  %v13558_v29 = vld [vmem:[#allocation3 + $0x40] sm:$0xff]  ;;  %v13560_v38 = vld [vmem:[#allocation3 + $0x50] sm:$0xff]  ;;  %v13559_v16 = vld [vmem:[#allocation3 + $0x48] sm:$0xff] }
 0x8ec   :  { %14044 = vmatpush1.bf16.msra.mxu0 %v13550_v36  ;;  %14208 = vmatpush1.bf16.msra.mxu1 %v13552_v37  ;;  %v13565_v45 = vld [vmem:[#allocation3 + $0x78] sm:$0xff]  ;;  %v13567_v2 = vld [vmem:[#allocation3 + $0x88] sm:$0xff]  ;;  %v13564_v4 = vld [vmem:[#allocation3 + $0x70] sm:$0xff] }
 0x8ed   :  { %14045 = vmatprep.subr.bf16.mxu0 %v13558_v29  ;;  %14209 = vmatprep.subr.bf16.mxu1 %v13560_v38  ;;  %v13566_v28 = vld [vmem:[#allocation3 + $0x80] sm:$0xff]  ;;  %v13572_v5 = vld [vmem:[#allocation3 + $0xb0] sm:$0xff]  ;;  %v13571_v47 = vld [vmem:[#allocation3 + $0xa8] sm:$0xff] }
 0x8ee   :  { %v13574_v46 = vld [vmem:[#allocation3 + $0xc0] sm:$0xff]  ;;  %v13573_v49 = vld [vmem:[#allocation3 + $0xb8] sm:$0xff]  ;;  %v13579_v51 = vld [vmem:[#allocation3 + $0xe8] sm:$0xff] }
 0x8ef   :  { %v13581_v52 = vld [vmem:[#allocation3 + $0xf8] sm:$0xff]  ;;  %v13578_v53 = vld [vmem:[#allocation3 + $0xe0] sm:$0xff]  ;;  %v13580_v54 = vld [vmem:[#allocation3 + $0xf0] sm:$0xff] }
 0x8f0   :  { %14046 = vmatpush1.bf16.msra.mxu0 %v13557_v31  ;;  %14210 = vmatpush1.bf16.msra.mxu1 %v13559_v16  ;;  %v13586_v56 = vld [vmem:[#allocation3 + $0x120] sm:$0xff]  ;;  %v13588_v57 = vld [vmem:[#allocation3 + $0x130] sm:$0xff]  ;;  %v13585_v58 = vld [vmem:[#allocation3 + $0x118] sm:$0xff] }
 0x8f1   :  { %14047 = vmatprep.subr.bf16.mxu0 %v13565_v45  ;;  %14211 = vmatprep.subr.bf16.mxu1 %v13567_v2  ;;  %v13587_v59 = vld [vmem:[#allocation3 + $0x128] sm:$0xff]  ;;  %v13593_v50 = vld [vmem:[#allocation3 + $0x158] sm:$0xff]  ;;  %v13592_v3 = vld [vmem:[#allocation3 + $0x150] sm:$0xff] }
 0x8f2   :  { %v13595_v60 = vld [vmem:[#allocation3 + $0x168] sm:$0xff]  ;;  %v13594_v32 = vld [vmem:[#allocation3 + $0x160] sm:$0xff]  ;;  %v13600_v27 = vld [vmem:[#allocation3 + $0x190] sm:$0xff] }
 0x8f3   :  { %v13602_v63 = vld [vmem:[#allocation3 + $0x1a0] sm:$0xff]  ;;  %v13599_v22 = vld [vmem:[#allocation3 + $0x188] sm:$0xff]  ;;  %v13601_v26 = vld [vmem:[#allocation3 + $0x198] sm:$0xff] }
 0x8f4   :  { %14048 = vmatpush1.bf16.msra.mxu0 %v13564_v4  ;;  %14212 = vmatpush1.bf16.msra.mxu1 %v13566_v28  ;;  %v13607_v61 = vld [vmem:[#allocation3 + $0x1c8] sm:$0xff]  ;;  %v13609_v43 = vld [vmem:[#allocation3 + $0x1d8] sm:$0xff]  ;;  %v13606_v62 = vld [vmem:[#allocation3 + $0x1c0] sm:$0xff] }
 0x8f5   :  { %14049 = vmatprep.subr.bf16.mxu0 %v13572_v5  ;;  %14213 = vmatprep.subr.bf16.mxu1 %v13574_v46  ;;  %v13608_v48 = vld [vmem:[#allocation3 + $0x1d0] sm:$0xff]  ;;  %v13614_v17 = vld [vmem:[#allocation3 + $0x200] sm:$0xff]  ;;  %v13613_v25 = vld [vmem:[#allocation3 + $0x1f8] sm:$0xff] }
 0x8f6   :  { %v13616_v19 = vld [vmem:[#allocation3 + $0x210] sm:$0xff]  ;;  %v13615_v39 = vld [vmem:[#allocation3 + $0x208] sm:$0xff]  ;;  %v13621_v0 = vld [vmem:[#allocation3 + $0x238] sm:$0xff] }
 0x8f7   :  { %v13623_v55 = vld [vmem:[#allocation3 + $0x248] sm:$0xff]  ;;  %v13620_v1 = vld [vmem:[#allocation3 + $0x230] sm:$0xff]  ;;  %v13622_v40 = vld [vmem:[#allocation3 + $0x240] sm:$0xff] }
 0x8f8   :  { %14050 = vmatpush1.bf16.msra.mxu0 %v13571_v47  ;;  %14214 = vmatpush1.bf16.msra.mxu1 %v13573_v49  ;;  %v13628_v18 = vld [vmem:[#allocation3 + $0x270] sm:$0xff]  ;;  %v13630_v13 = vld [vmem:[#allocation3 + $0x280] sm:$0xff]  ;;  %v13627_v14 = vld [vmem:[#allocation3 + $0x268] sm:$0xff] }
 0x8f9   :  { %14051 = vmatprep.subr.bf16.mxu0 %v13579_v51  ;;  %14215 = vmatprep.subr.bf16.mxu1 %v13581_v52  ;;  %v13629_v15 = vld [vmem:[#allocation3 + $0x278] sm:$0xff]  ;;  %v13635_v20 = vld [vmem:[#allocation3 + $0x2a8] sm:$0xff]  ;;  %v13634_v21 = vld [vmem:[#allocation3 + $0x2a0] sm:$0xff]  ;;  %v19894_v52 = vpack.c.bf16 %v19874_v10, %v19874_v10 }
 0x8fa   :  { %v13637_v35 = vld [vmem:[#allocation3 + $0x2b8] sm:$0xff]  ;;  %v13636_v36 = vld [vmem:[#allocation3 + $0x2b0] sm:$0xff]  ;;  %v13642_v37 = vld [vmem:[#allocation3 + $0x2e0] sm:$0xff] }
 0x8fb   :  { %v13644_v29 = vld [vmem:[#allocation3 + $0x2f0] sm:$0xff]  ;;  %v13641_v38 = vld [vmem:[#allocation3 + $0x2d8] sm:$0xff]  ;;  %v13643_v31 = vld [vmem:[#allocation3 + $0x2e8] sm:$0xff] }
 0x8fc   :  { %14052 = vmatpush1.bf16.msra.mxu0 %v13578_v53  ;;  %14216 = vmatpush1.bf16.msra.mxu1 %v13580_v54  ;;  %v13649_v16 = vld [vmem:[#allocation3 + $0x318] sm:$0xff]  ;;  %v13651_v45 = vld [vmem:[#allocation3 + $0x328] sm:$0xff]  ;;  %v13648_v2 = vld [vmem:[#allocation3 + $0x310] sm:$0xff] }
 0x8fd   :  { %14053 = vmatprep.subr.bf16.mxu0 %v13586_v56  ;;  %14217 = vmatprep.subr.bf16.mxu1 %v13588_v57  ;;  %v13650_v4 = vld [vmem:[#allocation3 + $0x320] sm:$0xff]  ;;  %v13656_v28 = vld [vmem:[#allocation3 + $0x350] sm:$0xff]  ;;  %v13655_v46 = vld [vmem:[#allocation3 + $0x348] sm:$0xff] }
 0x8fe   :  { %v13658_v5 = vld [vmem:[#allocation3 + $0x360] sm:$0xff]  ;;  %v13657_v47 = vld [vmem:[#allocation3 + $0x358] sm:$0xff]  ;;  %v13663_v49 = vld [vmem:[#allocation3 + $0x388] sm:$0xff] }
 0x8ff   :  { %v13665_v51 = vld [vmem:[#allocation3 + $0x398] sm:$0xff]  ;;  %v13662_v53 = vld [vmem:[#allocation3 + $0x380] sm:$0xff]  ;;  %v13664_v54 = vld [vmem:[#allocation3 + $0x390] sm:$0xff] }
 0x900   :  { %14054 = vmatpush1.bf16.msra.mxu0 %v13585_v58  ;;  %14218 = vmatpush1.bf16.msra.mxu1 %v13587_v59  ;;  %v13670_v56 = vld [vmem:[#allocation3 + $0x3c0] sm:$0xff]  ;;  %v13672_v57 = vld [vmem:[#allocation3 + $0x3d0] sm:$0xff]  ;;  %v19898_v58 = vpack.c.bf16 %v19878_v41, %v19878_v41  ;;  %v13669_v10 = vld [vmem:[#allocation3 + $0x3b8] sm:$0xff] }
 0x901   :  { %14055 = vmatprep.subr.bf16.mxu0 %v13593_v50  ;;  %14219 = vmatprep.subr.bf16.mxu1 %v13595_v60  ;;  %v13671_v59 = vld [vmem:[#allocation3 + $0x3c8] sm:$0xff]  ;;  %v13677_v50 = vld [vmem:[#allocation3 + $0x3f8] sm:$0xff]  ;;  %v13676_v41 = vld [vmem:[#allocation3 + $0x3f0] sm:$0xff] }
 0x902   :  { %v13679_v60 = vld [vmem:[#allocation3 + $0x408] sm:$0xff] }
 0x904   :  { %14056 = vmatpush1.bf16.msra.mxu0 %v13592_v3  ;;  %14220 = vmatpush1.bf16.msra.mxu1 %v13594_v32  ;;  %v13678_v3 = vld [vmem:[#allocation3 + $0x400] sm:$0xff]  ;;  %v13684_v32 = vld [vmem:[#allocation3 + $0x430] sm:$0xff] }
 0x905   :  { %14057 = vmatprep.subr.bf16.mxu0 %v13600_v27  ;;  %14221 = vmatprep.subr.bf16.mxu1 %v13602_v63  ;;  %v13686_v27 = vld [vmem:[#allocation3 + $0x440] sm:$0xff]  ;;  %v13683_v63 = vld [vmem:[#allocation3 + $0x428] sm:$0xff] }
 0x908   :  { %14058 = vmatpush1.bf16.msra.mxu0 %v13599_v22  ;;  %14222 = vmatpush1.bf16.msra.mxu1 %v13601_v26  ;;  %v13685_v22 = vld [vmem:[#allocation3 + $0x438] sm:$0xff]  ;;  %v13691_v26 = vld [vmem:[#allocation3 + $0x468] sm:$0xff] }
 0x909   :  { %14059 = vmatprep.subr.bf16.mxu0 %v13607_v61  ;;  %14223 = vmatprep.subr.bf16.mxu1 %v13609_v43  ;;  %v13693_v61 = vld [vmem:[#allocation3 + $0x478] sm:$0xff]  ;;  %v13690_v43 = vld [vmem:[#allocation3 + $0x460] sm:$0xff] }
 0x90c   :  { %14060 = vmatpush1.bf16.msra.mxu0 %v13606_v62  ;;  %14224 = vmatpush1.bf16.msra.mxu1 %v13608_v48  ;;  %v13692_v62 = vld [vmem:[#allocation3 + $0x470] sm:$0xff]  ;;  %v13698_v48 = vld [vmem:[#allocation3 + $0x4a0] sm:$0xff] }
 0x90d   :  { %14061 = vmatprep.subr.bf16.mxu0 %v13614_v17  ;;  %14225 = vmatprep.subr.bf16.mxu1 %v13616_v19  ;;  %v13700_v17 = vld [vmem:[#allocation3 + $0x4b0] sm:$0xff]  ;;  %v13697_v19 = vld [vmem:[#allocation3 + $0x498] sm:$0xff] }
 0x910   :  { %14062 = vmatpush1.bf16.msra.mxu0 %v13613_v25  ;;  %14226 = vmatpush1.bf16.msra.mxu1 %v13615_v39  ;;  %v13699_v25 = vld [vmem:[#allocation3 + $0x4a8] sm:$0xff]  ;;  %v13705_v39 = vld [vmem:[#allocation3 + $0x4d8] sm:$0xff] }
 0x911   :  { %14063 = vmatprep.subr.bf16.mxu0 %v13621_v0  ;;  %14227 = vmatprep.subr.bf16.mxu1 %v13623_v55  ;;  %v13707_v0 = vld [vmem:[#allocation3 + $0x4e8] sm:$0xff]  ;;  %v13704_v55 = vld [vmem:[#allocation3 + $0x4d0] sm:$0xff] }
 0x914   :  { %14064 = vmatpush1.bf16.msra.mxu0 %v13620_v1  ;;  %14228 = vmatpush1.bf16.msra.mxu1 %v13622_v40  ;;  %v13706_v1 = vld [vmem:[#allocation3 + $0x4e0] sm:$0xff]  ;;  %v13712_v40 = vld [vmem:[#allocation3 + $0x510] sm:$0xff] }
 0x915   :  { %14065 = vmatprep.subr.bf16.mxu0 %v13628_v18  ;;  %14229 = vmatprep.subr.bf16.mxu1 %v13630_v13  ;;  %v13714_v18 = vld [vmem:[#allocation3 + $0x520] sm:$0xff]  ;;  %v13711_v13 = vld [vmem:[#allocation3 + $0x508] sm:$0xff] }
 0x918   :  { %14066 = vmatpush1.bf16.msra.mxu0 %v13627_v14  ;;  %14230 = vmatpush1.bf16.msra.mxu1 %v13629_v15  ;;  %v13713_v14 = vld [vmem:[#allocation3 + $0x518] sm:$0xff]  ;;  %v13719_v15 = vld [vmem:[#allocation3 + $0x548] sm:$0xff] }
 0x919   :  { %14067 = vmatprep.subr.bf16.mxu0 %v13635_v20  ;;  %14231 = vmatprep.subr.bf16.mxu1 %v13637_v35  ;;  %v13721_v20 = vld [vmem:[#allocation3 + $0x558] sm:$0xff]  ;;  %v13718_v35 = vld [vmem:[#allocation3 + $0x540] sm:$0xff] }
 0x91c   :  { %14068 = vmatpush1.bf16.msra.mxu0 %v13634_v21  ;;  %14232 = vmatpush1.bf16.msra.mxu1 %v13636_v36  ;;  %v13720_v21 = vld [vmem:[#allocation3 + $0x550] sm:$0xff]  ;;  %v13726_v36 = vld [vmem:[#allocation3 + $0x580] sm:$0xff] }
 0x91d   :  { %14069 = vmatprep.subr.bf16.mxu0 %v13642_v37  ;;  %14233 = vmatprep.subr.bf16.mxu1 %v13644_v29  ;;  %v13728_v37 = vld [vmem:[#allocation3 + $0x590] sm:$0xff]  ;;  %v13725_v29 = vld [vmem:[#allocation3 + $0x578] sm:$0xff] }
 0x920   :  { %14070 = vmatpush1.bf16.msra.mxu0 %v13641_v38  ;;  %14234 = vmatpush1.bf16.msra.mxu1 %v13643_v31  ;;  %v13727_v38 = vld [vmem:[#allocation3 + $0x588] sm:$0xff]  ;;  %v13733_v31 = vld [vmem:[#allocation3 + $0x5b8] sm:$0xff] }
 0x921   :  { %14071 = vmatprep.subr.bf16.mxu0 %v13649_v16  ;;  %14235 = vmatprep.subr.bf16.mxu1 %v13651_v45  ;;  %v13735_v16 = vld [vmem:[#allocation3 + $0x5c8] sm:$0xff]  ;;  %v13732_v45 = vld [vmem:[#allocation3 + $0x5b0] sm:$0xff] }
 0x924   :  { %14072 = vmatpush1.bf16.msra.mxu0 %v13648_v2  ;;  %14236 = vmatpush1.bf16.msra.mxu1 %v13650_v4  ;;  %v13734_v2 = vld [vmem:[#allocation3 + $0x5c0] sm:$0xff]  ;;  %v13740_v4 = vld [vmem:[#allocation3 + $0x5f0] sm:$0xff] }
 0x925   :  { %14073 = vmatprep.subr.bf16.mxu0 %v13656_v28  ;;  %14237 = vmatprep.subr.bf16.mxu1 %v13658_v5  ;;  %v13742_v28 = vld [vmem:[#allocation3 + $0x600] sm:$0xff]  ;;  %v13739_v5 = vld [vmem:[#allocation3 + $0x5e8] sm:$0xff] }
 0x928   :  { %14074 = vmatpush1.bf16.msra.mxu0 %v13655_v46  ;;  %14238 = vmatpush1.bf16.msra.mxu1 %v13657_v47  ;;  %v13741_v46 = vld [vmem:[#allocation3 + $0x5f8] sm:$0xff]  ;;  %v13747_v47 = vld [vmem:[#allocation3 + $0x628] sm:$0xff] }
 0x929   :  { %14084 = vmatprep.subr.bf16.mxu0 %v13663_v49  ;;  %14248 = vmatprep.subr.bf16.mxu1 %v13665_v51  ;;  %v13749_v49 = vld [vmem:[#allocation3 + $0x638] sm:$0xff]  ;;  %v13746_v51 = vld [vmem:[#allocation3 + $0x620] sm:$0xff] }
 0x92b   :  { %14076 = vmatmul.mubr.bf16.vlgmr.msra.gmra.mrb[12].mxu0 %v19894_v52  ;;  %14240 = vmatmul.mubr.bf16.vlgmr.msra.gmra.mrb[20].mxu1 %v19894_v52 }
 0x92c   :  { %14085 = vmatpush1.bf16.msra.mxu0 %v13662_v53  ;;  %14249 = vmatpush1.bf16.msra.mxu1 %v13664_v54  ;;  %v13748_v53 = vld [vmem:[#allocation3 + $0x630] sm:$0xff]  ;;  %v13754_v54 = vld [vmem:[#allocation3 + $0x660] sm:$0xff] }
 0x92d   :  { %14086 = vmatprep.subr.bf16.mxu0 %v13670_v56  ;;  %14250 = vmatprep.subr.bf16.mxu1 %v13672_v57  ;;  %v13756_v56 = vld [vmem:[#allocation3 + $0x670] sm:$0xff]  ;;  %v13753_v57 = vld [vmem:[#allocation3 + $0x658] sm:$0xff] }
 0x92e   :  { %14116 = vmatprep.mubr.bf16.mxu0 %v19898_v58  ;;  %14280 = vmatprep.mubr.bf16.mxu1 %v19898_v58 }
 0x930   :  { %14087 = vmatpush1.bf16.msra.mxu0 %v13669_v10  ;;  %14251 = vmatpush1.bf16.msra.mxu1 %v13671_v59  ;;  %v13755_v10 = vld [vmem:[#allocation3 + $0x668] sm:$0xff]  ;;  %v13761_v59 = vld [vmem:[#allocation3 + $0x698] sm:$0xff] }
 0x931   :  { %14088 = vmatprep.subr.bf16.mxu0 %v13677_v50  ;;  %14252 = vmatprep.subr.bf16.mxu1 %v13679_v60  ;;  %v13763_v50 = vld [vmem:[#allocation3 + $0x6a8] sm:$0xff]  ;;  %v13760_v60 = vld [vmem:[#allocation3 + $0x690] sm:$0xff] }
 0x934   :  { %14089 = vmatpush1.bf16.msra.mxu0 %v13676_v41  ;;  %14253 = vmatpush1.bf16.msra.mxu1 %v13678_v3  ;;  %v13762_v41 = vld [vmem:[#allocation3 + $0x6a0] sm:$0xff]  ;;  %v13768_v3 = vld [vmem:[#allocation3 + $0x6d0] sm:$0xff] }
 0x935   :  { %14090 = vmatprep.subr.bf16.mxu0 %v13684_v32  ;;  %14254 = vmatprep.subr.bf16.mxu1 %v13686_v27  ;;  %v13770_v32 = vld [vmem:[#allocation3 + $0x6e0] sm:$0xff]  ;;  %v13767_v27 = vld [vmem:[#allocation3 + $0x6c8] sm:$0xff] }
 0x938   :  { %14091 = vmatpush1.bf16.msra.mxu0 %v13683_v63  ;;  %14255 = vmatpush1.bf16.msra.mxu1 %v13685_v22  ;;  %v13769_v63 = vld [vmem:[#allocation3 + $0x6d8] sm:$0xff]  ;;  %v13775_v22 = vld [vmem:[#allocation3 + $0x708] sm:$0xff] }
 0x939   :  { %14092 = vmatprep.subr.bf16.mxu0 %v13691_v26  ;;  %14256 = vmatprep.subr.bf16.mxu1 %v13693_v61  ;;  %v13777_v26 = vld [vmem:[#allocation3 + $0x718] sm:$0xff]  ;;  %v19906_v61 = vpack.c.bf16 %v19876_v9, %v19876_v9 }
 0x93a   :  { %v13781_v9 = vld [vmem:[#allocation3 + $0x738] sm:$0xff] }
 0x93c   :  { %14093 = vmatpush1.bf16.msra.mxu0 %v13690_v43  ;;  %14257 = vmatpush1.bf16.msra.mxu1 %v13692_v62  ;;  %v13774_v43 = vld [vmem:[#allocation3 + $0x700] sm:$0xff]  ;;  %v13776_v62 = vld [vmem:[#allocation3 + $0x710] sm:$0xff] }
 0x93d   :  { %14094 = vmatprep.subr.bf16.mxu0 %v13698_v48  ;;  %14258 = vmatprep.subr.bf16.mxu1 %v13700_v17  ;;  %v13782_v48 = vld [vmem:[#allocation3 + $0x740] sm:$0xff]  ;;  %v13784_v17 = vld [vmem:[#allocation3 + $0x750] sm:$0xff] }
 0x940   :  { %14095 = vmatpush1.bf16.msra.mxu0 %v13697_v19  ;;  %14259 = vmatpush1.bf16.msra.mxu1 %v13699_v25  ;;  %v19910_v19 = vpack.c.bf16 %v19882_v30, %v19882_v30  ;;  %v13783_v25 = vld [vmem:[#allocation3 + $0x748] sm:$0xff]  ;;  %v13788_v30 = vld [vmem:[#allocation3 + $0x770] sm:$0xff] }
 0x941   :  { %14096 = vmatprep.subr.bf16.mxu0 %v13705_v39  ;;  %14260 = vmatprep.subr.bf16.mxu1 %v13707_v0  ;;  %v13789_v39 = vld [vmem:[#allocation3 + $0x778] sm:$0xff]  ;;  %v13791_v0 = vld [vmem:[#allocation3 + $0x788] sm:$0xff] }
 0x944   :  { %14097 = vmatpush1.bf16.msra.mxu0 %v13704_v55  ;;  %14261 = vmatpush1.bf16.msra.mxu1 %v13706_v1  ;;  %v13790_v55 = vld [vmem:[#allocation3 + $0x780] sm:$0xff]  ;;  %v13796_v1 = vld [vmem:[#allocation3 + $0x7b0] sm:$0xff] }
 0x945   :  { %14098 = vmatprep.subr.bf16.mxu0 %v13712_v40  ;;  %14262 = vmatprep.subr.bf16.mxu1 %v13714_v18  ;;  %v13798_v40 = vld [vmem:[#allocation3 + $0x7c0] sm:$0xff]  ;;  %v13795_v18 = vld [vmem:[#allocation3 + $0x7a8] sm:$0xff] }
 0x948   :  { %14099 = vmatpush1.bf16.msra.mxu0 %v13711_v13  ;;  %14263 = vmatpush1.bf16.msra.mxu1 %v13713_v14  ;;  %v13797_v13 = vld [vmem:[#allocation3 + $0x7b8] sm:$0xff]  ;;  %v13803_v14 = vld [vmem:[#allocation3 + $0x7e8] sm:$0xff] }
 0x949   :  { %14100 = vmatprep.subr.bf16.mxu0 %v13719_v15  ;;  %14264 = vmatprep.subr.bf16.mxu1 %v13721_v20  ;;  %v13805_v15 = vld [vmem:[#allocation3 + $0x7f8] sm:$0xff]  ;;  %v13802_v20 = vld [vmem:[#allocation3 + $0x7e0] sm:$0xff] }
 0x94c   :  { %14101 = vmatpush1.bf16.msra.mxu0 %v13718_v35  ;;  %14265 = vmatpush1.bf16.msra.mxu1 %v13720_v21  ;;  %v13804_v35 = vld [vmem:[#allocation3 + $0x7f0] sm:$0xff]  ;;  %v13810_v21 = vld [vmem:[#allocation3 + $0x820] sm:$0xff] }
 0x94d   :  { %14102 = vmatprep.subr.bf16.mxu0 %v13726_v36  ;;  %14266 = vmatprep.subr.bf16.mxu1 %v13728_v37  ;;  %v13812_v36 = vld [vmem:[#allocation3 + $0x830] sm:$0xff]  ;;  %v13809_v37 = vld [vmem:[#allocation3 + $0x818] sm:$0xff] }
 0x950   :  { %14103 = vmatpush1.bf16.msra.mxu0 %v13725_v29  ;;  %14267 = vmatpush1.bf16.msra.mxu1 %v13727_v38  ;;  %v13811_v29 = vld [vmem:[#allocation3 + $0x828] sm:$0xff]  ;;  %v13817_v38 = vld [vmem:[#allocation3 + $0x858] sm:$0xff] }
 0x951   :  { %14104 = vmatprep.subr.bf16.mxu0 %v13733_v31  ;;  %14268 = vmatprep.subr.bf16.mxu1 %v13735_v16  ;;  %v13819_v31 = vld [vmem:[#allocation3 + $0x868] sm:$0xff]  ;;  %v13816_v16 = vld [vmem:[#allocation3 + $0x850] sm:$0xff] }
 0x954   :  { %14105 = vmatpush1.bf16.msra.mxu0 %v13732_v45  ;;  %14269 = vmatpush1.bf16.msra.mxu1 %v13734_v2  ;;  %v13818_v45 = vld [vmem:[#allocation3 + $0x860] sm:$0xff]  ;;  %v13824_v2 = vld [vmem:[#allocation3 + $0x890] sm:$0xff] }
 0x955   :  { %14106 = vmatprep.subr.bf16.mxu0 %v13740_v4  ;;  %14270 = vmatprep.subr.bf16.mxu1 %v13742_v28  ;;  %v13826_v4 = vld [vmem:[#allocation3 + $0x8a0] sm:$0xff]  ;;  %v13823_v28 = vld [vmem:[#allocation3 + $0x888] sm:$0xff] }
 0x958   :  { %14107 = vmatpush1.bf16.msra.mxu0 %v13739_v5  ;;  %14271 = vmatpush1.bf16.msra.mxu1 %v13741_v46  ;;  %v13825_v5 = vld [vmem:[#allocation3 + $0x898] sm:$0xff]  ;;  %v13831_v46 = vld [vmem:[#allocation3 + $0x8c8] sm:$0xff] }
 0x959   :  { %14108 = vmatprep.subr.bf16.mxu0 %v13747_v47  ;;  %14272 = vmatprep.subr.bf16.mxu1 %v13749_v49  ;;  %v13833_v47 = vld [vmem:[#allocation3 + $0x8d8] sm:$0xff]  ;;  %v13830_v49 = vld [vmem:[#allocation3 + $0x8c0] sm:$0xff] }
 0x95c   :  { %14109 = vmatpush1.bf16.msra.mxu0 %v13746_v51  ;;  %14273 = vmatpush1.bf16.msra.mxu1 %v13748_v53  ;;  %v13832_v51 = vld [vmem:[#allocation3 + $0x8d0] sm:$0xff]  ;;  %v13838_v53 = vld [vmem:[#allocation3 + $0x900] sm:$0xff] }
 0x95d   :  { %14110 = vmatprep.subr.bf16.mxu0 %v13754_v54  ;;  %14274 = vmatprep.subr.bf16.mxu1 %v13756_v56  ;;  %v13840_v54 = vld [vmem:[#allocation3 + $0x910] sm:$0xff]  ;;  %v13837_v56 = vld [vmem:[#allocation3 + $0x8f8] sm:$0xff] }
 0x960   :  { %14111 = vmatpush1.bf16.msra.mxu0 %v13753_v57  ;;  %14275 = vmatpush1.bf16.msra.mxu1 %v13755_v10  ;;  %v13839_v57 = vld [vmem:[#allocation3 + $0x908] sm:$0xff]  ;;  %v13845_v10 = vld [vmem:[#allocation3 + $0x938] sm:$0xff] }
 0x961   :  { %14112 = vmatprep.subr.bf16.mxu0 %v13761_v59  ;;  %14276 = vmatprep.subr.bf16.mxu1 %v13763_v50  ;;  %v13847_v59 = vld [vmem:[#allocation3 + $0x948] sm:$0xff]  ;;  %v13844_v50 = vld [vmem:[#allocation3 + $0x930] sm:$0xff] }
 0x964   :  { %14113 = vmatpush1.bf16.msra.mxu0 %v13760_v60  ;;  %14277 = vmatpush1.bf16.msra.mxu1 %v13762_v41  ;;  %v13846_v60 = vld [vmem:[#allocation3 + $0x940] sm:$0xff]  ;;  %v13852_v41 = vld [vmem:[#allocation3 + $0x970] sm:$0xff] }
 0x965   :  { %14114 = vmatprep.subr.bf16.mxu0 %v13768_v3  ;;  %14278 = vmatprep.subr.bf16.mxu1 %v13770_v32  ;;  %v13854_v3 = vld [vmem:[#allocation3 + $0x980] sm:$0xff]  ;;  %v13851_v32 = vld [vmem:[#allocation3 + $0x968] sm:$0xff] }
 0x968   :  { %14115 = vmatpush1.bf16.msra.mxu0 %v13767_v27  ;;  %14279 = vmatpush1.bf16.msra.mxu1 %v13769_v63  ;;  %v13853_v27 = vld [vmem:[#allocation3 + $0x978] sm:$0xff]  ;;  %v13859_v63 = vld [vmem:[#allocation3 + $0x9a8] sm:$0xff] }
 0x969   :  { %14125 = vmatprep.subr.bf16.mxu0 %v13775_v22  ;;  %14289 = vmatprep.subr.bf16.mxu1 %v13777_v26  ;;  %v13861_v22 = vld [vmem:[#allocation3 + $0x9b8] sm:$0xff]  ;;  %v13858_v26 = vld [vmem:[#allocation3 + $0x9a0] sm:$0xff] }
 0x96b   :  { %14117 = vmatmul.mubr.bf16.vlgmr.msra.gmra.mrb[12].mxu0 %v19906_v61  ;;  %14281 = vmatmul.mubr.bf16.vlgmr.msra.gmra.mrb[20].mxu1 %v19906_v61 }
 0x96c   :  { %14126 = vmatpush1.bf16.msra.mxu0 %v13774_v43  ;;  %14290 = vmatpush1.bf16.msra.mxu1 %v13776_v62  ;;  %v13860_v43 = vld [vmem:[#allocation3 + $0x9b0] sm:$0xff]  ;;  %v13866_v62 = vld [vmem:[#allocation3 + $0x9e0] sm:$0xff] }
 0x96d   :  { %14127 = vmatprep.subr.bf16.mxu0 %v13782_v48  ;;  %14291 = vmatprep.subr.bf16.mxu1 %v13784_v17  ;;  %v13868_v48 = vld [vmem:[#allocation3 + $0x9f0] sm:$0xff]  ;;  %v13865_v17 = vld [vmem:[#allocation3 + $0x9d8] sm:$0xff] }
 0x96e   :  { %14157 = vmatprep.mubr.bf16.mxu0 %v19910_v19  ;;  %14321 = vmatprep.mubr.bf16.mxu1 %v19910_v19 }
 0x970   :  { %14128 = vmatpush1.bf16.msra.mxu0 %v13781_v9  ;;  %14292 = vmatpush1.bf16.msra.mxu1 %v13783_v25  ;;  %v13867_v9 = vld [vmem:[#allocation3 + $0x9e8] sm:$0xff]  ;;  %v13873_v25 = vld [vmem:[#allocation3 + $0xa18] sm:$0xff] }
 0x971   :  { %14129 = vmatprep.subr.bf16.mxu0 %v13789_v39  ;;  %14293 = vmatprep.subr.bf16.mxu1 %v13791_v0  ;;  %v13875_v39 = vld [vmem:[#allocation3 + $0xa28] sm:$0xff]  ;;  %v13872_v0 = vld [vmem:[#allocation3 + $0xa10] sm:$0xff] }
 0x974   :  { %14130 = vmatpush1.bf16.msra.mxu0 %v13788_v30  ;;  %14294 = vmatpush1.bf16.msra.mxu1 %v13790_v55  ;;  %v13874_v30 = vld [vmem:[#allocation3 + $0xa20] sm:$0xff]  ;;  %v13880_v55 = vld [vmem:[#allocation3 + $0xa50] sm:$0xff] }
 0x975   :  { %14131 = vmatprep.subr.bf16.mxu0 %v13796_v1  ;;  %14295 = vmatprep.subr.bf16.mxu1 %v13798_v40  ;;  %v13882_v1 = vld [vmem:[#allocation3 + $0xa60] sm:$0xff]  ;;  %v13879_v40 = vld [vmem:[#allocation3 + $0xa48] sm:$0xff] }
 0x978   :  { %14132 = vmatpush1.bf16.msra.mxu0 %v13795_v18  ;;  %14296 = vmatpush1.bf16.msra.mxu1 %v13797_v13  ;;  %v13881_v18 = vld [vmem:[#allocation3 + $0xa58] sm:$0xff]  ;;  %v13887_v13 = vld [vmem:[#allocation3 + $0xa88] sm:$0xff] }
 0x979   :  { %14133 = vmatprep.subr.bf16.mxu0 %v13803_v14  ;;  %14297 = vmatprep.subr.bf16.mxu1 %v13805_v15  ;;  %v13889_v14 = vld [vmem:[#allocation3 + $0xa98] sm:$0xff]  ;;  %v19918_v15 = vpack.c.bf16 %v19880_v23, %v19880_v23 }
 0x97a   :  { %v13893_v23 = vld [vmem:[#allocation3 + $0xab8] sm:$0xff] }
 0x97c   :  { %14134 = vmatpush1.bf16.msra.mxu0 %v13802_v20  ;;  %14298 = vmatpush1.bf16.msra.mxu1 %v13804_v35  ;;  %v13886_v20 = vld [vmem:[#allocation3 + $0xa80] sm:$0xff]  ;;  %v13888_v35 = vld [vmem:[#allocation3 + $0xa90] sm:$0xff] }
 0x97d   :  { %14135 = vmatprep.subr.bf16.mxu0 %v13810_v21  ;;  %14299 = vmatprep.subr.bf16.mxu1 %v13812_v36  ;;  %v13894_v21 = vld [vmem:[#allocation3 + $0xac0] sm:$0xff]  ;;  %v13896_v36 = vld [vmem:[#allocation3 + $0xad0] sm:$0xff] }
 0x980   :  { %14136 = vmatpush1.bf16.msra.mxu0 %v13809_v37  ;;  %14300 = vmatpush1.bf16.msra.mxu1 %v13811_v29  ;;  %v19922_v37 = vpack.c.bf16 %v19886_v33, %v19886_v33  ;;  %v13895_v29 = vld [vmem:[#allocation3 + $0xac8] sm:$0xff]  ;;  %v13900_v33 = vld [vmem:[#allocation3 + $0xaf0] sm:$0xff] }
 0x981   :  { %14137 = vmatprep.subr.bf16.mxu0 %v13817_v38  ;;  %14301 = vmatprep.subr.bf16.mxu1 %v13819_v31  ;;  %v13901_v38 = vld [vmem:[#allocation3 + $0xaf8] sm:$0xff]  ;;  %v13903_v31 = vld [vmem:[#allocation3 + $0xb08] sm:$0xff] }
 0x984   :  { %14138 = vmatpush1.bf16.msra.mxu0 %v13816_v16  ;;  %14302 = vmatpush1.bf16.msra.mxu1 %v13818_v45  ;;  %v13902_v16 = vld [vmem:[#allocation3 + $0xb00] sm:$0xff]  ;;  %v13908_v45 = vld [vmem:[#allocation3 + $0xb30] sm:$0xff] }
 0x985   :  { %14139 = vmatprep.subr.bf16.mxu0 %v13824_v2  ;;  %14303 = vmatprep.subr.bf16.mxu1 %v13826_v4  ;;  %v13910_v2 = vld [vmem:[#allocation3 + $0xb40] sm:$0xff]  ;;  %v13907_v4 = vld [vmem:[#allocation3 + $0xb28] sm:$0xff] }
 0x988   :  { %14140 = vmatpush1.bf16.msra.mxu0 %v13823_v28  ;;  %14304 = vmatpush1.bf16.msra.mxu1 %v13825_v5  ;;  %v13909_v28 = vld [vmem:[#allocation3 + $0xb38] sm:$0xff]  ;;  %v13915_v5 = vld [vmem:[#allocation3 + $0xb68] sm:$0xff] }
 0x989   :  { %14141 = vmatprep.subr.bf16.mxu0 %v13831_v46  ;;  %14305 = vmatprep.subr.bf16.mxu1 %v13833_v47  ;;  %v13917_v46 = vld [vmem:[#allocation3 + $0xb78] sm:$0xff]  ;;  %v13914_v47 = vld [vmem:[#allocation3 + $0xb60] sm:$0xff] }
 0x98c   :  { %14142 = vmatpush1.bf16.msra.mxu0 %v13830_v49  ;;  %14306 = vmatpush1.bf16.msra.mxu1 %v13832_v51  ;;  %v13916_v49 = vld [vmem:[#allocation3 + $0xb70] sm:$0xff]  ;;  %v13922_v51 = vld [vmem:[#allocation3 + $0xba0] sm:$0xff] }
 0x98d   :  { %14143 = vmatprep.subr.bf16.mxu0 %v13838_v53  ;;  %14307 = vmatprep.subr.bf16.mxu1 %v13840_v54  ;;  %v13924_v53 = vld [vmem:[#allocation3 + $0xbb0] sm:$0xff]  ;;  %v13921_v54 = vld [vmem:[#allocation3 + $0xb98] sm:$0xff] }
 0x990   :  { %14144 = vmatpush1.bf16.msra.mxu0 %v13837_v56  ;;  %14308 = vmatpush1.bf16.msra.mxu1 %v13839_v57  ;;  %v13923_v56 = vld [vmem:[#allocation3 + $0xba8] sm:$0xff]  ;;  %v13929_v57 = vld [vmem:[#allocation3 + $0xbd8] sm:$0xff] }
 0x991   :  { %14145 = vmatprep.subr.bf16.mxu0 %v13845_v10  ;;  %14309 = vmatprep.subr.bf16.mxu1 %v13847_v59  ;;  %v13931_v10 = vld [vmem:[#allocation3 + $0xbe8] sm:$0xff]  ;;  %v13928_v59 = vld [vmem:[#allocation3 + $0xbd0] sm:$0xff] }
 0x994   :  { %14146 = vmatpush1.bf16.msra.mxu0 %v13844_v50  ;;  %14310 = vmatpush1.bf16.msra.mxu1 %v13846_v60  ;;  %v13930_v50 = vld [vmem:[#allocation3 + $0xbe0] sm:$0xff]  ;;  %v13936_v60 = vld [vmem:[#allocation3 + $0xc10] sm:$0xff] }
 0x995   :  { %14147 = vmatprep.subr.bf16.mxu0 %v13852_v41  ;;  %14311 = vmatprep.subr.bf16.mxu1 %v13854_v3  ;;  %v13938_v41 = vld [vmem:[#allocation3 + $0xc20] sm:$0xff]  ;;  %v13935_v3 = vld [vmem:[#allocation3 + $0xc08] sm:$0xff] }
 0x998   :  { %14148 = vmatpush1.bf16.msra.mxu0 %v13851_v32  ;;  %14312 = vmatpush1.bf16.msra.mxu1 %v13853_v27  ;;  %v13937_v32 = vld [vmem:[#allocation3 + $0xc18] sm:$0xff]  ;;  %v13943_v27 = vld [vmem:[#allocation3 + $0xc48] sm:$0xff] }
 0x999   :  { %14149 = vmatprep.subr.bf16.mxu0 %v13859_v63  ;;  %14313 = vmatprep.subr.bf16.mxu1 %v13861_v22  ;;  %v13945_v63 = vld [vmem:[#allocation3 + $0xc58] sm:$0xff]  ;;  %v13942_v22 = vld [vmem:[#allocation3 + $0xc40] sm:$0xff] }
 0x99c   :  { %14150 = vmatpush1.bf16.msra.mxu0 %v13858_v26  ;;  %14314 = vmatpush1.bf16.msra.mxu1 %v13860_v43  ;;  %v13944_v26 = vld [vmem:[#allocation3 + $0xc50] sm:$0xff]  ;;  %v13950_v43 = vld [vmem:[#allocation3 + $0xc80] sm:$0xff] }
 0x99d   :  { %14151 = vmatprep.subr.bf16.mxu0 %v13866_v62  ;;  %14315 = vmatprep.subr.bf16.mxu1 %v13868_v48  ;;  %v13952_v62 = vld [vmem:[#allocation3 + $0xc90] sm:$0xff]  ;;  %v13949_v48 = vld [vmem:[#allocation3 + $0xc78] sm:$0xff] }
 0x9a0   :  { %14152 = vmatpush1.bf16.msra.mxu0 %v13865_v17  ;;  %14316 = vmatpush1.bf16.msra.mxu1 %v13867_v9  ;;  %v13951_v17 = vld [vmem:[#allocation3 + $0xc88] sm:$0xff]  ;;  %v13957_v9 = vld [vmem:[#allocation3 + $0xcb8] sm:$0xff] }
 0x9a1   :  { %14153 = vmatprep.subr.bf16.mxu0 %v13873_v25  ;;  %14317 = vmatprep.subr.bf16.mxu1 %v13875_v39  ;;  %v13959_v25 = vld [vmem:[#allocation3 + $0xcc8] sm:$0xff]  ;;  %v13956_v39 = vld [vmem:[#allocation3 + $0xcb0] sm:$0xff] }
 0x9a4   :  { %14154 = vmatpush1.bf16.msra.mxu0 %v13872_v0  ;;  %14318 = vmatpush1.bf16.msra.mxu1 %v13874_v30  ;;  %v13958_v0 = vld [vmem:[#allocation3 + $0xcc0] sm:$0xff]  ;;  %v13964_v30 = vld [vmem:[#allocation3 + $0xcf0] sm:$0xff] }
 0x9a5   :  { %14155 = vmatprep.subr.bf16.mxu0 %v13880_v55  ;;  %14319 = vmatprep.subr.bf16.mxu1 %v13882_v1  ;;  %v13966_v55 = vld [vmem:[#allocation3 + $0xd00] sm:$0xff]  ;;  %v13963_v1 = vld [vmem:[#allocation3 + $0xce8] sm:$0xff] }
 0x9a8   :  { %14156 = vmatpush1.bf16.msra.mxu0 %v13879_v40  ;;  %14320 = vmatpush1.bf16.msra.mxu1 %v13881_v18  ;;  %v13965_v40 = vld [vmem:[#allocation3 + $0xcf8] sm:$0xff]  ;;  %v13971_v18 = vld [vmem:[#allocation3 + $0xd28] sm:$0xff] }
 0x9a9   :  { %14166 = vmatprep.subr.bf16.mxu0 %v13887_v13  ;;  %14330 = vmatprep.subr.bf16.mxu1 %v13889_v14  ;;  %v13973_v13 = vld [vmem:[#allocation3 + $0xd38] sm:$0xff]  ;;  %v13970_v14 = vld [vmem:[#allocation3 + $0xd20] sm:$0xff] }
 0x9ab   :  { %14158 = vmatmul.mubr.bf16.vlgmr.msra.gmra.mrb[12].mxu0 %v19918_v15  ;;  %14322 = vmatmul.mubr.bf16.vlgmr.msra.gmra.mrb[20].mxu1 %v19918_v15 }
 0x9ac   :  { %14167 = vmatpush1.bf16.msra.mxu0 %v13886_v20  ;;  %14331 = vmatpush1.bf16.msra.mxu1 %v13888_v35  ;;  %v13972_v20 = vld [vmem:[#allocation3 + $0xd30] sm:$0xff]  ;;  %v13978_v35 = vld [vmem:[#allocation3 + $0xd60] sm:$0xff] }
 0x9ad   :  { %14168 = vmatprep.subr.bf16.mxu0 %v13894_v21  ;;  %14332 = vmatprep.subr.bf16.mxu1 %v13896_v36  ;;  %v13980_v21 = vld [vmem:[#allocation3 + $0xd70] sm:$0xff]  ;;  %v13977_v36 = vld [vmem:[#allocation3 + $0xd58] sm:$0xff] }
 0x9ae   :  { %14198 = vmatprep.mubr.bf16.mxu0 %v19922_v37  ;;  %14362 = vmatprep.mubr.bf16.mxu1 %v19922_v37 }
 0x9b0   :  { %14169 = vmatpush1.bf16.msra.mxu0 %v13893_v23  ;;  %14333 = vmatpush1.bf16.msra.mxu1 %v13895_v29  ;;  %v13979_v23 = vld [vmem:[#allocation3 + $0xd68] sm:$0xff]  ;;  %v13985_v29 = vld [vmem:[#allocation3 + $0xd98] sm:$0xff] }
 0x9b1   :  { %14170 = vmatprep.subr.bf16.mxu0 %v13901_v38  ;;  %14334 = vmatprep.subr.bf16.mxu1 %v13903_v31  ;;  %v13987_v38 = vld [vmem:[#allocation3 + $0xda8] sm:$0xff]  ;;  %v13984_v31 = vld [vmem:[#allocation3 + $0xd90] sm:$0xff] }
 0x9b4   :  { %14171 = vmatpush1.bf16.msra.mxu0 %v13900_v33  ;;  %14335 = vmatpush1.bf16.msra.mxu1 %v13902_v16  ;;  %v13986_v33 = vld [vmem:[#allocation3 + $0xda0] sm:$0xff]  ;;  %v13992_v16 = vld [vmem:[#allocation3 + $0xdd0] sm:$0xff] }
 0x9b5   :  { %14172 = vmatprep.subr.bf16.mxu0 %v13908_v45  ;;  %14336 = vmatprep.subr.bf16.mxu1 %v13910_v2  ;;  %v13994_v45 = vld [vmem:[#allocation3 + $0xde0] sm:$0xff]  ;;  %v13991_v2 = vld [vmem:[#allocation3 + $0xdc8] sm:$0xff] }
 0x9b8   :  { %14173 = vmatpush1.bf16.msra.mxu0 %v13907_v4  ;;  %14337 = vmatpush1.bf16.msra.mxu1 %v13909_v28  ;;  %v13993_v4 = vld [vmem:[#allocation3 + $0xdd8] sm:$0xff]  ;;  %v13555_v28 = vld [vmem:[#allocation3 + $0x28] sm:$0xff] }
 0x9b9   :  { %14174 = vmatprep.subr.bf16.mxu0 %v13915_v5  ;;  %14338 = vmatprep.subr.bf16.mxu1 %v13917_v46  ;;  %v13612_v5 = vld [vmem:[#allocation3 + $0x1f0] sm:$0xff]  ;;  %v19930_v46 = vpack.c.bf16 %v19884_v24, %v19884_v24  ;;  %v13569_v24 = vld [vmem:[#allocation3 + $0x98] sm:$0xff] }
 0x9bc   :  { %14175 = vmatpush1.bf16.msra.mxu0 %v13914_v47  ;;  %14339 = vmatpush1.bf16.msra.mxu1 %v13916_v49  ;;  %v13554_v47 = vld [vmem:[#allocation3 + $0x20] sm:$0xff]  ;;  %v13556_v49 = vld [vmem:[#allocation3 + $0x30] sm:$0xff] }
 0x9bd   :  { %14176 = vmatprep.subr.bf16.mxu0 %v13922_v51  ;;  %14340 = vmatprep.subr.bf16.mxu1 %v13924_v53  ;;  %v13562_v51 = vld [vmem:[#allocation3 + $0x60] sm:$0xff]  ;;  %v13619_v53 = vld [vmem:[#allocation3 + $0x228] sm:$0xff] }
 0x9c0   :  { %14177 = vmatpush1.bf16.msra.mxu0 %v13921_v54  ;;  %14341 = vmatpush1.bf16.msra.mxu1 %v13923_v56  ;;  %v13561_v54 = vld [vmem:[#allocation3 + $0x58] sm:$0xff]  ;;  %v13563_v56 = vld [vmem:[#allocation3 + $0x68] sm:$0xff] }
 0x9c1   :  { %14178 = vmatprep.subr.bf16.mxu0 %v13929_v57  ;;  %14342 = vmatprep.subr.bf16.mxu1 %v13931_v10  ;;  %v13626_v57 = vld [vmem:[#allocation3 + $0x260] sm:$0xff]  ;;  %v13568_v10 = vld [vmem:[#allocation3 + $0x90] sm:$0xff] }
 0x9c4   :  { %14179 = vmatpush1.bf16.msra.mxu0 %v13928_v59  ;;  %14343 = vmatpush1.bf16.msra.mxu1 %v13930_v50  ;;  %v13570_v59 = vld [vmem:[#allocation3 + $0xa0] sm:$0xff]  ;;  %v13576_v50 = vld [vmem:[#allocation3 + $0xd0] sm:$0xff] }
 0x9c5   :  { %14180 = vmatprep.subr.bf16.mxu0 %v13936_v60  ;;  %14344 = vmatprep.subr.bf16.mxu1 %v13938_v41  ;;  %v13633_v60 = vld [vmem:[#allocation3 + $0x298] sm:$0xff]  ;;  %v13575_v41 = vld [vmem:[#allocation3 + $0xc8] sm:$0xff] }
 0x9c8   :  { %14181 = vmatpush1.bf16.msra.mxu0 %v13935_v3  ;;  %14345 = vmatpush1.bf16.msra.mxu1 %v13937_v32  ;;  %v13577_v3 = vld [vmem:[#allocation3 + $0xd8] sm:$0xff]  ;;  %v13583_v32 = vld [vmem:[#allocation3 + $0x108] sm:$0xff] }
 0x9c9   :  { %14182 = vmatprep.subr.bf16.mxu0 %v13943_v27  ;;  %14346 = vmatprep.subr.bf16.mxu1 %v13945_v63  ;;  %v13640_v27 = vld [vmem:[#allocation3 + $0x2d0] sm:$0xff] }
 0x9ca   :  { %v13584_v63 = vld [vmem:[#allocation3 + $0x110] sm:$0xff] }
 0x9cc   :  { %14183 = vmatpush1.bf16.msra.mxu0 %v13942_v22  ;;  %14347 = vmatpush1.bf16.msra.mxu1 %v13944_v26  ;;  %v13590_v22 = vld [vmem:[#allocation3 + $0x140] sm:$0xff]  ;;  %v13647_v26 = vld [vmem:[#allocation3 + $0x308] sm:$0xff] }
 0x9cd   :  { %14184 = vmatprep.subr.bf16.mxu0 %v13950_v43  ;;  %14348 = vmatprep.subr.bf16.mxu1 %v13952_v62  ;;  %v13589_v43 = vld [vmem:[#allocation3 + $0x138] sm:$0xff]  ;;  %v13591_v62 = vld [vmem:[#allocation3 + $0x148] sm:$0xff] }
 0x9d0   :  { %14185 = vmatpush1.bf16.msra.mxu0 %v13949_v48  ;;  %14349 = vmatpush1.bf16.msra.mxu1 %v13951_v17  ;;  %v13597_v48 = vld [vmem:[#allocation3 + $0x178] sm:$0xff]  ;;  %v13654_v17 = vld [vmem:[#allocation3 + $0x340] sm:$0xff] }
 0x9d1   :  { %14186 = vmatprep.subr.bf16.mxu0 %v13957_v9  ;;  %14350 = vmatprep.subr.bf16.mxu1 %v13959_v25  ;;  %v13596_v9 = vld [vmem:[#allocation3 + $0x170] sm:$0xff]  ;;  %v13598_v25 = vld [vmem:[#allocation3 + $0x180] sm:$0xff] }
 0x9d4   :  { %14187 = vmatpush1.bf16.msra.mxu0 %v13956_v39  ;;  %14351 = vmatpush1.bf16.msra.mxu1 %v13958_v0  ;;  %v13604_v39 = vld [vmem:[#allocation3 + $0x1b0] sm:$0xff]  ;;  %v13661_v0 = vld [vmem:[#allocation3 + $0x378] sm:$0xff] }
 0x9d5   :  { %14188 = vmatprep.subr.bf16.mxu0 %v13964_v30  ;;  %14352 = vmatprep.subr.bf16.mxu1 %v13966_v55  ;;  %v13603_v30 = vld [vmem:[#allocation3 + $0x1a8] sm:$0xff]  ;;  %v13605_v55 = vld [vmem:[#allocation3 + $0x1b8] sm:$0xff] }
 0x9d8   :  { %14189 = vmatpush1.bf16.msra.mxu0 %v13963_v1  ;;  %14353 = vmatpush1.bf16.msra.mxu1 %v13965_v40  ;;  %v13611_v1 = vld [vmem:[#allocation3 + $0x1e8] sm:$0xff]  ;;  %v13724_v40 = vld [vmem:[#allocation3 + $0x570] sm:$0xff] }
 0x9d9   :  { %14190 = vmatprep.subr.bf16.mxu0 %v13971_v18  ;;  %14354 = vmatprep.subr.bf16.mxu1 %v13973_v13  ;;  %v13610_v18 = vld [vmem:[#allocation3 + $0x1e0] sm:$0xff]  ;;  %v13668_v13 = vld [vmem:[#allocation3 + $0x3b0] sm:$0xff] }
 0x9dc   :  { %14191 = vmatpush1.bf16.msra.mxu0 %v13970_v14  ;;  %14355 = vmatpush1.bf16.msra.mxu1 %v13972_v20  ;;  %v13618_v14 = vld [vmem:[#allocation3 + $0x220] sm:$0xff]  ;;  %v13731_v20 = vld [vmem:[#allocation3 + $0x5a8] sm:$0xff] }
 0x9dd   :  { %14192 = vmatprep.subr.bf16.mxu0 %v13978_v35  ;;  %14356 = vmatprep.subr.bf16.mxu1 %v13980_v21  ;;  %v13617_v35 = vld [vmem:[#allocation3 + $0x218] sm:$0xff]  ;;  %v13675_v21 = vld [vmem:[#allocation3 + $0x3e8] sm:$0xff] }
 0x9e0   :  { %14193 = vmatpush1.bf16.msra.mxu0 %v13977_v36  ;;  %14357 = vmatpush1.bf16.msra.mxu1 %v13979_v23  ;;  %v13625_v36 = vld [vmem:[#allocation3 + $0x258] sm:$0xff]  ;;  %v13738_v23 = vld [vmem:[#allocation3 + $0x5e0] sm:$0xff] }
 0x9e1   :  { %14194 = vmatprep.subr.bf16.mxu0 %v13985_v29  ;;  %14358 = vmatprep.subr.bf16.mxu1 %v13987_v38  ;;  %v13624_v29 = vld [vmem:[#allocation3 + $0x250] sm:$0xff]  ;;  %v13682_v38 = vld [vmem:[#allocation3 + $0x420] sm:$0xff] }
 0x9e4   :  { %14195 = vmatpush1.bf16.msra.mxu0 %v13984_v31  ;;  %14359 = vmatpush1.bf16.msra.mxu1 %v13986_v33  ;;  %v13632_v31 = vld [vmem:[#allocation3 + $0x290] sm:$0xff]  ;;  %v13745_v33 = vld [vmem:[#allocation3 + $0x618] sm:$0xff] }
 0x9e5   :  { %14196 = vmatprep.subr.bf16.mxu0 %v13992_v16  ;;  %14360 = vmatprep.subr.bf16.mxu1 %v13994_v45  ;;  %v13631_v16 = vld [vmem:[#allocation3 + $0x288] sm:$0xff]  ;;  %v13689_v45 = vld [vmem:[#allocation3 + $0x458] sm:$0xff] }
 0x9e8   :  { %14197 = vmatpush1.bf16.msra.mxu0 %v13991_v2  ;;  %14361 = vmatpush1.bf16.msra.mxu1 %v13993_v4  ;;  %v13639_v2 = vld [vmem:[#allocation3 + $0x2c8] sm:$0xff]  ;;  %v13752_v4 = vld [vmem:[#allocation3 + $0x650] sm:$0xff] }
 0x9e9   :  { %14371 = vmatprep.subr.bf16.mxu0 %v13555_v28  ;;  %14936 = vmatprep.subr.bf16.mxu1 %v13612_v5  ;;  %v13638_v28 = vld [vmem:[#allocation3 + $0x2c0] sm:$0xff]  ;;  %v13696_v5 = vld [vmem:[#allocation3 + $0x490] sm:$0xff] }
 0x9eb   :  { %14199 = vmatmul.mubr.bf16.vlgmr.msra.gmra.mrb[12].mxu0 %v19930_v46  ;;  %14363 = vmatmul.mubr.bf16.vlgmr.msra.gmra.mrb[20].mxu1 %v19930_v46 }
 0x9ec   :  { %14372 = vmatpush1.bf16.msra.mxu0 %v13554_v47  ;;  %14937 = vmatpush3.bf16.msra.mxu1 %v13556_v49  ;;  %v13646_v47 = vld [vmem:[#allocation3 + $0x300] sm:$0xff]  ;;  %v13759_v49 = vld [vmem:[#allocation3 + $0x688] sm:$0xff] }
 0x9ed   :  { %14373 = vmatprep.subr.bf16.mxu0 %v13562_v51  ;;  %14938 = vmatprep.subr.bf16.mxu1 %v13619_v53  ;;  %v13645_v51 = vld [vmem:[#allocation3 + $0x2f8] sm:$0xff]  ;;  %v13703_v53 = vld [vmem:[#allocation3 + $0x4c8] sm:$0xff] }
 0x9ee   :  { %14403 = vmatprep.mubr.bf16.mxu0 %v19888_v34  ;;  %14567 = vmatprep.mubr.bf16.mxu1 %v19888_v34  ;;  %v13582_v34 = vld [vmem:[#allocation3 + $0x100] sm:$0xff] }
 0x9f0   :  { %14374 = vmatpush1.bf16.msra.mxu0 %v13561_v54  ;;  %14939 = vmatpush3.bf16.msra.mxu1 %v13563_v56  ;;  %v13653_v54 = vld [vmem:[#allocation3 + $0x338] sm:$0xff]  ;;  %v13766_v56 = vld [vmem:[#allocation3 + $0x6c0] sm:$0xff] }
 0x9f1   :  { %14375 = vmatprep.subr.bf16.mxu0 %v13569_v24  ;;  %14940 = vmatprep.subr.bf16.mxu1 %v13626_v57  ;;  %v13652_v24 = vld [vmem:[#allocation3 + $0x330] sm:$0xff]  ;;  %v13710_v57 = vld [vmem:[#allocation3 + $0x500] sm:$0xff] }
 0x9f4   :  { %14376 = vmatpush1.bf16.msra.mxu0 %v13568_v10  ;;  %14941 = vmatpush3.bf16.msra.mxu1 %v13570_v59  ;;  %v13660_v10 = vld [vmem:[#allocation3 + $0x370] sm:$0xff]  ;;  %v13773_v59 = vld [vmem:[#allocation3 + $0x6f8] sm:$0xff] }
 0x9f5   :  { %14377 = vmatprep.subr.bf16.mxu0 %v13576_v50  ;;  %14942 = vmatprep.subr.bf16.mxu1 %v13633_v60  ;;  %v13659_v50 = vld [vmem:[#allocation3 + $0x368] sm:$0xff]  ;;  %v13717_v60 = vld [vmem:[#allocation3 + $0x538] sm:$0xff] }
 0x9f8   :  { %14378 = vmatpush1.bf16.msra.mxu0 %v13575_v41  ;;  %14943 = vmatpush3.bf16.msra.mxu1 %v13577_v3  ;;  %v13667_v41 = vld [vmem:[#allocation3 + $0x3a8] sm:$0xff]  ;;  %v13836_v3 = vld [vmem:[#allocation3 + $0x8f0] sm:$0xff] }
 0x9f9   :  { %14379 = vmatprep.subr.bf16.mxu0 %v13583_v32  ;;  %14944 = vmatprep.subr.bf16.mxu1 %v13640_v27  ;;  %v13666_v32 = vld [vmem:[#allocation3 + $0x3a0] sm:$0xff]  ;;  %v13780_v27 = vld [vmem:[#allocation3 + $0x730] sm:$0xff] }
 0x9fc   :  { %14380 = vmatpush1.bf16.msra.mxu0 %v13582_v34  ;;  %14945 = vmatpush3.bf16.msra.mxu1 %v13584_v63  ;;  %v13674_v34 = vld [vmem:[#allocation3 + $0x3e0] sm:$0xff]  ;;  %v13843_v63 = vld [vmem:[#allocation3 + $0x928] sm:$0xff] }
 0x9fd   :  { %14381 = vmatprep.subr.bf16.mxu0 %v13590_v22  ;;  %14946 = vmatprep.subr.bf16.mxu1 %v13647_v26  ;;  %v13673_v22 = vld [vmem:[#allocation3 + $0x3d8] sm:$0xff]  ;;  %v13787_v26 = vld [vmem:[#allocation3 + $0x768] sm:$0xff] }
 0xa00   :  { %14382 = vmatpush1.bf16.msra.mxu0 %v13589_v43  ;;  %14947 = vmatpush3.bf16.msra.mxu1 %v13591_v62  ;;  %v13681_v43 = vld [vmem:[#allocation3 + $0x418] sm:$0xff]  ;;  %v13850_v62 = vld [vmem:[#allocation3 + $0x960] sm:$0xff] }
 0xa01   :  { %14383 = vmatprep.subr.bf16.mxu0 %v13597_v48  ;;  %14948 = vmatprep.subr.bf16.mxu1 %v13654_v17  ;;  %v13680_v48 = vld [vmem:[#allocation3 + $0x410] sm:$0xff] }
 0xa02   :  { %v13688_v17 = vld [vmem:[#allocation3 + $0x450] sm:$0xff] }
 0xa04   :  { %14384 = vmatpush1.bf16.msra.mxu0 %v13596_v9  ;;  %14949 = vmatpush3.bf16.msra.mxu1 %v13598_v25  ;;  %v13857_v9 = vld [vmem:[#allocation3 + $0x998] sm:$0xff]  ;;  %v13687_v25 = vld [vmem:[#allocation3 + $0x448] sm:$0xff] }
 0xa05   :  { %14385 = vmatprep.subr.bf16.mxu0 %v13604_v39  ;;  %14950 = vmatprep.subr.bf16.mxu1 %v13661_v0  ;;  %v13801_v39 = vld [vmem:[#allocation3 + $0x7d8] sm:$0xff]  ;;  %v13695_v0 = vld [vmem:[#allocation3 + $0x488] sm:$0xff] }
 0xa08   :  { %14386 = vmatpush1.bf16.msra.mxu0 %v13603_v30  ;;  %14951 = vmatpush3.bf16.msra.mxu1 %v13605_v55  ;;  %v13864_v30 = vld [vmem:[#allocation3 + $0x9d0] sm:$0xff] }
 0xa09   :  { %14387 = vmatprep.subr.bf16.mxu0 %v13611_v1  ;;  %14958 = vmatprep.subr.bf16.mxu1 %v13724_v40  ;;  %v13808_v55 = vld [vmem:[#allocation3 + $0x810] sm:$0xff]  ;;  %v13702_v1 = vld [vmem:[#allocation3 + $0x4c0] sm:$0xff]  ;;  %v13871_v40 = vld [vmem:[#allocation3 + $0xa08] sm:$0xff] }
 0xa0b   :  { %14568 = vmatmul.mubr.bf16.vlgmr.msra.gmra.mrb[24].mxu1 %v19894_v52 }
 0xa0c   :  { %14388 = vmatpush1.bf16.msra.mxu0 %v13610_v18  ;;  %14959 = vmatpush3.bf16.msra.mxu1 %v13668_v13  ;;  %v13701_v18 = vld [vmem:[#allocation3 + $0x4b8] sm:$0xff]  ;;  %v13815_v13 = vld [vmem:[#allocation3 + $0x848] sm:$0xff] }
 0xa0d   :  { %14389 = vmatprep.subr.bf16.mxu0 %v13618_v14  ;;  %14960 = vmatprep.subr.bf16.mxu1 %v13731_v20  ;;  %v13709_v14 = vld [vmem:[#allocation3 + $0x4f8] sm:$0xff]  ;;  %v13878_v20 = vld [vmem:[#allocation3 + $0xa40] sm:$0xff] }
 0xa0e   :  { %14607 = vmatprep.mubr.bf16.mxu1 %v19898_v58 }
 0xa10   :  { %14390 = vmatpush1.bf16.msra.mxu0 %v13617_v35  ;;  %14961 = vmatpush3.bf16.msra.mxu1 %v13675_v21  ;;  %v13708_v35 = vld [vmem:[#allocation3 + $0x4f0] sm:$0xff]  ;;  %v13822_v21 = vld [vmem:[#allocation3 + $0x880] sm:$0xff] }
 0xa11   :  { %14391 = vmatprep.subr.bf16.mxu0 %v13625_v36  ;;  %14962 = vmatprep.subr.bf16.mxu1 %v13738_v23  ;;  %v13716_v36 = vld [vmem:[#allocation3 + $0x530] sm:$0xff]  ;;  %v13885_v23 = vld [vmem:[#allocation3 + $0xa78] sm:$0xff] }
 0xa14   :  { %14392 = vmatpush1.bf16.msra.mxu0 %v13624_v29  ;;  %14963 = vmatpush3.bf16.msra.mxu1 %v13682_v38  ;;  %v13715_v29 = vld [vmem:[#allocation3 + $0x528] sm:$0xff]  ;;  %v13829_v38 = vld [vmem:[#allocation3 + $0x8b8] sm:$0xff] }
 0xa15   :  { %14393 = vmatprep.subr.bf16.mxu0 %v13632_v31  ;;  %14964 = vmatprep.subr.bf16.mxu1 %v13745_v33  ;;  %v13723_v31 = vld [vmem:[#allocation3 + $0x568] sm:$0xff]  ;;  %v13948_v33 = vld [vmem:[#allocation3 + $0xc70] sm:$0xff] }
 0xa18   :  { %14394 = vmatpush1.bf16.msra.mxu0 %v13631_v16  ;;  %14965 = vmatpush3.bf16.msra.mxu1 %v13689_v45  ;;  %v13722_v16 = vld [vmem:[#allocation3 + $0x560] sm:$0xff]  ;;  %v13892_v45 = vld [vmem:[#allocation3 + $0xab0] sm:$0xff] }
 0xa19   :  { %14395 = vmatprep.subr.bf16.mxu0 %v13639_v2  ;;  %14966 = vmatprep.subr.bf16.mxu1 %v13752_v4  ;;  %v13730_v2 = vld [vmem:[#allocation3 + $0x5a0] sm:$0xff]  ;;  %v13955_v4 = vld [vmem:[#allocation3 + $0xca8] sm:$0xff] }
 0xa1c   :  { %14396 = vmatpush1.bf16.msra.mxu0 %v13638_v28  ;;  %14967 = vmatpush3.bf16.msra.mxu1 %v13696_v5  ;;  %v13729_v28 = vld [vmem:[#allocation3 + $0x598] sm:$0xff]  ;;  %v13899_v5 = vld [vmem:[#allocation3 + $0xae8] sm:$0xff] }
 0xa1d   :  { %14397 = vmatprep.subr.bf16.mxu0 %v13646_v47  ;;  %14968 = vmatprep.subr.bf16.mxu1 %v13759_v49  ;;  %v13737_v47 = vld [vmem:[#allocation3 + $0x5d8] sm:$0xff]  ;;  %v13962_v49 = vld [vmem:[#allocation3 + $0xce0] sm:$0xff] }
 0xa20   :  { %14398 = vmatpush1.bf16.msra.mxu0 %v13645_v51  ;;  %14969 = vmatpush3.bf16.msra.mxu1 %v13703_v53  ;;  %v13736_v51 = vld [vmem:[#allocation3 + $0x5d0] sm:$0xff]  ;;  %v13906_v53 = vld [vmem:[#allocation3 + $0xb20] sm:$0xff] }
 0xa21   :  { %14399 = vmatprep.subr.bf16.mxu0 %v13653_v54  ;;  %14970 = vmatprep.subr.bf16.mxu1 %v13766_v56  ;;  %v13744_v54 = vld [vmem:[#allocation3 + $0x610] sm:$0xff]  ;;  %v13969_v56 = vld [vmem:[#allocation3 + $0xd18] sm:$0xff] }
 0xa24   :  { %14400 = vmatpush1.bf16.msra.mxu0 %v13652_v24  ;;  %14971 = vmatpush3.bf16.msra.mxu1 %v13710_v57  ;;  %v13743_v24 = vld [vmem:[#allocation3 + $0x608] sm:$0xff]  ;;  %v13913_v57 = vld [vmem:[#allocation3 + $0xb58] sm:$0xff] }
 0xa25   :  { %14401 = vmatprep.subr.bf16.mxu0 %v13660_v10  ;;  %14972 = vmatprep.subr.bf16.mxu1 %v13773_v59  ;;  %v13751_v10 = vld [vmem:[#allocation3 + $0x648] sm:$0xff]  ;;  %v13976_v59 = vld [vmem:[#allocation3 + $0xd50] sm:$0xff] }
 0xa28   :  { %14402 = vmatpush1.bf16.msra.mxu0 %v13659_v50  ;;  %14973 = vmatpush3.bf16.msra.mxu1 %v13717_v60  ;;  %v13750_v50 = vld [vmem:[#allocation3 + $0x640] sm:$0xff]  ;;  %v13920_v60 = vld [vmem:[#allocation3 + $0xb90] sm:$0xff] }
 0xa29   :  { %14412 = vmatprep.subr.bf16.mxu0 %v13667_v41  ;;  %14980 = vmatprep.subr.bf16.mxu1 %v13836_v3  ;;  %v13758_v41 = vld [vmem:[#allocation3 + $0x680] sm:$0xff]  ;;  %v13983_v3 = vld [vmem:[#allocation3 + $0xd88] sm:$0xff] }
 0xa2b   :  { %14404 = vmatmul.mubr.bf16.vlgmr.msra.gmra.mrb[16].mxu0 %v19894_v52  ;;  %14608 = vmatmul.mubr.bf16.vlgmr.msra.gmra.mrb[28].mxu1 %v19906_v61  ;;  %v13794_v52 = vld [vmem:[#allocation3 + $0x7a0] sm:$0xff] }
 0xa2c   :  { %14413 = vmatpush1.bf16.msra.mxu0 %v13666_v32  ;;  %14981 = vmatpush3.bf16.msra.mxu1 %v13780_v27  ;;  %v13757_v32 = vld [vmem:[#allocation3 + $0x678] sm:$0xff]  ;;  %v13927_v27 = vld [vmem:[#allocation3 + $0xbc8] sm:$0xff] }
 0xa2d   :  { %14414 = vmatprep.subr.bf16.mxu0 %v13674_v34  ;;  %14982 = vmatprep.subr.bf16.mxu1 %v13843_v63  ;;  %v13765_v34 = vld [vmem:[#allocation3 + $0x6b8] sm:$0xff]  ;;  %v13990_v63 = vld [vmem:[#allocation3 + $0xdc0] sm:$0xff] }
 0xa2e   :  { %14444 = vmatprep.mubr.bf16.mxu0 %v19898_v58  ;;  %14647 = vmatprep.mubr.bf16.mxu1 %v19910_v19  ;;  %v13694_v58 = vld [vmem:[#allocation3 + $0x480] sm:$0xff] }
 0xa30   :  { %14415 = vmatpush1.bf16.msra.mxu0 %v13673_v22  ;;  %14983 = vmatpush3.bf16.msra.mxu1 %v13787_v26  ;;  %v13764_v22 = vld [vmem:[#allocation3 + $0x6b0] sm:$0xff]  ;;  %v13934_v26 = vld [vmem:[#allocation3 + $0xc00] sm:$0xff] }
 0xa31   :  { %14416 = vmatprep.subr.bf16.mxu0 %v13681_v43  ;;  %14984 = vmatprep.subr.bf16.mxu1 %v13850_v62  ;;  %v13772_v43 = vld [vmem:[#allocation3 + $0x6f0] sm:$0xff]  ;;  %v13997_v62 = vld [vmem:[#allocation3 + $0xdf8] sm:$0xff] }
 0xa34   :  { %14417 = vmatpush1.bf16.msra.mxu0 %v13680_v48  ;;  %14985 = vmatpush3.bf16.msra.mxu1 %v13794_v52  ;;  %v13771_v48 = vld [vmem:[#allocation3 + $0x6e8] sm:$0xff]  ;;  %v13941_v52 = vld [vmem:[#allocation3 + $0xc38] sm:$0xff] }
 0xa35   :  { %14418 = vmatprep.subr.bf16.mxu0 %v13688_v17  ;;  %14986 = vmatprep.subr.bf16.mxu1 %v13857_v9  ;;  %v13779_v17 = vld [vmem:[#allocation3 + $0x728] sm:$0xff]  ;;  %v13778_v9 = vld [vmem:[#allocation3 + $0x720] sm:$0xff] }
 0xa38   :  { %14419 = vmatpush1.bf16.msra.mxu0 %v13687_v25  ;;  %14987 = vmatpush3.bf16.msra.mxu1 %v13801_v39  ;;  %v13786_v25 = vld [vmem:[#allocation3 + $0x760] sm:$0xff]  ;;  %v13785_v39 = vld [vmem:[#allocation3 + $0x758] sm:$0xff] }
 0xa39   :  { %14420 = vmatprep.subr.bf16.mxu0 %v13695_v0  ;;  %14988 = vmatprep.subr.bf16.mxu1 %v13864_v30  ;;  %v13793_v0 = vld [vmem:[#allocation3 + $0x798] sm:$0xff]  ;;  %v13792_v30 = vld [vmem:[#allocation3 + $0x790] sm:$0xff] }
 0xa3c   :  { %14421 = vmatpush1.bf16.msra.mxu0 %v13694_v58  ;;  %14989 = vmatpush3.bf16.msra.mxu1 %v13808_v55  ;;  %v13800_v58 = vld [vmem:[#allocation3 + $0x7d0] sm:$0xff]  ;;  %v13799_v55 = vld [vmem:[#allocation3 + $0x7c8] sm:$0xff] }
 0xa3d   :  { %14422 = vmatprep.subr.bf16.mxu0 %v13702_v1  ;;  %14990 = vmatprep.subr.bf16.mxu1 %v13871_v40  ;;  %v13807_v1 = vld [vmem:[#allocation3 + $0x808] sm:$0xff]  ;;  %v13806_v40 = vld [vmem:[#allocation3 + $0x800] sm:$0xff] }
 0xa40   :  { %14423 = vmatpush1.bf16.msra.mxu0 %v13701_v18  ;;  %14991 = vmatpush3.bf16.msra.mxu1 %v13815_v13  ;;  %v13813_v18 = vld [vmem:[#allocation3 + $0x838] sm:$0xff] }
 0xa41   :  { %14424 = vmatprep.subr.bf16.mxu0 %v13709_v14  ;;  %14992 = vmatprep.subr.bf16.mxu1 %v13878_v20  ;;  %v13821_v13 = vld [vmem:[#allocation3 + $0x878] sm:$0xff]  ;;  %v13828_v14 = vld [vmem:[#allocation3 + $0x8b0] sm:$0xff]  ;;  %v13827_v20 = vld [vmem:[#allocation3 + $0x8a8] sm:$0xff] }
 0xa44   :  { %14425 = vmatpush1.bf16.msra.mxu0 %v13708_v35  ;;  %14993 = vmatpush3.bf16.msra.mxu1 %v13822_v21  ;;  %v13835_v35 = vld [vmem:[#allocation3 + $0x8e8] sm:$0xff]  ;;  %v13834_v21 = vld [vmem:[#allocation3 + $0x8e0] sm:$0xff] }
 0xa45   :  { %14426 = vmatprep.subr.bf16.mxu0 %v13716_v36  ;;  %14994 = vmatprep.subr.bf16.mxu1 %v13885_v23  ;;  %v13842_v36 = vld [vmem:[#allocation3 + $0x920] sm:$0xff]  ;;  %v13841_v23 = vld [vmem:[#allocation3 + $0x918] sm:$0xff] }
 0xa48   :  { %14427 = vmatpush1.bf16.msra.mxu0 %v13715_v29  ;;  %14995 = vmatpush3.bf16.msra.mxu1 %v13829_v38  ;;  %v13849_v29 = vld [vmem:[#allocation3 + $0x958] sm:$0xff]  ;;  %v13848_v38 = vld [vmem:[#allocation3 + $0x950] sm:$0xff] }
 0xa49   :  { %14428 = vmatprep.subr.bf16.mxu0 %v13723_v31  ;;  %15002 = vmatprep.subr.bf16.mxu1 %v13948_v33  ;;  %v13856_v31 = vld [vmem:[#allocation3 + $0x990] sm:$0xff]  ;;  %v13855_v33 = vld [vmem:[#allocation3 + $0x988] sm:$0xff] }
 0xa4b   :  { %14648 = vmatmul.mubr.bf16.vlgmr.msra.gmra.mrb[32].mxu1 %v19918_v15 }
 0xa4c   :  { %14429 = vmatpush1.bf16.msra.mxu0 %v13722_v16  ;;  %15003 = vmatpush3.bf16.msra.mxu1 %v13892_v45  ;;  %v13863_v16 = vld [vmem:[#allocation3 + $0x9c8] sm:$0xff]  ;;  %v13862_v45 = vld [vmem:[#allocation3 + $0x9c0] sm:$0xff] }
 0xa4d   :  { %14430 = vmatprep.subr.bf16.mxu0 %v13730_v2  ;;  %15004 = vmatprep.subr.bf16.mxu1 %v13955_v4  ;;  %v13870_v2 = vld [vmem:[#allocation3 + $0xa00] sm:$0xff]  ;;  %v13869_v4 = vld [vmem:[#allocation3 + $0x9f8] sm:$0xff] }
 0xa4e   :  { %14687 = vmatprep.mubr.bf16.mxu1 %v19922_v37 }
 0xa50   :  { %14431 = vmatpush1.bf16.msra.mxu0 %v13729_v28  ;;  %15005 = vmatpush3.bf16.msra.mxu1 %v13899_v5  ;;  %v13877_v28 = vld [vmem:[#allocation3 + $0xa38] sm:$0xff]  ;;  %v13876_v5 = vld [vmem:[#allocation3 + $0xa30] sm:$0xff] }
 0xa51   :  { %14432 = vmatprep.subr.bf16.mxu0 %v13737_v47  ;;  %15006 = vmatprep.subr.bf16.mxu1 %v13962_v49  ;;  %v13884_v47 = vld [vmem:[#allocation3 + $0xa70] sm:$0xff]  ;;  %v13883_v49 = vld [vmem:[#allocation3 + $0xa68] sm:$0xff] }
 0xa54   :  { %14433 = vmatpush1.bf16.msra.mxu0 %v13736_v51  ;;  %15007 = vmatpush3.bf16.msra.mxu1 %v13906_v53  ;;  %v13891_v51 = vld [vmem:[#allocation3 + $0xaa8] sm:$0xff]  ;;  %v13890_v53 = vld [vmem:[#allocation3 + $0xaa0] sm:$0xff] }
 0xa55   :  { %14434 = vmatprep.subr.bf16.mxu0 %v13744_v54  ;;  %15008 = vmatprep.subr.bf16.mxu1 %v13969_v56  ;;  %v13898_v54 = vld [vmem:[#allocation3 + $0xae0] sm:$0xff]  ;;  %v13897_v56 = vld [vmem:[#allocation3 + $0xad8] sm:$0xff] }
 0xa58   :  { %14435 = vmatpush1.bf16.msra.mxu0 %v13743_v24  ;;  %15009 = vmatpush3.bf16.msra.mxu1 %v13913_v57  ;;  %v13905_v24 = vld [vmem:[#allocation3 + $0xb18] sm:$0xff]  ;;  %v13904_v57 = vld [vmem:[#allocation3 + $0xb10] sm:$0xff] }
 0xa59   :  { %14436 = vmatprep.subr.bf16.mxu0 %v13751_v10  ;;  %15010 = vmatprep.subr.bf16.mxu1 %v13976_v59  ;;  %v13912_v10 = vld [vmem:[#allocation3 + $0xb50] sm:$0xff]  ;;  %v13911_v59 = vld [vmem:[#allocation3 + $0xb48] sm:$0xff] }
 0xa5c   :  { %14437 = vmatpush1.bf16.msra.mxu0 %v13750_v50  ;;  %15011 = vmatpush3.bf16.msra.mxu1 %v13920_v60  ;;  %v13919_v50 = vld [vmem:[#allocation3 + $0xb88] sm:$0xff]  ;;  %v19952_v60 = vld [vmem:[%s19997_s16] sm:$0x7f]  ;;  %s15314_s16 = smov [#allocation5]  }
 0xa5d   :  { %14438 = vmatprep.subr.bf16.mxu0 %v13758_v41  ;;  %15012 = vmatprep.subr.bf16.mxu1 %v13983_v3  ;;  %v14011_v41 = vrot.slane %v19952_v60, %v19524_v42  ;;  %v14019_v3 = vrot.slane %v19952_v60, %v19664_v11  ;;  %s14716_s26 = sshll.u32 %s15314_s16, 4  ;;  %s14717_s26 = int_to_ptr.vmem [resolvable:$true] %s14716_s26 }
 0xa5e   :  { %s15282_s27 = scalar_lea.vmem %s14717_s26, 896  ;;  %p15287_p1 = scmp.lt.s32.totalorder %s14717_s26, %s14717_s26 }
 0xa5f   :  { %p15283_p0 = scmp.ne.s32.totalorder %s14717_s26, %s15282_s27  ;;  %p15288_p2 = scmp.lt.s32.totalorder %s15282_s27, %s15282_s27 }
 0xa60   :  { %14439 = vmatpush1.bf16.msra.mxu0 %v13757_v32  ;;  %15013 = vmatpush3.bf16.msra.mxu1 %v13927_v27  ;;  %v14015_v32 = vrot.slane %v19952_v60, %v19530_v44  ;;  %v14023_v27 = vrot.slane %v19952_v60, %v19667_v12  ;;  %v13940_v12 = vld [vmem:[#allocation3 + $0xc30] sm:$0xff] }
 0xa61   :  { %14440 = vmatprep.subr.bf16.mxu0 %v13765_v34  ;;  %15014 = vmatprep.subr.bf16.mxu1 %v13990_v63  ;;  %v13925_v34 = vld [vmem:[#allocation3 + $0xbb8] sm:$0xff]  ;;  %p15289_p3 = por %p15288_p2, %p15287_p1 }
 0xa63   :  { %p15290_p4 = pnand %p15289_p3, %p15283_p0 }
 0xa64   :  { %14441 = vmatpush1.bf16.msra.mxu0 %v13764_v22  ;;  %15015 = vmatpush3.bf16.msra.mxu1 %v13934_v26  ;;  %v13933_v26 = vld [vmem:[#allocation3 + $0xbf8] sm:$0xff] }
 0xa65   :  { %14442 = vmatprep.subr.bf16.mxu0 %v13772_v43  ;;  %15016 = vmatprep.subr.bf16.mxu1 %v13997_v62 }
 0xa68   :  { %14443 = vmatpush1.bf16.msra.mxu0 %v13771_v48  ;;  %15017 = vmatpush3.bf16.msra.mxu1 %v13941_v52 }
 0xa69   :  { %14453 = vmatprep.subr.bf16.mxu0 %v13779_v17 }
 0xa6b   :  { %14445 = vmatmul.mubr.bf16.vlgmr.msra.gmra.mrb[16].mxu0 %v19906_v61  ;;  %14688 = vmatmul.mubr.bf16.vlgmr.msra.gmra.mrb[36].mxu1 %v19930_v46  ;;  %v13814_v61 = vld [vmem:[#allocation3 + $0x840] sm:$0xff] }
 0xa6c   :  { %14454 = vmatpush1.bf16.msra.mxu0 %v13778_v9  ;;  %14485 = vmatprep.mubr.bf16.mxu0 %v19910_v19  ;;  %v13820_v19 = vld [vmem:[#allocation3 + $0x870] sm:$0xff] }
 0xa6d   :  { %14455 = vmatprep.subr.bf16.mxu0 %v13786_v25 }
 0xa70   :  { %14456 = vmatpush1.bf16.msra.mxu0 %v13785_v39  ;;  %v13932_v39 = vld [vmem:[#allocation3 + $0xbf0] sm:$0xff] }
 0xa71   :  { %14457 = vmatprep.subr.bf16.mxu0 %v13793_v0  ;;  %v13939_v0 = vld [vmem:[#allocation3 + $0xc28] sm:$0xff] }
 0xa74   :  { %14458 = vmatpush1.bf16.msra.mxu0 %v13792_v30  ;;  %v13947_v30 = vld [vmem:[#allocation3 + $0xc68] sm:$0xff] }
 0xa75   :  { %14459 = vmatprep.subr.bf16.mxu0 %v13800_v58  ;;  %v13946_v58 = vld [vmem:[#allocation3 + $0xc60] sm:$0xff] }
 0xa78   :  { %14460 = vmatpush1.bf16.msra.mxu0 %v13799_v55  ;;  %v13954_v55 = vld [vmem:[#allocation3 + $0xca0] sm:$0xff] }
 0xa79   :  { %14461 = vmatprep.subr.bf16.mxu0 %v13807_v1 }
 0xa7c   :  { %14462 = vmatpush1.bf16.msra.mxu0 %v13806_v40 }
 0xa7d   :  { %14463 = vmatprep.subr.bf16.mxu0 %v13814_v61 }
 0xa80   :  { %14464 = vmatpush1.bf16.msra.mxu0 %v13813_v18  ;;  %v13953_v18 = vld [vmem:[#allocation3 + $0xc98] sm:$0xff] }
 0xa81   :  { %14465 = vmatprep.subr.bf16.mxu0 %v13821_v13 }
 0xa84   :  { %14466 = vmatpush1.bf16.msra.mxu0 %v13820_v19  ;;  %v13961_v19 = vld [vmem:[#allocation3 + $0xcd8] sm:$0xff] }
 0xa85   :  { %14467 = vmatprep.subr.bf16.mxu0 %v13828_v14  ;;  %v13960_v14 = vld [vmem:[#allocation3 + $0xcd0] sm:$0xff] }
 0xa88   :  { %14468 = vmatpush1.bf16.msra.mxu0 %v13827_v20  ;;  %v13968_v20 = vld [vmem:[#allocation3 + $0xd10] sm:$0xff] }
 0xa89   :  { %14469 = vmatprep.subr.bf16.mxu0 %v13835_v35  ;;  %v13967_v35 = vld [vmem:[#allocation3 + $0xd08] sm:$0xff] }
 0xa8c   :  { %14470 = vmatpush1.bf16.msra.mxu0 %v13834_v21  ;;  %v13975_v21 = vld [vmem:[#allocation3 + $0xd48] sm:$0xff] }
 0xa8d   :  { %14471 = vmatprep.subr.bf16.mxu0 %v13842_v36  ;;  %v13974_v36 = vld [vmem:[#allocation3 + $0xd40] sm:$0xff] }
 0xa90   :  { %14472 = vmatpush1.bf16.msra.mxu0 %v13841_v23  ;;  %v13982_v23 = vld [vmem:[#allocation3 + $0xd80] sm:$0xff] }
 0xa91   :  { %14473 = vmatprep.subr.bf16.mxu0 %v13849_v29  ;;  %v13981_v29 = vld [vmem:[#allocation3 + $0xd78] sm:$0xff] }
 0xa94   :  { %14474 = vmatpush1.bf16.msra.mxu0 %v13848_v38  ;;  %v13989_v38 = vld [vmem:[#allocation3 + $0xdb8] sm:$0xff] }
 0xa95   :  { %14475 = vmatprep.subr.bf16.mxu0 %v13856_v31 }
 0xa98   :  { %14476 = vmatpush1.bf16.msra.mxu0 %v13855_v33 }
 0xa99   :  { %14477 = vmatprep.subr.bf16.mxu0 %v13863_v16 }
 0xa9c   :  { %14478 = vmatpush1.bf16.msra.mxu0 %v13862_v45 }
 0xa9d   :  { %14479 = vmatprep.subr.bf16.mxu0 %v13870_v2  ;;  %v13988_v2 = vld [vmem:[#allocation3 + $0xdb0] sm:$0xff] }
 0xaa0   :  { %14480 = vmatpush1.bf16.msra.mxu0 %v13869_v4 }
 0xaa1   :  { %14481 = vmatprep.subr.bf16.mxu0 %v13877_v28  ;;  %v13996_v28 = vld [vmem:[#allocation3 + $0xdf0] sm:$0xff] }
 0xaa4   :  { %14482 = vmatpush1.bf16.msra.mxu0 %v13876_v5  ;;  %v13995_v5 = vld [vmem:[#allocation3 + $0xde8] sm:$0xff] }
 0xaa5   :  { %14483 = vmatprep.subr.bf16.mxu0 %v13884_v47  ;;  %v14035_v47 = vrot.slane %v19952_v60, %v19794_v7 }
 0xaa8   :  { %14484 = vmatpush1.bf16.msra.mxu0 %v13883_v49 }
 0xaa9   :  { %14494 = vmatprep.subr.bf16.mxu0 %v13891_v51 }
 0xaab   :  { %14486 = vmatmul.mubr.bf16.vlgmr.msra.gmra.mrb[16].mxu0 %v19918_v15  ;;  %v13918_v15 = vld [vmem:[#allocation3 + $0xb80] sm:$0xff] }
 0xaac   :  { %14495 = vmatpush1.bf16.msra.mxu0 %v13890_v53  ;;  %14526 = vmatprep.mubr.bf16.mxu0 %v19922_v37  ;;  %v13926_v37 = vld [vmem:[#allocation3 + $0xbc0] sm:$0xff] }
 0xaad   :  { %14496 = vmatprep.subr.bf16.mxu0 %v13898_v54 }
 0xab0   :  { %14497 = vmatpush1.bf16.msra.mxu0 %v13897_v56 }
 0xab1   :  { %14498 = vmatprep.subr.bf16.mxu0 %v13905_v24 }
 0xab4   :  { %14499 = vmatpush1.bf16.msra.mxu0 %v13904_v57 }
 0xab5   :  { %14500 = vmatprep.subr.bf16.mxu0 %v13912_v10 }
 0xab8   :  { %14501 = vmatpush1.bf16.msra.mxu0 %v13911_v59 }
 0xab9   :  { %14502 = vmatprep.subr.bf16.mxu0 %v13919_v50 }
 0xabc   :  { %14503 = vmatpush1.bf16.msra.mxu0 %v13918_v15 }
 0xabd   :  { %14504 = vmatprep.subr.bf16.mxu0 %v13926_v37 }
 0xabe   :  { %v14200_v63 = vpop.f32.mrb[12].mxu0  ;;  %v14364_v22 = vpop.f32.mrb[20].mxu1 }
 0xabf   :  { %v15050_v43 = vadd.f32 %v14200_v63, %v14011_v41  ;;  %v15052_v62 = vadd.f32 %v14364_v22, %v14019_v3  ;;  %v14202_v48 = vpop.f32.mrb[13].mxu0  ;;  %v14366_v52 = vpop.f32.mrb[21].mxu1  ;;  %v14027_v22 = vrot.slane %v19952_v60, %v19791_v6 }
 0xac0   :  { %v15051_v42 = vadd.f32 %v14202_v48, %v14015_v32  ;;  %v15053_v17 = vadd.f32 %v14366_v52, %v14023_v27  ;;  %v14204_v9 = vpop.f32.mrb[14].mxu0  ;;  %v14368_v11 = vpop.f32.mrb[22].mxu1  ;;  %14505 = vmatpush1.bf16.msra.mxu0 %v13925_v34 }
 0xac1   :  { %15268 = vtanh.f32 %v15050_v43  ;;  %v14205_v25 = vpop.f32.mrb[15].mxu0  ;;  %v14369_v44 = vpop.f32.mrb[23].mxu1  ;;  %14506 = vmatprep.subr.bf16.mxu0 %v13933_v26  ;;  %v14031_v26 = vrot.slane %v19952_v60, %v19797_v8 }
 0xac2   :  { %15270 = vtanh.f32 %v15052_v62 }
 0xac3   :  { %15272 = vtanh.f32 %v15051_v42 }
 0xac4   :  { %15274 = vtanh.f32 %v15053_v17  ;;  %14507 = vmatpush1.bf16.msra.mxu0 %v13932_v39 }
 0xac5   :  { %14508 = vmatprep.subr.bf16.mxu0 %v13940_v12 }
 0xac8   :  { %14509 = vmatpush1.bf16.msra.mxu0 %v13939_v0 }
 0xac9   :  { %14510 = vmatprep.subr.bf16.mxu0 %v13947_v30 }
 0xacb   :  { %v15269_v1 = vpop.eup %15268 }
 0xacc   :  { %v15271_v40 = vpop.eup %15270  ;;  %14702 = vst [vmem:[#allocation5] sm:$0xff] %v15269_v1  ;;  %14511 = vmatpush1.bf16.msra.mxu0 %v13946_v58 }
 0xacd   :  { %v15273_v61 = vpop.eup %15272  ;;  %14704 = vst [vmem:[#allocation5 + $0x10] sm:$0xff] %v15271_v40  ;;  %14512 = vmatprep.subr.bf16.mxu0 %v13954_v55 }
 0xace   :  { %v15275_v13 = vpop.eup %15274  ;;  %14703 = vst [vmem:[#allocation5 + $0x8] sm:$0xff] %v15273_v61 }
 0xacf   :  { %14705 = vst [vmem:[#allocation5 + $0x18] sm:$0xff] %v15275_v13 }
 0xad0   :  { %14513 = vmatpush1.bf16.msra.mxu0 %v13953_v18 }
 0xad1   :  { %14514 = vmatprep.subr.bf16.mxu0 %v13961_v19 }
 0xad4   :  { %14515 = vmatpush1.bf16.msra.mxu0 %v13960_v14 }
 0xad5   :  { %14516 = vmatprep.subr.bf16.mxu0 %v13968_v20 }
 0xad8   :  { %14517 = vmatpush1.bf16.msra.mxu0 %v13967_v35 }
 0xad9   :  { %14518 = vmatprep.subr.bf16.mxu0 %v13975_v21 }
 0xadc   :  { %14519 = vmatpush1.bf16.msra.mxu0 %v13974_v36 }
 0xadd   :  { %14520 = vmatprep.subr.bf16.mxu0 %v13982_v23 }
 0xade   :  { %v14952_v31 = vpop.f32.mrb[24].mxu1 }
 0xadf   :  { %v14953_v33 = vpop.f32.mrb[25].mxu1 }
 0xae0   :  { %14521 = vmatpush1.bf16.msra.mxu0 %v13981_v29  ;;  %v14954_v16 = vadd.f32 %v14953_v33, %v14952_v31  ;;  %v14955_v45 = vpop.f32.mrb[26].mxu1 }
 0xae1   :  { %14522 = vmatprep.subr.bf16.mxu0 %v13989_v38  ;;  %v14956_v4 = vpop.f32.mrb[27].mxu1 }
 0xae2   :  { %v14570_v49 = vadd.f32 %v14954_v16, %v14035_v47 }
 0xae4   :  { %14523 = vmatpush1.bf16.msra.mxu0 %v13988_v2 }
 0xae5   :  { %14524 = vmatprep.subr.bf16.mxu0 %v13996_v28 }
 0xae8   :  { %14525 = vmatpush1.bf16.msra.mxu0 %v13995_v5 }
 0xaeb   :  { %14527 = vmatmul.mubr.bf16.vlgmr.msra.gmra.mrb[16].mxu0 %v19930_v46 }
 0xafe   :  { %v14974_v51 = vpop.f32.mrb[28].mxu1 }
 0xaff   :  { %v14975_v53 = vpop.f32.mrb[29].mxu1 }
 0xb00   :  { %v14976_v54 = vadd.f32 %v14975_v53, %v14974_v51  ;;  %v14977_v56 = vpop.f32.mrb[30].mxu1 }
 0xb01   :  { %v14978_v24 = vpop.f32.mrb[31].mxu1 }
 0xb02   :  { %v14610_v57 = vadd.f32 %v14976_v54, %v14570_v49 }
 0xb1e   :  { %v14996_v10 = vpop.f32.mrb[32].mxu1 }
 0xb1f   :  { %v14997_v59 = vpop.f32.mrb[33].mxu1 }
 0xb20   :  { %v14998_v50 = vadd.f32 %v14997_v59, %v14996_v10  ;;  %v14999_v15 = vpop.f32.mrb[34].mxu1 }
 0xb21   :  { %v15000_v37 = vpop.f32.mrb[35].mxu1 }
 0xb22   :  { %v14650_v41 = vadd.f32 %v14998_v50, %v14610_v57 }
 0xb3e   :  { %v15018_v3 = vpop.f32.mrb[36].mxu1 }
 0xb3f   :  { %v15019_v32 = vpop.f32.mrb[37].mxu1 }
 0xb40   :  { %v15020_v27 = vadd.f32 %v15019_v32, %v15018_v3  ;;  %v15021_v46 = vpop.f32.mrb[38].mxu1 }
 0xb41   :  { %v15022_v34 = vpop.f32.mrb[39].mxu1 }
 0xb42   :  { %v14690_v63 = vadd.f32 %v15020_v27, %v14650_v41 }
 0xb44   :  { %15276 = vtanh.f32 %v14690_v63 }
 0xb4e   :  { %v15277_v7 = vpop.eup %15276 }
 0xb4f   :  { %14709 = vst.msk [vmem:[#allocation5 + $0x30] sm:$0xff] %vm14708_vm3, %v15277_v7 }
 0xbbe   :  { %v14528_v43 = vpop.f32.mrb[16].mxu0 }
 0xbbf   :  { %v15054_v62 = vadd.f32 %v14528_v43, %v14027_v22  ;;  %v14530_v48 = vpop.f32.mrb[17].mxu0 }
 0xbc0   :  { %v15055_v52 = vadd.f32 %v14530_v48, %v14031_v26  ;;  %v14532_v42 = vpop.f32.mrb[18].mxu0 }
 0xbc1   :  { %15278 = vtanh.f32 %v15054_v62  ;;  %v14533_v17 = vpop.f32.mrb[19].mxu0 }
 0xbc2   :  { %15280 = vtanh.f32 %v15055_v52 }
 0xbcb   :  { %v15279_v9 = vpop.eup %15278 }
 0xbcc   :  { %v15281_v11 = vpop.eup %15280  ;;  %14706 = vst [vmem:[#allocation5 + $0x20] sm:$0xff] %v15279_v9 }
 0xbcd   :  { %14707 = vst [vmem:[#allocation5 + $0x28] sm:$0xff] %v15281_v11 }
 0xbce   :  { %15293 = shalt.err (!%p15290_p4)
}
 0xbcf   :  { %s15294_s30 = scalar_lea.hbm %s19998_s17, 896 }
 0xbd0   :  { %p15295_p5 = scmp.ne.s32.totalorder %s19998_s17, %s15294_s30  ;;  %p15298_p6 = scmp.lt.u32.totalorder %s15294_s30, %s19998_s17 }
 0xbd2   :  { %p15300_p7 = pnand %p15298_p6, %p15295_p5 }
 0xbd4   :  { %15303 = shalt.err (!%p15300_p7)
}
 0xbd5   :  { %14719 = dma.vmem_to_hbm [thread:$0]  %s14717_s26, 896, %s19998_s17, [#allocation6]  }
 0xbd6   :  { %15308 = dma.done.wait [#allocation6], 896  }
 0xbd7   :  { %15309 = vsyncadd [#allocation6], 4294966400 }
 0xbd8   :  { %14723 = vsyncpa [#allocation6], 1 }
 0xbd9   :  { %14724 = vsyncmov [#allocation4] }
 0xbdc   :  { %s14725_s11 = vpop.sfrf %14724 }
 0xbdd   :  { %p14926_p8 = scmp.ne.s32.totalorder %s14725_s11, 0 }
 0xbdf   :  { %14729 = shalt.err (%p14926_p8)  }
 0xbe0   :  { %14731 = vsyncmov [#allocation4 + $0x1] }
 0xbe3   :  { %s14732_s1 = vpop.sfrf %14731 }
 0xbe4   :  { %p14927_p9 = scmp.ne.s32.totalorder %s14732_s1, 0 }
 0xbe6   :  { %14736 = shalt.err (%p14927_p9)  }

</bundles_post_ra>
